<compile_context>
chip_gen: v6e
topology: v6e:2x2x1
jax: 0.10.0
libtpu: 0.0.40
codegen_flags: <defaults>
</compile_context>

<pallas_src>
import math
import jax
import jax.numpy as jnp
from jax.experimental import pallas as pl
from jax.experimental.pallas import tpu as pltpu


# ----------------------------------------------------------------------------- matmul kernel
def _make_conv_mm_kernel(has_residual: bool, relu_cols: int, cout: int):
    """out = act( X @ W + bias (+ residual) )  on one (TM, Kp) x (Kp, Cout) tile.

    relu_cols: 0 = no ReLU, >=cout = full ReLU, else ReLU on the first relu_cols
    output channels only (used for the fused conv1+downsample matmul)."""

    def kern(x_ref, w_ref, b_ref, *rest):
        if has_residual:
            r_ref, o_ref = rest
        else:
            (o_ref,) = rest
        y = jnp.dot(x_ref[...], w_ref[...], preferred_element_type=jnp.float32)
        y = y + b_ref[...]
        if has_residual:
            y = y + r_ref[...]
        if relu_cols >= cout:
            y = jnp.maximum(y, 0.0)
        elif relu_cols > 0:
            col = jax.lax.broadcasted_iota(jnp.int32, y.shape, 1)
            y = jnp.where(col < relu_cols, jnp.maximum(y, 0.0), y)
        o_ref[...] = y.astype(o_ref.dtype)

    return kern


def _choose_tm(M: int) -> int:
    """Big tiles; split into >=2 blocks when a single block would be large
    (keeps both TensorCores busy on v7x with dimension_semantics=('parallel',))."""
    if M > 1024:
        return 512
    if M >= 256:
        half = (M + 1) // 2
        return int(math.ceil(half / 16) * 16)  # bf16 sublane multiple
    return M  # tiny layers: one full-M block (full-dim block is always legal)


def matmul_bias_act(x_bf16, w_bf16, bias_f32, residual_f32, relu_cols):
    """x: (M, Kp) bf16, w: (Kp, Cout) bf16, bias: (1, Cout) f32,
    residual: (M, Cout) f32 or None."""
    M, Kp = x_bf16.shape
    cout = w_bf16.shape[1]
    tm = _choose_tm(M)
    grid = (pl.cdiv(M, tm),)

    in_specs = [
        pl.BlockSpec((tm, Kp), lambda i: (i, 0)),      # im2col rows (bf16)
        pl.BlockSpec((Kp, cout), lambda i: (0, 0)),    # scale-folded weights (resident)
        pl.BlockSpec((1, cout), lambda i: (0, 0)),     # folded BN bias
    ]
    args = [x_bf16, w_bf16, bias_f32]
    if residual_f32 is not None:
        in_specs.append(pl.BlockSpec((tm, cout), lambda i: (i, 0)))
        args.append(residual_f32)

    out = pl.pallas_call(
        _make_conv_mm_kernel(residual_f32 is not None, relu_cols, cout),
        out_shape=jax.ShapeDtypeStruct((M, cout), jnp.float32),
        grid_spec=pltpu.PrefetchScalarGridSpec(
            num_scalar_prefetch=0,
            grid=grid,
            in_specs=in_specs,
            out_specs=pl.BlockSpec((tm, cout), lambda i: (i, 0)),
        ),
        compiler_params=pltpu.CompilerParams(dimension_semantics=("parallel",)),
    )(*args)
    return out


# ----------------------------------------------------------------------------- conv glue
def _im2col(x_nhwc, kh, kw, stride, pad):
    N, H, W, C = x_nhwc.shape
    xp = jnp.pad(x_nhwc, ((0, 0), (pad, pad), (pad, pad), (0, 0))) if pad > 0 else x_nhwc
    Ho = (H + 2 * pad - kh) // stride + 1
    Wo = (W + 2 * pad - kw) // stride + 1
    patches = []
    for i in range(kh):
        for j in range(kw):
            patches.append(xp[:, i:i + Ho * stride:stride, j:j + Wo * stride:stride, :])
    cols = jnp.stack(patches, axis=3)                     # (N, Ho, Wo, kh*kw, C)
    return cols.reshape(N * Ho * Wo, kh * kw * C), (N, Ho, Wo)


def conv_bn_act(x_nhwc, w, scale, bias, stride=1, pad=0, relu=True, residual=None):
    """w: (KH, KW, Cin, Cout). Conv + folded BN (+ optional residual) (+ ReLU).
    `relu` may be True/False or an int = number of leading output channels to ReLU."""
    kh, kw, cin, cout = w.shape
    cols, (N, Ho, Wo) = _im2col(x_nhwc, kh, kw, stride, pad)
    K = cols.shape[1]
    Kp = int(math.ceil(K / 128) * 128)                    # lane-aligned contraction dim

    cols = cols.astype(jnp.bfloat16)
    if Kp != K:
        cols = jnp.pad(cols, ((0, 0), (0, Kp - K)))

    wmat = (w.reshape(-1, cout) * scale).astype(jnp.bfloat16)  # fold BN scale into W
    if Kp != K:
        wmat = jnp.pad(wmat, ((0, Kp - K), (0, 0)))

    res = None if residual is None else residual.reshape(-1, cout)
    relu_cols = cout if relu is True else (0 if relu is False else int(relu))
    y = matmul_bias_act(cols, wmat, bias, res, relu_cols)
    return y.reshape(N, Ho, Wo, cout)


# ----------------------------------------------------------------------------- fused maxpool
def _make_pool_kernel(k, Ho, Wo, C):
    def kern(x_ref, o_ref):
        x = x_ref[0]                     # (Hg, 2, Wg, 2C) even/odd pair view
        best = None
        for i in range(k):
            hg, hh = i // 2, i % 2
            for j in range(k):
                wg, wh = j // 2, j % 2
                v = x[hg:hg + Ho, hh, wg:wg + Wo, wh * C:(wh + 1) * C]  # (Ho, Wo, C)
                best = v if best is None else jnp.maximum(best, v)
        o_ref[0] = best
    return kern


def maxpool2d(x_nhwc, k, stride, pad):
    """MaxPool2d with stride 2 (k in {2, 3}), fully inside one Pallas kernel.

    The padded image is reshaped (free, row-major) to (N, Hg, 2, Wg, 2C): the
    stride-2 window taps become static slices on the leading dims plus a static
    lane-half selection — no strided loads, no k*k HBM stacking."""
    assert stride == 2
    N, H, W, C = x_nhwc.shape
    Ho = (H + 2 * pad - k) // stride + 1
    Wo = (W + 2 * pad - k) // stride + 1
    Hg = Ho + (k - 1) // 2
    Wg = Wo + (k - 1) // 2
    ph_hi = 2 * Hg - H - pad
    pw_hi = 2 * Wg - W - pad
    assert ph_hi >= 0 and pw_hi >= 0
    xp = jnp.pad(x_nhwc, ((0, 0), (pad, ph_hi), (pad, pw_hi), (0, 0)),
                 constant_values=-jnp.inf)
    x2 = xp.reshape(N, Hg, 2, Wg, 2 * C)

    out = pl.pallas_call(
        _make_pool_kernel(k, Ho, Wo, C),
        out_shape=jax.ShapeDtypeStruct((N, Ho, Wo, C), jnp.float32),
        grid_spec=pltpu.PrefetchScalarGridSpec(
            num_scalar_prefetch=0,
            grid=(N,),
            in_specs=[pl.BlockSpec((1, Hg, 2, Wg, 2 * C), lambda n: (n, 0, 0, 0, 0))],
            out_specs=pl.BlockSpec((1, Ho, Wo, C), lambda n: (n, 0, 0, 0)),
        ),
        compiler_params=pltpu.CompilerParams(dimension_semantics=("parallel",)),
    )(x2)
    return out


# ----------------------------------------------------------------------------- parameters
def _conv_params(key, kh, kw, cin, cout):
    k1, k2, k3 = jax.random.split(key, 3)
    fan_in = kh * kw * cin
    w = jax.random.normal(k1, (kh, kw, cin, cout), jnp.float32) / jnp.sqrt(fan_in)
    # folded eval-mode BatchNorm: scale = gamma/sqrt(var+eps), bias = beta - mean*scale
    scale = 1.0 + 0.01 * jax.random.normal(k2, (1, cout), jnp.float32)
    bias = 0.01 * jax.random.normal(k3, (1, cout), jnp.float32)
    return (w, scale, bias)


def make_encoder_params(key, in_channels=3):
    keys = iter(jax.random.split(key, 32))
    p = {}
    p["stem"] = _conv_params(next(keys), 7, 7, in_channels, 64)
    for i, stride in zip(range(4), (1, 1, 2, 1)):
        blk = {"conv1": _conv_params(next(keys), 3, 3, 64, 64),
               "conv2": _conv_params(next(keys), 3, 3, 64, 64),
               "stride": stride}
        if stride != 1:
            blk["down"] = _conv_params(next(keys), 1, 1, 64, 64)
        p[f"res{i}"] = blk
    p["l1"] = _conv_params(next(keys), 3, 3, 64, 128)
    p["l2"] = _conv_params(next(keys), 3, 3, 128, 64)
    p["l3"] = _conv_params(next(keys), 3, 3, 64, 64)
    return p


# ----------------------------------------------------------------------------- forward
def _resblock(x, blk):
    stride = blk["stride"]
    if stride == 1:
        out = conv_bn_act(x, *blk["conv1"], stride=1, pad=1, relu=True)
        identity = x
    else:
        # Fuse conv1 (3x3/s2, ReLU) and the 1x1/s2 downsample (no ReLU) in one matmul:
        # embed the 1x1 weights at the centre of a zero 3x3 kernel (same stride/pad=1
        # gives identical taps) and concatenate along Cout -> lane-dense 128-wide RHS.
        w1, s1, b1 = blk["conv1"]
        wd, sd, bd = blk["down"]
        kh, kw, cin, c1 = w1.shape
        cd = wd.shape[-1]
        wd3 = jnp.zeros((kh, kw, cin, cd), w1.dtype).at[kh // 2, kw // 2].set(wd[0, 0])
        w_cat = jnp.concatenate([w1, wd3], axis=-1)
        s_cat = jnp.concatenate([s1, sd], axis=-1)
        b_cat = jnp.concatenate([b1, bd], axis=-1)
        y = conv_bn_act(x, w_cat, s_cat, b_cat, stride=stride, pad=1, relu=c1)
        out = y[..., :c1]
        identity = y[..., c1:]
    # second conv+BN, add identity, ReLU — all inside one Pallas kernel call
    return conv_bn_act(out, *blk["conv2"], stride=1, pad=1, relu=True, residual=identity)


def encoder_forward(x_nchw, params):
    x = jnp.transpose(x_nchw, (0, 2, 3, 1))                            # NCHW -> NHWC
    # resnet18 part
    x = conv_bn_act(x, *params["stem"], stride=2, pad=3, relu=True)    # 7x7 / 2
    x = maxpool2d(x, k=3, stride=2, pad=1)
    for i in range(4):
        x = _resblock(x, params[f"res{i}"])
    # layer part
    x = conv_bn_act(x, *params["l1"], stride=1, pad=1, relu=True)
    x = maxpool2d(x, k=2, stride=2, pad=0)
    x = conv_bn_act(x, *params["l2"], stride=1, pad=1, relu=True)
    x = maxpool2d(x, k=2, stride=2, pad=0)
    x = conv_bn_act(x, *params["l3"], stride=1, pad=1, relu=True)
    return jnp.transpose(x, (0, 3, 1, 2))                              # NHWC -> NCHW


# ----------------------------------------------------------------------------- main
if __name__ == "__main__":
    in_channels = 3
    x = jax.random.normal(jax.random.PRNGKey(0), (2, in_channels, 64, 64), jnp.float32)
    params = make_encoder_params(jax.random.PRNGKey(42), in_channels=in_channels)

    fwd = jax.jit(lambda a: encoder_forward(a, params))
    y = fwd(x)
    jax.block_until_ready(y)
    assert y.shape == (2, 64, 2, 2), y.shape
    assert bool(jnp.all(jnp.isfinite(y)))
    print("KERNEL_OK")
</pallas_src>

<mosaic_0001>
module attributes {stable_mosaic.version = 11 : i64} {
  func.func @kern(%arg0: i32, %arg1: memref<512x256xbf16, #tpu.memory_space<vmem>>, %arg2: memref<256x64xbf16, #tpu.memory_space<vmem>>, %arg3: memref<1x64xf32, #tpu.memory_space<vmem>>, %arg4: memref<512x64xf32, #tpu.memory_space<vmem>>) attributes {dimension_semantics = [#tpu.dimension_semantics<parallel>], iteration_bounds = array<i64: 4>, scalar_prefetch = 0 : i64, scratch_operands = 0 : i64, tpu.core_type = #tpu.core_type<tc>, window_params = [{transform_indices = @transform_0, window_bounds = array<i64: 512, 256>}, {pipeline_mode = #tpu.pipeline_mode<synchronous>, transform_indices = @transform_1, window_bounds = array<i64: 256, 64>}, {pipeline_mode = #tpu.pipeline_mode<synchronous>, transform_indices = @transform_2, window_bounds = array<i64: 1, 64>}, {transform_indices = @transform_3, window_bounds = array<i64: 512, 64>}]} {
    %c0 = arith.constant 0 : index
    %c0_0 = arith.constant 0 : index
    %0 = vector.load %arg1[%c0, %c0_0] : memref<512x256xbf16, #tpu.memory_space<vmem>>, vector<512x256xbf16>
    %c0_1 = arith.constant 0 : index
    %c0_2 = arith.constant 0 : index
    %1 = vector.load %arg2[%c0_1, %c0_2] : memref<256x64xbf16, #tpu.memory_space<vmem>>, vector<256x64xbf16>
    %cst = arith.constant dense<0.000000e+00> : vector<512x64xf32>
    %2 = tpu.matmul %0, %1, %cst {dimension_numbers = #tpu.dot_dimension_numbers<[1], [0], [0], [1], [0, 0, 1, 1], [], []>} : vector<512x256xbf16>, vector<256x64xbf16>, vector<512x64xf32> -> vector<512x64xf32>
    %c0_3 = arith.constant 0 : index
    %c0_4 = arith.constant 0 : index
    %3 = vector.load %arg3[%c0_3, %c0_4] : memref<1x64xf32, #tpu.memory_space<vmem>>, vector<1x64xf32>
    %4 = vector.broadcast %3 : vector<1x64xf32> to vector<512x64xf32>
    %5 = arith.addf %2, %4 : vector<512x64xf32>
    %cst_5 = arith.constant 0.000000e+00 : f32
    %6 = vector.broadcast %cst_5 : f32 to vector<512x64xf32>
    %7 = arith.maximumf %5, %6 : vector<512x64xf32>
    %c0_6 = arith.constant 0 : index
    %c0_7 = arith.constant 0 : index
    %8 = vector.load %arg4[%c0_6, %c0_7] : memref<512x64xf32, #tpu.memory_space<vmem>>, vector<512x64xf32>
    tpu.vector_store %arg4[%c0_6, %c0_7], %7 {strides = array<i32>} : memref<512x64xf32, #tpu.memory_space<vmem>>, vector<512x64xf32>,
    return
  }
  func.func @transform_0(%arg0: i32) -> (i32, i32) {
    %c0_i32 = arith.constant 0 : i32
    %c0_i32_0 = arith.constant 0 : i32
    return %arg0, %c0_i32 : i32, i32
  }
  func.func @transform_1(%arg0: i32) -> (i32, i32) {
    %c0_i32 = arith.constant 0 : i32
    %c0_i32_0 = arith.constant 0 : i32
    %c0_i32_1 = arith.constant 0 : i32
    return %c0_i32, %c0_i32_0 : i32, i32
  }
  func.func @transform_2(%arg0: i32) -> (i32, i32) {
    %c0_i32 = arith.constant 0 : i32
    %c0_i32_0 = arith.constant 0 : i32
    %c0_i32_1 = arith.constant 0 : i32
    return %c0_i32, %c0_i32_0 : i32, i32
  }
  func.func @transform_3(%arg0: i32) -> (i32, i32) {
    %c0_i32 = arith.constant 0 : i32
    %c0_i32_0 = arith.constant 0 : i32
    return %arg0, %c0_i32 : i32, i32
  }
}

module attributes {stable_mosaic.version = 11 : i64} {
  func.func @kern(%arg0: i32, %arg1: memref<1x17x2x17x128xf32, #tpu.memory_space<vmem>>, %arg2: memref<1x16x16x64xf32, #tpu.memory_space<vmem>>) attributes {dimension_semantics = [#tpu.dimension_semantics<parallel>], iteration_bounds = array<i64: 2>, scalar_prefetch = 0 : i64, scratch_operands = 0 : i64, tpu.core_type = #tpu.core_type<tc>, window_params = [{transform_indices = @transform_0, window_bounds = array<i64: 1, 17, 2, 17, 128>}, {transform_indices = @transform_1, window_bounds = array<i64: 1, 16, 16, 64>}]} {
    %c0 = arith.constant 0 : index
    %c0_0 = arith.constant 0 : index
    %c0_1 = arith.constant 0 : index
    %c0_2 = arith.constant 0 : index
    %c0_3 = arith.constant 0 : index
    %0 = vector.load %arg1[%c0, %c0_0, %c0_1, %c0_2, %c0_3] : memref<1x17x2x17x128xf32, #tpu.memory_space<vmem>>, vector<1x17x2x17x128xf32>
    %1 = vector.shape_cast %0 : vector<1x17x2x17x128xf32> to vector<17x2x17x128xf32>
    %2 = vector.extract_strided_slice %1 {offsets = [0, 0, 0, 0], sizes = [16, 1, 16, 64], strides = [1, 1, 1, 1]} : vector<17x2x17x128xf32> to vector<16x1x16x64xf32>
    %3 = vector.shape_cast %2 : vector<16x1x16x64xf32> to vector<16x16x64xf32>
    %4 = vector.extract_strided_slice %1 {offsets = [0, 0, 0, 64], sizes = [16, 1, 16, 64], strides = [1, 1, 1, 1]} : vector<17x2x17x128xf32> to vector<16x1x16x64xf32>
    %5 = vector.shape_cast %4 : vector<16x1x16x64xf32> to vector<16x16x64xf32>
    %6 = arith.maximumf %3, %5 : vector<16x16x64xf32>
    %7 = vector.extract_strided_slice %1 {offsets = [0, 0, 1, 0], sizes = [16, 1, 16, 64], strides = [1, 1, 1, 1]} : vector<17x2x17x128xf32> to vector<16x1x16x64xf32>
    %8 = vector.shape_cast %7 : vector<16x1x16x64xf32> to vector<16x16x64xf32>
    %9 = arith.maximumf %6, %8 : vector<16x16x64xf32>
    %10 = vector.extract_strided_slice %1 {offsets = [0, 1, 0, 0], sizes = [16, 1, 16, 64], strides = [1, 1, 1, 1]} : vector<17x2x17x128xf32> to vector<16x1x16x64xf32>
    %11 = vector.shape_cast %10 : vector<16x1x16x64xf32> to vector<16x16x64xf32>
    %12 = arith.maximumf %9, %11 : vector<16x16x64xf32>
    %13 = vector.extract_strided_slice %1 {offsets = [0, 1, 0, 64], sizes = [16, 1, 16, 64], strides = [1, 1, 1, 1]} : vector<17x2x17x128xf32> to vector<16x1x16x64xf32>
    %14 = vector.shape_cast %13 : vector<16x1x16x64xf32> to vector<16x16x64xf32>
    %15 = arith.maximumf %12, %14 : vector<16x16x64xf32>
    %16 = vector.extract_strided_slice %1 {offsets = [0, 1, 1, 0], sizes = [16, 1, 16, 64], strides = [1, 1, 1, 1]} : vector<17x2x17x128xf32> to vector<16x1x16x64xf32>
    %17 = vector.shape_cast %16 : vector<16x1x16x64xf32> to vector<16x16x64xf32>
    %18 = arith.maximumf %15, %17 : vector<16x16x64xf32>
    %19 = vector.extract_strided_slice %1 {offsets = [1, 0, 0, 0], sizes = [16, 1, 16, 64], strides = [1, 1, 1, 1]} : vector<17x2x17x128xf32> to vector<16x1x16x64xf32>
    %20 = vector.shape_cast %19 : vector<16x1x16x64xf32> to vector<16x16x64xf32>
    %21 = arith.maximumf %18, %20 : vector<16x16x64xf32>
    %22 = vector.extract_strided_slice %1 {offsets = [1, 0, 0, 64], sizes = [16, 1, 16, 64], strides = [1, 1, 1, 1]} : vector<17x2x17x128xf32> to vector<16x1x16x64xf32>
    %23 = vector.shape_cast %22 : vector<16x1x16x64xf32> to vector<16x16x64xf32>
    %24 = arith.maximumf %21, %23 : vector<16x16x64xf32>
    %25 = vector.extract_strided_slice %1 {offsets = [1, 0, 1, 0], sizes = [16, 1, 16, 64], strides = [1, 1, 1, 1]} : vector<17x2x17x128xf32> to vector<16x1x16x64xf32>
    %26 = vector.shape_cast %25 : vector<16x1x16x64xf32> to vector<16x16x64xf32>
    %27 = arith.maximumf %24, %26 : vector<16x16x64xf32>
    %c0_4 = arith.constant 0 : index
    %c0_5 = arith.constant 0 : index
    %c0_6 = arith.constant 0 : index
    %c0_7 = arith.constant 0 : index
    %28 = vector.load %arg2[%c0_4, %c0_5, %c0_6, %c0_7] : memref<1x16x16x64xf32, #tpu.memory_space<vmem>>, vector<1x16x16x64xf32>
    %29 = vector.shape_cast %28 : vector<1x16x16x64xf32> to vector<16x16x64xf32>
    %30 = vector.shape_cast %27 : vector<16x16x64xf32> to vector<1x16x16x64xf32>
    tpu.vector_store %arg2[%c0_4, %c0_5, %c0_6, %c0_7], %30 {strides = array<i32>} : memref<1x16x16x64xf32, #tpu.memory_space<vmem>>, vector<1x16x16x64xf32>,
    return
  }
  func.func @transform_0(%arg0: i32) -> (i32, i32, i32, i32, i32) {
    %c0_i32 = arith.constant 0 : i32
    %c0_i32_0 = arith.constant 0 : i32
    %c0_i32_1 = arith.constant 0 : i32
    %c0_i32_2 = arith.constant 0 : i32
    %c0_i32_3 = arith.constant 0 : i32
    return %arg0, %c0_i32, %c0_i32_0, %c0_i32_1, %c0_i32_2 : i32, i32, i32, i32, i32
  }
  func.func @transform_1(%arg0: i32) -> (i32, i32, i32, i32) {
    %c0_i32 = arith.constant 0 : i32
    %c0_i32_0 = arith.constant 0 : i32
    %c0_i32_1 = arith.constant 0 : i32
    %c0_i32_2 = arith.constant 0 : i32
    return %arg0, %c0_i32, %c0_i32_0, %c0_i32_1 : i32, i32, i32, i32
  }
}

module attributes {stable_mosaic.version = 11 : i64} {
  func.func @kern(%arg0: i32, %arg1: memref<256x640xbf16, #tpu.memory_space<vmem>>, %arg2: memref<640x64xbf16, #tpu.memory_space<vmem>>, %arg3: memref<1x64xf32, #tpu.memory_space<vmem>>, %arg4: memref<256x64xf32, #tpu.memory_space<vmem>>) attributes {dimension_semantics = [#tpu.dimension_semantics<parallel>], iteration_bounds = array<i64: 2>, scalar_prefetch = 0 : i64, scratch_operands = 0 : i64, tpu.core_type = #tpu.core_type<tc>, window_params = [{transform_indices = @transform_0, window_bounds = array<i64: 256, 640>}, {pipeline_mode = #tpu.pipeline_mode<synchronous>, transform_indices = @transform_1, window_bounds = array<i64: 640, 64>}, {pipeline_mode = #tpu.pipeline_mode<synchronous>, transform_indices = @transform_2, window_bounds = array<i64: 1, 64>}, {transform_indices = @transform_3, window_bounds = array<i64: 256, 64>}]} {
    %c0 = arith.constant 0 : index
    %c0_0 = arith.constant 0 : index
    %0 = vector.load %arg1[%c0, %c0_0] : memref<256x640xbf16, #tpu.memory_space<vmem>>, vector<256x640xbf16>
    %c0_1 = arith.constant 0 : index
    %c0_2 = arith.constant 0 : index
    %1 = vector.load %arg2[%c0_1, %c0_2] : memref<640x64xbf16, #tpu.memory_space<vmem>>, vector<640x64xbf16>
    %cst = arith.constant dense<0.000000e+00> : vector<256x64xf32>
    %2 = tpu.matmul %0, %1, %cst {dimension_numbers = #tpu.dot_dimension_numbers<[1], [0], [0], [1], [0, 0, 1, 1], [], []>} : vector<256x640xbf16>, vector<640x64xbf16>, vector<256x64xf32> -> vector<256x64xf32>
    %c0_3 = arith.constant 0 : index
    %c0_4 = arith.constant 0 : index
    %3 = vector.load %arg3[%c0_3, %c0_4] : memref<1x64xf32, #tpu.memory_space<vmem>>, vector<1x64xf32>
    %4 = vector.broadcast %3 : vector<1x64xf32> to vector<256x64xf32>
    %5 = arith.addf %2, %4 : vector<256x64xf32>
    %cst_5 = arith.constant 0.000000e+00 : f32
    %6 = vector.broadcast %cst_5 : f32 to vector<256x64xf32>
    %7 = arith.maximumf %5, %6 : vector<256x64xf32>
    %c0_6 = arith.constant 0 : index
    %c0_7 = arith.constant 0 : index
    %8 = vector.load %arg4[%c0_6, %c0_7] : memref<256x64xf32, #tpu.memory_space<vmem>>, vector<256x64xf32>
    tpu.vector_store %arg4[%c0_6, %c0_7], %7 {strides = array<i32>} : memref<256x64xf32, #tpu.memory_space<vmem>>, vector<256x64xf32>,
    return
  }
  func.func @transform_0(%arg0: i32) -> (i32, i32) {
    %c0_i32 = arith.constant 0 : i32
    %c0_i32_0 = arith.constant 0 : i32
    return %arg0, %c0_i32 : i32, i32
  }
  func.func @transform_1(%arg0: i32) -> (i32, i32) {
    %c0_i32 = arith.constant 0 : i32
    %c0_i32_0 = arith.constant 0 : i32
    %c0_i32_1 = arith.constant 0 : i32
    return %c0_i32, %c0_i32_0 : i32, i32
  }
  func.func @transform_2(%arg0: i32) -> (i32, i32) {
    %c0_i32 = arith.constant 0 : i32
    %c0_i32_0 = arith.constant 0 : i32
    %c0_i32_1 = arith.constant 0 : i32
    return %c0_i32, %c0_i32_0 : i32, i32
  }
  func.func @transform_3(%arg0: i32) -> (i32, i32) {
    %c0_i32 = arith.constant 0 : i32
    %c0_i32_0 = arith.constant 0 : i32
    return %arg0, %c0_i32 : i32, i32
  }
}

module attributes {stable_mosaic.version = 11 : i64} {
  func.func @kern(%arg0: i32, %arg1: memref<256x640xbf16, #tpu.memory_space<vmem>>, %arg2: memref<640x64xbf16, #tpu.memory_space<vmem>>, %arg3: memref<1x64xf32, #tpu.memory_space<vmem>>, %arg4: memref<256x64xf32, #tpu.memory_space<vmem>>, %arg5: memref<256x64xf32, #tpu.memory_space<vmem>>) attributes {dimension_semantics = [#tpu.dimension_semantics<parallel>], iteration_bounds = array<i64: 2>, scalar_prefetch = 0 : i64, scratch_operands = 0 : i64, tpu.core_type = #tpu.core_type<tc>, window_params = [{transform_indices = @transform_0, window_bounds = array<i64: 256, 640>}, {pipeline_mode = #tpu.pipeline_mode<synchronous>, transform_indices = @transform_1, window_bounds = array<i64: 640, 64>}, {pipeline_mode = #tpu.pipeline_mode<synchronous>, transform_indices = @transform_2, window_bounds = array<i64: 1, 64>}, {transform_indices = @transform_3, window_bounds = array<i64: 256, 64>}, {transform_indices = @transform_4, window_bounds = array<i64: 256, 64>}]} {
    %c0 = arith.constant 0 : index
    %c0_0 = arith.constant 0 : index
    %0 = vector.load %arg1[%c0, %c0_0] : memref<256x640xbf16, #tpu.memory_space<vmem>>, vector<256x640xbf16>
    %c0_1 = arith.constant 0 : index
    %c0_2 = arith.constant 0 : index
    %1 = vector.load %arg2[%c0_1, %c0_2] : memref<640x64xbf16, #tpu.memory_space<vmem>>, vector<640x64xbf16>
    %cst = arith.constant dense<0.000000e+00> : vector<256x64xf32>
    %2 = tpu.matmul %0, %1, %cst {dimension_numbers = #tpu.dot_dimension_numbers<[1], [0], [0], [1], [0, 0, 1, 1], [], []>} : vector<256x640xbf16>, vector<640x64xbf16>, vector<256x64xf32> -> vector<256x64xf32>
    %c0_3 = arith.constant 0 : index
    %c0_4 = arith.constant 0 : index
    %3 = vector.load %arg3[%c0_3, %c0_4] : memref<1x64xf32, #tpu.memory_space<vmem>>, vector<1x64xf32>
    %4 = vector.broadcast %3 : vector<1x64xf32> to vector<256x64xf32>
    %5 = arith.addf %2, %4 : vector<256x64xf32>
    %c0_5 = arith.constant 0 : index
    %c0_6 = arith.constant 0 : index
    %6 = vector.load %arg4[%c0_5, %c0_6] : memref<256x64xf32, #tpu.memory_space<vmem>>, vector<256x64xf32>
    %7 = arith.addf %5, %6 : vector<256x64xf32>
    %cst_7 = arith.constant 0.000000e+00 : f32
    %8 = vector.broadcast %cst_7 : f32 to vector<256x64xf32>
    %9 = arith.maximumf %7, %8 : vector<256x64xf32>
    %c0_8 = arith.constant 0 : index
    %c0_9 = arith.constant 0 : index
    %10 = vector.load %arg5[%c0_8, %c0_9] : memref<256x64xf32, #tpu.memory_space<vmem>>, vector<256x64xf32>
    tpu.vector_store %arg5[%c0_8, %c0_9], %9 {strides = array<i32>} : memref<256x64xf32, #tpu.memory_space<vmem>>, vector<256x64xf32>,
    return
  }
  func.func @transform_0(%arg0: i32) -> (i32, i32) {
    %c0_i32 = arith.constant 0 : i32
    %c0_i32_0 = arith.constant 0 : i32
    return %arg0, %c0_i32 : i32, i32
  }
  func.func @transform_1(%arg0: i32) -> (i32, i32) {
    %c0_i32 = arith.constant 0 : i32
    %c0_i32_0 = arith.constant 0 : i32
    %c0_i32_1 = arith.constant 0 : i32
    return %c0_i32, %c0_i32_0 : i32, i32
  }
  func.func @transform_2(%arg0: i32) -> (i32, i32) {
    %c0_i32 = arith.constant 0 : i32
    %c0_i32_0 = arith.constant 0 : i32
    %c0_i32_1 = arith.constant 0 : i32
    return %c0_i32, %c0_i32_0 : i32, i32
  }
  func.func @transform_3(%arg0: i32) -> (i32, i32) {
    %c0_i32 = arith.constant 0 : i32
    %c0_i32_0 = arith.constant 0 : i32
    return %arg0, %c0_i32 : i32, i32
  }
  func.func @transform_4(%arg0: i32) -> (i32, i32) {
    %c0_i32 = arith.constant 0 : i32
    %c0_i32_0 = arith.constant 0 : i32
    return %arg0, %c0_i32 : i32, i32
  }
}

module attributes {stable_mosaic.version = 11 : i64} {
  func.func @kern(%arg0: i32, %arg1: memref<128x640xbf16, #tpu.memory_space<vmem>>, %arg2: memref<640x128xbf16, #tpu.memory_space<vmem>>, %arg3: memref<1x128xf32, #tpu.memory_space<vmem>>, %arg4: memref<128x128xf32, #tpu.memory_space<vmem>>) attributes {dimension_semantics = [#tpu.dimension_semantics<parallel>], iteration_bounds = array<i64: 1>, scalar_prefetch = 0 : i64, scratch_operands = 0 : i64, tpu.core_type = #tpu.core_type<tc>, window_params = [{transform_indices = @transform_0, window_bounds = array<i64: 128, 640>}, {pipeline_mode = #tpu.pipeline_mode<synchronous>, transform_indices = @transform_1, window_bounds = array<i64: 640, 128>}, {pipeline_mode = #tpu.pipeline_mode<synchronous>, transform_indices = @transform_2, window_bounds = array<i64: 1, 128>}, {transform_indices = @transform_3, window_bounds = array<i64: 128, 128>}]} {
    %c0 = arith.constant 0 : index
    %c0_0 = arith.constant 0 : index
    %0 = vector.load %arg1[%c0, %c0_0] : memref<128x640xbf16, #tpu.memory_space<vmem>>, vector<128x640xbf16>
    %c0_1 = arith.constant 0 : index
    %c0_2 = arith.constant 0 : index
    %1 = vector.load %arg2[%c0_1, %c0_2] : memref<640x128xbf16, #tpu.memory_space<vmem>>, vector<640x128xbf16>
    %cst = arith.constant dense<0.000000e+00> : vector<128x128xf32>
    %2 = tpu.matmul %0, %1, %cst {dimension_numbers = #tpu.dot_dimension_numbers<[1], [0], [0], [1], [0, 0, 1, 1], [], []>} : vector<128x640xbf16>, vector<640x128xbf16>, vector<128x128xf32> -> vector<128x128xf32>
    %c0_3 = arith.constant 0 : index
    %c0_4 = arith.constant 0 : index
    %3 = vector.load %arg3[%c0_3, %c0_4] : memref<1x128xf32, #tpu.memory_space<vmem>>, vector<1x128xf32>
    %4 = vector.broadcast %3 : vector<1x128xf32> to vector<128x128xf32>
    %5 = arith.addf %2, %4 : vector<128x128xf32>
    %6 = tpu.iota {dimensions = array<i32: 1>} : vector<128x128xi32>
    %c64_i32 = arith.constant 64 : i32
    %7 = vector.broadcast %c64_i32 : i32 to vector<128x128xi32>
    %8 = arith.cmpi slt, %6, %7 : vector<128x128xi32>
    %cst_5 = arith.constant 0.000000e+00 : f32
    %9 = vector.broadcast %cst_5 : f32 to vector<128x128xf32>
    %10 = arith.maximumf %5, %9 : vector<128x128xf32>
    %11 = arith.select %8, %10, %5 : vector<128x128xi1>, vector<128x128xf32>
    %c0_6 = arith.constant 0 : index
    %c0_7 = arith.constant 0 : index
    %12 = vector.load %arg4[%c0_6, %c0_7] : memref<128x128xf32, #tpu.memory_space<vmem>>, vector<128x128xf32>
    tpu.vector_store %arg4[%c0_6, %c0_7], %11 {strides = array<i32>} : memref<128x128xf32, #tpu.memory_space<vmem>>, vector<128x128xf32>,
    return
  }
  func.func @transform_0(%arg0: i32) -> (i32, i32) {
    %c0_i32 = arith.constant 0 : i32
    %c0_i32_0 = arith.constant 0 : i32
    return %arg0, %c0_i32 : i32, i32
  }
  func.func @transform_1(%arg0: i32) -> (i32, i32) {
    %c0_i32 = arith.constant 0 : i32
    %c0_i32_0 = arith.constant 0 : i32
    %c0_i32_1 = arith.constant 0 : i32
    return %c0_i32, %c0_i32_0 : i32, i32
  }
  func.func @transform_2(%arg0: i32) -> (i32, i32) {
    %c0_i32 = arith.constant 0 : i32
    %c0_i32_0 = arith.constant 0 : i32
    %c0_i32_1 = arith.constant 0 : i32
    return %c0_i32, %c0_i32_0 : i32, i32
  }
  func.func @transform_3(%arg0: i32) -> (i32, i32) {
    %c0_i32 = arith.constant 0 : i32
    %c0_i32_0 = arith.constant 0 : i32
    return %arg0, %c0_i32 : i32, i32
  }
}

module attributes {stable_mosaic.version = 11 : i64} {
  func.func @kern(%arg0: i32, %arg1: memref<128x640xbf16, #tpu.memory_space<vmem>>, %arg2: memref<640x64xbf16, #tpu.memory_space<vmem>>, %arg3: memref<1x64xf32, #tpu.memory_space<vmem>>, %arg4: memref<128x64xf32, #tpu.memory_space<vmem>>, %arg5: memref<128x64xf32, #tpu.memory_space<vmem>>) attributes {dimension_semantics = [#tpu.dimension_semantics<parallel>], iteration_bounds = array<i64: 1>, scalar_prefetch = 0 : i64, scratch_operands = 0 : i64, tpu.core_type = #tpu.core_type<tc>, window_params = [{transform_indices = @transform_0, window_bounds = array<i64: 128, 640>}, {pipeline_mode = #tpu.pipeline_mode<synchronous>, transform_indices = @transform_1, window_bounds = array<i64: 640, 64>}, {pipeline_mode = #tpu.pipeline_mode<synchronous>, transform_indices = @transform_2, window_bounds = array<i64: 1, 64>}, {transform_indices = @transform_3, window_bounds = array<i64: 128, 64>}, {transform_indices = @transform_4, window_bounds = array<i64: 128, 64>}]} {
    %c0 = arith.constant 0 : index
    %c0_0 = arith.constant 0 : index
    %0 = vector.load %arg1[%c0, %c0_0] : memref<128x640xbf16, #tpu.memory_space<vmem>>, vector<128x640xbf16>
    %c0_1 = arith.constant 0 : index
    %c0_2 = arith.constant 0 : index
    %1 = vector.load %arg2[%c0_1, %c0_2] : memref<640x64xbf16, #tpu.memory_space<vmem>>, vector<640x64xbf16>
    %cst = arith.constant dense<0.000000e+00> : vector<128x64xf32>
    %2 = tpu.matmul %0, %1, %cst {dimension_numbers = #tpu.dot_dimension_numbers<[1], [0], [0], [1], [0, 0, 1, 1], [], []>} : vector<128x640xbf16>, vector<640x64xbf16>, vector<128x64xf32> -> vector<128x64xf32>
    %c0_3 = arith.constant 0 : index
    %c0_4 = arith.constant 0 : index
    %3 = vector.load %arg3[%c0_3, %c0_4] : memref<1x64xf32, #tpu.memory_space<vmem>>, vector<1x64xf32>
    %4 = vector.broadcast %3 : vector<1x64xf32> to vector<128x64xf32>
    %5 = arith.addf %2, %4 : vector<128x64xf32>
    %c0_5 = arith.constant 0 : index
    %c0_6 = arith.constant 0 : index
    %6 = vector.load %arg4[%c0_5, %c0_6] : memref<128x64xf32, #tpu.memory_space<vmem>>, vector<128x64xf32>
    %7 = arith.addf %5, %6 : vector<128x64xf32>
    %cst_7 = arith.constant 0.000000e+00 : f32
    %8 = vector.broadcast %cst_7 : f32 to vector<128x64xf32>
    %9 = arith.maximumf %7, %8 : vector<128x64xf32>
    %c0_8 = arith.constant 0 : index
    %c0_9 = arith.constant 0 : index
    %10 = vector.load %arg5[%c0_8, %c0_9] : memref<128x64xf32, #tpu.memory_space<vmem>>, vector<128x64xf32>
    tpu.vector_store %arg5[%c0_8, %c0_9], %9 {strides = array<i32>} : memref<128x64xf32, #tpu.memory_space<vmem>>, vector<128x64xf32>,
    return
  }
  func.func @transform_0(%arg0: i32) -> (i32, i32) {
    %c0_i32 = arith.constant 0 : i32
    %c0_i32_0 = arith.constant 0 : i32
    return %arg0, %c0_i32 : i32, i32
  }
  func.func @transform_1(%arg0: i32) -> (i32, i32) {
    %c0_i32 = arith.constant 0 : i32
    %c0_i32_0 = arith.constant 0 : i32
    %c0_i32_1 = arith.constant 0 : i32
    return %c0_i32, %c0_i32_0 : i32, i32
  }
  func.func @transform_2(%arg0: i32) -> (i32, i32) {
    %c0_i32 = arith.constant 0 : i32
    %c0_i32_0 = arith.constant 0 : i32
    %c0_i32_1 = arith.constant 0 : i32
    return %c0_i32, %c0_i32_0 : i32, i32
  }
  func.func @transform_3(%arg0: i32) -> (i32, i32) {
    %c0_i32 = arith.constant 0 : i32
    %c0_i32_0 = arith.constant 0 : i32
    return %arg0, %c0_i32 : i32, i32
  }
  func.func @transform_4(%arg0: i32) -> (i32, i32) {
    %c0_i32 = arith.constant 0 : i32
    %c0_i32_0 = arith.constant 0 : i32
    return %arg0, %c0_i32 : i32, i32
  }
}

module attributes {stable_mosaic.version = 11 : i64} {
  func.func @kern(%arg0: i32, %arg1: memref<128x640xbf16, #tpu.memory_space<vmem>>, %arg2: memref<640x64xbf16, #tpu.memory_space<vmem>>, %arg3: memref<1x64xf32, #tpu.memory_space<vmem>>, %arg4: memref<128x64xf32, #tpu.memory_space<vmem>>) attributes {dimension_semantics = [#tpu.dimension_semantics<parallel>], iteration_bounds = array<i64: 1>, scalar_prefetch = 0 : i64, scratch_operands = 0 : i64, tpu.core_type = #tpu.core_type<tc>, window_params = [{transform_indices = @transform_0, window_bounds = array<i64: 128, 640>}, {pipeline_mode = #tpu.pipeline_mode<synchronous>, transform_indices = @transform_1, window_bounds = array<i64: 640, 64>}, {pipeline_mode = #tpu.pipeline_mode<synchronous>, transform_indices = @transform_2, window_bounds = array<i64: 1, 64>}, {transform_indices = @transform_3, window_bounds = array<i64: 128, 64>}]} {
    %c0 = arith.constant 0 : index
    %c0_0 = arith.constant 0 : index
    %0 = vector.load %arg1[%c0, %c0_0] : memref<128x640xbf16, #tpu.memory_space<vmem>>, vector<128x640xbf16>
    %c0_1 = arith.constant 0 : index
    %c0_2 = arith.constant 0 : index
    %1 = vector.load %arg2[%c0_1, %c0_2] : memref<640x64xbf16, #tpu.memory_space<vmem>>, vector<640x64xbf16>
    %cst = arith.constant dense<0.000000e+00> : vector<128x64xf32>
    %2 = tpu.matmul %0, %1, %cst {dimension_numbers = #tpu.dot_dimension_numbers<[1], [0], [0], [1], [0, 0, 1, 1], [], []>} : vector<128x640xbf16>, vector<640x64xbf16>, vector<128x64xf32> -> vector<128x64xf32>
    %c0_3 = arith.constant 0 : index
    %c0_4 = arith.constant 0 : index
    %3 = vector.load %arg3[%c0_3, %c0_4] : memref<1x64xf32, #tpu.memory_space<vmem>>, vector<1x64xf32>
    %4 = vector.broadcast %3 : vector<1x64xf32> to vector<128x64xf32>
    %5 = arith.addf %2, %4 : vector<128x64xf32>
    %cst_5 = arith.constant 0.000000e+00 : f32
    %6 = vector.broadcast %cst_5 : f32 to vector<128x64xf32>
    %7 = arith.maximumf %5, %6 : vector<128x64xf32>
    %c0_6 = arith.constant 0 : index
    %c0_7 = arith.constant 0 : index
    %8 = vector.load %arg4[%c0_6, %c0_7] : memref<128x64xf32, #tpu.memory_space<vmem>>, vector<128x64xf32>
    tpu.vector_store %arg4[%c0_6, %c0_7], %7 {strides = array<i32>} : memref<128x64xf32, #tpu.memory_space<vmem>>, vector<128x64xf32>,
    return
  }
  func.func @transform_0(%arg0: i32) -> (i32, i32) {
    %c0_i32 = arith.constant 0 : i32
    %c0_i32_0 = arith.constant 0 : i32
    return %arg0, %c0_i32 : i32, i32
  }
  func.func @transform_1(%arg0: i32) -> (i32, i32) {
    %c0_i32 = arith.constant 0 : i32
    %c0_i32_0 = arith.constant 0 : i32
    %c0_i32_1 = arith.constant 0 : i32
    return %c0_i32, %c0_i32_0 : i32, i32
  }
  func.func @transform_2(%arg0: i32) -> (i32, i32) {
    %c0_i32 = arith.constant 0 : i32
    %c0_i32_0 = arith.constant 0 : i32
    %c0_i32_1 = arith.constant 0 : i32
    return %c0_i32, %c0_i32_0 : i32, i32
  }
  func.func @transform_3(%arg0: i32) -> (i32, i32) {
    %c0_i32 = arith.constant 0 : i32
    %c0_i32_0 = arith.constant 0 : i32
    return %arg0, %c0_i32 : i32, i32
  }
}

module attributes {stable_mosaic.version = 11 : i64} {
  func.func @kern(%arg0: i32, %arg1: memref<128x640xbf16, #tpu.memory_space<vmem>>, %arg2: memref<640x128xbf16, #tpu.memory_space<vmem>>, %arg3: memref<1x128xf32, #tpu.memory_space<vmem>>, %arg4: memref<128x128xf32, #tpu.memory_space<vmem>>) attributes {dimension_semantics = [#tpu.dimension_semantics<parallel>], iteration_bounds = array<i64: 1>, scalar_prefetch = 0 : i64, scratch_operands = 0 : i64, tpu.core_type = #tpu.core_type<tc>, window_params = [{transform_indices = @transform_0, window_bounds = array<i64: 128, 640>}, {pipeline_mode = #tpu.pipeline_mode<synchronous>, transform_indices = @transform_1, window_bounds = array<i64: 640, 128>}, {pipeline_mode = #tpu.pipeline_mode<synchronous>, transform_indices = @transform_2, window_bounds = array<i64: 1, 128>}, {transform_indices = @transform_3, window_bounds = array<i64: 128, 128>}]} {
    %c0 = arith.constant 0 : index
    %c0_0 = arith.constant 0 : index
    %0 = vector.load %arg1[%c0, %c0_0] : memref<128x640xbf16, #tpu.memory_space<vmem>>, vector<128x640xbf16>
    %c0_1 = arith.constant 0 : index
    %c0_2 = arith.constant 0 : index
    %1 = vector.load %arg2[%c0_1, %c0_2] : memref<640x128xbf16, #tpu.memory_space<vmem>>, vector<640x128xbf16>
    %cst = arith.constant dense<0.000000e+00> : vector<128x128xf32>
    %2 = tpu.matmul %0, %1, %cst {dimension_numbers = #tpu.dot_dimension_numbers<[1], [0], [0], [1], [0, 0, 1, 1], [], []>} : vector<128x640xbf16>, vector<640x128xbf16>, vector<128x128xf32> -> vector<128x128xf32>
    %c0_3 = arith.constant 0 : index
    %c0_4 = arith.constant 0 : index
    %3 = vector.load %arg3[%c0_3, %c0_4] : memref<1x128xf32, #tpu.memory_space<vmem>>, vector<1x128xf32>
    %4 = vector.broadcast %3 : vector<1x128xf32> to vector<128x128xf32>
    %5 = arith.addf %2, %4 : vector<128x128xf32>
    %cst_5 = arith.constant 0.000000e+00 : f32
    %6 = vector.broadcast %cst_5 : f32 to vector<128x128xf32>
    %7 = arith.maximumf %5, %6 : vector<128x128xf32>
    %c0_6 = arith.constant 0 : index
    %c0_7 = arith.constant 0 : index
    %8 = vector.load %arg4[%c0_6, %c0_7] : memref<128x128xf32, #tpu.memory_space<vmem>>, vector<128x128xf32>
    tpu.vector_store %arg4[%c0_6, %c0_7], %7 {strides = array<i32>} : memref<128x128xf32, #tpu.memory_space<vmem>>, vector<128x128xf32>,
    return
  }
  func.func @transform_0(%arg0: i32) -> (i32, i32) {
    %c0_i32 = arith.constant 0 : i32
    %c0_i32_0 = arith.constant 0 : i32
    return %arg0, %c0_i32 : i32, i32
  }
  func.func @transform_1(%arg0: i32) -> (i32, i32) {
    %c0_i32 = arith.constant 0 : i32
    %c0_i32_0 = arith.constant 0 : i32
    %c0_i32_1 = arith.constant 0 : i32
    return %c0_i32, %c0_i32_0 : i32, i32
  }
  func.func @transform_2(%arg0: i32) -> (i32, i32) {
    %c0_i32 = arith.constant 0 : i32
    %c0_i32_0 = arith.constant 0 : i32
    %c0_i32_1 = arith.constant 0 : i32
    return %c0_i32, %c0_i32_0 : i32, i32
  }
  func.func @transform_3(%arg0: i32) -> (i32, i32) {
    %c0_i32 = arith.constant 0 : i32
    %c0_i32_0 = arith.constant 0 : i32
    return %arg0, %c0_i32 : i32, i32
  }
}

module attributes {stable_mosaic.version = 11 : i64} {
  func.func @kern(%arg0: i32, %arg1: memref<1x4x2x4x256xf32, #tpu.memory_space<vmem>>, %arg2: memref<1x4x4x128xf32, #tpu.memory_space<vmem>>) attributes {dimension_semantics = [#tpu.dimension_semantics<parallel>], iteration_bounds = array<i64: 2>, scalar_prefetch = 0 : i64, scratch_operands = 0 : i64, tpu.core_type = #tpu.core_type<tc>, window_params = [{transform_indices = @transform_0, window_bounds = array<i64: 1, 4, 2, 4, 256>}, {transform_indices = @transform_1, window_bounds = array<i64: 1, 4, 4, 128>}]} {
    %c0 = arith.constant 0 : index
    %c0_0 = arith.constant 0 : index
    %c0_1 = arith.constant 0 : index
    %c0_2 = arith.constant 0 : index
    %c0_3 = arith.constant 0 : index
    %0 = vector.load %arg1[%c0, %c0_0, %c0_1, %c0_2, %c0_3] : memref<1x4x2x4x256xf32, #tpu.memory_space<vmem>>, vector<1x4x2x4x256xf32>
    %1 = vector.shape_cast %0 : vector<1x4x2x4x256xf32> to vector<4x2x4x256xf32>
    %2 = vector.extract_strided_slice %1 {offsets = [0, 0, 0, 0], sizes = [4, 1, 4, 128], strides = [1, 1, 1, 1]} : vector<4x2x4x256xf32> to vector<4x1x4x128xf32>
    %3 = vector.shape_cast %2 : vector<4x1x4x128xf32> to vector<4x4x128xf32>
    %4 = vector.extract_strided_slice %1 {offsets = [0, 0, 0, 128], sizes = [4, 1, 4, 128], strides = [1, 1, 1, 1]} : vector<4x2x4x256xf32> to vector<4x1x4x128xf32>
    %5 = vector.shape_cast %4 : vector<4x1x4x128xf32> to vector<4x4x128xf32>
    %6 = arith.maximumf %3, %5 : vector<4x4x128xf32>
    %7 = vector.extract_strided_slice %1 {offsets = [0, 1, 0, 0], sizes = [4, 1, 4, 128], strides = [1, 1, 1, 1]} : vector<4x2x4x256xf32> to vector<4x1x4x128xf32>
    %8 = vector.shape_cast %7 : vector<4x1x4x128xf32> to vector<4x4x128xf32>
    %9 = arith.maximumf %6, %8 : vector<4x4x128xf32>
    %10 = vector.extract_strided_slice %1 {offsets = [0, 1, 0, 128], sizes = [4, 1, 4, 128], strides = [1, 1, 1, 1]} : vector<4x2x4x256xf32> to vector<4x1x4x128xf32>
    %11 = vector.shape_cast %10 : vector<4x1x4x128xf32> to vector<4x4x128xf32>
    %12 = arith.maximumf %9, %11 : vector<4x4x128xf32>
    %c0_4 = arith.constant 0 : index
    %c0_5 = arith.constant 0 : index
    %c0_6 = arith.constant 0 : index
    %c0_7 = arith.constant 0 : index
    %13 = vector.load %arg2[%c0_4, %c0_5, %c0_6, %c0_7] : memref<1x4x4x128xf32, #tpu.memory_space<vmem>>, vector<1x4x4x128xf32>
    %14 = vector.shape_cast %13 : vector<1x4x4x128xf32> to vector<4x4x128xf32>
    %15 = vector.shape_cast %12 : vector<4x4x128xf32> to vector<1x4x4x128xf32>
    tpu.vector_store %arg2[%c0_4, %c0_5, %c0_6, %c0_7], %15 {strides = array<i32>} : memref<1x4x4x128xf32, #tpu.memory_space<vmem>>, vector<1x4x4x128xf32>,
    return
  }
  func.func @transform_0(%arg0: i32) -> (i32, i32, i32, i32, i32) {
    %c0_i32 = arith.constant 0 : i32
    %c0_i32_0 = arith.constant 0 : i32
    %c0_i32_1 = arith.constant 0 : i32
    %c0_i32_2 = arith.constant 0 : i32
    %c0_i32_3 = arith.constant 0 : i32
    return %arg0, %c0_i32, %c0_i32_0, %c0_i32_1, %c0_i32_2 : i32, i32, i32, i32, i32
  }
  func.func @transform_1(%arg0: i32) -> (i32, i32, i32, i32) {
    %c0_i32 = arith.constant 0 : i32
    %c0_i32_0 = arith.constant 0 : i32
    %c0_i32_1 = arith.constant 0 : i32
    %c0_i32_2 = arith.constant 0 : i32
    return %arg0, %c0_i32, %c0_i32_0, %c0_i32_1 : i32, i32, i32, i32
  }
}

module attributes {stable_mosaic.version = 11 : i64} {
  func.func @kern(%arg0: i32, %arg1: memref<32x1152xbf16, #tpu.memory_space<vmem>>, %arg2: memref<1152x64xbf16, #tpu.memory_space<vmem>>, %arg3: memref<1x64xf32, #tpu.memory_space<vmem>>, %arg4: memref<32x64xf32, #tpu.memory_space<vmem>>) attributes {dimension_semantics = [#tpu.dimension_semantics<parallel>], iteration_bounds = array<i64: 1>, scalar_prefetch = 0 : i64, scratch_operands = 0 : i64, tpu.core_type = #tpu.core_type<tc>, window_params = [{transform_indices = @transform_0, window_bounds = array<i64: 32, 1152>}, {pipeline_mode = #tpu.pipeline_mode<synchronous>, transform_indices = @transform_1, window_bounds = array<i64: 1152, 64>}, {pipeline_mode = #tpu.pipeline_mode<synchronous>, transform_indices = @transform_2, window_bounds = array<i64: 1, 64>}, {transform_indices = @transform_3, window_bounds = array<i64: 32, 64>}]} {
    %c0 = arith.constant 0 : index
    %c0_0 = arith.constant 0 : index
    %0 = vector.load %arg1[%c0, %c0_0] : memref<32x1152xbf16, #tpu.memory_space<vmem>>, vector<32x1152xbf16>
    %c0_1 = arith.constant 0 : index
    %c0_2 = arith.constant 0 : index
    %1 = vector.load %arg2[%c0_1, %c0_2] : memref<1152x64xbf16, #tpu.memory_space<vmem>>, vector<1152x64xbf16>
    %cst = arith.constant dense<0.000000e+00> : vector<32x64xf32>
    %2 = tpu.matmul %0, %1, %cst {dimension_numbers = #tpu.dot_dimension_numbers<[1], [0], [0], [1], [0, 0, 1, 1], [], []>} : vector<32x1152xbf16>, vector<1152x64xbf16>, vector<32x64xf32> -> vector<32x64xf32>
    %c0_3 = arith.constant 0 : index
    %c0_4 = arith.constant 0 : index
    %3 = vector.load %arg3[%c0_3, %c0_4] : memref<1x64xf32, #tpu.memory_space<vmem>>, vector<1x64xf32>
    %4 = vector.broadcast %3 : vector<1x64xf32> to vector<32x64xf32>
    %5 = arith.addf %2, %4 : vector<32x64xf32>
    %cst_5 = arith.constant 0.000000e+00 : f32
    %6 = vector.broadcast %cst_5 : f32 to vector<32x64xf32>
    %7 = arith.maximumf %5, %6 : vector<32x64xf32>
    %c0_6 = arith.constant 0 : index
    %c0_7 = arith.constant 0 : index
    %8 = vector.load %arg4[%c0_6, %c0_7] : memref<32x64xf32, #tpu.memory_space<vmem>>, vector<32x64xf32>
    tpu.vector_store %arg4[%c0_6, %c0_7], %7 {strides = array<i32>} : memref<32x64xf32, #tpu.memory_space<vmem>>, vector<32x64xf32>,
    return
  }
  func.func @transform_0(%arg0: i32) -> (i32, i32) {
    %c0_i32 = arith.constant 0 : i32
    %c0_i32_0 = arith.constant 0 : i32
    return %arg0, %c0_i32 : i32, i32
  }
  func.func @transform_1(%arg0: i32) -> (i32, i32) {
    %c0_i32 = arith.constant 0 : i32
    %c0_i32_0 = arith.constant 0 : i32
    %c0_i32_1 = arith.constant 0 : i32
    return %c0_i32, %c0_i32_0 : i32, i32
  }
  func.func @transform_2(%arg0: i32) -> (i32, i32) {
    %c0_i32 = arith.constant 0 : i32
    %c0_i32_0 = arith.constant 0 : i32
    %c0_i32_1 = arith.constant 0 : i32
    return %c0_i32, %c0_i32_0 : i32, i32
  }
  func.func @transform_3(%arg0: i32) -> (i32, i32) {
    %c0_i32 = arith.constant 0 : i32
    %c0_i32_0 = arith.constant 0 : i32
    return %arg0, %c0_i32 : i32, i32
  }
}

module attributes {stable_mosaic.version = 11 : i64} {
  func.func @kern(%arg0: i32, %arg1: memref<1x2x2x2x128xf32, #tpu.memory_space<vmem>>, %arg2: memref<1x2x2x64xf32, #tpu.memory_space<vmem>>) attributes {dimension_semantics = [#tpu.dimension_semantics<parallel>], iteration_bounds = array<i64: 2>, scalar_prefetch = 0 : i64, scratch_operands = 0 : i64, tpu.core_type = #tpu.core_type<tc>, window_params = [{transform_indices = @transform_0, window_bounds = array<i64: 1, 2, 2, 2, 128>}, {transform_indices = @transform_1, window_bounds = array<i64: 1, 2, 2, 64>}]} {
    %c0 = arith.constant 0 : index
    %c0_0 = arith.constant 0 : index
    %c0_1 = arith.constant 0 : index
    %c0_2 = arith.constant 0 : index
    %c0_3 = arith.constant 0 : index
    %0 = vector.load %arg1[%c0, %c0_0, %c0_1, %c0_2, %c0_3] : memref<1x2x2x2x128xf32, #tpu.memory_space<vmem>>, vector<1x2x2x2x128xf32>
    %1 = vector.shape_cast %0 : vector<1x2x2x2x128xf32> to vector<2x2x2x128xf32>
    %2 = vector.extract_strided_slice %1 {offsets = [0, 0, 0, 0], sizes = [2, 1, 2, 64], strides = [1, 1, 1, 1]} : vector<2x2x2x128xf32> to vector<2x1x2x64xf32>
    %3 = vector.shape_cast %2 : vector<2x1x2x64xf32> to vector<2x2x64xf32>
    %4 = vector.extract_strided_slice %1 {offsets = [0, 0, 0, 64], sizes = [2, 1, 2, 64], strides = [1, 1, 1, 1]} : vector<2x2x2x128xf32> to vector<2x1x2x64xf32>
    %5 = vector.shape_cast %4 : vector<2x1x2x64xf32> to vector<2x2x64xf32>
    %6 = arith.maximumf %3, %5 : vector<2x2x64xf32>
    %7 = vector.extract_strided_slice %1 {offsets = [0, 1, 0, 0], sizes = [2, 1, 2, 64], strides = [1, 1, 1, 1]} : vector<2x2x2x128xf32> to vector<2x1x2x64xf32>
    %8 = vector.shape_cast %7 : vector<2x1x2x64xf32> to vector<2x2x64xf32>
    %9 = arith.maximumf %6, %8 : vector<2x2x64xf32>
    %10 = vector.extract_strided_slice %1 {offsets = [0, 1, 0, 64], sizes = [2, 1, 2, 64], strides = [1, 1, 1, 1]} : vector<2x2x2x128xf32> to vector<2x1x2x64xf32>
    %11 = vector.shape_cast %10 : vector<2x1x2x64xf32> to vector<2x2x64xf32>
    %12 = arith.maximumf %9, %11 : vector<2x2x64xf32>
    %c0_4 = arith.constant 0 : index
    %c0_5 = arith.constant 0 : index
    %c0_6 = arith.constant 0 : index
    %c0_7 = arith.constant 0 : index
    %13 = vector.load %arg2[%c0_4, %c0_5, %c0_6, %c0_7] : memref<1x2x2x64xf32, #tpu.memory_space<vmem>>, vector<1x2x2x64xf32>
    %14 = vector.shape_cast %13 : vector<1x2x2x64xf32> to vector<2x2x64xf32>
    %15 = vector.shape_cast %12 : vector<2x2x64xf32> to vector<1x2x2x64xf32>
    tpu.vector_store %arg2[%c0_4, %c0_5, %c0_6, %c0_7], %15 {strides = array<i32>} : memref<1x2x2x64xf32, #tpu.memory_space<vmem>>, vector<1x2x2x64xf32>,
    return
  }
  func.func @transform_0(%arg0: i32) -> (i32, i32, i32, i32, i32) {
    %c0_i32 = arith.constant 0 : i32
    %c0_i32_0 = arith.constant 0 : i32
    %c0_i32_1 = arith.constant 0 : i32
    %c0_i32_2 = arith.constant 0 : i32
    %c0_i32_3 = arith.constant 0 : i32
    return %arg0, %c0_i32, %c0_i32_0, %c0_i32_1, %c0_i32_2 : i32, i32, i32, i32, i32
  }
  func.func @transform_1(%arg0: i32) -> (i32, i32, i32, i32) {
    %c0_i32 = arith.constant 0 : i32
    %c0_i32_0 = arith.constant 0 : i32
    %c0_i32_1 = arith.constant 0 : i32
    %c0_i32_2 = arith.constant 0 : i32
    return %arg0, %c0_i32, %c0_i32_0, %c0_i32_1 : i32, i32, i32, i32
  }
}

module attributes {stable_mosaic.version = 11 : i64} {
  func.func @kern(%arg0: i32, %arg1: memref<8x640xbf16, #tpu.memory_space<vmem>>, %arg2: memref<640x64xbf16, #tpu.memory_space<vmem>>, %arg3: memref<1x64xf32, #tpu.memory_space<vmem>>, %arg4: memref<8x64xf32, #tpu.memory_space<vmem>>) attributes {dimension_semantics = [#tpu.dimension_semantics<parallel>], iteration_bounds = array<i64: 1>, scalar_prefetch = 0 : i64, scratch_operands = 0 : i64, tpu.core_type = #tpu.core_type<tc>, window_params = [{transform_indices = @transform_0, window_bounds = array<i64: 8, 640>}, {pipeline_mode = #tpu.pipeline_mode<synchronous>, transform_indices = @transform_1, window_bounds = array<i64: 640, 64>}, {pipeline_mode = #tpu.pipeline_mode<synchronous>, transform_indices = @transform_2, window_bounds = array<i64: 1, 64>}, {transform_indices = @transform_3, window_bounds = array<i64: 8, 64>}]} {
    %c0 = arith.constant 0 : index
    %c0_0 = arith.constant 0 : index
    %0 = vector.load %arg1[%c0, %c0_0] : memref<8x640xbf16, #tpu.memory_space<vmem>>, vector<8x640xbf16>
    %c0_1 = arith.constant 0 : index
    %c0_2 = arith.constant 0 : index
    %1 = vector.load %arg2[%c0_1, %c0_2] : memref<640x64xbf16, #tpu.memory_space<vmem>>, vector<640x64xbf16>
    %cst = arith.constant dense<0.000000e+00> : vector<8x64xf32>
    %2 = tpu.matmul %0, %1, %cst {dimension_numbers = #tpu.dot_dimension_numbers<[1], [0], [0], [1], [0, 0, 1, 1], [], []>} : vector<8x640xbf16>, vector<640x64xbf16>, vector<8x64xf32> -> vector<8x64xf32>
    %c0_3 = arith.constant 0 : index
    %c0_4 = arith.constant 0 : index
    %3 = vector.load %arg3[%c0_3, %c0_4] : memref<1x64xf32, #tpu.memory_space<vmem>>, vector<1x64xf32>
    %4 = vector.broadcast %3 : vector<1x64xf32> to vector<8x64xf32>
    %5 = arith.addf %2, %4 : vector<8x64xf32>
    %cst_5 = arith.constant 0.000000e+00 : f32
    %6 = vector.broadcast %cst_5 : f32 to vector<8x64xf32>
    %7 = arith.maximumf %5, %6 : vector<8x64xf32>
    %c0_6 = arith.constant 0 : index
    %c0_7 = arith.constant 0 : index
    %8 = vector.load %arg4[%c0_6, %c0_7] : memref<8x64xf32, #tpu.memory_space<vmem>>, vector<8x64xf32>
    tpu.vector_store %arg4[%c0_6, %c0_7], %7 {strides = array<i32>} : memref<8x64xf32, #tpu.memory_space<vmem>>, vector<8x64xf32>,
    return
  }
  func.func @transform_0(%arg0: i32) -> (i32, i32) {
    %c0_i32 = arith.constant 0 : i32
    %c0_i32_0 = arith.constant 0 : i32
    return %arg0, %c0_i32 : i32, i32
  }
  func.func @transform_1(%arg0: i32) -> (i32, i32) {
    %c0_i32 = arith.constant 0 : i32
    %c0_i32_0 = arith.constant 0 : i32
    %c0_i32_1 = arith.constant 0 : i32
    return %c0_i32, %c0_i32_0 : i32, i32
  }
  func.func @transform_2(%arg0: i32) -> (i32, i32) {
    %c0_i32 = arith.constant 0 : i32
    %c0_i32_0 = arith.constant 0 : i32
    %c0_i32_1 = arith.constant 0 : i32
    return %c0_i32, %c0_i32_0 : i32, i32
  }
  func.func @transform_3(%arg0: i32) -> (i32, i32) {
    %c0_i32 = arith.constant 0 : i32
    %c0_i32_0 = arith.constant 0 : i32
    return %arg0, %c0_i32 : i32, i32
  }
}

</mosaic_0001>

<bundles_post_ra>
// kernel: _lambda_.15
= control target key start
LH: loop header
LB: loop body
LE: loop exit
PB: predicated region body
PF: predicated region fallthrough
CT: control target
= control target key end

     0   :  { %s1447_s12 = smov 0   ;;  %s1816_s0 = inlined_call_operand.vmem [shape: bf16[2048,256], index: 0, kind: input, shape index: {}]   ;;  %s1817_s1 = inlined_call_operand.vmem [shape: bf16[256,64], index: 1, kind: input, shape index: {}]   ;;  %s1818_s2 = inlined_call_operand.vmem [shape: f32[1,64], index: 2, kind: input, shape index: {}]   ;;  %s1819_s3 = inlined_call_operand.vmem [shape: f32[2048,64], index: 3, kind: output, shape index: {}]  }
   0x1 LB: > { %s1171_s13 = sadd.s32 4294967295, %s1424_s12   ;;  %p1175_p0 = scmp.ge.s32.totalorder %s1424_s12, 1  ;;  %s1424_s12 = sphi %s1447_s12, %s13_s12  }
   0x2   : > { %p139_p1 = scmp.lt.s32.totalorder %s1424_s12, 5 }
   0x4   : > { %p140_p2 = pnand %p1175_p0, %p139_p1 }
   0x5   : > { %s1176_s16 = sshll.u32 (!%p140_p2), %s1171_s13, 6 }
   0x6   : > { %143 = sbr.rel (%p140_p2) target bundleno = 398 (0x18e), region = 32  ;;  %p165_p3 = scmp.lt.s32.totalorder (!%p140_p2), %s1176_s16, 255 }
   0xb   : > { %v1306_v0 = vld [vmem:[%s1817_s1 + $0x38] sm:$0xff]   ;;  %v1426_v1 = vmov 0   ;;  %v1307_v2 = vld [vmem:[%s1817_s1 + $0x30] sm:$0xff]   ;;  %v1308_v3 = vld [vmem:[%s1817_s1 + $0x28] sm:$0xff]   ;;  %s1821_s16 = smov (!%p165_p3, %s1176_s16), 255  ;;  %vm1050_vm0 = vcmask 523264  }
   0xc   : > { %697 = vmatprep.subr.bf16.mxu0 %v1426_v1  ;;  %1265 = vmatprep.subr.bf16.mxu1 %v1426_v1  ;;  %v1309_v4 = vld [vmem:[%s1817_s1 + $0x20] sm:$0xff]   ;;  %s1264_s23 = sshll.u32 %s1821_s16, 3  ;;  %v1310_v5 = vld [vmem:[%s1817_s1 + $0x18] sm:$0xff]   ;;  %v1311_v7 = vld [vmem:[%s1817_s1 + $0x10] sm:$0xff]  }
   0xd   : > { %698 = vmatpush1.bf16.msra.mxu0 %v1306_v0  ;;  %1281 = vmatpush1.bf16.msra.mxu1 %v1306_v0  ;;  %s1486_s28 = scalar_lea.vmem %s1816_s0, %s1264_s23  ;;  %v1312_v9 = vld [vmem:[%s1817_s1 + $0x8] sm:$0xff]   ;;  %v1313_v10 = vld [vmem:[%s1817_s1] sm:$0xff]   ;;  %v1314_v11 = vld [vmem:[%s1817_s1 + $0x78] sm:$0xff]   ;;  %s1621_s5 = scalar_lea.vmem %s1819_s3, %s1264_s23 }
   0xe   : > { %699 = vmatprep.subr.bf16.mxu0 %v1426_v1  ;;  %1266 = vmatprep.subr.bf16.mxu1 %v1426_v1  ;;  %v1324_v6 = vld [vmem:[%s1486_s28 + $0x4] ss:$8 sps:$4 sm:$0xff]   ;;  %v1315_v12 = vld [vmem:[%s1817_s1 + $0x70] sm:$0xff]   ;;  %v1318_v15 = vld [vmem:[%s1817_s1 + $0x58] sm:$0xff]  }
   0xf   : > { %v1327_v8 = vld [vmem:[%s1486_s28 + $0x104] ss:$8 sps:$4 sm:$0xff]   ;;  %729 = vmatprep.mubr.bf16.mxu0 %v1324_v6  ;;  %v1319_v16 = vld [vmem:[%s1817_s1 + $0x50] sm:$0xff]   ;;  %v1322_v19 = vld [vmem:[%s1486_s28] ss:$8 sps:$4 sm:$0xff]  }
  0x10   : > { %857 = vmatprep.mubr.bf16.mxu1 %v1327_v8  ;;  %v1316_v13 = vld [vmem:[%s1817_s1 + $0x68] sm:$0xff]   ;;  %v1317_v14 = vld [vmem:[%s1817_s1 + $0x60] sm:$0xff]   ;;  %v1328_v21 = vld [vmem:[%s1486_s28 + $0x14] ss:$8 sps:$4 sm:$0xff]  }
  0x11   : > { %700 = vmatpush1.bf16.msra.mxu0 %v1307_v2  ;;  %1282 = vmatpush1.bf16.msra.mxu1 %v1307_v2  ;;  %v1320_v17 = vld [vmem:[%s1817_s1 + $0x48] sm:$0xff]   ;;  %v1321_v18 = vld [vmem:[%s1817_s1 + $0x40] sm:$0xff]   ;;  %v1330_v22 = vld [vmem:[%s1486_s28 + $0x114] ss:$8 sps:$4 sm:$0xff]  }
  0x12   : > { %701 = vmatprep.subr.bf16.mxu0 %v1426_v1  ;;  %1267 = vmatprep.subr.bf16.mxu1 %v1426_v1  ;;  %v1325_v20 = vld [vmem:[%s1486_s28 + $0x100] ss:$8 sps:$4 sm:$0xff]   ;;  %v1332_v23 = vld [vmem:[%s1486_s28 + $0x10] ss:$8 sps:$4 sm:$0xff]   ;;  %v1334_v25 = vld [vmem:[%s1486_s28 + $0x24] ss:$8 sps:$4 sm:$0xff]  }
  0x13   : > { %v1333_v24 = vld [vmem:[%s1486_s28 + $0x110] ss:$8 sps:$4 sm:$0xff]   ;;  %v1336_v26 = vld [vmem:[%s1486_s28 + $0x124] ss:$8 sps:$4 sm:$0xff]   ;;  %v1338_v27 = vld [vmem:[%s1486_s28 + $0x20] ss:$8 sps:$4 sm:$0xff]  }
  0x14   : > { %v1339_v28 = vld [vmem:[%s1486_s28 + $0x120] ss:$8 sps:$4 sm:$0xff]   ;;  %v1340_v29 = vld [vmem:[%s1486_s28 + $0x34] ss:$8 sps:$4 sm:$0xff]   ;;  %v1344_v31 = vld [vmem:[%s1486_s28 + $0x30] ss:$8 sps:$4 sm:$0xff]  }
  0x15   : > { %702 = vmatpush1.bf16.msra.mxu0 %v1308_v3  ;;  %1283 = vmatpush1.bf16.msra.mxu1 %v1308_v3  ;;  %v1342_v30 = vld [vmem:[%s1486_s28 + $0x134] ss:$8 sps:$4 sm:$0xff]   ;;  %v1345_v32 = vld [vmem:[%s1486_s28 + $0x130] ss:$8 sps:$4 sm:$0xff]   ;;  %v1346_v33 = vld [vmem:[%s1486_s28 + $0x44] ss:$8 sps:$4 sm:$0xff]  }
  0x16   : > { %703 = vmatprep.subr.bf16.mxu0 %v1426_v1  ;;  %1268 = vmatprep.subr.bf16.mxu1 %v1426_v1  ;;  %v1348_v34 = vld [vmem:[%s1486_s28 + $0x144] ss:$8 sps:$4 sm:$0xff]   ;;  %v1350_v35 = vld [vmem:[%s1486_s28 + $0x40] ss:$8 sps:$4 sm:$0xff]   ;;  %v1352_v37 = vld [vmem:[%s1486_s28 + $0x54] ss:$8 sps:$4 sm:$0xff]  }
  0x17   : > { %v1351_v36 = vld [vmem:[%s1486_s28 + $0x140] ss:$8 sps:$4 sm:$0xff]   ;;  %v1354_v38 = vld [vmem:[%s1486_s28 + $0x154] ss:$8 sps:$4 sm:$0xff]   ;;  %v1356_v39 = vld [vmem:[%s1486_s28 + $0x50] ss:$8 sps:$4 sm:$0xff]  }
  0x18   : > { %v1357_v40 = vld [vmem:[%s1486_s28 + $0x150] ss:$8 sps:$4 sm:$0xff]   ;;  %v1358_v41 = vld [vmem:[%s1486_s28 + $0x64] ss:$8 sps:$4 sm:$0xff]   ;;  %v1362_v43 = vld [vmem:[%s1486_s28 + $0x60] ss:$8 sps:$4 sm:$0xff]  }
  0x19   : > { %704 = vmatpush1.bf16.msra.mxu0 %v1309_v4  ;;  %1284 = vmatpush1.bf16.msra.mxu1 %v1309_v4  ;;  %v1360_v42 = vld [vmem:[%s1486_s28 + $0x164] ss:$8 sps:$4 sm:$0xff]   ;;  %v1363_v44 = vld [vmem:[%s1486_s28 + $0x160] ss:$8 sps:$4 sm:$0xff]   ;;  %v1364_v45 = vld [vmem:[%s1486_s28 + $0x74] ss:$8 sps:$4 sm:$0xff]  }
  0x1a   : > { %705 = vmatprep.subr.bf16.mxu0 %v1426_v1  ;;  %1269 = vmatprep.subr.bf16.mxu1 %v1426_v1  ;;  %v1366_v46 = vld [vmem:[%s1486_s28 + $0x174] ss:$8 sps:$4 sm:$0xff]   ;;  %v1368_v47 = vld [vmem:[%s1486_s28 + $0x70] ss:$8 sps:$4 sm:$0xff]   ;;  %v1370_v49 = vld [vmem:[%s1486_s28 + $0x84] ss:$8 sps:$4 sm:$0xff]  }
  0x1b   : > { %v1369_v48 = vld [vmem:[%s1486_s28 + $0x170] ss:$8 sps:$4 sm:$0xff]   ;;  %v1372_v50 = vld [vmem:[%s1486_s28 + $0x184] ss:$8 sps:$4 sm:$0xff]   ;;  %v1374_v51 = vld [vmem:[%s1486_s28 + $0x80] ss:$8 sps:$4 sm:$0xff]  }
  0x1c   : > { %v1375_v52 = vld [vmem:[%s1486_s28 + $0x180] ss:$8 sps:$4 sm:$0xff]   ;;  %v1376_v53 = vld [vmem:[%s1486_s28 + $0x94] ss:$8 sps:$4 sm:$0xff]   ;;  %v1380_v55 = vld [vmem:[%s1486_s28 + $0x90] ss:$8 sps:$4 sm:$0xff]  }
  0x1d   : > { %706 = vmatpush1.bf16.msra.mxu0 %v1310_v5  ;;  %1285 = vmatpush1.bf16.msra.mxu1 %v1310_v5  ;;  %v1378_v54 = vld [vmem:[%s1486_s28 + $0x194] ss:$8 sps:$4 sm:$0xff]   ;;  %v1381_v56 = vld [vmem:[%s1486_s28 + $0x190] ss:$8 sps:$4 sm:$0xff]   ;;  %v1382_v57 = vld [vmem:[%s1486_s28 + $0xa4] ss:$8 sps:$4 sm:$0xff]  }
  0x1e   : > { %707 = vmatprep.subr.bf16.mxu0 %v1426_v1  ;;  %1270 = vmatprep.subr.bf16.mxu1 %v1426_v1  ;;  %v1384_v58 = vld [vmem:[%s1486_s28 + $0x1a4] ss:$8 sps:$4 sm:$0xff]   ;;  %v1386_v59 = vld [vmem:[%s1486_s28 + $0xa0] ss:$8 sps:$4 sm:$0xff]   ;;  %v1388_v61 = vld [vmem:[%s1486_s28 + $0xb4] ss:$8 sps:$4 sm:$0xff]  }
  0x1f   : > { %v1387_v60 = vld [vmem:[%s1486_s28 + $0x1a0] ss:$8 sps:$4 sm:$0xff]   ;;  %v1390_v62 = vld [vmem:[%s1486_s28 + $0x1b4] ss:$8 sps:$4 sm:$0xff]   ;;  %v1392_v63 = vld [vmem:[%s1486_s28 + $0xb0] ss:$8 sps:$4 sm:$0xff]  }
  0x20   : > { %v1393_v0 = vld [vmem:[%s1486_s28 + $0x1b0] ss:$8 sps:$4 sm:$0xff]   ;;  %v1396_v2 = vld [vmem:[%s1486_s28 + $0x1c4] ss:$8 sps:$4 sm:$0xff]   ;;  %v1398_v3 = vld [vmem:[%s1486_s28 + $0xc0] ss:$8 sps:$4 sm:$0xff]  }
  0x21   : > { %708 = vmatpush1.bf16.msra.mxu0 %v1311_v7  ;;  %1286 = vmatpush1.bf16.msra.mxu1 %v1311_v7  ;;  %v1399_v4 = vld [vmem:[%s1486_s28 + $0x1c0] ss:$8 sps:$4 sm:$0xff]   ;;  %v1400_v5 = vld [vmem:[%s1486_s28 + $0xd4] ss:$8 sps:$4 sm:$0xff]   ;;  %v1404_v7 = vld [vmem:[%s1486_s28 + $0xd0] ss:$8 sps:$4 sm:$0xff]  }
  0x22   : > { %709 = vmatprep.subr.bf16.mxu0 %v1426_v1  ;;  %1271 = vmatprep.subr.bf16.mxu1 %v1426_v1  ;;  %v1402_v6 = vld [vmem:[%s1486_s28 + $0x1d4] ss:$8 sps:$4 sm:$0xff]   ;;  %v1405_v8 = vld [vmem:[%s1486_s28 + $0x1d0] ss:$8 sps:$4 sm:$0xff]  }
  0x25   : > { %710 = vmatpush1.bf16.msra.mxu0 %v1312_v9  ;;  %1287 = vmatpush1.bf16.msra.mxu1 %v1312_v9  ;;  %v1406_v9 = vld [vmem:[%s1486_s28 + $0xe4] ss:$8 sps:$4 sm:$0xff]  }
  0x26   : > { %711 = vmatprep.subr.bf16.mxu0 %v1426_v1  ;;  %1272 = vmatprep.subr.bf16.mxu1 %v1426_v1 }
  0x29   : > { %712 = vmatpush1.bf16.msra.mxu0 %v1313_v10  ;;  %1288 = vmatpush1.bf16.msra.mxu1 %v1313_v10  ;;  %v1408_v10 = vld [vmem:[%s1486_s28 + $0x1e4] ss:$8 sps:$4 sm:$0xff]  }
  0x2a   : > { %713 = vmatprep.subr.bf16.mxu0 %v1426_v1  ;;  %1273 = vmatprep.subr.bf16.mxu1 %v1426_v1 }
  0x2d   : > { %714 = vmatpush2.bf16.msra.mxu0 %v1314_v11  ;;  %1289 = vmatpush2.bf16.msra.mxu1 %v1314_v11  ;;  %v1410_v11 = vld [vmem:[%s1486_s28 + $0xe0] ss:$8 sps:$4 sm:$0xff]  }
  0x2e   : > { %715 = vmatprep.subr.bf16.mxu0 %v1426_v1  ;;  %1274 = vmatprep.subr.bf16.mxu1 %v1426_v1 }
  0x31   : > { %716 = vmatpush2.bf16.msra.mxu0 %v1315_v12  ;;  %1290 = vmatpush2.bf16.msra.mxu1 %v1315_v12  ;;  %v1411_v12 = vld [vmem:[%s1486_s28 + $0x1e0] ss:$8 sps:$4 sm:$0xff]  }
  0x32   : > { %717 = vmatprep.subr.bf16.mxu0 %v1426_v1  ;;  %1275 = vmatprep.subr.bf16.mxu1 %v1426_v1 }
  0x35   : > { %718 = vmatpush2.bf16.msra.mxu0 %v1316_v13  ;;  %1291 = vmatpush2.bf16.msra.mxu1 %v1316_v13  ;;  %v1412_v13 = vld [vmem:[%s1486_s28 + $0xf4] ss:$8 sps:$4 sm:$0xff]  }
  0x36   : > { %719 = vmatprep.subr.bf16.mxu0 %v1426_v1  ;;  %1276 = vmatprep.subr.bf16.mxu1 %v1426_v1 }
  0x39   : > { %720 = vmatpush2.bf16.msra.mxu0 %v1317_v14  ;;  %1292 = vmatpush2.bf16.msra.mxu1 %v1317_v14  ;;  %v1414_v14 = vld [vmem:[%s1486_s28 + $0x1f4] ss:$8 sps:$4 sm:$0xff]  }
  0x3a   : > { %721 = vmatprep.subr.bf16.mxu0 %v1426_v1  ;;  %1277 = vmatprep.subr.bf16.mxu1 %v1426_v1 }
  0x3d   : > { %722 = vmatpush2.bf16.msra.mxu0 %v1318_v15  ;;  %1293 = vmatpush2.bf16.msra.mxu1 %v1318_v15  ;;  %v1416_v15 = vld [vmem:[%s1486_s28 + $0xf0] ss:$8 sps:$4 sm:$0xff]  }
  0x3e   : > { %723 = vmatprep.subr.bf16.mxu0 %v1426_v1  ;;  %1278 = vmatprep.subr.bf16.mxu1 %v1426_v1 }
  0x41   : > { %724 = vmatpush2.bf16.msra.mxu0 %v1319_v16  ;;  %1294 = vmatpush2.bf16.msra.mxu1 %v1319_v16  ;;  %v1417_v16 = vld [vmem:[%s1486_s28 + $0x1f0] ss:$8 sps:$4 sm:$0xff]  }
  0x42   : > { %725 = vmatprep.subr.bf16.mxu0 %v1426_v1  ;;  %1279 = vmatprep.subr.bf16.mxu1 %v1426_v1 }
  0x45   : > { %726 = vmatpush2.bf16.msra.mxu0 %v1320_v17  ;;  %1295 = vmatpush2.bf16.msra.mxu1 %v1320_v17  ;;  %v1612_v17 = vld [vmem:[%s1818_s2] ss:$0 sm:$0xff] }
  0x46   : > { %727 = vmatprep.subr.bf16.mxu0 %v1426_v1  ;;  %1280 = vmatprep.subr.bf16.mxu1 %v1426_v1  ;;  %v1394_v1 = vld [vmem:[%s1486_s28 + $0xc4] ss:$8 sps:$4 sm:$0xff]  }
  0x49   : > { %728 = vmatpush2.bf16.msra.mxu0 %v1321_v18  ;;  %1296 = vmatpush2.bf16.msra.mxu1 %v1321_v18 }
  0x4c   : > { %730 = vmatmul.mubr.bf16.vlgmr.msra.gmra.mxu0 %v1322_v19  ;;  %858 = vmatmul.mubr.bf16.vlgmr.msra.gmra.mxu1 %v1325_v20 }
  0x4d   : > { %737 = vmatprep.mubr.bf16.mxu0 %v1328_v21  ;;  %865 = vmatprep.mubr.bf16.mxu1 %v1330_v22 }
  0x54   : > { %738 = vmatmul.mubr.bf16.gmra.mxu0 %v1332_v23  ;;  %866 = vmatmul.mubr.bf16.gmra.mxu1 %v1333_v24 }
  0x55   : > { %745 = vmatprep.mubr.bf16.mxu0 %v1334_v25  ;;  %873 = vmatprep.mubr.bf16.mxu1 %v1336_v26 }
  0x5c   : > { %746 = vmatmul.mubr.bf16.gmra.mxu0 %v1338_v27  ;;  %874 = vmatmul.mubr.bf16.gmra.mxu1 %v1339_v28 }
  0x5d   : > { %753 = vmatprep.mubr.bf16.mxu0 %v1340_v29  ;;  %881 = vmatprep.mubr.bf16.mxu1 %v1342_v30 }
  0x64   : > { %754 = vmatmul.mubr.bf16.gmra.mxu0 %v1344_v31  ;;  %882 = vmatmul.mubr.bf16.gmra.mxu1 %v1345_v32 }
  0x65   : > { %761 = vmatprep.mubr.bf16.mxu0 %v1346_v33  ;;  %889 = vmatprep.mubr.bf16.mxu1 %v1348_v34 }
  0x6c   : > { %762 = vmatmul.mubr.bf16.gmra.mxu0 %v1350_v35  ;;  %890 = vmatmul.mubr.bf16.gmra.mxu1 %v1351_v36 }
  0x6d   : > { %769 = vmatprep.mubr.bf16.mxu0 %v1352_v37  ;;  %897 = vmatprep.mubr.bf16.mxu1 %v1354_v38 }
  0x74   : > { %770 = vmatmul.mubr.bf16.gmra.mxu0 %v1356_v39  ;;  %898 = vmatmul.mubr.bf16.gmra.mxu1 %v1357_v40 }
  0x75   : > { %777 = vmatprep.mubr.bf16.mxu0 %v1358_v41  ;;  %905 = vmatprep.mubr.bf16.mxu1 %v1360_v42 }
  0x7c   : > { %778 = vmatmul.mubr.bf16.gmra.mxu0 %v1362_v43  ;;  %906 = vmatmul.mubr.bf16.gmra.mxu1 %v1363_v44 }
  0x7d   : > { %785 = vmatprep.mubr.bf16.mxu0 %v1364_v45  ;;  %913 = vmatprep.mubr.bf16.mxu1 %v1366_v46 }
  0x84   : > { %786 = vmatmul.mubr.bf16.gmra.mxu0 %v1368_v47  ;;  %914 = vmatmul.mubr.bf16.gmra.mxu1 %v1369_v48 }
  0x85   : > { %793 = vmatprep.mubr.bf16.mxu0 %v1370_v49  ;;  %921 = vmatprep.mubr.bf16.mxu1 %v1372_v50 }
  0x8c   : > { %794 = vmatmul.mubr.bf16.gmra.mxu0 %v1374_v51  ;;  %922 = vmatmul.mubr.bf16.gmra.mxu1 %v1375_v52 }
  0x8d   : > { %801 = vmatprep.mubr.bf16.mxu0 %v1376_v53  ;;  %929 = vmatprep.mubr.bf16.mxu1 %v1378_v54 }
  0x94   : > { %802 = vmatmul.mubr.bf16.gmra.mxu0 %v1380_v55  ;;  %930 = vmatmul.mubr.bf16.gmra.mxu1 %v1381_v56 }
  0x95   : > { %809 = vmatprep.mubr.bf16.mxu0 %v1382_v57  ;;  %937 = vmatprep.mubr.bf16.mxu1 %v1384_v58 }
  0x9c   : > { %810 = vmatmul.mubr.bf16.gmra.mxu0 %v1386_v59  ;;  %938 = vmatmul.mubr.bf16.gmra.mxu1 %v1387_v60 }
  0x9d   : > { %817 = vmatprep.mubr.bf16.mxu0 %v1388_v61  ;;  %945 = vmatprep.mubr.bf16.mxu1 %v1390_v62 }
  0xa4   : > { %818 = vmatmul.mubr.bf16.gmra.mxu0 %v1392_v63  ;;  %946 = vmatmul.mubr.bf16.gmra.mxu1 %v1393_v0 }
  0xa5   : > { %825 = vmatprep.mubr.bf16.mxu0 %v1394_v1  ;;  %953 = vmatprep.mubr.bf16.mxu1 %v1396_v2 }
  0xac   : > { %826 = vmatmul.mubr.bf16.gmra.mxu0 %v1398_v3  ;;  %954 = vmatmul.mubr.bf16.gmra.mxu1 %v1399_v4 }
  0xad   : > { %833 = vmatprep.mubr.bf16.mxu0 %v1400_v5  ;;  %961 = vmatprep.mubr.bf16.mxu1 %v1402_v6 }
  0xb4   : > { %834 = vmatmul.mubr.bf16.gmra.mxu0 %v1404_v7  ;;  %962 = vmatmul.mubr.bf16.gmra.mxu1 %v1405_v8 }
  0xb5   : > { %841 = vmatprep.mubr.bf16.mxu0 %v1406_v9  ;;  %969 = vmatprep.mubr.bf16.mxu1 %v1408_v10 }
  0xbc   : > { %842 = vmatmul.mubr.bf16.gmra.mxu0 %v1410_v11  ;;  %970 = vmatmul.mubr.bf16.gmra.mxu1 %v1411_v12 }
  0xbd   : > { %849 = vmatprep.mubr.bf16.mxu0 %v1412_v13  ;;  %977 = vmatprep.mubr.bf16.mxu1 %v1414_v14 }
  0xc4   : > { %850 = vmatmul.mubr.bf16.gmra.mxu0 %v1416_v15  ;;  %978 = vmatmul.mubr.bf16.gmra.mxu1 %v1417_v16 }
 0x10c   : > { %v731_v18 = vpop.f32.mrf.mxu0  ;;  %v859_v19 = vpop.f32.mrf.mxu1 }
 0x10d   : > { %v732_v20 = vadd.f32 %v1612_v17, %v731_v18  ;;  %v860_v21 = vadd.f32 %v1612_v17, %v859_v19 }
 0x10e   : > { %v733_v22 = vpop.f32.mrf.mxu0  ;;  %v861_v23 = vpop.f32.mrf.mxu1 }
 0x10f   : > { %v986_v24 = vmax.f32 %v732_v20, 0.0  ;;  %v1018_v25 = vmax.f32 %v860_v21, 0.0 }
 0x110   : > { %v734_v26 = vpop.f32.mrf.mxu0  ;;  %v862_v27 = vpop.f32.mrf.mxu1 }
 0x111   : > { %1051 = vst.msk [vmem:[%s1621_s5] sm:$0xff] %vm1050_vm0, %v986_v24  ;;  %1083 = vst.msk [vmem:[%s1621_s5 + $0x100] sm:$0xff] %vm1050_vm0, %v1018_v25  ;;  %v735_v28 = vadd.f32 %v1612_v17, %v734_v26  ;;  %v863_v29 = vadd.f32 %v1612_v17, %v862_v27 }
 0x112   : > { %v736_v30 = vpop.f32.mrf.mxu0  ;;  %v864_v31 = vpop.f32.mrf.mxu1 }
 0x113   : > { %v987_v32 = vmax.f32 %v735_v28, 0.0  ;;  %v1019_v33 = vmax.f32 %v863_v29, 0.0 }
 0x114   : > { %v739_v34 = vpop.f32.mrf.mxu0  ;;  %v867_v35 = vpop.f32.mrf.mxu1 }
 0x115   : > { %1052 = vst.msk [vmem:[%s1621_s5 + $0x8] sm:$0xff] %vm1050_vm0, %v987_v32  ;;  %1084 = vst.msk [vmem:[%s1621_s5 + $0x108] sm:$0xff] %vm1050_vm0, %v1019_v33  ;;  %v740_v36 = vadd.f32 %v1612_v17, %v739_v34  ;;  %v868_v37 = vadd.f32 %v1612_v17, %v867_v35 }
 0x116   : > { %v741_v38 = vpop.f32.mrf.mxu0  ;;  %v869_v39 = vpop.f32.mrf.mxu1 }
 0x117   : > { %v988_v40 = vmax.f32 %v740_v36, 0.0  ;;  %v1020_v41 = vmax.f32 %v868_v37, 0.0 }
 0x118   : > { %v742_v42 = vpop.f32.mrf.mxu0  ;;  %v870_v43 = vpop.f32.mrf.mxu1 }
 0x119   : > { %1053 = vst.msk [vmem:[%s1621_s5 + $0x10] sm:$0xff] %vm1050_vm0, %v988_v40  ;;  %1085 = vst.msk [vmem:[%s1621_s5 + $0x110] sm:$0xff] %vm1050_vm0, %v1020_v41  ;;  %v743_v44 = vadd.f32 %v1612_v17, %v742_v42  ;;  %v871_v45 = vadd.f32 %v1612_v17, %v870_v43 }
 0x11a   : > { %v744_v46 = vpop.f32.mrf.mxu0  ;;  %v872_v47 = vpop.f32.mrf.mxu1 }
 0x11b   : > { %v989_v48 = vmax.f32 %v743_v44, 0.0  ;;  %v1021_v49 = vmax.f32 %v871_v45, 0.0 }
 0x11c   : > { %v747_v50 = vpop.f32.mrf.mxu0  ;;  %v875_v51 = vpop.f32.mrf.mxu1 }
 0x11d   : > { %1054 = vst.msk [vmem:[%s1621_s5 + $0x18] sm:$0xff] %vm1050_vm0, %v989_v48  ;;  %1086 = vst.msk [vmem:[%s1621_s5 + $0x118] sm:$0xff] %vm1050_vm0, %v1021_v49  ;;  %v748_v52 = vadd.f32 %v1612_v17, %v747_v50  ;;  %v876_v53 = vadd.f32 %v1612_v17, %v875_v51 }
 0x11e   : > { %v749_v54 = vpop.f32.mrf.mxu0  ;;  %v877_v55 = vpop.f32.mrf.mxu1 }
 0x11f   : > { %v990_v56 = vmax.f32 %v748_v52, 0.0  ;;  %v1022_v57 = vmax.f32 %v876_v53, 0.0 }
 0x120   : > { %v750_v58 = vpop.f32.mrf.mxu0  ;;  %v878_v59 = vpop.f32.mrf.mxu1 }
 0x121   : > { %1055 = vst.msk [vmem:[%s1621_s5 + $0x20] sm:$0xff] %vm1050_vm0, %v990_v56  ;;  %1087 = vst.msk [vmem:[%s1621_s5 + $0x120] sm:$0xff] %vm1050_vm0, %v1022_v57  ;;  %v751_v60 = vadd.f32 %v1612_v17, %v750_v58  ;;  %v879_v61 = vadd.f32 %v1612_v17, %v878_v59 }
 0x122   : > { %v752_v62 = vpop.f32.mrf.mxu0  ;;  %v880_v63 = vpop.f32.mrf.mxu1 }
 0x123   : > { %v991_v0 = vmax.f32 %v751_v60, 0.0  ;;  %v1023_v1 = vmax.f32 %v879_v61, 0.0 }
 0x124   : > { %v755_v2 = vpop.f32.mrf.mxu0  ;;  %v883_v3 = vpop.f32.mrf.mxu1 }
 0x125   : > { %1056 = vst.msk [vmem:[%s1621_s5 + $0x28] sm:$0xff] %vm1050_vm0, %v991_v0  ;;  %1088 = vst.msk [vmem:[%s1621_s5 + $0x128] sm:$0xff] %vm1050_vm0, %v1023_v1  ;;  %v756_v4 = vadd.f32 %v1612_v17, %v755_v2  ;;  %v884_v5 = vadd.f32 %v1612_v17, %v883_v3 }
 0x126   : > { %v757_v6 = vpop.f32.mrf.mxu0  ;;  %v885_v7 = vpop.f32.mrf.mxu1 }
 0x127   : > { %v992_v8 = vmax.f32 %v756_v4, 0.0  ;;  %v1024_v9 = vmax.f32 %v884_v5, 0.0 }
 0x128   : > { %v758_v10 = vpop.f32.mrf.mxu0  ;;  %v886_v11 = vpop.f32.mrf.mxu1 }
 0x129   : > { %1057 = vst.msk [vmem:[%s1621_s5 + $0x30] sm:$0xff] %vm1050_vm0, %v992_v8  ;;  %1089 = vst.msk [vmem:[%s1621_s5 + $0x130] sm:$0xff] %vm1050_vm0, %v1024_v9  ;;  %v759_v12 = vadd.f32 %v1612_v17, %v758_v10  ;;  %v887_v13 = vadd.f32 %v1612_v17, %v886_v11 }
 0x12a   : > { %v760_v14 = vpop.f32.mrf.mxu0  ;;  %v888_v15 = vpop.f32.mrf.mxu1 }
 0x12b   : > { %v993_v16 = vmax.f32 %v759_v12, 0.0  ;;  %v1025_v18 = vmax.f32 %v887_v13, 0.0 }
 0x12c   : > { %v763_v19 = vpop.f32.mrf.mxu0  ;;  %v891_v20 = vpop.f32.mrf.mxu1 }
 0x12d   : > { %1058 = vst.msk [vmem:[%s1621_s5 + $0x38] sm:$0xff] %vm1050_vm0, %v993_v16  ;;  %1090 = vst.msk [vmem:[%s1621_s5 + $0x138] sm:$0xff] %vm1050_vm0, %v1025_v18  ;;  %v764_v21 = vadd.f32 %v1612_v17, %v763_v19  ;;  %v892_v22 = vadd.f32 %v1612_v17, %v891_v20 }
 0x12e   : > { %v765_v23 = vpop.f32.mrf.mxu0  ;;  %v893_v24 = vpop.f32.mrf.mxu1 }
 0x12f   : > { %v994_v25 = vmax.f32 %v764_v21, 0.0  ;;  %v1026_v26 = vmax.f32 %v892_v22, 0.0 }
 0x130   : > { %v766_v27 = vpop.f32.mrf.mxu0  ;;  %v894_v28 = vpop.f32.mrf.mxu1 }
 0x131   : > { %1059 = vst.msk [vmem:[%s1621_s5 + $0x40] sm:$0xff] %vm1050_vm0, %v994_v25  ;;  %1091 = vst.msk [vmem:[%s1621_s5 + $0x140] sm:$0xff] %vm1050_vm0, %v1026_v26  ;;  %v767_v29 = vadd.f32 %v1612_v17, %v766_v27  ;;  %v895_v30 = vadd.f32 %v1612_v17, %v894_v28 }
 0x132   : > { %v768_v31 = vpop.f32.mrf.mxu0  ;;  %v896_v32 = vpop.f32.mrf.mxu1 }
 0x133   : > { %v995_v33 = vmax.f32 %v767_v29, 0.0  ;;  %v1027_v34 = vmax.f32 %v895_v30, 0.0 }
 0x134   : > { %v771_v35 = vpop.f32.mrf.mxu0  ;;  %v899_v36 = vpop.f32.mrf.mxu1 }
 0x135   : > { %1060 = vst.msk [vmem:[%s1621_s5 + $0x48] sm:$0xff] %vm1050_vm0, %v995_v33  ;;  %1092 = vst.msk [vmem:[%s1621_s5 + $0x148] sm:$0xff] %vm1050_vm0, %v1027_v34  ;;  %v772_v37 = vadd.f32 %v1612_v17, %v771_v35  ;;  %v900_v38 = vadd.f32 %v1612_v17, %v899_v36 }
 0x136   : > { %v773_v39 = vpop.f32.mrf.mxu0  ;;  %v901_v40 = vpop.f32.mrf.mxu1 }
 0x137   : > { %v996_v41 = vmax.f32 %v772_v37, 0.0  ;;  %v1028_v42 = vmax.f32 %v900_v38, 0.0 }
 0x138   : > { %v774_v43 = vpop.f32.mrf.mxu0  ;;  %v902_v44 = vpop.f32.mrf.mxu1 }
 0x139   : > { %1061 = vst.msk [vmem:[%s1621_s5 + $0x50] sm:$0xff] %vm1050_vm0, %v996_v41  ;;  %1093 = vst.msk [vmem:[%s1621_s5 + $0x150] sm:$0xff] %vm1050_vm0, %v1028_v42  ;;  %v775_v45 = vadd.f32 %v1612_v17, %v774_v43  ;;  %v903_v46 = vadd.f32 %v1612_v17, %v902_v44 }
 0x13a   : > { %v776_v47 = vpop.f32.mrf.mxu0  ;;  %v904_v48 = vpop.f32.mrf.mxu1 }
 0x13b   : > { %v997_v49 = vmax.f32 %v775_v45, 0.0  ;;  %v1029_v50 = vmax.f32 %v903_v46, 0.0 }
 0x13c   : > { %v779_v51 = vpop.f32.mrf.mxu0  ;;  %v907_v52 = vpop.f32.mrf.mxu1 }
 0x13d   : > { %1062 = vst.msk [vmem:[%s1621_s5 + $0x58] sm:$0xff] %vm1050_vm0, %v997_v49  ;;  %1094 = vst.msk [vmem:[%s1621_s5 + $0x158] sm:$0xff] %vm1050_vm0, %v1029_v50  ;;  %v780_v53 = vadd.f32 %v1612_v17, %v779_v51  ;;  %v908_v54 = vadd.f32 %v1612_v17, %v907_v52 }
 0x13e   : > { %v781_v55 = vpop.f32.mrf.mxu0  ;;  %v909_v56 = vpop.f32.mrf.mxu1 }
 0x13f   : > { %v998_v57 = vmax.f32 %v780_v53, 0.0  ;;  %v1030_v58 = vmax.f32 %v908_v54, 0.0 }
 0x140   : > { %v782_v59 = vpop.f32.mrf.mxu0  ;;  %v910_v60 = vpop.f32.mrf.mxu1 }
 0x141   : > { %1063 = vst.msk [vmem:[%s1621_s5 + $0x60] sm:$0xff] %vm1050_vm0, %v998_v57  ;;  %1095 = vst.msk [vmem:[%s1621_s5 + $0x160] sm:$0xff] %vm1050_vm0, %v1030_v58  ;;  %v783_v61 = vadd.f32 %v1612_v17, %v782_v59  ;;  %v911_v62 = vadd.f32 %v1612_v17, %v910_v60 }
 0x142   : > { %v784_v63 = vpop.f32.mrf.mxu0  ;;  %v912_v0 = vpop.f32.mrf.mxu1 }
 0x143   : > { %v999_v1 = vmax.f32 %v783_v61, 0.0  ;;  %v1031_v2 = vmax.f32 %v911_v62, 0.0 }
 0x144   : > { %v787_v3 = vpop.f32.mrf.mxu0  ;;  %v915_v4 = vpop.f32.mrf.mxu1 }
 0x145   : > { %1064 = vst.msk [vmem:[%s1621_s5 + $0x68] sm:$0xff] %vm1050_vm0, %v999_v1  ;;  %1096 = vst.msk [vmem:[%s1621_s5 + $0x168] sm:$0xff] %vm1050_vm0, %v1031_v2  ;;  %v788_v5 = vadd.f32 %v1612_v17, %v787_v3  ;;  %v916_v6 = vadd.f32 %v1612_v17, %v915_v4 }
 0x146   : > { %v789_v7 = vpop.f32.mrf.mxu0  ;;  %v917_v8 = vpop.f32.mrf.mxu1 }
 0x147   : > { %v1000_v9 = vmax.f32 %v788_v5, 0.0  ;;  %v1032_v10 = vmax.f32 %v916_v6, 0.0 }
 0x148   : > { %v790_v11 = vpop.f32.mrf.mxu0  ;;  %v918_v12 = vpop.f32.mrf.mxu1 }
 0x149   : > { %1065 = vst.msk [vmem:[%s1621_s5 + $0x70] sm:$0xff] %vm1050_vm0, %v1000_v9  ;;  %1097 = vst.msk [vmem:[%s1621_s5 + $0x170] sm:$0xff] %vm1050_vm0, %v1032_v10  ;;  %v791_v13 = vadd.f32 %v1612_v17, %v790_v11  ;;  %v919_v14 = vadd.f32 %v1612_v17, %v918_v12 }
 0x14a   : > { %v792_v15 = vpop.f32.mrf.mxu0  ;;  %v920_v16 = vpop.f32.mrf.mxu1 }
 0x14b   : > { %v1001_v18 = vmax.f32 %v791_v13, 0.0  ;;  %v1033_v19 = vmax.f32 %v919_v14, 0.0 }
 0x14c   : > { %v795_v20 = vpop.f32.mrf.mxu0  ;;  %v923_v21 = vpop.f32.mrf.mxu1 }
 0x14d   : > { %1066 = vst.msk [vmem:[%s1621_s5 + $0x78] sm:$0xff] %vm1050_vm0, %v1001_v18  ;;  %1098 = vst.msk [vmem:[%s1621_s5 + $0x178] sm:$0xff] %vm1050_vm0, %v1033_v19  ;;  %v796_v22 = vadd.f32 %v1612_v17, %v795_v20  ;;  %v924_v23 = vadd.f32 %v1612_v17, %v923_v21 }
 0x14e   : > { %v797_v24 = vpop.f32.mrf.mxu0  ;;  %v925_v25 = vpop.f32.mrf.mxu1 }
 0x14f   : > { %v1002_v26 = vmax.f32 %v796_v22, 0.0  ;;  %v1034_v27 = vmax.f32 %v924_v23, 0.0 }
 0x150   : > { %v798_v28 = vpop.f32.mrf.mxu0  ;;  %v926_v29 = vpop.f32.mrf.mxu1 }
 0x151   : > { %1067 = vst.msk [vmem:[%s1621_s5 + $0x80] sm:$0xff] %vm1050_vm0, %v1002_v26  ;;  %1099 = vst.msk [vmem:[%s1621_s5 + $0x180] sm:$0xff] %vm1050_vm0, %v1034_v27  ;;  %v799_v30 = vadd.f32 %v1612_v17, %v798_v28  ;;  %v927_v31 = vadd.f32 %v1612_v17, %v926_v29 }
 0x152   : > { %v800_v32 = vpop.f32.mrf.mxu0  ;;  %v928_v33 = vpop.f32.mrf.mxu1 }
 0x153   : > { %v1003_v34 = vmax.f32 %v799_v30, 0.0  ;;  %v1035_v35 = vmax.f32 %v927_v31, 0.0 }
 0x154   : > { %v803_v36 = vpop.f32.mrf.mxu0  ;;  %v931_v37 = vpop.f32.mrf.mxu1 }
 0x155   : > { %1068 = vst.msk [vmem:[%s1621_s5 + $0x88] sm:$0xff] %vm1050_vm0, %v1003_v34  ;;  %1100 = vst.msk [vmem:[%s1621_s5 + $0x188] sm:$0xff] %vm1050_vm0, %v1035_v35  ;;  %v804_v38 = vadd.f32 %v1612_v17, %v803_v36  ;;  %v932_v39 = vadd.f32 %v1612_v17, %v931_v37 }
 0x156   : > { %v805_v40 = vpop.f32.mrf.mxu0  ;;  %v933_v41 = vpop.f32.mrf.mxu1 }
 0x157   : > { %v1004_v42 = vmax.f32 %v804_v38, 0.0  ;;  %v1036_v43 = vmax.f32 %v932_v39, 0.0 }
 0x158   : > { %v806_v44 = vpop.f32.mrf.mxu0  ;;  %v934_v45 = vpop.f32.mrf.mxu1 }
 0x159   : > { %1069 = vst.msk [vmem:[%s1621_s5 + $0x90] sm:$0xff] %vm1050_vm0, %v1004_v42  ;;  %1101 = vst.msk [vmem:[%s1621_s5 + $0x190] sm:$0xff] %vm1050_vm0, %v1036_v43  ;;  %v807_v46 = vadd.f32 %v1612_v17, %v806_v44  ;;  %v935_v47 = vadd.f32 %v1612_v17, %v934_v45 }
 0x15a   : > { %v808_v48 = vpop.f32.mrf.mxu0  ;;  %v936_v49 = vpop.f32.mrf.mxu1 }
 0x15b   : > { %v1005_v50 = vmax.f32 %v807_v46, 0.0  ;;  %v1037_v51 = vmax.f32 %v935_v47, 0.0 }
 0x15c   : > { %v811_v52 = vpop.f32.mrf.mxu0  ;;  %v939_v53 = vpop.f32.mrf.mxu1 }
 0x15d   : > { %1070 = vst.msk [vmem:[%s1621_s5 + $0x98] sm:$0xff] %vm1050_vm0, %v1005_v50  ;;  %1102 = vst.msk [vmem:[%s1621_s5 + $0x198] sm:$0xff] %vm1050_vm0, %v1037_v51  ;;  %v812_v54 = vadd.f32 %v1612_v17, %v811_v52  ;;  %v940_v55 = vadd.f32 %v1612_v17, %v939_v53 }
 0x15e   : > { %v813_v56 = vpop.f32.mrf.mxu0  ;;  %v941_v57 = vpop.f32.mrf.mxu1 }
 0x15f   : > { %v1006_v58 = vmax.f32 %v812_v54, 0.0  ;;  %v1038_v59 = vmax.f32 %v940_v55, 0.0 }
 0x160   : > { %v814_v60 = vpop.f32.mrf.mxu0  ;;  %v942_v61 = vpop.f32.mrf.mxu1 }
 0x161   : > { %1071 = vst.msk [vmem:[%s1621_s5 + $0xa0] sm:$0xff] %vm1050_vm0, %v1006_v58  ;;  %1103 = vst.msk [vmem:[%s1621_s5 + $0x1a0] sm:$0xff] %vm1050_vm0, %v1038_v59  ;;  %v815_v62 = vadd.f32 %v1612_v17, %v814_v60  ;;  %v943_v63 = vadd.f32 %v1612_v17, %v942_v61 }
 0x162   : > { %v816_v0 = vpop.f32.mrf.mxu0  ;;  %v944_v1 = vpop.f32.mrf.mxu1 }
 0x163   : > { %v1007_v2 = vmax.f32 %v815_v62, 0.0  ;;  %v1039_v3 = vmax.f32 %v943_v63, 0.0 }
 0x164   : > { %v819_v4 = vpop.f32.mrf.mxu0  ;;  %v947_v5 = vpop.f32.mrf.mxu1 }
 0x165   : > { %1072 = vst.msk [vmem:[%s1621_s5 + $0xa8] sm:$0xff] %vm1050_vm0, %v1007_v2  ;;  %1104 = vst.msk [vmem:[%s1621_s5 + $0x1a8] sm:$0xff] %vm1050_vm0, %v1039_v3  ;;  %v820_v6 = vadd.f32 %v1612_v17, %v819_v4  ;;  %v948_v7 = vadd.f32 %v1612_v17, %v947_v5 }
 0x166   : > { %v821_v8 = vpop.f32.mrf.mxu0  ;;  %v949_v9 = vpop.f32.mrf.mxu1 }
 0x167   : > { %v1008_v10 = vmax.f32 %v820_v6, 0.0  ;;  %v1040_v11 = vmax.f32 %v948_v7, 0.0 }
 0x168   : > { %v822_v12 = vpop.f32.mrf.mxu0  ;;  %v950_v13 = vpop.f32.mrf.mxu1 }
 0x169   : > { %1073 = vst.msk [vmem:[%s1621_s5 + $0xb0] sm:$0xff] %vm1050_vm0, %v1008_v10  ;;  %1105 = vst.msk [vmem:[%s1621_s5 + $0x1b0] sm:$0xff] %vm1050_vm0, %v1040_v11  ;;  %v823_v14 = vadd.f32 %v1612_v17, %v822_v12  ;;  %v951_v15 = vadd.f32 %v1612_v17, %v950_v13 }
 0x16a   : > { %v824_v16 = vpop.f32.mrf.mxu0  ;;  %v952_v18 = vpop.f32.mrf.mxu1 }
 0x16b   : > { %v1009_v19 = vmax.f32 %v823_v14, 0.0  ;;  %v1041_v20 = vmax.f32 %v951_v15, 0.0 }
 0x16c   : > { %v827_v21 = vpop.f32.mrf.mxu0  ;;  %v955_v22 = vpop.f32.mrf.mxu1 }
 0x16d   : > { %1074 = vst.msk [vmem:[%s1621_s5 + $0xb8] sm:$0xff] %vm1050_vm0, %v1009_v19  ;;  %1106 = vst.msk [vmem:[%s1621_s5 + $0x1b8] sm:$0xff] %vm1050_vm0, %v1041_v20  ;;  %v828_v23 = vadd.f32 %v1612_v17, %v827_v21  ;;  %v956_v24 = vadd.f32 %v1612_v17, %v955_v22 }
 0x16e   : > { %v829_v25 = vpop.f32.mrf.mxu0  ;;  %v957_v26 = vpop.f32.mrf.mxu1 }
 0x16f   : > { %v1010_v27 = vmax.f32 %v828_v23, 0.0  ;;  %v1042_v28 = vmax.f32 %v956_v24, 0.0 }
 0x170   : > { %v830_v29 = vpop.f32.mrf.mxu0  ;;  %v958_v30 = vpop.f32.mrf.mxu1 }
 0x171   : > { %1075 = vst.msk [vmem:[%s1621_s5 + $0xc0] sm:$0xff] %vm1050_vm0, %v1010_v27  ;;  %1107 = vst.msk [vmem:[%s1621_s5 + $0x1c0] sm:$0xff] %vm1050_vm0, %v1042_v28  ;;  %v831_v31 = vadd.f32 %v1612_v17, %v830_v29  ;;  %v959_v32 = vadd.f32 %v1612_v17, %v958_v30 }
 0x172   : > { %v832_v33 = vpop.f32.mrf.mxu0  ;;  %v960_v34 = vpop.f32.mrf.mxu1 }
 0x173   : > { %v1011_v35 = vmax.f32 %v831_v31, 0.0  ;;  %v1043_v36 = vmax.f32 %v959_v32, 0.0 }
 0x174   : > { %v835_v37 = vpop.f32.mrf.mxu0  ;;  %v963_v38 = vpop.f32.mrf.mxu1 }
 0x175   : > { %1076 = vst.msk [vmem:[%s1621_s5 + $0xc8] sm:$0xff] %vm1050_vm0, %v1011_v35  ;;  %1108 = vst.msk [vmem:[%s1621_s5 + $0x1c8] sm:$0xff] %vm1050_vm0, %v1043_v36  ;;  %v836_v39 = vadd.f32 %v1612_v17, %v835_v37  ;;  %v964_v40 = vadd.f32 %v1612_v17, %v963_v38 }
 0x176   : > { %v837_v41 = vpop.f32.mrf.mxu0  ;;  %v965_v42 = vpop.f32.mrf.mxu1 }
 0x177   : > { %v1012_v43 = vmax.f32 %v836_v39, 0.0  ;;  %v1044_v44 = vmax.f32 %v964_v40, 0.0 }
 0x178   : > { %v838_v45 = vpop.f32.mrf.mxu0  ;;  %v966_v46 = vpop.f32.mrf.mxu1 }
 0x179   : > { %1077 = vst.msk [vmem:[%s1621_s5 + $0xd0] sm:$0xff] %vm1050_vm0, %v1012_v43  ;;  %1109 = vst.msk [vmem:[%s1621_s5 + $0x1d0] sm:$0xff] %vm1050_vm0, %v1044_v44  ;;  %v839_v47 = vadd.f32 %v1612_v17, %v838_v45  ;;  %v967_v48 = vadd.f32 %v1612_v17, %v966_v46 }
 0x17a   : > { %v840_v49 = vpop.f32.mrf.mxu0  ;;  %v968_v50 = vpop.f32.mrf.mxu1 }
 0x17b   : > { %v1013_v51 = vmax.f32 %v839_v47, 0.0  ;;  %v1045_v52 = vmax.f32 %v967_v48, 0.0 }
 0x17c   : > { %v843_v53 = vpop.f32.mrf.mxu0  ;;  %v971_v54 = vpop.f32.mrf.mxu1 }
 0x17d   : > { %1078 = vst.msk [vmem:[%s1621_s5 + $0xd8] sm:$0xff] %vm1050_vm0, %v1013_v51  ;;  %1110 = vst.msk [vmem:[%s1621_s5 + $0x1d8] sm:$0xff] %vm1050_vm0, %v1045_v52  ;;  %v844_v55 = vadd.f32 %v1612_v17, %v843_v53  ;;  %v972_v56 = vadd.f32 %v1612_v17, %v971_v54 }
 0x17e   : > { %v845_v57 = vpop.f32.mrf.mxu0  ;;  %v973_v58 = vpop.f32.mrf.mxu1 }
 0x17f   : > { %v1014_v59 = vmax.f32 %v844_v55, 0.0  ;;  %v1046_v60 = vmax.f32 %v972_v56, 0.0 }
 0x180   : > { %v846_v61 = vpop.f32.mrf.mxu0  ;;  %v974_v62 = vpop.f32.mrf.mxu1 }
 0x181   : > { %1079 = vst.msk [vmem:[%s1621_s5 + $0xe0] sm:$0xff] %vm1050_vm0, %v1014_v59  ;;  %1111 = vst.msk [vmem:[%s1621_s5 + $0x1e0] sm:$0xff] %vm1050_vm0, %v1046_v60  ;;  %v847_v63 = vadd.f32 %v1612_v17, %v846_v61  ;;  %v975_v0 = vadd.f32 %v1612_v17, %v974_v62 }
 0x182   : > { %v848_v1 = vpop.f32.mrf.mxu0  ;;  %v976_v2 = vpop.f32.mrf.mxu1 }
 0x183   : > { %v1015_v3 = vmax.f32 %v847_v63, 0.0  ;;  %v1047_v4 = vmax.f32 %v975_v0, 0.0 }
 0x184   : > { %v851_v5 = vpop.f32.mrf.mxu0  ;;  %v979_v6 = vpop.f32.mrf.mxu1 }
 0x185   : > { %1080 = vst.msk [vmem:[%s1621_s5 + $0xe8] sm:$0xff] %vm1050_vm0, %v1015_v3  ;;  %1112 = vst.msk [vmem:[%s1621_s5 + $0x1e8] sm:$0xff] %vm1050_vm0, %v1047_v4  ;;  %v852_v7 = vadd.f32 %v1612_v17, %v851_v5  ;;  %v980_v8 = vadd.f32 %v1612_v17, %v979_v6 }
 0x186   : > { %v853_v9 = vpop.f32.mrf.mxu0  ;;  %v981_v10 = vpop.f32.mrf.mxu1 }
 0x187   : > { %v1016_v11 = vmax.f32 %v852_v7, 0.0  ;;  %v1048_v12 = vmax.f32 %v980_v8, 0.0 }
 0x188   : > { %v854_v13 = vpop.f32.mrf.mxu0  ;;  %v982_v14 = vpop.f32.mrf.mxu1 }
 0x189   : > { %1081 = vst.msk [vmem:[%s1621_s5 + $0xf0] sm:$0xff] %vm1050_vm0, %v1016_v11  ;;  %1113 = vst.msk [vmem:[%s1621_s5 + $0x1f0] sm:$0xff] %vm1050_vm0, %v1048_v12  ;;  %v855_v15 = vadd.f32 %v1612_v17, %v854_v13  ;;  %v983_v16 = vadd.f32 %v1612_v17, %v982_v14 }
 0x18a   : > { %v856_v18 = vpop.f32.mrf.mxu0  ;;  %v984_v19 = vpop.f32.mrf.mxu1 }
 0x18b   : > { %v1017_v20 = vmax.f32 %v855_v15, 0.0  ;;  %v1049_v21 = vmax.f32 %v983_v16, 0.0 }
 0x18d   : > { %1082 = vst.msk [vmem:[%s1621_s5 + $0xf8] sm:$0xff] %vm1050_vm0, %v1017_v20  ;;  %1114 = vst.msk [vmem:[%s1621_s5 + $0x1f8] sm:$0xff] %vm1050_vm0, %v1049_v21 }
 0x18e PF: > { %s13_s12 = sadd.s32 1, %s1424_s12  }
 0x18f   : > { %p10_p4 = scmp.ge.s32.totalorder %s13_s12, 6  }
 0x191   :  { %12 = sbr.rel (!%p10_p4) target bundleno = 1 (0x1), region = 62 }

// kernel: _lambda_.16
= control target key start
LH: loop header
LB: loop body
LE: loop exit
PB: predicated region body
PF: predicated region fallthrough
CT: control target
= control target key end

     0   :  { %s1145_s6 = smov 0   ;;  %s2361_s0 = inlined_call_operand.vmem [shape: f32[2,17,2,17,128], index: 0, kind: input, shape index: {}]   ;;  %s2362_s1 = inlined_call_operand.vmem [shape: f32[2,16,16,64], index: 1, kind: output, shape index: {}]  }
   0x1 LB: > { %s1089_s7 = sadd.s32 4294967295, %s1132_s6   ;;  %p1093_p0 = scmp.ge.s32.totalorder %s1132_s6, 1  ;;  %s1132_s6 = sphi %s1145_s6, %s11_s6  }
   0x2   : > { %p87_p1 = scmp.lt.s32.totalorder %s1132_s6, 3 }
   0x4   : > { %p88_p2 = pnand %p1093_p0, %p87_p1 }
   0x6   : > { %91 = sbr.rel (%p88_p2) target bundleno = 289 (0x121), region = 24 }
   0xb   : > { %p107_p3 = scmp.lt.s32.totalorder %s1089_s7, 1  ;;  %s1134_s12 = smov 64   ;;  %vm392_vm0 = vcmask 1046528   ;;  %vm1001_vm1 = vcmask 523264  }
   0xd   : > { %s2851_s7 = smov (!%p107_p3, %s1089_s7), 1 }
   0xe   : > { %s1100_s8 = smul.u32 816, %s2851_s7  ;;  %s1099_s13 = sshll.u32 %s2851_s7, 8 }
   0xf   : > { %s2047_s16 = scalar_lea.vmem %s2362_s1, %s1099_s13 }
  0x10   : > { %s1159_s11 = scalar_lea.vmem %s2361_s0, %s1100_s8 }
  0x11   : > { %v1162_v0 = vld [vmem:[%s1159_s11 + $0x30] sm:$0xff]  ;;  %v1165_v1 = vld [vmem:[%s1159_s11] sm:$0xff]  ;;  %v1172_v2 = vld [vmem:[%s1159_s11 + $0x38] sm:$0xff] }
  0x12   : > { %252 = vrot.lane.b32.xlu1 %v1162_v0, %s1134_s12  ;;  %248 = vrot.lane.b32.xlu0 %v1165_v1, %s1134_s12  ;;  %v1175_v3 = vld [vmem:[%s1159_s11 + $0x8] sm:$0xff]  ;;  %v1185_v5 = vld [vmem:[%s1159_s11 + $0x60] sm:$0xff] }
  0x13   : > { %v1182_v4 = vld [vmem:[%s1159_s11 + $0x68] sm:$0xff]  ;;  %2497 = vst [vmem:[#allocation2_spill] sm:$0xff] %v1185_v5  ;;  %v1192_v6 = vld [vmem:[%s1159_s11 + $0x98] sm:$0xff]  ;;  %v1195_v7 = vld [vmem:[%s1159_s11 + $0x90] sm:$0xff] }
  0x14   : > { %2498 = vst [vmem:[#allocation3_spill] sm:$0xff] %v1195_v7  ;;  %v1202_v8 = vld [vmem:[%s1159_s11 + $0xc8] sm:$0xff]  ;;  %v1205_v9 = vld [vmem:[%s1159_s11 + $0xc0] sm:$0xff]  ;;  %v1212_v10 = vld [vmem:[%s1159_s11 + $0xf8] sm:$0xff] }
  0x15   : > { %2499 = vst [vmem:[#allocation4_spill] sm:$0xff] %v1205_v9  ;;  %v1215_v11 = vld [vmem:[%s1159_s11 + $0xf0] sm:$0xff]  ;;  %v1222_v12 = vld [vmem:[%s1159_s11 + $0x128] sm:$0xff]  ;;  %v1225_v13 = vld [vmem:[%s1159_s11 + $0x120] sm:$0xff] }
  0x16   : > { %254 = vrot.lane.b32.xlu1 %v1172_v2, %s1134_s12  ;;  %250 = vrot.lane.b32.xlu0 %v1175_v3, %s1134_s12  ;;  %2500 = vst [vmem:[#allocation5_spill] sm:$0xff] %v1215_v11  ;;  %2501 = vst [vmem:[#allocation6_spill] sm:$0xff] %v1225_v13  ;;  %v1232_v14 = vld [vmem:[%s1159_s11 + $0x158] sm:$0xff]  ;;  %v1235_v15 = vld [vmem:[%s1159_s11 + $0x150] sm:$0xff] }
  0x17   : > { %2502 = vst [vmem:[#allocation7_spill] sm:$0xff] %v1232_v14  ;;  %2503 = vst [vmem:[#allocation8_spill] sm:$0xff] %v1235_v15  ;;  %v1242_v16 = vld [vmem:[%s1159_s11 + $0x188] sm:$0xff]  ;;  %v1245_v17 = vld [vmem:[%s1159_s11 + $0x180] sm:$0xff] }
  0x18   : > { %2504 = vst [vmem:[#allocation9_spill] sm:$0xff] %v1242_v16  ;;  %2505 = vst [vmem:[#allocation10_spill] sm:$0xff] %v1245_v17  ;;  %v1252_v18 = vld [vmem:[%s1159_s11 + $0x1b8] sm:$0xff]  ;;  %v1255_v19 = vld [vmem:[%s1159_s11 + $0x1b0] sm:$0xff] }
  0x19   : > { %2506 = vst [vmem:[#allocation11_spill] sm:$0xff] %v1252_v18  ;;  %2507 = vst [vmem:[#allocation12_spill] sm:$0xff] %v1255_v19  ;;  %v1262_v20 = vld [vmem:[%s1159_s11 + $0x1e8] sm:$0xff]  ;;  %v1265_v21 = vld [vmem:[%s1159_s11 + $0x1e0] sm:$0xff] }
  0x1a   : > { %258 = vrot.lane.b32.xlu1 %v1182_v4, %s1134_s12  ;;  %256 = vrot.lane.b32.xlu0 %v1185_v5, %s1134_s12  ;;  %2508 = vst [vmem:[#allocation13_spill] sm:$0xff] %v1262_v20  ;;  %2509 = vst [vmem:[#allocation14_spill] sm:$0xff] %v1265_v21  ;;  %v1272_v22 = vld [vmem:[%s1159_s11 + $0x218] sm:$0xff]  ;;  %v1275_v23 = vld [vmem:[%s1159_s11 + $0x210] sm:$0xff] }
  0x1b   : > { %2510 = vst [vmem:[#allocation15_spill] sm:$0xff] %v1272_v22  ;;  %2511 = vst [vmem:[#allocation16_spill] sm:$0xff] %v1275_v23  ;;  %v1282_v24 = vld [vmem:[%s1159_s11 + $0x248] sm:$0xff]  ;;  %v1285_v25 = vld [vmem:[%s1159_s11 + $0x240] sm:$0xff] }
  0x1c   : > { %2512 = vst [vmem:[#allocation17_spill] sm:$0xff] %v1282_v24  ;;  %2513 = vst [vmem:[#allocation18_spill] sm:$0xff] %v1285_v25  ;;  %v1292_v26 = vld [vmem:[%s1159_s11 + $0x278] sm:$0xff]  ;;  %v1295_v27 = vld [vmem:[%s1159_s11 + $0x270] sm:$0xff] }
  0x1d   : > { %2514 = vst [vmem:[#allocation19_spill] sm:$0xff] %v1292_v26  ;;  %2515 = vst [vmem:[#allocation20_spill] sm:$0xff] %v1295_v27  ;;  %v1302_v28 = vld [vmem:[%s1159_s11 + $0x2a8] sm:$0xff]  ;;  %v1305_v29 = vld [vmem:[%s1159_s11 + $0x2a0] sm:$0xff] }
  0x1e   : > { %262 = vrot.lane.b32.xlu1 %v1192_v6, %s1134_s12  ;;  %260 = vrot.lane.b32.xlu0 %v1195_v7, %s1134_s12  ;;  %v1312_v30 = vld [vmem:[%s1159_s11 + $0x2d8] sm:$0xff]  ;;  %v1315_v31 = vld [vmem:[%s1159_s11 + $0x2d0] sm:$0xff] }
  0x1f   : > { %v1322_v32 = vld [vmem:[%s1159_s11 + $0x20] sm:$0xff]  ;;  %v1325_v33 = vld [vmem:[%s1159_s11 + $0x18] sm:$0xff]  ;;  %v1332_v34 = vld [vmem:[%s1159_s11 + $0x50] sm:$0xff] }
  0x20   : > { %v1335_v35 = vld [vmem:[%s1159_s11 + $0x48] sm:$0xff]  ;;  %v1342_v36 = vld [vmem:[%s1159_s11 + $0x80] sm:$0xff]  ;;  %v1345_v37 = vld [vmem:[%s1159_s11 + $0x78] sm:$0xff] }
  0x21   : > { %v1352_v38 = vld [vmem:[%s1159_s11 + $0xb0] sm:$0xff]  ;;  %v1355_v39 = vld [vmem:[%s1159_s11 + $0xa8] sm:$0xff]  ;;  %v1362_v40 = vld [vmem:[%s1159_s11 + $0xe0] sm:$0xff] }
  0x22   : > { %266 = vrot.lane.b32.xlu1 %v1202_v8, %s1134_s12  ;;  %264 = vrot.lane.b32.xlu0 %v1205_v9, %s1134_s12  ;;  %v1365_v41 = vld [vmem:[%s1159_s11 + $0xd8] sm:$0xff]  ;;  %v1372_v42 = vld [vmem:[%s1159_s11 + $0x110] sm:$0xff] }
  0x23   : > { %2516 = vst [vmem:[#allocation21_spill] sm:$0xff] %v1372_v42  ;;  %v1375_v43 = vld [vmem:[%s1159_s11 + $0x108] sm:$0xff]  ;;  %v1382_v44 = vld [vmem:[%s1159_s11 + $0x140] sm:$0xff]  ;;  %v1385_v45 = vld [vmem:[%s1159_s11 + $0x138] sm:$0xff] }
  0x24   : > { %2517 = vst [vmem:[#allocation22_spill] sm:$0xff] %v1375_v43  ;;  %2518 = vst [vmem:[#allocation23_spill] sm:$0xff] %v1382_v44  ;;  %v1392_v46 = vld [vmem:[%s1159_s11 + $0x170] sm:$0xff]  ;;  %v1395_v47 = vld [vmem:[%s1159_s11 + $0x168] sm:$0xff] }
  0x25   : > { %2519 = vst [vmem:[#allocation24_spill] sm:$0xff] %v1385_v45  ;;  %2520 = vst [vmem:[#allocation25_spill] sm:$0xff] %v1392_v46  ;;  %v1402_v48 = vld [vmem:[%s1159_s11 + $0x1a0] sm:$0xff]  ;;  %v1405_v49 = vld [vmem:[%s1159_s11 + $0x198] sm:$0xff] }
  0x26   : > { %270 = vrot.lane.b32.xlu1 %v1212_v10, %s1134_s12  ;;  %268 = vrot.lane.b32.xlu0 %v1215_v11, %s1134_s12  ;;  %2521 = vst [vmem:[#allocation26_spill] sm:$0xff] %v1395_v47  ;;  %2522 = vst [vmem:[#allocation27_spill] sm:$0xff] %v1402_v48  ;;  %v1412_v50 = vld [vmem:[%s1159_s11 + $0x1d0] sm:$0xff]  ;;  %v1415_v51 = vld [vmem:[%s1159_s11 + $0x1c8] sm:$0xff] }
  0x27   : > { %2523 = vst [vmem:[#allocation28_spill] sm:$0xff] %v1405_v49  ;;  %2524 = vst [vmem:[#allocation29_spill] sm:$0xff] %v1412_v50  ;;  %v1422_v52 = vld [vmem:[%s1159_s11 + $0x200] sm:$0xff]  ;;  %v1425_v53 = vld [vmem:[%s1159_s11 + $0x1f8] sm:$0xff] }
  0x28   : > { %2525 = vst [vmem:[#allocation30_spill] sm:$0xff] %v1415_v51  ;;  %2526 = vst [vmem:[#allocation31_spill] sm:$0xff] %v1422_v52  ;;  %v1432_v54 = vld [vmem:[%s1159_s11 + $0x230] sm:$0xff]  ;;  %v1435_v55 = vld [vmem:[%s1159_s11 + $0x228] sm:$0xff] }
  0x29   : > { %2527 = vst [vmem:[#allocation32_spill] sm:$0xff] %v1425_v53  ;;  %2528 = vst [vmem:[#allocation33_spill] sm:$0xff] %v1432_v54  ;;  %v1442_v56 = vld [vmem:[%s1159_s11 + $0x260] sm:$0xff]  ;;  %v1445_v57 = vld [vmem:[%s1159_s11 + $0x258] sm:$0xff] }
  0x2a   : > { %274 = vrot.lane.b32.xlu1 %v1222_v12, %s1134_s12  ;;  %272 = vrot.lane.b32.xlu0 %v1225_v13, %s1134_s12  ;;  %2529 = vst [vmem:[#allocation34_spill] sm:$0xff] %v1435_v55  ;;  %2530 = vst [vmem:[#allocation35_spill] sm:$0xff] %v1442_v56  ;;  %v1452_v58 = vld [vmem:[%s1159_s11 + $0x290] sm:$0xff]  ;;  %v1455_v59 = vld [vmem:[%s1159_s11 + $0x288] sm:$0xff] }
  0x2b   : > { %2531 = vst [vmem:[#allocation36_spill] sm:$0xff] %v1445_v57  ;;  %2532 = vst [vmem:[#allocation37_spill] sm:$0xff] %v1452_v58  ;;  %v1466_v62 = vld [vmem:[%s1159_s11 + $0x2c0] sm:$0xff]  ;;  %v1469_v63 = vld [vmem:[%s1159_s11 + $0x2b8] sm:$0xff] }
  0x2c   : > { %2533 = vst [vmem:[#allocation38_spill] sm:$0xff] %v1455_v59  ;;  %2536 = vst [vmem:[#allocation41_spill] sm:$0xff] %v1466_v62 }
  0x2d   : > { %2537 = vst [vmem:[#allocation42_spill] sm:$0xff] %v1469_v63 }
  0x2e   : > { %278 = vrot.lane.b32.xlu1 %v1232_v14, %s1134_s12  ;;  %276 = vrot.lane.b32.xlu0 %v1235_v15, %s1134_s12 }
  0x32   : > { %282 = vrot.lane.b32.xlu1 %v1242_v16, %s1134_s12  ;;  %280 = vrot.lane.b32.xlu0 %v1245_v17, %s1134_s12 }
  0x36   : > { %286 = vrot.lane.b32.xlu1 %v1252_v18, %s1134_s12  ;;  %284 = vrot.lane.b32.xlu0 %v1255_v19, %s1134_s12 }
  0x3a   : > { %290 = vrot.lane.b32.xlu1 %v1262_v20, %s1134_s12  ;;  %288 = vrot.lane.b32.xlu0 %v1265_v21, %s1134_s12 }
  0x3e   : > { %294 = vrot.lane.b32.xlu1 %v1272_v22, %s1134_s12  ;;  %292 = vrot.lane.b32.xlu0 %v1275_v23, %s1134_s12 }
  0x42   : > { %298 = vrot.lane.b32.xlu1 %v1282_v24, %s1134_s12  ;;  %296 = vrot.lane.b32.xlu0 %v1285_v25, %s1134_s12 }
  0x46   : > { %302 = vrot.lane.b32.xlu1 %v1292_v26, %s1134_s12  ;;  %300 = vrot.lane.b32.xlu0 %v1295_v27, %s1134_s12 }
  0x4a   : > { %306 = vrot.lane.b32.xlu1 %v1302_v28, %s1134_s12  ;;  %304 = vrot.lane.b32.xlu0 %v1305_v29, %s1134_s12 }
  0x4e   : > { %310 = vrot.lane.b32.xlu1 %v1312_v30, %s1134_s12  ;;  %308 = vrot.lane.b32.xlu0 %v1315_v31, %s1134_s12 }
  0x52   : > { %603 = vrot.lane.b32.xlu1 %v1322_v32, %s1134_s12  ;;  %601 = vrot.lane.b32.xlu0 %v1325_v33, %s1134_s12 }
  0x56   : > { %607 = vrot.lane.b32.xlu1 %v1332_v34, %s1134_s12  ;;  %605 = vrot.lane.b32.xlu0 %v1335_v35, %s1134_s12 }
  0x5a   : > { %611 = vrot.lane.b32.xlu1 %v1342_v36, %s1134_s12  ;;  %609 = vrot.lane.b32.xlu0 %v1345_v37, %s1134_s12 }
  0x5e   : > { %615 = vrot.lane.b32.xlu1 %v1352_v38, %s1134_s12  ;;  %613 = vrot.lane.b32.xlu0 %v1355_v39, %s1134_s12 }
  0x62   : > { %619 = vrot.lane.b32.xlu1 %v1362_v40, %s1134_s12  ;;  %617 = vrot.lane.b32.xlu0 %v1365_v41, %s1134_s12 }
  0x66   : > { %623 = vrot.lane.b32.xlu1 %v1372_v42, %s1134_s12  ;;  %621 = vrot.lane.b32.xlu0 %v1375_v43, %s1134_s12 }
  0x6a   : > { %627 = vrot.lane.b32.xlu1 %v1382_v44, %s1134_s12  ;;  %625 = vrot.lane.b32.xlu0 %v1385_v45, %s1134_s12  ;;  %v2572_v45 = vrot.slane %v1175_v3, 1 }
  0x6e   : > { %631 = vrot.lane.b32.xlu1 %v1392_v46, %s1134_s12  ;;  %629 = vrot.lane.b32.xlu0 %v1395_v47, %s1134_s12  ;;  %v149_v47 = vld [vmem:[%s1159_s11 + $0x100] sm:$0x1] }
  0x72   : > { %635 = vrot.lane.b32.xlu1 %v1402_v48, %s1134_s12  ;;  %633 = vrot.lane.b32.xlu0 %v1405_v49, %s1134_s12 }
  0x76   : > { %639 = vrot.lane.b32.xlu1 %v1412_v50, %s1134_s12  ;;  %637 = vrot.lane.b32.xlu0 %v1415_v51, %s1134_s12 }
  0x7a   : > { %643 = vrot.lane.b32.xlu1 %v1422_v52, %s1134_s12  ;;  %641 = vrot.lane.b32.xlu0 %v1425_v53, %s1134_s12  ;;  %v2578_v52 = vrot.slane %v1192_v6, 1 }
  0x7e   : > { %647 = vrot.lane.b32.xlu1 %v1432_v54, %s1134_s12  ;;  %645 = vrot.lane.b32.xlu0 %v1435_v55, %s1134_s12 }
  0x82   : > { %651 = vrot.lane.b32.xlu1 %v1442_v56, %s1134_s12  ;;  %649 = vrot.lane.b32.xlu0 %v1445_v57, %s1134_s12 }
  0x84   : > { %v1457_v60 = vpop.permute.xlu1 %252  ;;  %v1459_v61 = vpop.permute.xlu0 %248 }
  0x85   : > { %2534 = vst [vmem:[#allocation39_spill] sm:$0xff] %v1457_v60  ;;  %2535 = vst [vmem:[#allocation40_spill] sm:$0xff] %v1459_v61  ;;  %v1480_v60 = vld [vmem:[%s1159_s11 + $0x2f0] sm:$0xff]  ;;  %v1483_v61 = vld [vmem:[%s1159_s11 + $0x2e8] sm:$0xff] }
  0x86   : > { %655 = vrot.lane.b32.xlu1 %v1452_v58, %s1134_s12  ;;  %653 = vrot.lane.b32.xlu0 %v1455_v59, %s1134_s12  ;;  %2540 = vst [vmem:[#allocation45_spill] sm:$0xff] %v1480_v60  ;;  %2541 = vst [vmem:[#allocation46_spill] sm:$0xff] %v1483_v61 }
  0x88   : > { %v1471_v57 = vpop.permute.xlu1 %254  ;;  %v1473_v56 = vpop.permute.xlu0 %250 }
  0x89   : > { %2538 = vst [vmem:[#allocation43_spill] sm:$0xff] %v1471_v57  ;;  %2539 = vst [vmem:[#allocation44_spill] sm:$0xff] %v1473_v56  ;;  %v1494_v57 = vld [vmem:[%s1159_s11 + $0x308] sm:$0xff]  ;;  %v213_v56 = vld [vmem:[%s1159_s11 + $0x300] sm:$0xff] }
  0x8a   : > { %659 = vrot.lane.b32.xlu1 %v1466_v62, %s1134_s12  ;;  %657 = vrot.lane.b32.xlu0 %v1469_v63, %s1134_s12  ;;  %2544 = vst [vmem:[#allocation49_spill] sm:$0xff] %v1494_v57 }
  0x8c   : > { %v1485_v58 = vpop.permute.xlu1 %258  ;;  %v1487_v59 = vpop.permute.xlu0 %256 }
  0x8d   : > { %2542 = vst [vmem:[#allocation47_spill] sm:$0xff] %v1485_v58  ;;  %2543 = vst [vmem:[#allocation48_spill] sm:$0xff] %v1487_v59 }
  0x8e   : > { %663 = vrot.lane.b32.xlu1 %v1480_v60, %s1134_s12  ;;  %661 = vrot.lane.b32.xlu0 %v1483_v61, %s1134_s12 }
  0x90   : > { %v1497_v62 = vpop.permute.xlu1 %262  ;;  %v1499_v63 = vpop.permute.xlu0 %260 }
  0x91   : > { %2545 = vst [vmem:[#allocation50_spill] sm:$0xff] %v1497_v62  ;;  %2546 = vst [vmem:[#allocation51_spill] sm:$0xff] %v1499_v63 }
  0x92   : > { %925 = vrot.lane.b32.xlu1 %v1494_v57, %s1134_s12  ;;  %923 = vrot.lane.b32.xlu0 %v213_v56, %s1134_s12  ;;  %v143_v56 = vld [vmem:[%s1159_s11 + $0xd0] sm:$0x1] }
  0x93   : > { %v416_v57 = vrot.slane %v143_v56, 1  ;;  %v2588_v56 = vrot.slane %v1225_v13, 1 }
  0x94   : > { %v1504_v58 = vpop.permute.xlu1 %266  ;;  %v1506_v59 = vpop.permute.xlu0 %264 }
  0x95   : > { %2547 = vst [vmem:[#allocation52_spill] sm:$0xff] %v1504_v58  ;;  %2548 = vst [vmem:[#allocation53_spill] sm:$0xff] %v1506_v59 }
  0x98   : > { %v1508_v60 = vpop.permute.xlu1 %270  ;;  %v1510_v55 = vpop.permute.xlu0 %268 }
  0x99   : > { %2549 = vst [vmem:[#allocation54_spill] sm:$0xff] %v1508_v60  ;;  %2550 = vst [vmem:[#allocation55_spill] sm:$0xff] %v1510_v55  ;;  %v131_v60 = vld [vmem:[%s1159_s11 + $0x70] sm:$0x1] }
  0x9c   : > { %v1515_v63 = vpop.permute.xlu1 %274  ;;  %v1517_v53 = vpop.permute.xlu0 %272 }
  0x9d   : > { %2551 = vst [vmem:[#allocation56_spill] sm:$0xff] %v1515_v63  ;;  %2552 = vst [vmem:[#allocation57_spill] sm:$0xff] %v1517_v53  ;;  %v119_v63 = vld [vmem:[%s1159_s11 + $0x10] sm:$0x1]  ;;  %v2582_v53 = vrot.slane %v1205_v9, 1  ;;  %v2593_v9 = vrot.slane %v1242_v16, 1 }
  0x9e   : > { %v396_v49 = vrot.slane %v119_v63, 1  ;;  %v2575_v63 = vrot.slane %v1182_v4, 1 }
  0xa0   : > { %v1535_v54 = vpop.permute.xlu1 %278  ;;  %v1537_v62 = vpop.permute.xlu0 %276 }
  0xa1   : > { %2553 = vst [vmem:[#allocation58_spill] sm:$0xff] %v1535_v54  ;;  %2554 = vst [vmem:[#allocation59_spill] sm:$0xff] %v1537_v62  ;;  %v2565_v54 = vrot.slane %v1162_v0, 1 }
  0xa4   : > { %v1555_v58 = vpop.permute.xlu1 %282  ;;  %v1557_v55 = vpop.permute.xlu0 %280 }
  0xa5   : > { %2555 = vst [vmem:[#allocation60_spill] sm:$0xff] %v1555_v58  ;;  %2556 = vst [vmem:[#allocation61_spill] sm:$0xff] %v1557_v55  ;;  %v125_v55 = vld [vmem:[%s1159_s11 + $0x40] sm:$0x1] }
  0xa6   : > { %v137_v58 = vld [vmem:[%s1159_s11 + $0xa0] sm:$0x1]  ;;  %v401_v46 = vrot.slane %v125_v55, 1  ;;  %v406_v55 = vrot.slane %v131_v60, 1  ;;  %v2581_v60 = vrot.slane %v1202_v8, 1 }
  0xa8   : > { %v1575_v59 = vpop.permute.xlu1 %286  ;;  %v1577_v61 = vpop.permute.xlu0 %284 }
  0xa9   : > { %2557 = vst [vmem:[#allocation62_spill] sm:$0xff] %v1575_v59  ;;  %2558 = vst [vmem:[#allocation63_spill] sm:$0xff] %v1577_v61  ;;  %v2564_v61 = vrot.slane %v1172_v2, 1  ;;  %v2576_v59 = vrot.slane %v1185_v5, 1  ;;  %v1634_v5 = vsel %vm392_vm0, %v2582_v53, %v2581_v60  ;;  %v2590_v53 = vrot.slane %v1232_v14, 1 }
  0xaa   : > { %2583 = vst [vmem:[#allocation69_spill] sm:$0xff] %v1634_v5  ;;  %v2591_v60 = vrot.slane %v1235_v15, 1  ;;  %v421_v15 = vrot.slane %v149_v47, 1  ;;  %v197_v47 = vld [vmem:[%s1159_s11 + $0x280] sm:$0x1] }
  0xab   : > { %v1594_v62 = vsel %vm392_vm0, %v2565_v54, %v2564_v61  ;;  %v2573_v54 = vrot.slane %v1165_v1, 1  ;;  %v1618_v48 = vsel %vm392_vm0, %v2576_v59, %v2575_v63  ;;  %v161_v59 = vld [vmem:[%s1159_s11 + $0x160] sm:$0x1]  ;;  %v167_v63 = vld [vmem:[%s1159_s11 + $0x190] sm:$0x1] }
  0xac   : > { %2566 = vst [vmem:[#allocation64_spill] sm:$0xff] %v1594_v62  ;;  %v1601_v50 = vpop.permute.xlu1 %290  ;;  %v1603_v51 = vpop.permute.xlu0 %288  ;;  %2577 = vst [vmem:[#allocation67_spill] sm:$0xff] %v1618_v48  ;;  %v2585_v48 = vrot.slane %v1215_v11, 1  ;;  %v1657_v5 = vsel %vm392_vm0, %v2591_v60, %v2590_v53  ;;  %v2594_v11 = vrot.slane %v1245_v17, 1  ;;  %v191_v17 = vld [vmem:[%s1159_s11 + $0x250] sm:$0x1] }
  0xad   : > { %2570 = vst [vmem:[#allocation65_spill] sm:$0xff] %v1601_v50  ;;  %2571 = vst [vmem:[#allocation66_spill] sm:$0xff] %v1603_v51  ;;  %v1610_v61 = vsel %vm392_vm0, %v2573_v54, %v2572_v45  ;;  %v155_v51 = vld [vmem:[%s1159_s11 + $0x130] sm:$0x1]  ;;  %v411_v50 = vrot.slane %v137_v58, 1  ;;  %v2579_v45 = vrot.slane %v1195_v7, 1 }
  0xae   : > { %v2584_v58 = vrot.slane %v1212_v10, 1  ;;  %2592 = vst [vmem:[#allocation72_spill] sm:$0xff] %v1657_v5  ;;  %v426_v53 = vrot.slane %v155_v51, 1  ;;  %v2600_v62 = vrot.slane %v1172_v2, 1  ;;  %v436_v13 = vrot.slane %v167_v63, 1 }
  0xaf   : > { %v1627_v54 = vsel %vm392_vm0, %v2579_v45, %v2578_v52  ;;  %v2587_v52 = vrot.slane %v1222_v12, 1  ;;  %v203_v51 = vld [vmem:[%s1159_s11 + $0x2b0] sm:$0x1]  ;;  %v2606_v63 = vrot.slane %v1252_v18, 1 }
  0xb0   : > { %2580 = vst [vmem:[#allocation68_spill] sm:$0xff] %v1627_v54  ;;  %v1643_v7 = vsel %vm392_vm0, %v2585_v48, %v2584_v58  ;;  %v1664_v48 = vsel %vm392_vm0, %v2594_v11, %v2593_v9  ;;  %v173_v58 = vld [vmem:[%s1159_s11 + $0x1c0] sm:$0x1]  ;;  %v1671_v60 = vpop.permute.xlu1 %294  ;;  %v1673_v5 = vpop.permute.xlu0 %292  ;;  %v1679_v9 = vsel %vm392_vm0, %v2600_v62, %v401_v46  ;;  %v2602_v11 = vrot.slane %v1175_v3, 1 }
  0xb1   : > { %2586 = vst [vmem:[#allocation70_spill] sm:$0xff] %v1643_v7  ;;  %v1650_v45 = vsel %vm392_vm0, %v2588_v56, %v2587_v52  ;;  %2595 = vst [vmem:[#allocation73_spill] sm:$0xff] %v1664_v48  ;;  %v179_v7 = vld [vmem:[%s1159_s11 + $0x1f0] sm:$0x1]  ;;  %v185_v52 = vld [vmem:[%s1159_s11 + $0x220] sm:$0x1] }
  0xb2   : > { %2589 = vst [vmem:[#allocation71_spill] sm:$0xff] %v1650_v45  ;;  %2598 = vst [vmem:[#allocation74_spill] sm:$0xff] %v1671_v60  ;;  %v1684_v45 = vsel %vm392_vm0, %v2602_v11, %v396_v49  ;;  %v431_v54 = vrot.slane %v161_v59, 1  ;;  %v2603_v56 = vrot.slane %v1182_v4, 1  ;;  %v441_v60 = vrot.slane %v173_v58, 1 }
  0xb3   : > { %2599 = vst [vmem:[#allocation75_spill] sm:$0xff] %v1673_v5  ;;  %2601 = vst [vmem:[#allocation76_spill] sm:$0xff] %v1679_v9  ;;  %v446_v48 = vrot.slane %v179_v7, 1  ;;  %v451_v44 = vrot.slane %v185_v52, 1  ;;  %v209_v46 = vld [vmem:[%s1159_s11 + $0x2e0] sm:$0x1] }
  0xb4   : > { %v1691_v5 = vsel %vm392_vm0, %v2603_v56, %v406_v55  ;;  %v2604_v62 = vrot.slane %v1192_v6, 1  ;;  %v2605_v49 = vrot.slane %v1202_v8, 1  ;;  %v2607_v55 = vrot.slane %v1255_v19, 1  ;;  %v122_v52 = vld [vmem:[%s1159_s11 + $0x28] sm:$0x1] }
  0xb5   : > { %v456_v7 = vrot.slane %v191_v17, 1  ;;  %v2609_v56 = vrot.slane %v1212_v10, 1  ;;  %v2610_v11 = vrot.slane %v1262_v20, 1  ;;  %v461_v17 = vrot.slane %v197_v47, 1  ;;  %v134_v47 = vld [vmem:[%s1159_s11 + $0x88] sm:$0x1] }
  0xb6   : > { %v1697_v9 = vsel %vm392_vm0, %v2604_v62, %v411_v50  ;;  %v1702_v59 = vsel %vm392_vm0, %v2605_v49, %v416_v57  ;;  %v1709_v58 = vsel %vm392_vm0, %v2607_v55, %v2606_v63  ;;  %v2611_v62 = vrot.slane %v1265_v21, 1  ;;  %v1724_v49 = vpop.permute.xlu1 %298  ;;  %v1726_v63 = vpop.permute.xlu0 %296 }
  0xb7   : > { %2608 = vst [vmem:[#allocation77_spill] sm:$0xff] %v1709_v58  ;;  %v1715_v50 = vsel %vm392_vm0, %v2609_v56, %v421_v15  ;;  %2613 = vst [vmem:[#allocation79_spill] sm:$0xff] %v1724_v49  ;;  %v466_v55 = vrot.slane %v203_v51, 1  ;;  %v128_v58 = vld [vmem:[%s1159_s11 + $0x58] sm:$0x1]  ;;  %v2615_v19 = vrot.slane %v1222_v12, 1 }
  0xb8   : > { %v1722_v57 = vsel %vm392_vm0, %v2611_v62, %v2610_v11  ;;  %2614 = vst [vmem:[#allocation80_spill] sm:$0xff] %v1726_v63  ;;  %v2616_v56 = vrot.slane %v1232_v14, 1  ;;  %v2618_v11 = vrot.slane %v1242_v16, 1  ;;  %v471_v63 = vrot.slane %v209_v46, 1 }
  0xb9   : > { %2612 = vst [vmem:[#allocation78_spill] sm:$0xff] %v1722_v57  ;;  %v1732_v15 = vsel %vm392_vm0, %v2615_v19, %v426_v53  ;;  %v2620_v51 = vrot.slane %v1252_v18, 1  ;;  %v2622_v19 = vrot.slane %v1262_v20, 1  ;;  %v748_v57 = vrot.slane %v122_v52, 1 }
  0xba   : > { %v1737_v21 = vsel %vm392_vm0, %v2616_v56, %v431_v54  ;;  %v1742_v62 = vsel %vm392_vm0, %v2618_v11, %v436_v13  ;;  %v2624_v54 = vrot.slane %v1272_v22, 1  ;;  %v140_v13 = vld [vmem:[%s1159_s11 + $0xb8] sm:$0x1]  ;;  %v146_v11 = vld [vmem:[%s1159_s11 + $0xe8] sm:$0x1]  ;;  %v2632_v52 = vrot.slane %v1285_v25, 1 }
  0xbb   : > { %2617 = vst [vmem:[#allocation81_spill] sm:$0xff] %v1737_v21  ;;  %2619 = vst [vmem:[#allocation82_spill] sm:$0xff] %v1742_v62  ;;  %v1748_v49 = vsel %vm392_vm0, %v2620_v51, %v441_v60  ;;  %v1753_v53 = vsel %vm392_vm0, %v2622_v19, %v446_v48  ;;  %v2627_v62 = vrot.slane %v1275_v23, 1  ;;  %v2629_v51 = vrot.slane %v1282_v24, 1  ;;  %v2674_v25 = vld [vmem:[#allocation39_spill] sm:$0xff] }
  0xbc   : > { %2621 = vst [vmem:[#allocation83_spill] sm:$0xff] %v1748_v49  ;;  %2623 = vst [vmem:[#allocation84_spill] sm:$0xff] %v1753_v53  ;;  %v1758_v56 = vsel %vm392_vm0, %v2624_v54, %v451_v44  ;;  %v2626_v46 = vmov %v2624_v54  ;;  %v753_v54 = vrot.slane %v128_v58, 1  ;;  %v2634_v23 = vrot.slane %v1292_v26, 1 }
  0xbd   : > { %2625 = vst [vmem:[#allocation85_spill] sm:$0xff] %v1758_v56  ;;  %v1767_v60 = vsel %vm392_vm0, %v2627_v62, %v2626_v46  ;;  %v1772_v48 = vsel %vm392_vm0, %v2629_v51, %v456_v7  ;;  %v2631_v44 = vmov %v2629_v51  ;;  %v152_v56 = vld [vmem:[%s1159_s11 + $0x118] sm:$0x1]  ;;  %v1787_v46 = vpop.permute.xlu1 %302  ;;  %v2638_v51 = vrot.slane %v1295_v27, 1 }
  0xbe   : > { %2628 = vst [vmem:[#allocation86_spill] sm:$0xff] %v1767_v60  ;;  %2630 = vst [vmem:[#allocation87_spill] sm:$0xff] %v1772_v48  ;;  %v1779_v19 = vsel %vm392_vm0, %v2632_v52, %v2631_v44  ;;  %v1785_v62 = vsel %vm392_vm0, %v2634_v23, %v461_v17  ;;  %v2637_v7 = vmov %v2634_v23  ;;  %v1796_v60 = vpop.permute.xlu0 %300  ;;  %v2641_v58 = vrot.slane %v1302_v28, 1 }
  0xbf   : > { %2633 = vst [vmem:[#allocation88_spill] sm:$0xff] %v1779_v19  ;;  %2635 = vst [vmem:[#allocation89_spill] sm:$0xff] %v1785_v62  ;;  %v1794_v48 = vsel %vm392_vm0, %v2638_v51, %v2637_v7  ;;  %v758_v52 = vrot.slane %v134_v47, 1  ;;  %v2644_v17 = vrot.slane %v1305_v29, 1  ;;  %v2646_v27 = vrot.slane %v1312_v30, 1  ;;  %v2654_v30 = vld [vmem:[#allocation40_spill] sm:$0xff] }
  0xc0   : > { %2636 = vst [vmem:[#allocation90_spill] sm:$0xff] %v1787_v46  ;;  %2639 = vst [vmem:[#allocation91_spill] sm:$0xff] %v1794_v48  ;;  %v1801_v44 = vsel %vm392_vm0, %v2641_v58, %v466_v55  ;;  %v2643_v23 = vmov %v2641_v58  ;;  %v763_v51 = vrot.slane %v140_v13, 1  ;;  %v768_v48 = vrot.slane %v146_v11, 1  ;;  %v164_v55 = vld [vmem:[%s1159_s11 + $0x178] sm:$0x1] }
  0xc1   : > { %2640 = vst [vmem:[#allocation92_spill] sm:$0xff] %v1796_v60  ;;  %2642 = vst [vmem:[#allocation93_spill] sm:$0xff] %v1801_v44  ;;  %v1808_v62 = vsel %vm392_vm0, %v2644_v17, %v2643_v23  ;;  %v1813_v7 = vsel %vm392_vm0, %v2646_v27, %v471_v63  ;;  %v158_v60 = vld [vmem:[%s1159_s11 + $0x148] sm:$0x1]  ;;  %v2648_v47 = vmov %v2646_v27  ;;  %v2649_v28 = vrot.slane %v1315_v31, 1 }
  0xc2   : > { %2645 = vst [vmem:[#allocation94_spill] sm:$0xff] %v1808_v62  ;;  %2647 = vst [vmem:[#allocation95_spill] sm:$0xff] %v1813_v7  ;;  %v2651_v58 = vrot.slane %v1322_v32, 1  ;;  %v2653_v27 = vrot.slane %v1325_v33, 1  ;;  %v773_v13 = vrot.slane %v152_v56, 1  ;;  %v344_v31 = vmax.f32 %v1165_v1, %v2654_v30  ;;  %v2655_v7 = vld [vmem:[#allocation44_spill] sm:$0xff]  ;;  %v1855_v62 = vpop.permute.xlu1 %306  ;;  %v1857_v1 = vpop.permute.xlu0 %304 }
  0xc3   : > { %v1822_v29 = vsel %vm392_vm0, %v2649_v28, %v2648_v47  ;;  %v170_v11 = vld [vmem:[%s1159_s11 + $0x1a8] sm:$0x1]  ;;  %v345_v47 = vmax.f32 %v1175_v3, %v2655_v7  ;;  %v2656_v28 = vrot.slane %v1332_v34, 1  ;;  %v176_v56 = vld [vmem:[%s1159_s11 + $0x1d8] sm:$0x1]  ;;  %2659 = vst [vmem:[#allocation40_spill] sm:$0xff] %v1855_v62 }
  0xc4   : > { %2650 = vst [vmem:[#allocation96_spill] sm:$0xff] %v1822_v29  ;;  %v1827_v23 = vsel %vm392_vm0, %v2651_v58, %v748_v57  ;;  %v2652_v17 = vmov %v2651_v58  ;;  %v2658_v29 = vrot.slane %v1335_v35, 1  ;;  %2660 = vst [vmem:[#allocation44_spill] sm:$0xff] %v1857_v1  ;;  %v2661_v3 = vrot.slane %v1342_v36, 1  ;;  %v188_v19 = vld [vmem:[%s1159_s11 + $0x238] sm:$0x1] }
  0xc5   : > { %v1834_v63 = vsel %vm392_vm0, %v2653_v27, %v2652_v17  ;;  %v1844_v57 = vsel %vm392_vm0, %v2656_v28, %v753_v54  ;;  %v2657_v58 = vmov %v2656_v28  ;;  %v182_v27 = vld [vmem:[%s1159_s11 + $0x208] sm:$0x1]  ;;  %v2663_v30 = vrot.slane %v1345_v37, 1 }
  0xc6   : > { %v1851_v17 = vsel %vm392_vm0, %v2658_v29, %v2657_v58  ;;  %v1862_v7 = vsel %vm392_vm0, %v2661_v3, %v758_v52  ;;  %v2662_v54 = vmov %v2661_v3  ;;  %v778_v29 = vrot.slane %v158_v60, 1  ;;  %v1910_v53 = vpop.permute.xlu0 %308 }
  0xc7   : > { %v1869_v28 = vsel %vm392_vm0, %v2663_v30, %v2662_v54  ;;  %v783_v58 = vrot.slane %v164_v55, 1  ;;  %v2664_v44 = vrot.slane %v1352_v38, 1  ;;  %v2666_v52 = vrot.slane %v1355_v39, 1 }
  0xc8   : > { %v2667_v26 = vrot.slane %v1362_v40, 1  ;;  %v788_v30 = vrot.slane %v170_v11, 1  ;;  %v2670_v55 = vrot.slane %v1365_v41, 1  ;;  %v2675_v11 = vld [vmem:[#allocation43_spill] sm:$0xff]  ;;  %v506_v22 = vmax.f32 %v345_v47, %v1684_v45 }
  0xc9   : > { %v1874_v62 = vsel %vm392_vm0, %v2664_v44, %v763_v51  ;;  %v2665_v1 = vmov %v2664_v44  ;;  %v2672_v51 = vrot.slane %v1372_v42, 1  ;;  %v347_v24 = vmax.f32 %v1172_v2, %v2675_v11  ;;  %2677 = vst [vmem:[#allocation43_spill] sm:$0xff] %v1910_v53  ;;  %v2688_v53 = vld [vmem:[#allocation25_spill] sm:$0xff] }
  0xca   : > { %v1881_v3 = vsel %vm392_vm0, %v2666_v52, %v2665_v1  ;;  %v1886_v54 = vsel %vm392_vm0, %v2667_v26, %v768_v48  ;;  %v2669_v60 = vmov %v2667_v26  ;;  %v793_v1 = vrot.slane %v176_v56, 1 }
  0xcb   : > { %2668 = vst [vmem:[#allocation97_spill] sm:$0xff] %v1886_v54  ;;  %v1893_v44 = vsel %vm392_vm0, %v2670_v55, %v2669_v60  ;;  %v1898_v46 = vsel %vm392_vm0, %v2672_v51, %v773_v13  ;;  %v798_v52 = vrot.slane %v182_v27, 1  ;;  %v346_v26 = vmax.f32 %v1162_v0, %v2674_v25  ;;  %v194_v60 = vld [vmem:[%s1159_s11 + $0x268] sm:$0x1]  ;;  %v1908_v55 = vpop.permute.xlu1 %310  ;;  %v2728_v54 = vld [vmem:[#allocation34_spill] sm:$0xff] }
  0xcc   : > { %2671 = vst [vmem:[#allocation98_spill] sm:$0xff] %v1893_v44  ;;  %2673 = vst [vmem:[#allocation99_spill] sm:$0xff] %v1898_v46  ;;  %v505_v48 = vmax.f32 %v344_v31, %v1610_v61  ;;  %v2678_v13 = vmov %v2672_v51  ;;  %v2679_v56 = vrot.slane %v1375_v43, 1  ;;  %v2681_v51 = vld [vmem:[#allocation23_spill] sm:$0xff]  ;;  %v2685_v31 = vld [vmem:[#allocation24_spill] sm:$0xff]  ;;  %v2689_v49 = vrot.slane %v2688_v53, 1 }
  0xcd   : > { %2676 = vst [vmem:[#allocation39_spill] sm:$0xff] %v1908_v55  ;;  %v2682_v20 = vrot.slane %v2681_v51, 1  ;;  %v2686_v47 = vrot.slane %v2685_v31, 1  ;;  %v2717_v53 = vld [vmem:[#allocation50_spill] sm:$0xff]  ;;  %v2724_v51 = vld [vmem:[#allocation33_spill] sm:$0xff]  ;;  %v2729_v14 = vrot.slane %v2728_v54, 1 }
  0xce   : > { %v1917_v27 = vsel %vm392_vm0, %v2679_v56, %v2678_v13  ;;  %v1934_v46 = vsel %vm392_vm0, %v2689_v49, %v783_v58  ;;  %v2691_v13 = vmov %v2689_v49  ;;  %v2692_v56 = vld [vmem:[#allocation26_spill] sm:$0xff]  ;;  %v803_v49 = vrot.slane %v188_v19, 1  ;;  %v2702_v58 = vld [vmem:[#allocation29_spill] sm:$0xff] }
  0xcf   : > { %2680 = vst [vmem:[#allocation100_spill] sm:$0xff] %v1917_v27  ;;  %v1922_v61 = vsel %vm392_vm0, %v2682_v20, %v778_v29  ;;  %v2684_v45 = vmov %v2682_v20  ;;  %2690 = vst [vmem:[#allocation103_spill] sm:$0xff] %v1934_v46  ;;  %v2693_v27 = vrot.slane %v2692_v56, 1  ;;  %v2695_v20 = vld [vmem:[#allocation27_spill] sm:$0xff]  ;;  %v2703_v46 = vrot.slane %v2702_v58, 1 }
  0xd0   : > { %2683 = vst [vmem:[#allocation101_spill] sm:$0xff] %v1922_v61  ;;  %v1929_v55 = vsel %vm392_vm0, %v2686_v47, %v2684_v45  ;;  %v2696_v29 = vrot.slane %v2695_v20, 1  ;;  %v2699_v47 = vld [vmem:[#allocation28_spill] sm:$0xff]  ;;  %v2714_v58 = vld [vmem:[#allocation47_spill] sm:$0xff]  ;;  %v2725_v43 = vrot.slane %v2724_v51, 1 }
  0xd1   : > { %2687 = vst [vmem:[#allocation102_spill] sm:$0xff] %v1929_v55  ;;  %v1941_v18 = vsel %vm392_vm0, %v2693_v27, %v2691_v13  ;;  %v2700_v55 = vrot.slane %v2699_v47, 1  ;;  %v1958_v56 = vsel %vm392_vm0, %v2703_v46, %v793_v1  ;;  %v2705_v27 = vmov %v2703_v46  ;;  %v2706_v13 = vld [vmem:[#allocation30_spill] sm:$0xff] }
  0xd2   : > { %2694 = vst [vmem:[#allocation104_spill] sm:$0xff] %v1941_v18  ;;  %v1946_v61 = vsel %vm392_vm0, %v2696_v29, %v788_v30  ;;  %v2698_v45 = vmov %v2696_v29  ;;  %2704 = vst [vmem:[#allocation107_spill] sm:$0xff] %v1958_v56  ;;  %v2707_v18 = vrot.slane %v2706_v13, 1  ;;  %v2709_v29 = vld [vmem:[#allocation31_spill] sm:$0xff]  ;;  %v538_v46 = vmax.f32 %v506_v22, %v1322_v32  ;;  %v200_v56 = vld [vmem:[%s1159_s11 + $0x298] sm:$0x1] }
  0xd3   : > { %2697 = vst [vmem:[#allocation105_spill] sm:$0xff] %v1946_v61  ;;  %v1953_v16 = vsel %vm392_vm0, %v2700_v55, %v2698_v45  ;;  %v2710_v61 = vrot.slane %v2709_v29, 1  ;;  %v808_v55 = vrot.slane %v194_v60, 1  ;;  %v2712_v45 = vld [vmem:[#allocation64_spill] sm:$0xff]  ;;  %v537_v1 = vmax.f32 %v505_v48, %v1325_v33  ;;  %v2719_v60 = vld [vmem:[#allocation3_spill] sm:$0xff] }
  0xd4   : > { %2701 = vst [vmem:[#allocation106_spill] sm:$0xff] %v1953_v16  ;;  %v1965_v30 = vsel %vm392_vm0, %v2707_v18, %v2705_v27  ;;  %v507_v19 = vmax.f32 %v346_v26, %v2712_v45  ;;  %v2713_v16 = vld [vmem:[#allocation76_spill] sm:$0xff]  ;;  %v349_v13 = vmax.f32 %v1182_v4, %v2714_v58  ;;  %v2716_v27 = vld [vmem:[#allocation2_spill] sm:$0xff]  ;;  %v602_v26 = vpop.permute.xlu0 %601  ;;  %v2720_v33 = vrot.slane %v2709_v29, 1 }
  0xd5   : > { %2708 = vst [vmem:[#allocation108_spill] sm:$0xff] %v1965_v30  ;;  %v1970_v47 = vsel %vm392_vm0, %v2710_v61, %v798_v52  ;;  %v508_v20 = vmax.f32 %v347_v24, %v2713_v16  ;;  %v2715_v18 = vld [vmem:[#allocation48_spill] sm:$0xff]  ;;  %v351_v52 = vmax.f32 %v1192_v6, %v2717_v53  ;;  %v2718_v61 = vld [vmem:[#allocation51_spill] sm:$0xff]  ;;  %v604_v24 = vpop.permute.xlu1 %603  ;;  %v697_v32 = vmax.f32 %v537_v1, %v602_v26 }
  0xd6   : > { %2711 = vst [vmem:[#allocation31_spill] sm:$0xff] %v1970_v47  ;;  %v348_v30 = vmax.f32 %v2716_v27, %v2715_v18  ;;  %v350_v47 = vmax.f32 %v2719_v60, %v2718_v61  ;;  %v698_v22 = vmax.f32 %v538_v46, %v604_v24  ;;  %v2721_v48 = vld [vmem:[#allocation32_spill] sm:$0xff]  ;;  %v1995_v42 = vsel %vm392_vm0, %v2725_v43, %v803_v49  ;;  %v2731_v1 = vld [vmem:[#allocation35_spill] sm:$0xff] }
  0xd7   : > { %v2722_v21 = vrot.slane %v2721_v48, 1  ;;  %2726 = vst [vmem:[#allocation76_spill] sm:$0xff] %v1995_v42  ;;  %v2727_v44 = vmov %v2725_v43  ;;  %v2732_v24 = vrot.slane %v2731_v1, 1  ;;  %v813_v49 = vrot.slane %v200_v56, 1  ;;  %v2739_v1 = vld [vmem:[#allocation68_spill] sm:$0xff] }
  0xd8   : > { %v2002_v46 = vsel %vm392_vm0, %v2729_v14, %v2727_v44  ;;  %v858_v42 = vmax.f32 %v698_v22, %v1827_v23  ;;  %v857_v54 = vmax.f32 %v697_v32, %v1834_v63  ;;  %v540_v14 = vmax.f32 %v508_v20, %v1332_v34  ;;  %v606_v56 = vpop.permute.xlu0 %605  ;;  %v2741_v22 = vld [vmem:[#allocation53_spill] sm:$0xff] }
  0xd9   : > { %v1990_v31 = vsel %vm392_vm0, %v2722_v21, %v2720_v33  ;;  %2730 = vst [vmem:[#allocation47_spill] sm:$0xff] %v2002_v46  ;;  %v2007_v26 = vsel %vm392_vm0, %v2732_v24, %v808_v55  ;;  %v2734_v21 = vmov %v2732_v24  ;;  %v2735_v33 = vld [vmem:[#allocation36_spill] sm:$0xff]  ;;  %v539_v44 = vmax.f32 %v507_v19, %v1335_v35  ;;  %v2021_v46 = vld [vmem:[%s1159_s11 + $0x2c8] sm:$0x1] }
  0xda   : > { %2723 = vst [vmem:[#allocation64_spill] sm:$0xff] %v1990_v31  ;;  %2733 = vst [vmem:[#allocation48_spill] sm:$0xff] %v2007_v26  ;;  %v2736_v31 = vrot.slane %v2735_v33, 1  ;;  %v510_v55 = vmax.f32 %v349_v13, %v1691_v5  ;;  %v2738_v24 = vld [vmem:[#allocation67_spill] sm:$0xff]  ;;  %v512_v33 = vmax.f32 %v351_v52, %v1697_v9  ;;  %v890_v23 = vmax.f32 %v858_v42, %v1172_v2  ;;  %v2740_v35 = vld [vmem:[#allocation52_spill] sm:$0xff] }
  0xdb   : > { %v509_v26 = vmax.f32 %v348_v30, %v2738_v24  ;;  %v889_v63 = vmax.f32 %v857_v54, %v1162_v0  ;;  %v699_v20 = vmax.f32 %v539_v44, %v606_v56  ;;  %v353_v19 = vmax.f32 %v1202_v8, %v2740_v35  ;;  %v2742_v13 = vld [vmem:[#allocation4_spill] sm:$0xff]  ;;  %v2743_v30 = vld [vmem:[#allocation37_spill] sm:$0xff] }
  0xdc   : > { %v2014_v43 = vsel %vm392_vm0, %v2736_v31, %v2734_v21  ;;  %v511_v31 = vmax.f32 %v350_v47, %v2739_v1  ;;  %v608_v21 = vpop.permute.xlu1 %607  ;;  %v352_v32 = vmax.f32 %v2742_v13, %v2741_v22  ;;  %v818_v47 = vrot.slane %v2021_v46, 1  ;;  %v2826_v46 = vld [vmem:[#allocation36_spill] sm:$0xff] }
  0xdd   : > { %2737 = vst [vmem:[#allocation2_spill] sm:$0xff] %v2014_v43  ;;  %v700_v34 = vmax.f32 %v540_v14, %v608_v21  ;;  %v2744_v43 = vrot.slane %v2743_v30, 1  ;;  %v930_v51 = vmax.f32 %v890_v23, %v2675_v11  ;;  %v929_v2 = vmax.f32 %v889_v63, %v2674_v25  ;;  %v610_v14 = vpop.permute.xlu0 %609 }
  0xde   : > { %v859_v42 = vmax.f32 %v699_v20, %v1851_v17  ;;  %v542_v54 = vmax.f32 %v510_v55, %v1342_v36  ;;  %v544_v11 = vmax.f32 %v512_v33, %v1352_v38  ;;  %v543_v25 = vmax.f32 %v511_v31, %v1355_v39  ;;  %v2745_v55 = vld [vmem:[#allocation69_spill] sm:$0xff]  ;;  %v2747_v38 = vld [vmem:[#allocation55_spill] sm:$0xff]  ;;  %v2751_v31 = vld [vmem:[#allocation6_spill] sm:$0xff] }
  0xdf   : > { %v2037_v52 = vsel %vm392_vm0, %v2744_v43, %v813_v49  ;;  %v860_v0 = vmax.f32 %v700_v34, %v1844_v57  ;;  %v541_v49 = vmax.f32 %v509_v26, %v1345_v37  ;;  %v970_v57 = vmax.f32 %v930_v51, %v2713_v16  ;;  %v2746_v37 = vld [vmem:[#allocation54_spill] sm:$0xff]  ;;  %v2748_v33 = vld [vmem:[#allocation5_spill] sm:$0xff]  ;;  %v2749_v51 = vld [vmem:[#allocation56_spill] sm:$0xff] }
  0xe0   : > { %v612_v43 = vpop.permute.xlu1 %611  ;;  %v969_v17 = vmax.f32 %v929_v2, %v2712_v45  ;;  %v891_v21 = vmax.f32 %v859_v42, %v2716_v27  ;;  %v514_v36 = vmax.f32 %v353_v19, %v1702_v59  ;;  %v513_v56 = vmax.f32 %v352_v32, %v2745_v55  ;;  %v2750_v27 = vld [vmem:[#allocation57_spill] sm:$0xff] }
  0xe1   : > { %v892_v44 = vmax.f32 %v860_v0, %v1182_v4  ;;  %v702_v23 = vmax.f32 %v542_v54, %v612_v43  ;;  %v701_v63 = vmax.f32 %v541_v49, %v610_v14  ;;  %v355_v26 = vmax.f32 %v1212_v10, %v2746_v37  ;;  %1003 = vst.msk [vmem:[%s2047_s16 + $0x8] sm:$0xff] %vm1001_vm1, %v970_v57  ;;  %v614_v2 = vpop.permute.xlu0 %613  ;;  %v2752_v57 = vld [vmem:[#allocation70_spill] sm:$0xff] }
  0xe2   : > { %v354_v39 = vmax.f32 %v2748_v33, %v2747_v38  ;;  %1002 = vst.msk [vmem:[%s2047_s16] sm:$0xff] %vm1001_vm1, %v969_v17  ;;  %v931_v16 = vmax.f32 %v891_v21, %v2715_v18  ;;  %v357_v45 = vmax.f32 %v1222_v12, %v2749_v51  ;;  %v356_v34 = vmax.f32 %v2751_v31, %v2750_v27 }
  0xe3   : > { %v932_v4 = vmax.f32 %v892_v44, %v2714_v58  ;;  %v862_v20 = vmax.f32 %v702_v23, %v1862_v7  ;;  %v861_v19 = vmax.f32 %v701_v63, %v1869_v28  ;;  %v703_v18 = vmax.f32 %v543_v25, %v614_v2  ;;  %v2756_v63 = vld [vmem:[#allocation59_spill] sm:$0xff]  ;;  %v2761_v2 = vld [vmem:[#allocation22_spill] sm:$0xff] }
  0xe4   : > { %v616_v32 = vpop.permute.xlu1 %615  ;;  %v971_v58 = vmax.f32 %v931_v16, %v2738_v24  ;;  %v546_v49 = vmax.f32 %v514_v36, %v1362_v40  ;;  %v545_v14 = vmax.f32 %v513_v56, %v1365_v41  ;;  %v516_v7 = vmax.f32 %v355_v26, %v1715_v50  ;;  %v2754_v56 = vld [vmem:[#allocation58_spill] sm:$0xff]  ;;  %v2757_v26 = vld [vmem:[#allocation8_spill] sm:$0xff] }
  0xe5   : > { %v972_v0 = vmax.f32 %v932_v4, %v1691_v5  ;;  %v704_v42 = vmax.f32 %v544_v11, %v616_v32  ;;  %v894_v54 = vmax.f32 %v862_v20, %v1192_v6  ;;  %v893_v43 = vmax.f32 %v861_v19, %v2719_v60  ;;  %v2753_v11 = vld [vmem:[#allocation71_spill] sm:$0xff]  ;;  %v618_v17 = vpop.permute.xlu0 %617  ;;  %v2760_v20 = vld [vmem:[#allocation21_spill] sm:$0xff] }
  0xe6   : > { %v515_v28 = vmax.f32 %v354_v39, %v2752_v57  ;;  %1004 = vst.msk [vmem:[%s2047_s16 + $0x10] sm:$0xff] %vm1001_vm1, %v971_v58  ;;  %v863_v24 = vmax.f32 %v703_v18, %v1881_v3  ;;  %v518_v6 = vmax.f32 %v357_v45, %v1732_v15  ;;  %v517_v60 = vmax.f32 %v356_v34, %v2753_v11  ;;  %v2755_v3 = vld [vmem:[#allocation7_spill] sm:$0xff]  ;;  %v2758_v45 = vld [vmem:[#allocation97_spill] sm:$0xff]  ;;  %v2759_v34 = vld [vmem:[#allocation98_spill] sm:$0xff] }
  0xe7   : > { %1005 = vst.msk [vmem:[%s2047_s16 + $0x18] sm:$0xff] %vm1001_vm1, %v972_v0  ;;  %v864_v5 = vmax.f32 %v704_v42, %v1874_v62  ;;  %v934_v40 = vmax.f32 %v894_v54, %v2717_v53  ;;  %v933_v41 = vmax.f32 %v893_v43, %v2718_v61  ;;  %v705_v62 = vmax.f32 %v545_v14, %v618_v17  ;;  %v2762_v0 = vld [vmem:[#allocation23_spill] sm:$0xff]  ;;  %v2763_v58 = vld [vmem:[#allocation24_spill] sm:$0xff]  ;;  %v2769_v17 = vld [vmem:[#allocation10_spill] sm:$0xff] }
  0xe8   : > { %v620_v25 = vpop.permute.xlu1 %619  ;;  %v895_v21 = vmax.f32 %v863_v24, %v2742_v13  ;;  %v359_v23 = vmax.f32 %v2755_v3, %v2754_v56  ;;  %v358_v39 = vmax.f32 %v2757_v26, %v2756_v63  ;;  %v548_v19 = vmax.f32 %v516_v7, %v2760_v20  ;;  %v2765_v7 = vld [vmem:[#allocation72_spill] sm:$0xff]  ;;  %v2776_v20 = vld [vmem:[#allocation25_spill] sm:$0xff] }
  0xe9   : > { %v896_v44 = vmax.f32 %v864_v5, %v1202_v8  ;;  %v706_v36 = vmax.f32 %v546_v49, %v620_v25  ;;  %v974_v53 = vmax.f32 %v934_v40, %v1697_v9  ;;  %v973_v4 = vmax.f32 %v933_v41, %v2739_v1  ;;  %v622_v1 = vpop.permute.xlu0 %621  ;;  %v2764_v49 = vld [vmem:[#allocation81_spill] sm:$0xff] }
  0xea   : > { %v935_v16 = vmax.f32 %v895_v21, %v2741_v22  ;;  %v865_v13 = vmax.f32 %v705_v62, %v2759_v34  ;;  %v547_v9 = vmax.f32 %v515_v28, %v2761_v2  ;;  %v549_v22 = vmax.f32 %v517_v60, %v2763_v58  ;;  %v2766_v28 = vld [vmem:[#allocation60_spill] sm:$0xff]  ;;  %v2767_v41 = vld [vmem:[#allocation9_spill] sm:$0xff]  ;;  %v2772_v21 = vld [vmem:[#allocation63_spill] sm:$0xff] }
  0xeb   : > { %v936_v61 = vmax.f32 %v896_v44, %v2740_v35  ;;  %v866_v8 = vmax.f32 %v706_v36, %v2758_v45  ;;  %1007 = vst.msk [vmem:[%s2047_s16 + $0x28] sm:$0xff] %vm1001_vm1, %v974_v53  ;;  %1006 = vst.msk [vmem:[%s2047_s16 + $0x20] sm:$0xff] %vm1001_vm1, %v973_v4  ;;  %v550_v35 = vmax.f32 %v518_v6, %v2762_v0  ;;  %v2768_v6 = vld [vmem:[#allocation61_spill] sm:$0xff]  ;;  %v2773_v36 = vld [vmem:[#allocation12_spill] sm:$0xff] }
  0xec   : > { %v624_v32 = vpop.permute.xlu1 %623  ;;  %v975_v18 = vmax.f32 %v935_v16, %v2745_v55  ;;  %v897_v43 = vmax.f32 %v865_v13, %v2748_v33  ;;  %v520_v14 = vmax.f32 %v359_v23, %v2764_v49  ;;  %v519_v5 = vmax.f32 %v358_v39, %v2765_v7  ;;  %v2770_v55 = vld [vmem:[#allocation62_spill] sm:$0xff]  ;;  %v2771_v33 = vld [vmem:[#allocation11_spill] sm:$0xff]  ;;  %v2775_v53 = vld [vmem:[#allocation100_spill] sm:$0xff] }
  0xed   : > { %v976_v42 = vmax.f32 %v936_v61, %v1702_v59  ;;  %v898_v54 = vmax.f32 %v866_v8, %v1212_v10  ;;  %v708_v24 = vmax.f32 %v548_v19, %v624_v32  ;;  %v707_v40 = vmax.f32 %v547_v9, %v622_v1  ;;  %v2774_v23 = vld [vmem:[#allocation99_spill] sm:$0xff]  ;;  %v626_v16 = vpop.permute.xlu0 %625  ;;  %v2777_v32 = vld [vmem:[#allocation26_spill] sm:$0xff]  ;;  %v2779_v0 = vld [vmem:[#allocation73_spill] sm:$0xff] }
  0xee   : > { %v361_v25 = vmax.f32 %v2767_v41, %v2766_v28  ;;  %v360_v60 = vmax.f32 %v2769_v17, %v2768_v6  ;;  %1008 = vst.msk [vmem:[%s2047_s16 + $0x30] sm:$0xff] %vm1001_vm1, %v975_v18  ;;  %v937_v59 = vmax.f32 %v897_v43, %v2747_v38  ;;  %v363_v44 = vmax.f32 %v2771_v33, %v2770_v55  ;;  %v2778_v9 = vld [vmem:[#allocation82_spill] sm:$0xff]  ;;  %v2783_v18 = vld [vmem:[#allocation77_spill] sm:$0xff] }
  0xef   : > { %1009 = vst.msk [vmem:[%s2047_s16 + $0x38] sm:$0xff] %vm1001_vm1, %v976_v42  ;;  %v938_v10 = vmax.f32 %v898_v54, %v2746_v37  ;;  %v362_v62 = vmax.f32 %v2773_v36, %v2772_v21  ;;  %v868_v39 = vmax.f32 %v708_v24, %v2774_v23  ;;  %v867_v4 = vmax.f32 %v707_v40, %v2775_v53  ;;  %v2782_v42 = vld [vmem:[#allocation83_spill] sm:$0xff] }
  0xf0   : > { %v628_v61 = vpop.permute.xlu1 %627  ;;  %v977_v37 = vmax.f32 %v937_v59, %v2752_v57  ;;  %v709_v38 = vmax.f32 %v549_v22, %v626_v16  ;;  %v552_v19 = vmax.f32 %v520_v14, %v2776_v20  ;;  %v551_v2 = vmax.f32 %v519_v5, %v2777_v32  ;;  %v2785_v59 = vld [vmem:[#allocation13_spill] sm:$0xff]  ;;  %v2789_v16 = vld [vmem:[#allocation104_spill] sm:$0xff] }
  0xf1   : > { %v978_v45 = vmax.f32 %v938_v10, %v1715_v50  ;;  %v710_v8 = vmax.f32 %v550_v35, %v628_v61  ;;  %v900_v34 = vmax.f32 %v868_v39, %v1222_v12  ;;  %v899_v13 = vmax.f32 %v867_v4, %v2751_v31  ;;  %v2780_v50 = vld [vmem:[#allocation101_spill] sm:$0xff]  ;;  %v2781_v35 = vld [vmem:[#allocation102_spill] sm:$0xff]  ;;  %v630_v5 = vpop.permute.xlu0 %629  ;;  %v2788_v61 = vld [vmem:[#allocation103_spill] sm:$0xff] }
  0xf2   : > { %v522_v1 = vmax.f32 %v361_v25, %v2778_v9  ;;  %v521_v58 = vmax.f32 %v360_v60, %v2779_v0  ;;  %1010 = vst.msk [vmem:[%s2047_s16 + $0x40] sm:$0xff] %vm1001_vm1, %v977_v37  ;;  %v869_v22 = vmax.f32 %v709_v38, %v2781_v35  ;;  %v524_v12 = vmax.f32 %v363_v44, %v2782_v42  ;;  %v2784_v10 = vld [vmem:[#allocation65_spill] sm:$0xff]  ;;  %v2786_v44 = vld [vmem:[#allocation66_spill] sm:$0xff]  ;;  %v2791_v38 = vld [vmem:[#allocation28_spill] sm:$0xff] }
  0xf3   : > { %1011 = vst.msk [vmem:[%s2047_s16 + $0x48] sm:$0xff] %vm1001_vm1, %v978_v45  ;;  %v870_v57 = vmax.f32 %v710_v8, %v2780_v50  ;;  %v523_v31 = vmax.f32 %v362_v62, %v2783_v18  ;;  %v940_v54 = vmax.f32 %v900_v34, %v2749_v51  ;;  %v939_v43 = vmax.f32 %v899_v13, %v2750_v27  ;;  %v2787_v39 = vld [vmem:[#allocation14_spill] sm:$0xff]  ;;  %v2790_v45 = vld [vmem:[#allocation27_spill] sm:$0xff]  ;;  %v2792_v34 = vld [vmem:[#allocation29_spill] sm:$0xff] }
  0xf4   : > { %v632_v14 = vpop.permute.xlu1 %631  ;;  %v901_v40 = vmax.f32 %v869_v22, %v2757_v26  ;;  %v711_v60 = vmax.f32 %v551_v2, %v630_v5  ;;  %v365_v23 = vmax.f32 %v2785_v59, %v2784_v10  ;;  %v364_v62 = vmax.f32 %v2787_v39, %v2786_v44  ;;  %v2793_v13 = vld [vmem:[#allocation30_spill] sm:$0xff]  ;;  %v2794_v50 = vld [vmem:[#allocation84_spill] sm:$0xff]  ;;  %v2804_v59 = vld [vmem:[#allocation105_spill] sm:$0xff] }
  0xf5   : > { %v902_v24 = vmax.f32 %v870_v57, %v2755_v3  ;;  %v712_v25 = vmax.f32 %v552_v19, %v632_v14  ;;  %v980_v51 = vmax.f32 %v940_v54, %v1732_v15  ;;  %v979_v53 = vmax.f32 %v939_v43, %v2753_v11  ;;  %v634_v11 = vpop.permute.xlu0 %633  ;;  %v2795_v57 = vld [vmem:[#allocation78_spill] sm:$0xff]  ;;  %v2797_v43 = vld [vmem:[#allocation15_spill] sm:$0xff]  ;;  %v2799_v5 = vld [vmem:[#allocation16_spill] sm:$0xff] }
  0xf6   : > { %v941_v4 = vmax.f32 %v901_v40, %v2756_v63  ;;  %v871_v26 = vmax.f32 %v711_v60, %v2789_v16  ;;  %v554_v37 = vmax.f32 %v522_v1, %v2790_v45  ;;  %v553_v15 = vmax.f32 %v521_v58, %v2791_v38  ;;  %v2796_v58 = vld [vmem:[#allocation74_spill] sm:$0xff]  ;;  %v2802_v40 = vld [vmem:[#allocation80_spill] sm:$0xff]  ;;  %v2806_v45 = vld [vmem:[#allocation85_spill] sm:$0xff] }
  0xf7   : > { %v942_v27 = vmax.f32 %v902_v24, %v2754_v56  ;;  %v872_v3 = vmax.f32 %v712_v25, %v2788_v61  ;;  %1013 = vst.msk [vmem:[%s2047_s16 + $0x58] sm:$0xff] %vm1001_vm1, %v980_v51  ;;  %1012 = vst.msk [vmem:[%s2047_s16 + $0x50] sm:$0xff] %vm1001_vm1, %v979_v53  ;;  %v556_v56 = vmax.f32 %v524_v12, %v2792_v34  ;;  %v2798_v12 = vld [vmem:[#allocation75_spill] sm:$0xff]  ;;  %v2803_v25 = vld [vmem:[#allocation18_spill] sm:$0xff] }
  0xf8   : > { %v636_v8 = vpop.permute.xlu1 %635  ;;  %v555_v63 = vmax.f32 %v523_v31, %v2793_v13  ;;  %v981_v19 = vmax.f32 %v941_v4, %v2765_v7  ;;  %v903_v2 = vmax.f32 %v871_v26, %v2769_v17  ;;  %v526_v1 = vmax.f32 %v365_v23, %v2794_v50  ;;  %v2801_v17 = vld [vmem:[#allocation17_spill] sm:$0xff]  ;;  %v2805_v39 = vld [vmem:[#allocation106_spill] sm:$0xff] }
  0xf9   : > { %v982_v20 = vmax.f32 %v942_v27, %v2764_v49  ;;  %v904_v32 = vmax.f32 %v872_v3, %v2767_v41  ;;  %v525_v35 = vmax.f32 %v364_v62, %v2795_v57  ;;  %v714_v22 = vmax.f32 %v554_v37, %v636_v8  ;;  %v2800_v41 = vld [vmem:[#allocation79_spill] sm:$0xff]  ;;  %v638_v53 = vpop.permute.xlu0 %637  ;;  %v2807_v8 = vld [vmem:[#allocation86_spill] sm:$0xff] }
  0xfa   : > { %v713_v54 = vmax.f32 %v553_v15, %v634_v11  ;;  %v367_v14 = vmax.f32 %v2797_v43, %v2796_v58  ;;  %v366_v31 = vmax.f32 %v2799_v5, %v2798_v12  ;;  %1014 = vst.msk [vmem:[%s2047_s16 + $0x60] sm:$0xff] %vm1001_vm1, %v981_v19  ;;  %v943_v7 = vmax.f32 %v903_v2, %v2768_v6  ;;  %v2809_v15 = vld [vmem:[#allocation108_spill] sm:$0xff]  ;;  %v2810_v11 = vld [vmem:[#allocation87_spill] sm:$0xff] }
  0xfb   : > { %1015 = vst.msk [vmem:[%s2047_s16 + $0x68] sm:$0xff] %vm1001_vm1, %v982_v20  ;;  %v944_v49 = vmax.f32 %v904_v32, %v2766_v28  ;;  %v369_v24 = vmax.f32 %v2801_v17, %v2800_v41  ;;  %v368_v60 = vmax.f32 %v2803_v25, %v2802_v40  ;;  %v874_v23 = vmax.f32 %v714_v22, %v2804_v59  ;;  %v1110_v20 = vld [vmem:[%s1159_s11 + $0x1e8] sm:$0xff]  ;;  %v1111_v32 = vld [vmem:[%s1159_s11 + $0x1e0] sm:$0xff]  ;;  %v2815_v5 = vld [vmem:[#allocation20_spill] sm:$0xff] }
  0xfc   : > { %v873_v62 = vmax.f32 %v713_v54, %v2805_v39  ;;  %v640_v51 = vpop.permute.xlu1 %639  ;;  %v983_v28 = vmax.f32 %v943_v7, %v2779_v0  ;;  %v715_v6 = vmax.f32 %v555_v63, %v638_v53  ;;  %v558_v16 = vmax.f32 %v526_v1, %v2709_v29  ;;  %v2812_v22 = vld [vmem:[#allocation90_spill] sm:$0xff]  ;;  %v2813_v54 = vld [vmem:[#allocation19_spill] sm:$0xff]  ;;  %v2817_v25 = vld [vmem:[#allocation64_spill] sm:$0xff] }
  0xfd   : > { %v984_v27 = vmax.f32 %v944_v49, %v2778_v9  ;;  %v716_v4 = vmax.f32 %v556_v56, %v640_v51  ;;  %v906_v61 = vmax.f32 %v874_v23, %v2771_v33  ;;  %v557_v26 = vmax.f32 %v525_v35, %v2721_v48  ;;  %v2808_v9 = vld [vmem:[#allocation107_spill] sm:$0xff]  ;;  %v642_v63 = vpop.permute.xlu0 %641  ;;  %v2818_v59 = vld [vmem:[#allocation33_spill] sm:$0xff]  ;;  %v2821_v51 = vld [vmem:[#allocation38_spill] sm:$0xff] }
  0xfe   : > { %v905_v3 = vmax.f32 %v873_v62, %v2773_v36  ;;  %v528_v37 = vmax.f32 %v367_v14, %v2806_v45  ;;  %v527_v38 = vmax.f32 %v366_v31, %v2807_v8  ;;  %1016 = vst.msk [vmem:[%s2047_s16 + $0x70] sm:$0xff] %vm1001_vm1, %v983_v28  ;;  %v875_v33 = vmax.f32 %v715_v6, %v2809_v15  ;;  %v2811_v36 = vld [vmem:[#allocation88_spill] sm:$0xff]  ;;  %v2816_v17 = vld [vmem:[#allocation31_spill] sm:$0xff] }
  0xff   : > { %1017 = vst.msk [vmem:[%s2047_s16 + $0x78] sm:$0xff] %vm1001_vm1, %v984_v27  ;;  %v876_v0 = vmax.f32 %v716_v4, %v2808_v9  ;;  %v530_v34 = vmax.f32 %v369_v24, %v2810_v11  ;;  %v529_v56 = vmax.f32 %v368_v60, %v2811_v36  ;;  %v946_v29 = vmax.f32 %v906_v61, %v2770_v55  ;;  %v2814_v14 = vld [vmem:[#allocation92_spill] sm:$0xff]  ;;  %v2823_v27 = vld [vmem:[#allocation41_spill] sm:$0xff] }
 0x100   : > { %v945_v48 = vmax.f32 %v905_v3, %v2772_v21  ;;  %v644_v13 = vpop.permute.xlu1 %643  ;;  %v907_v2 = vmax.f32 %v875_v33, %v1111_v32  ;;  %v717_v35 = vmax.f32 %v557_v26, %v642_v63  ;;  %v371_v43 = vmax.f32 %v2813_v54, %v2812_v22  ;;  %v1112_v3 = vld [vmem:[%s1159_s11 + $0x218] sm:$0xff]  ;;  %v1113_v26 = vld [vmem:[%s1159_s11 + $0x210] sm:$0xff]  ;;  %v1114_v63 = vld [vmem:[%s1159_s11 + $0x2a8] sm:$0xff] }
 0x101   : > { %v908_v19 = vmax.f32 %v876_v0, %v1110_v20  ;;  %v718_v1 = vmax.f32 %v558_v16, %v644_v13  ;;  %v370_v31 = vmax.f32 %v2815_v5, %v2814_v14  ;;  %v986_v55 = vmax.f32 %v946_v29, %v2782_v42  ;;  %v2819_v42 = vld [vmem:[#allocation34_spill] sm:$0xff]  ;;  %v2825_v0 = vld [vmem:[#allocation35_spill] sm:$0xff]  ;;  %v2827_v29 = vld [vmem:[#allocation89_spill] sm:$0xff] }
 0x102   : > { %v985_v21 = vmax.f32 %v945_v48, %v2783_v18  ;;  %v947_v7 = vmax.f32 %v907_v2, %v2786_v44  ;;  %v877_v60 = vmax.f32 %v717_v35, %v2817_v25  ;;  %v560_v23 = vmax.f32 %v528_v37, %v2818_v59  ;;  %v646_v18 = vpop.permute.xlu0 %645  ;;  %v2829_v20 = vld [vmem:[#allocation40_spill] sm:$0xff]  ;;  %v2832_v35 = vld [vmem:[#allocation47_spill] sm:$0xff] }
 0x103   : > { %v948_v49 = vmax.f32 %v908_v19, %v2784_v10  ;;  %v878_v24 = vmax.f32 %v718_v1, %v2816_v17  ;;  %1019 = vst.msk [vmem:[%s2047_s16 + $0x88] sm:$0xff] %vm1001_vm1, %v986_v55  ;;  %v559_v62 = vmax.f32 %v527_v38, %v2819_v42  ;;  %v2820_v10 = vrot.slane %v2743_v30, 1  ;;  %v1115_v19 = vld [vmem:[%s1159_s11 + $0x2a0] sm:$0xff]  ;;  %v2831_v2 = vld [vmem:[#allocation76_spill] sm:$0xff] }
 0x104   : > { %1018 = vst.msk [vmem:[%s2047_s16 + $0x80] sm:$0xff] %vm1001_vm1, %v985_v21  ;;  %v648_v39 = vpop.permute.xlu1 %647  ;;  %v2822_v53 = vrot.slane %v2821_v51, 1  ;;  %v2824_v28 = vrot.slane %v2823_v27, 1  ;;  %v987_v61 = vmax.f32 %v947_v7, %v2795_v57  ;;  %v909_v37 = vmax.f32 %v877_v60, %v1113_v26  ;;  %v2268_v21 = vld [vmem:[%s1159_s11 + $0x2d8] sm:$0xff]  ;;  %v2273_v17 = vld [vmem:[%s1159_s11 + $0x2d0] sm:$0xff]  ;;  %v1118_v60 = vld [vmem:[%s1159_s11 + $0x248] sm:$0xff] }
 0x105   : > { %v988_v6 = vmax.f32 %v948_v49, %v2794_v50  ;;  %v910_v16 = vmax.f32 %v878_v24, %v1112_v3  ;;  %v720_v38 = vmax.f32 %v560_v23, %v648_v39  ;;  %v719_v9 = vmax.f32 %v559_v62, %v646_v18  ;;  %v2833_v49 = vld [vmem:[#allocation39_spill] sm:$0xff]  ;;  %v1119_v23 = vld [vmem:[%s1159_s11 + $0x240] sm:$0xff] }
 0x106   : > { %v2236_v44 = vsel %vm392_vm0, %v2822_v53, %v2820_v10  ;;  %v2243_v4 = vsel %vm392_vm0, %v2824_v28, %v818_v47  ;;  %v562_v15 = vmax.f32 %v530_v34, %v2825_v0  ;;  %v561_v33 = vmax.f32 %v529_v56, %v2826_v46  ;;  %v2828_v47 = vld [vmem:[#allocation91_spill] sm:$0xff]  ;;  %1020 = vst.msk [vmem:[%s2047_s16 + $0x90] sm:$0xff] %vm1001_vm1, %v987_v61  ;;  %v2830_v56 = vld [vmem:[#allocation44_spill] sm:$0xff]  ;;  %v650_v5 = vpop.permute.xlu0 %649  ;;  %v2836_v42 = vld [vmem:[#allocation2_spill] sm:$0xff] }
 0x107   : > { %v532_v48 = vmax.f32 %v371_v43, %v2827_v29  ;;  %v531_v13 = vmax.f32 %v370_v31, %v2828_v47  ;;  %1021 = vst.msk [vmem:[%s2047_s16 + $0x98] sm:$0xff] %vm1001_vm1, %v988_v6  ;;  %v950_v50 = vmax.f32 %v910_v16, %v2796_v58  ;;  %v949_v57 = vmax.f32 %v909_v37, %v2798_v12  ;;  %v2834_v24 = vld [vmem:[#allocation43_spill] sm:$0xff]  ;;  %v2837_v53 = vld [vmem:[#allocation93_spill] sm:$0xff]  ;;  %v2838_v6 = vld [vmem:[#allocation94_spill] sm:$0xff] }
 0x108   : > { %v373_v34 = vmax.f32 %v1114_v63, %v2829_v20  ;;  %v372_v32 = vmax.f32 %v1115_v19, %v2830_v56  ;;  %v880_v1 = vmax.f32 %v720_v38, %v2831_v2  ;;  %v879_v54 = vmax.f32 %v719_v9, %v2832_v35  ;;  %v652_v43 = vpop.permute.xlu1 %651  ;;  %v1120_v38 = vld [vmem:[%s1159_s11 + $0x278] sm:$0xff]  ;;  %v1121_v0 = vld [vmem:[%s1159_s11 + $0x270] sm:$0xff] }
 0x109   : > { %v990_v58 = vmax.f32 %v950_v50, %v2806_v45  ;;  %v989_v12 = vmax.f32 %v949_v57, %v2807_v8  ;;  %v722_v31 = vmax.f32 %v562_v15, %v652_v43  ;;  %v721_v55 = vmax.f32 %v561_v33, %v650_v5  ;;  %v2835_v8 = vld [vmem:[#allocation48_spill] sm:$0xff]  ;;  %v212_v33 = vld [vmem:[%s1159_s11 + $0x2f8] sm:$0x1] }
 0x10a   : > { %v375_v7 = vmax.f32 %v2268_v21, %v2833_v49  ;;  %v374_v25 = vmax.f32 %v2273_v17, %v2834_v24  ;;  %v912_v59 = vmax.f32 %v880_v1, %v1118_v60  ;;  %v911_v45 = vmax.f32 %v879_v54, %v1119_v23  ;;  %v654_v37 = vpop.permute.xlu0 %653 }
 0x10b   : > { %1023 = vst.msk [vmem:[%s2047_s16 + $0xa8] sm:$0xff] %vm1001_vm1, %v990_v58  ;;  %1022 = vst.msk [vmem:[%s2047_s16 + $0xa0] sm:$0xff] %vm1001_vm1, %v989_v12  ;;  %v882_v39 = vmax.f32 %v722_v31, %v2835_v8  ;;  %v881_v62 = vmax.f32 %v721_v55, %v2836_v42  ;;  %v564_v18 = vmax.f32 %v532_v48, %v2743_v30  ;;  %v823_v54 = vrot.slane %v212_v33, 1  ;;  %v2844_v31 = vld [vmem:[#allocation49_spill] sm:$0xff] }
 0x10c   : > { %v563_v10 = vmax.f32 %v531_v13, %v2821_v51  ;;  %v534_v28 = vmax.f32 %v373_v34, %v2837_v53  ;;  %v533_v61 = vmax.f32 %v372_v32, %v2838_v6  ;;  %v952_v3 = vmax.f32 %v912_v59, %v2800_v41  ;;  %v656_v26 = vpop.permute.xlu1 %655  ;;  %v2839_v51 = vld [vmem:[#allocation95_spill] sm:$0xff]  ;;  %v2840_v13 = vld [vmem:[#allocation96_spill] sm:$0xff]  ;;  %v2845_v8 = vld [vmem:[#allocation45_spill] sm:$0xff] }
 0x10d   : > { %v951_v16 = vmax.f32 %v911_v45, %v2802_v40  ;;  %v914_v9 = vmax.f32 %v882_v39, %v1120_v38  ;;  %v913_v15 = vmax.f32 %v881_v62, %v1121_v0  ;;  %v724_v46 = vmax.f32 %v564_v18, %v656_v26  ;;  %v1122_v59 = vld [vmem:[%s1159_s11 + $0x2f0] sm:$0xff]  ;;  %v2848_v18 = vld [vmem:[#allocation46_spill] sm:$0xff] }
 0x10e   : > { %v723_v30 = vmax.f32 %v563_v10, %v654_v37  ;;  %v536_v48 = vmax.f32 %v375_v7, %v2839_v51  ;;  %v535_v50 = vmax.f32 %v374_v25, %v2840_v13  ;;  %v992_v57 = vmax.f32 %v952_v3, %v2810_v11  ;;  %v2841_v11 = vld [vmem:[#allocation42_spill] sm:$0xff] }
 0x10f   : > { %v991_v41 = vmax.f32 %v951_v16, %v2811_v36  ;;  %v954_v40 = vmax.f32 %v914_v9, %v2812_v22  ;;  %v953_v34 = vmax.f32 %v913_v15, %v2814_v14  ;;  %v884_v32 = vmax.f32 %v724_v46, %v2037_v52  ;;  %v1124_v26 = vld [vmem:[%s1159_s11 + $0x300] sm:$0xff] }
 0x110   : > { %v883_v2 = vmax.f32 %v723_v30, %v2236_v44  ;;  %1025 = vst.msk [vmem:[%s2047_s16 + $0xb8] sm:$0xff] %vm1001_vm1, %v992_v57  ;;  %v566_v1 = vmax.f32 %v534_v28, %v2823_v27  ;;  %v660_v35 = vpop.permute.xlu1 %659  ;;  %v565_v36 = vmax.f32 %v533_v61, %v2841_v11  ;;  %v2842_v22 = vrot.slane %v2823_v27, 1  ;;  %v658_v44 = vpop.permute.xlu0 %657 }
 0x111   : > { %1024 = vst.msk [vmem:[%s2047_s16 + $0xb0] sm:$0xff] %vm1001_vm1, %v991_v41  ;;  %v2843_v14 = vrot.slane %v2841_v11, 1  ;;  %v994_v43 = vmax.f32 %v954_v40, %v2827_v29  ;;  %v993_v5 = vmax.f32 %v953_v34, %v2828_v47  ;;  %v916_v58 = vmax.f32 %v884_v32, %v1114_v63  ;;  %v1123_v29 = vld [vmem:[%s1159_s11 + $0x2e8] sm:$0xff]  ;;  %v215_v47 = vld [vmem:[%s1159_s11 + $0x310] sm:$0x1] }
 0x112   : > { %v915_v12 = vmax.f32 %v883_v2, %v1115_v19  ;;  %v963_v55 = vrot.slane %v2844_v31, 1  ;;  %v726_v7 = vmax.f32 %v566_v1, %v660_v35  ;;  %v725_v25 = vmax.f32 %v565_v36, %v658_v44 }
 0x113   : > { %v817_v52 = vsel %vm392_vm0, %v2843_v14, %v2842_v22  ;;  %1027 = vst.msk [vmem:[%s2047_s16 + $0xc8] sm:$0xff] %vm1001_vm1, %v994_v43  ;;  %1026 = vst.msk [vmem:[%s2047_s16 + $0xc0] sm:$0xff] %vm1001_vm1, %v993_v5  ;;  %v956_v27 = vmax.f32 %v916_v58, %v2829_v20  ;;  %v568_v23 = vmax.f32 %v536_v48, %v1122_v59  ;;  %v2846_v39 = vrot.slane %v2845_v8, 1 }
 0x114   : > { %v955_v60 = vmax.f32 %v915_v12, %v2830_v56  ;;  %v567_v45 = vmax.f32 %v535_v50, %v1123_v29  ;;  %v886_v63 = vmax.f32 %v726_v7, %v2243_v4  ;;  %v885_v19 = vmax.f32 %v725_v25, %v817_v52  ;;  %v664_v62 = vpop.permute.xlu1 %663  ;;  %v662_v28 = vpop.permute.xlu0 %661 }
 0x115   : > { %v824_v42 = vsel %vm392_vm0, %v2846_v39, %v823_v54  ;;  %v2847_v20 = vmov %v2846_v39  ;;  %v2849_v56 = vrot.slane %v2848_v18, 1  ;;  %v996_v61 = vmax.f32 %v956_v27, %v2837_v53 }
 0x116   : > { %v995_v3 = vmax.f32 %v955_v60, %v2838_v6  ;;  %v728_v4 = vmax.f32 %v568_v23, %v664_v62  ;;  %v727_v16 = vmax.f32 %v567_v45, %v662_v28  ;;  %v962_v37 = vrot.slane %v1124_v26, 1 }
 0x117   : > { %v822_v10 = vsel %vm392_vm0, %v2849_v56, %v2847_v20  ;;  %v918_v38 = vmax.f32 %v886_v63, %v2268_v21  ;;  %v917_v9 = vmax.f32 %v885_v19, %v2273_v17  ;;  %v965_v0 = vrot.slane %v215_v47, 1  ;;  %1029 = vst.msk [vmem:[%s2047_s16 + $0xd8] sm:$0xff] %vm1001_vm1, %v996_v61  ;;  %v1125_v21 = vld [vmem:[%s1159_s11 + $0x308] sm:$0xff] }
 0x118   : > { %1028 = vst.msk [vmem:[%s2047_s16 + $0xd0] sm:$0xff] %vm1001_vm1, %v995_v3  ;;  %v888_v15 = vmax.f32 %v728_v4, %v824_v42  ;;  %v887_v53 = vmax.f32 %v727_v16, %v822_v10  ;;  %v926_v30 = vpop.permute.xlu1 %925  ;;  %v924_v33 = vpop.permute.xlu0 %923  ;;  %v964_v40 = vsel %vm392_vm0, %v962_v37, %v963_v55 }
 0x119   : > { %v958_v6 = vmax.f32 %v918_v38, %v2833_v49  ;;  %v957_v46 = vmax.f32 %v917_v9, %v2834_v24  ;;  %v966_v41 = vsel %vm392_vm0, %v963_v55, %v965_v0 }
 0x11a   : > { %v920_v48 = vmax.f32 %v888_v15, %v1125_v21  ;;  %v919_v17 = vmax.f32 %v887_v53, %v1124_v26 }
 0x11b   : > { %v998_v50 = vmax.f32 %v958_v6, %v2839_v51  ;;  %v997_v57 = vmax.f32 %v957_v46, %v2840_v13 }
 0x11c   : > { %v960_v34 = vmax.f32 %v920_v48, %v926_v30  ;;  %v959_v32 = vmax.f32 %v919_v17, %v924_v33 }
 0x11d   : > { %1031 = vst.msk [vmem:[%s2047_s16 + $0xe8] sm:$0xff] %vm1001_vm1, %v998_v50  ;;  %1030 = vst.msk [vmem:[%s2047_s16 + $0xe0] sm:$0xff] %vm1001_vm1, %v997_v57 }
 0x11e   : > { %v1000_v49 = vmax.f32 %v960_v34, %v966_v41  ;;  %v999_v24 = vmax.f32 %v959_v32, %v964_v40 }
 0x120   : > { %1033 = vst.msk [vmem:[%s2047_s16 + $0xf8] sm:$0xff] %vm1001_vm1, %v1000_v49  ;;  %1032 = vst.msk [vmem:[%s2047_s16 + $0xf0] sm:$0xff] %vm1001_vm1, %v999_v24 }
 0x121 PF: > { %s11_s6 = sadd.s32 1, %s1132_s6  }
 0x122   : > { %p8_p4 = scmp.ge.s32.totalorder %s11_s6, 4  }
 0x124   :  { %10 = sbr.rel (!%p8_p4) target bundleno = 1 (0x1), region = 54 }

// kernel: _lambda_.17
= control target key start
LH: loop header
LB: loop body
LE: loop exit
PB: predicated region body
PF: predicated region fallthrough
CT: control target
= control target key end

     0   :  { %s2254_s12 = smov 0   ;;  %s2820_s0 = inlined_call_operand.vmem [shape: bf16[512,640], index: 0, kind: input, shape index: {}]   ;;  %s2821_s1 = inlined_call_operand.vmem [shape: bf16[640,64], index: 1, kind: input, shape index: {}]   ;;  %s2822_s2 = inlined_call_operand.vmem [shape: f32[1,64], index: 2, kind: input, shape index: {}]   ;;  %s2823_s3 = inlined_call_operand.vmem [shape: f32[512,64], index: 3, kind: output, shape index: {}]  }
   0x1 LB: > { %s1621_s13 = sadd.s32 4294967295, %s2232_s12   ;;  %p1625_p0 = scmp.ge.s32.totalorder %s2232_s12, 1  ;;  %s2232_s12 = sphi %s2254_s12, %s13_s12  }
   0x2   : > { %p139_p1 = scmp.lt.s32.totalorder %s2232_s12, 3 }
   0x4   : > { %p140_p2 = pnand %p1625_p0, %p139_p1 }
   0x6   : > { %143 = sbr.rel (%p140_p2) target bundleno = 404 (0x194), region = 32 }
   0xb   : > { %v2074_v0 = vld [vmem:[%s2821_s1 + $0x78] sm:$0xff]   ;;  %s1626_s16 = sshll.u32 %s1621_s13, 5  ;;  %v2076_v2 = vld [vmem:[%s2821_s1 + $0x70] sm:$0xff]   ;;  %v2078_v4 = vld [vmem:[%s2821_s1 + $0x68] sm:$0xff]   ;;  %vm1532_vm0 = vcmask 523264  }
   0xc   : > { %v2075_v1 = vld [vmem:[%s2821_s1 + $0x38] sm:$0xff]   ;;  %1753 = vmatprep.subr.bf16.mxu0 %v2074_v0  ;;  %2049 = vmatprep.subr.bf16.mxu1 %v2074_v0  ;;  %p165_p3 = scmp.lt.s32.totalorder %s1626_s16, 63  ;;  %v2077_v3 = vld [vmem:[%s2821_s1 + $0x30] sm:$0xff]   ;;  %v2079_v5 = vld [vmem:[%s2821_s1 + $0x28] sm:$0xff]  }
   0xd   : > { %1754 = vmatpush3.bf16.msra.mxu0 %v2075_v1  ;;  %2057 = vmatpush3.bf16.msra.mxu1 %v2075_v1  ;;  %v2080_v6 = vld [vmem:[%s2821_s1 + $0x60] sm:$0xff]   ;;  %v2082_v8 = vld [vmem:[%s2821_s1 + $0x58] sm:$0xff]   ;;  %v2084_v10 = vld [vmem:[%s2821_s1 + $0x50] sm:$0xff]  }
   0xe   : > { %1755 = vmatprep.subr.bf16.mxu0 %v2076_v2  ;;  %2050 = vmatprep.subr.bf16.mxu1 %v2076_v2  ;;  %s2863_s16 = smov (!%p165_p3, %s1626_s16), 63  ;;  %v2081_v7 = vld [vmem:[%s2821_s1 + $0x20] sm:$0xff]   ;;  %v2083_v9 = vld [vmem:[%s2821_s1 + $0x18] sm:$0xff]   ;;  %v2085_v13 = vld [vmem:[%s2821_s1 + $0x10] sm:$0xff]  }
   0xf   : > { %s2065_s29 = smul.u32 20, %s2863_s16  ;;  %v2086_v14 = vld [vmem:[%s2821_s1 + $0x48] sm:$0xff]   ;;  %v2088_v16 = vld [vmem:[%s2821_s1 + $0x40] sm:$0xff]   ;;  %v2096_v18 = vld [vmem:[%s2821_s1 + $0xf8] sm:$0xff]   ;;  %s1629_s27 = sshll.u32 %s2863_s16, 3 }
  0x10   : > { %v2087_v15 = vld [vmem:[%s2821_s1 + $0x8] sm:$0xff]   ;;  %v2089_v17 = vld [vmem:[%s2821_s1] sm:$0xff]   ;;  %v2099_v19 = vld [vmem:[%s2821_s1 + $0x138] sm:$0xff]   ;;  %s2629_s30 = scalar_lea.vmem %s2823_s3, %s1629_s27 }
  0x11   : > { %1756 = vmatpush3.bf16.msra.mxu0 %v2077_v3  ;;  %2058 = vmatpush3.bf16.msra.mxu1 %v2077_v3  ;;  %s2295_s9 = scalar_lea.vmem %s2820_s0, %s2065_s29  ;;  %v2097_v22 = vld [vmem:[%s2821_s1 + $0xb8] sm:$0xff]   ;;  %v2098_v23 = vld [vmem:[%s2821_s1 + $0xf0] sm:$0xff]   ;;  %v2107_v29 = vld [vmem:[%s2821_s1 + $0xe8] sm:$0xff]  }
  0x12   : > { %1757 = vmatprep.subr.bf16.mxu0 %v2078_v4  ;;  %2051 = vmatprep.subr.bf16.mxu1 %v2078_v4  ;;  %v2092_v11 = vld [vmem:[%s2295_s9 + $0x4] ss:$20 sps:$4 sm:$0xff]   ;;  %v2090_v20 = vld [vmem:[%s2295_s9] ss:$20 sps:$4 sm:$0xff]   ;;  %v2105_v28 = vld [vmem:[%s2295_s9 + $0x28] ss:$20 sps:$4 sm:$0xff]  }
  0x13   : > { %v2095_v12 = vld [vmem:[%s2295_s9 + $0x1e4] ss:$20 sps:$4 sm:$0xff]   ;;  %1049 = vmatprep.mubr.bf16.mxu0 %v2092_v11  ;;  %v2093_v21 = vld [vmem:[%s2295_s9 + $0x1e0] ss:$20 sps:$4 sm:$0xff]   ;;  %v2106_v30 = vld [vmem:[%s2295_s9 + $0x208] ss:$20 sps:$4 sm:$0xff]  }
  0x14   : > { %1145 = vmatprep.mubr.bf16.mxu1 %v2095_v12  ;;  %v2101_v24 = vld [vmem:[%s2295_s9 + $0x2c] ss:$20 sps:$4 sm:$0xff]   ;;  %v2118_v26 = vld [vmem:[%s2821_s1 + $0x130] sm:$0xff]   ;;  %v2117_v36 = vld [vmem:[%s2821_s1 + $0xd8] sm:$0xff]  }
  0x15   : > { %1758 = vmatpush3.bf16.msra.mxu0 %v2079_v5  ;;  %2059 = vmatpush3.bf16.msra.mxu1 %v2079_v5  ;;  %v2103_v25 = vld [vmem:[%s2295_s9 + $0x20c] ss:$20 sps:$4 sm:$0xff]   ;;  %v2100_v27 = vld [vmem:[%s2821_s1 + $0xb0] sm:$0xff]   ;;  %v2119_v40 = vld [vmem:[%s2821_s1 + $0x98] sm:$0xff]  }
  0x16   : > { %1759 = vmatprep.subr.bf16.mxu0 %v2080_v6  ;;  %2052 = vmatprep.subr.bf16.mxu1 %v2080_v6  ;;  %v2108_v31 = vld [vmem:[%s2821_s1 + $0xa8] sm:$0xff]   ;;  %v2109_v33 = vld [vmem:[%s2821_s1 + $0xe0] sm:$0xff]   ;;  %v2120_v41 = vld [vmem:[%s2821_s1 + $0xd0] sm:$0xff]  }
  0x17   : > { %v2111_v32 = vld [vmem:[%s2295_s9 + $0x54] ss:$20 sps:$4 sm:$0xff]   ;;  %v2110_v35 = vld [vmem:[%s2821_s1 + $0xa0] sm:$0xff]   ;;  %v2122_v42 = vld [vmem:[%s2295_s9 + $0x7c] ss:$20 sps:$4 sm:$0xff]  }
  0x18   : > { %v2113_v34 = vld [vmem:[%s2295_s9 + $0x234] ss:$20 sps:$4 sm:$0xff]   ;;  %v2115_v37 = vld [vmem:[%s2295_s9 + $0x50] ss:$20 sps:$4 sm:$0xff]   ;;  %v2126_v46 = vld [vmem:[%s2295_s9 + $0x78] ss:$20 sps:$4 sm:$0xff]  }
  0x19   : > { %1760 = vmatpush3.bf16.msra.mxu0 %v2081_v7  ;;  %2060 = vmatpush3.bf16.msra.mxu1 %v2081_v7  ;;  %v2131_v38 = vld [vmem:[%s2821_s1 + $0x128] sm:$0xff]   ;;  %v2116_v39 = vld [vmem:[%s2295_s9 + $0x230] ss:$20 sps:$4 sm:$0xff]   ;;  %v2152_v52 = vld [vmem:[%s2821_s1 + $0x118] sm:$0xff]  }
  0x1a   : > { %1761 = vmatprep.subr.bf16.mxu0 %v2082_v8  ;;  %2053 = vmatprep.subr.bf16.mxu1 %v2082_v8  ;;  %v2124_v43 = vld [vmem:[%s2295_s9 + $0x25c] ss:$20 sps:$4 sm:$0xff]   ;;  %v2145_v45 = vld [vmem:[%s2821_s1 + $0x120] sm:$0xff]   ;;  %v2127_v47 = vld [vmem:[%s2295_s9 + $0x258] ss:$20 sps:$4 sm:$0xff]  }
  0x1b   : > { %v2121_v44 = vld [vmem:[%s2821_s1 + $0x90] sm:$0xff]   ;;  %v2128_v48 = vld [vmem:[%s2821_s1 + $0xc8] sm:$0xff]   ;;  %v2130_v50 = vld [vmem:[%s2821_s1 + $0xc0] sm:$0xff]  }
  0x1c   : > { %v2129_v49 = vld [vmem:[%s2821_s1 + $0x88] sm:$0xff]   ;;  %v2133_v51 = vld [vmem:[%s2295_s9 + $0xa4] ss:$20 sps:$4 sm:$0xff]   ;;  %v2138_v56 = vld [vmem:[%s2295_s9 + $0xa0] ss:$20 sps:$4 sm:$0xff]  }
  0x1d   : > { %1762 = vmatpush3.bf16.msra.mxu0 %v2083_v9  ;;  %2061 = vmatpush3.bf16.msra.mxu1 %v2083_v9  ;;  %v2137_v53 = vld [vmem:[%s2295_s9 + $0xc] ss:$20 sps:$4 sm:$0xff]   ;;  %v2135_v55 = vld [vmem:[%s2295_s9 + $0x8] ss:$20 sps:$4 sm:$0xff]   ;;  %v2165_v57 = vld [vmem:[%s2821_s1 + $0x110] sm:$0xff]  }
  0x1e   : > { %1763 = vmatprep.subr.bf16.mxu0 %v2084_v10  ;;  %2054 = vmatprep.subr.bf16.mxu1 %v2084_v10  ;;  %v2132_v54 = vld [vmem:[%s2821_s1 + $0x80] sm:$0xff]   ;;  %v2141_v59 = vld [vmem:[%s2295_s9 + $0x34] ss:$20 sps:$4 sm:$0xff]   ;;  %v2148_v0 = vld [vmem:[%s2295_s9 + $0x5c] ss:$20 sps:$4 sm:$0xff]  }
  0x1f   : > { %v2139_v58 = vld [vmem:[%s2295_s9 + $0xcc] ss:$20 sps:$4 sm:$0xff]   ;;  %v2143_v61 = vld [vmem:[%s2295_s9 + $0xc8] ss:$20 sps:$4 sm:$0xff]   ;;  %v2144_v62 = vld [vmem:[%s2295_s9 + $0x30] ss:$20 sps:$4 sm:$0xff]  }
  0x20   : > { %v2172_v60 = vld [vmem:[%s2821_s1 + $0x108] sm:$0xff]   ;;  %v2185_v1 = vld [vmem:[%s2821_s1 + $0x100] sm:$0xff]   ;;  %v2153_v4 = vld [vmem:[%s2295_s9 + $0x11c] ss:$20 sps:$4 sm:$0xff]  }
  0x21   : > { %1764 = vmatpush3.bf16.msra.mxu0 %v2085_v13  ;;  %2062 = vmatpush3.bf16.msra.mxu1 %v2085_v13  ;;  %v2146_v63 = vld [vmem:[%s2295_s9 + $0xf4] ss:$20 sps:$4 sm:$0xff]   ;;  %v2150_v2 = vld [vmem:[%s2295_s9 + $0xf0] ss:$20 sps:$4 sm:$0xff]   ;;  %v2151_v3 = vld [vmem:[%s2295_s9 + $0x58] ss:$20 sps:$4 sm:$0xff]  }
  0x22   : > { %1765 = vmatprep.subr.bf16.mxu0 %v2086_v14  ;;  %2055 = vmatprep.subr.bf16.mxu1 %v2086_v14  ;;  %v2155_v5 = vld [vmem:[%s2295_s9 + $0x84] ss:$20 sps:$4 sm:$0xff]   ;;  %v2158_v7 = vld [vmem:[%s2295_s9 + $0x80] ss:$20 sps:$4 sm:$0xff]   ;;  %v2164_v11 = vld [vmem:[%s2295_s9 + $0xa8] ss:$20 sps:$4 sm:$0xff]  }
  0x23   : > { %v2157_v6 = vld [vmem:[%s2295_s9 + $0x118] ss:$20 sps:$4 sm:$0xff]   ;;  %v2163_v10 = vld [vmem:[%s2295_s9 + $0x140] ss:$20 sps:$4 sm:$0xff]   ;;  %v2170_v14 = vld [vmem:[%s2295_s9 + $0x168] ss:$20 sps:$4 sm:$0xff]  }
  0x24   : > { %v2159_v8 = vld [vmem:[%s2295_s9 + $0x144] ss:$20 sps:$4 sm:$0xff]   ;;  %v2161_v9 = vld [vmem:[%s2295_s9 + $0xac] ss:$20 sps:$4 sm:$0xff]   ;;  %v2168_v13 = vld [vmem:[%s2295_s9 + $0xd4] ss:$20 sps:$4 sm:$0xff]  }
  0x25   : > { %1766 = vmatpush3.bf16.msra.mxu0 %v2087_v15  ;;  %2063 = vmatpush3.bf16.msra.mxu1 %v2087_v15  ;;  %v2166_v12 = vld [vmem:[%s2295_s9 + $0x16c] ss:$20 sps:$4 sm:$0xff]   ;;  %v2171_v15 = vld [vmem:[%s2295_s9 + $0xd0] ss:$20 sps:$4 sm:$0xff]  }
  0x26   : > { %1767 = vmatprep.subr.bf16.mxu0 %v2088_v16  ;;  %2056 = vmatprep.subr.bf16.mxu1 %v2088_v16  ;;  %v2173_v16 = vld [vmem:[%s2295_s9 + $0x194] ss:$20 sps:$4 sm:$0xff]  }
  0x29   : > { %1768 = vmatpush3.bf16.msra.mxu0 %v2089_v17  ;;  %2064 = vmatpush3.bf16.msra.mxu1 %v2089_v17  ;;  %v2175_v17 = vld [vmem:[%s2295_s9 + $0xfc] ss:$20 sps:$4 sm:$0xff]  }
  0x2a   : > { %1865 = vmatprep.subr.bf16.mxu1 %v2096_v18  ;;  %2001 = vmatprep.subr.bf16.mxu0 %v2099_v19  ;;  %v2177_v18 = vld [vmem:[%s2295_s9 + $0x190] ss:$20 sps:$4 sm:$0xff]  }
  0x2c   : > { %1050 = vmatmul.mubr.bf16.vlgmr.msra.gmra.mxu0 %v2090_v20  ;;  %1146 = vmatmul.mubr.bf16.vlgmr.msra.gmra.mxu1 %v2093_v21  ;;  %v2179_v20 = vld [vmem:[%s2295_s9 + $0x1bc] ss:$20 sps:$4 sm:$0xff]   ;;  %v2181_v21 = vld [vmem:[%s2295_s9 + $0x124] ss:$20 sps:$4 sm:$0xff]  }
  0x2d   : > { %1866 = vmatpush3.bf16.msra.mxu1 %v2097_v22  ;;  %2002 = vmatpush3.bf16.msra.mxu0 %v2099_v19  ;;  %v2178_v19 = vld [vmem:[%s2295_s9 + $0xf8] ss:$20 sps:$4 sm:$0xff]  }
  0x2e   : > { %1867 = vmatprep.subr.bf16.mxu1 %v2098_v23  ;;  %1057 = vmatprep.mubr.bf16.mxu0 %v2101_v24  ;;  %v2183_v22 = vld [vmem:[%s2295_s9 + $0x1b8] ss:$20 sps:$4 sm:$0xff]   ;;  %v2184_v23 = vld [vmem:[%s2295_s9 + $0x120] ss:$20 sps:$4 sm:$0xff]  }
  0x2f   : > { %1153 = vmatprep.mubr.bf16.mxu1 %v2103_v25  ;;  %2003 = vmatprep.subr.bf16.mxu0 %v2118_v26  ;;  %v2186_v24 = vld [vmem:[%s2295_s9 + $0x14c] ss:$20 sps:$4 sm:$0xff]   ;;  %v2188_v25 = vld [vmem:[%s2295_s9 + $0x10] ss:$20 sps:$4 sm:$0xff]  }
  0x31   : > { %1868 = vmatpush3.bf16.msra.mxu1 %v2100_v27  ;;  %2004 = vmatpush3.bf16.msra.mxu0 %v2118_v26  ;;  %v2189_v26 = vld [vmem:[%s2295_s9 + $0x148] ss:$20 sps:$4 sm:$0xff]   ;;  %v2190_v27 = vld [vmem:[%s2295_s9 + $0x38] ss:$20 sps:$4 sm:$0xff]  }
  0x32   : > { %1869 = vmatprep.subr.bf16.mxu1 %v2107_v29  ;;  %2005 = vmatprep.subr.bf16.mxu0 %v2131_v38  ;;  %v2193_v29 = vld [vmem:[%s2295_s9 + $0x60] ss:$20 sps:$4 sm:$0xff]  }
  0x34   : > { %1058 = vmatmul.mubr.bf16.gmra.mxu0 %v2105_v28  ;;  %1154 = vmatmul.mubr.bf16.gmra.mxu1 %v2106_v30  ;;  %v2191_v28 = vld [vmem:[%s2295_s9 + $0x174] ss:$20 sps:$4 sm:$0xff]   ;;  %v2194_v30 = vld [vmem:[%s2295_s9 + $0x170] ss:$20 sps:$4 sm:$0xff]  }
  0x35   : > { %1870 = vmatpush3.bf16.msra.mxu1 %v2108_v31  ;;  %1065 = vmatprep.mubr.bf16.mxu0 %v2111_v32  ;;  %v2195_v31 = vld [vmem:[%s2295_s9 + $0x88] ss:$20 sps:$4 sm:$0xff]  }
  0x36   : > { %1871 = vmatprep.subr.bf16.mxu1 %v2109_v33  ;;  %1161 = vmatprep.mubr.bf16.mxu1 %v2113_v34  ;;  %v2196_v32 = vld [vmem:[%s2295_s9 + $0x19c] ss:$20 sps:$4 sm:$0xff]   ;;  %v2199_v34 = vld [vmem:[%s2295_s9 + $0x198] ss:$20 sps:$4 sm:$0xff]  }
  0x37   : > { %2006 = vmatpush3.bf16.msra.mxu0 %v2131_v38  ;;  %v2198_v33 = vld [vmem:[%s2295_s9 + $0xb0] ss:$20 sps:$4 sm:$0xff]   ;;  %v2204_v38 = vld [vmem:[%s2295_s9 + $0x1c0] ss:$20 sps:$4 sm:$0xff]  }
  0x38   : > { %2007 = vmatprep.subr.bf16.mxu0 %v2145_v45 }
  0x39   : > { %1872 = vmatpush3.bf16.msra.mxu1 %v2110_v35  ;;  %v2200_v35 = vld [vmem:[%s2295_s9 + $0xd8] ss:$20 sps:$4 sm:$0xff]  }
  0x3a   : > { %1873 = vmatprep.subr.bf16.mxu1 %v2117_v36  ;;  %v2201_v36 = vld [vmem:[%s2295_s9 + $0x1c4] ss:$20 sps:$4 sm:$0xff]  }
  0x3b   : > { %2008 = vmatpush3.bf16.msra.mxu0 %v2145_v45  ;;  %v2213_v45 = vld [vmem:[%s2295_s9 + $0x1a0] ss:$20 sps:$4 sm:$0xff]  }
  0x3c   : > { %1066 = vmatmul.mubr.bf16.gmra.mxu0 %v2115_v37  ;;  %1162 = vmatmul.mubr.bf16.gmra.mxu1 %v2116_v39  ;;  %v2203_v37 = vld [vmem:[%s2295_s9 + $0x100] ss:$20 sps:$4 sm:$0xff]   ;;  %v2205_v39 = vld [vmem:[%s2295_s9 + $0x128] ss:$20 sps:$4 sm:$0xff]  }
  0x3d   : > { %1874 = vmatpush3.bf16.msra.mxu1 %v2119_v40  ;;  %1073 = vmatprep.mubr.bf16.mxu0 %v2122_v42  ;;  %v2206_v40 = vld [vmem:[%s2295_s9 + $0x1ec] ss:$20 sps:$4 sm:$0xff]   ;;  %v2209_v42 = vld [vmem:[%s2295_s9 + $0x1e8] ss:$20 sps:$4 sm:$0xff]  }
  0x3e   : > { %1875 = vmatprep.subr.bf16.mxu1 %v2120_v41  ;;  %1169 = vmatprep.mubr.bf16.mxu1 %v2124_v43  ;;  %v2208_v41 = vld [vmem:[%s2295_s9 + $0x150] ss:$20 sps:$4 sm:$0xff]   ;;  %v2210_v43 = vld [vmem:[%s2295_s9 + $0x178] ss:$20 sps:$4 sm:$0xff]  }
  0x3f   : > { %2009 = vmatprep.subr.bf16.mxu0 %v2152_v52 }
  0x40   : > { %2010 = vmatpush3.bf16.msra.mxu0 %v2152_v52  ;;  %v2221_v52 = vld [vmem:[%s2295_s9 + $0x264] ss:$20 sps:$4 sm:$0xff]  }
  0x41   : > { %1876 = vmatpush3.bf16.msra.mxu1 %v2121_v44  ;;  %2011 = vmatprep.subr.bf16.mxu0 %v2165_v57  ;;  %v2211_v44 = vld [vmem:[%s2295_s9 + $0x214] ss:$20 sps:$4 sm:$0xff]  }
  0x42   : > { %1877 = vmatprep.subr.bf16.mxu1 %v2128_v48  ;;  %v2216_v48 = vld [vmem:[%s2295_s9 + $0x23c] ss:$20 sps:$4 sm:$0xff]  }
  0x44   : > { %1074 = vmatmul.mubr.bf16.gmra.mxu0 %v2126_v46  ;;  %1170 = vmatmul.mubr.bf16.gmra.mxu1 %v2127_v47  ;;  %v2214_v46 = vld [vmem:[%s2295_s9 + $0x210] ss:$20 sps:$4 sm:$0xff]   ;;  %v2215_v47 = vld [vmem:[%s2295_s9 + $0x1c8] ss:$20 sps:$4 sm:$0xff]  }
  0x45   : > { %1878 = vmatpush3.bf16.msra.mxu1 %v2129_v49  ;;  %1081 = vmatprep.mubr.bf16.mxu0 %v2133_v51  ;;  %v2218_v49 = vld [vmem:[%s2295_s9 + $0x1f0] ss:$20 sps:$4 sm:$0xff]   ;;  %v2220_v51 = vld [vmem:[%s2295_s9 + $0x218] ss:$20 sps:$4 sm:$0xff]  }
  0x46   : > { %1879 = vmatprep.subr.bf16.mxu1 %v2130_v50  ;;  %1210 = vmatprep.mubr.bf16.mxu1 %v2137_v53  ;;  %v2219_v50 = vld [vmem:[%s2295_s9 + $0x238] ss:$20 sps:$4 sm:$0xff]   ;;  %v2223_v53 = vld [vmem:[%s2295_s9 + $0x240] ss:$20 sps:$4 sm:$0xff]  }
  0x47   : > { %2012 = vmatpush3.bf16.msra.mxu0 %v2165_v57 }
  0x48   : > { %2013 = vmatprep.subr.bf16.mxu0 %v2172_v60 }
  0x49   : > { %1880 = vmatpush3.bf16.msra.mxu1 %v2132_v54  ;;  %v2224_v54 = vld [vmem:[%s2295_s9 + $0x260] ss:$20 sps:$4 sm:$0xff]  }
  0x4b   : > { %2014 = vmatpush3.bf16.msra.mxu0 %v2172_v60 }
  0x4c   : > { %1082 = vmatmul.mubr.bf16.gmra.mxu0 %v2138_v56  ;;  %1211 = vmatmul.mubr.bf16.vlgmr.msra.gmra.mxu1 %v2135_v55  ;;  %v2225_v55 = vld [vmem:[%s2295_s9 + $0x268] ss:$20 sps:$4 sm:$0xff]  }
  0x4d   : > { %1089 = vmatprep.mubr.bf16.mxu0 %v2139_v58  ;;  %1218 = vmatprep.mubr.bf16.mxu1 %v2141_v59 }
  0x4e   : > { %2015 = vmatprep.subr.bf16.mxu0 %v2185_v1 }
  0x4f   : > { %2016 = vmatpush3.bf16.msra.mxu0 %v2185_v1 }
  0x54   : > { %1090 = vmatmul.mubr.bf16.gmra.mxu0 %v2143_v61  ;;  %1219 = vmatmul.mubr.bf16.gmra.mxu1 %v2144_v62 }
  0x55   : > { %1097 = vmatprep.mubr.bf16.mxu0 %v2146_v63  ;;  %1226 = vmatprep.mubr.bf16.mxu1 %v2148_v0 }
  0x5c   : > { %1098 = vmatmul.mubr.bf16.gmra.mxu0 %v2150_v2  ;;  %1227 = vmatmul.mubr.bf16.gmra.mxu1 %v2151_v3 }
  0x5d   : > { %1105 = vmatprep.mubr.bf16.mxu0 %v2153_v4  ;;  %1234 = vmatprep.mubr.bf16.mxu1 %v2155_v5 }
  0x64   : > { %1106 = vmatmul.mubr.bf16.gmra.mxu0 %v2157_v6  ;;  %1235 = vmatmul.mubr.bf16.gmra.mxu1 %v2158_v7 }
  0x65   : > { %1113 = vmatprep.mubr.bf16.mxu0 %v2159_v8  ;;  %1242 = vmatprep.mubr.bf16.mxu1 %v2161_v9 }
  0x6c   : > { %1114 = vmatmul.mubr.bf16.gmra.mxu0 %v2163_v10  ;;  %1243 = vmatmul.mubr.bf16.gmra.mxu1 %v2164_v11 }
  0x6d   : > { %1121 = vmatprep.mubr.bf16.mxu0 %v2166_v12  ;;  %1250 = vmatprep.mubr.bf16.mxu1 %v2168_v13 }
  0x74   : > { %1122 = vmatmul.mubr.bf16.gmra.mxu0 %v2170_v14  ;;  %1251 = vmatmul.mubr.bf16.gmra.mxu1 %v2171_v15 }
  0x75   : > { %1129 = vmatprep.mubr.bf16.mxu0 %v2173_v16  ;;  %1258 = vmatprep.mubr.bf16.mxu1 %v2175_v17 }
  0x7c   : > { %1130 = vmatmul.mubr.bf16.gmra.mxu0 %v2177_v18  ;;  %1259 = vmatmul.mubr.bf16.gmra.mxu1 %v2178_v19 }
  0x7d   : > { %1137 = vmatprep.mubr.bf16.mxu0 %v2179_v20  ;;  %1266 = vmatprep.mubr.bf16.mxu1 %v2181_v21 }
  0x84   : > { %1138 = vmatmul.mubr.bf16.gmra.mxu0 %v2183_v22  ;;  %1267 = vmatmul.mubr.bf16.gmra.mxu1 %v2184_v23 }
  0x85   : > { %1274 = vmatprep.mubr.bf16.mxu1 %v2186_v24  ;;  %2017 = vmatprep.mubr.bf16.mxu0 %v2188_v25 }
  0x8c   : > { %1275 = vmatmul.mubr.bf16.gmra.mxu1 %v2189_v26  ;;  %2018 = vmatmul.mubr.bf16.vlgmr.msra.gmra.mxu0 %v2190_v27 }
  0x8d   : > { %1282 = vmatprep.mubr.bf16.mxu1 %v2191_v28  ;;  %2021 = vmatprep.mubr.bf16.mxu0 %v2193_v29 }
  0x94   : > { %1283 = vmatmul.mubr.bf16.gmra.mxu1 %v2194_v30  ;;  %2022 = vmatmul.mubr.bf16.gmra.mxu0 %v2195_v31 }
  0x95   : > { %1290 = vmatprep.mubr.bf16.mxu1 %v2196_v32  ;;  %2025 = vmatprep.mubr.bf16.mxu0 %v2198_v33 }
  0x9c   : > { %1291 = vmatmul.mubr.bf16.gmra.mxu1 %v2199_v34  ;;  %2026 = vmatmul.mubr.bf16.gmra.mxu0 %v2200_v35 }
  0x9d   : > { %1298 = vmatprep.mubr.bf16.mxu1 %v2201_v36  ;;  %2029 = vmatprep.mubr.bf16.mxu0 %v2203_v37 }
  0xa4   : > { %1299 = vmatmul.mubr.bf16.gmra.mxu1 %v2204_v38  ;;  %2030 = vmatmul.mubr.bf16.gmra.mxu0 %v2205_v39 }
  0xa5   : > { %1306 = vmatprep.mubr.bf16.mxu1 %v2206_v40  ;;  %2033 = vmatprep.mubr.bf16.mxu0 %v2208_v41 }
  0xac   : > { %1307 = vmatmul.mubr.bf16.gmra.mxu1 %v2209_v42  ;;  %2034 = vmatmul.mubr.bf16.gmra.mxu0 %v2210_v43 }
  0xad   : > { %1314 = vmatprep.mubr.bf16.mxu1 %v2211_v44  ;;  %2037 = vmatprep.mubr.bf16.mxu0 %v2213_v45 }
  0xb4   : > { %1315 = vmatmul.mubr.bf16.gmra.mxu1 %v2214_v46  ;;  %2038 = vmatmul.mubr.bf16.gmra.mxu0 %v2215_v47 }
  0xb5   : > { %1322 = vmatprep.mubr.bf16.mxu1 %v2216_v48  ;;  %2041 = vmatprep.mubr.bf16.mxu0 %v2218_v49 }
  0xbc   : > { %1323 = vmatmul.mubr.bf16.gmra.mxu1 %v2219_v50  ;;  %2042 = vmatmul.mubr.bf16.gmra.mxu0 %v2220_v51 }
  0xbd   : > { %1330 = vmatprep.mubr.bf16.mxu1 %v2221_v52  ;;  %2045 = vmatprep.mubr.bf16.mxu0 %v2223_v53 }
  0xc4   : > { %1331 = vmatmul.mubr.bf16.gmra.mxu1 %v2224_v54  ;;  %2046 = vmatmul.mubr.bf16.gmra.mxu0 %v2225_v55 }
  0xec   : > { %v1769_v56 = vpop.f32.mrf.mxu0  ;;  %v1841_v57 = vpop.f32.mrf.mxu1 }
  0xee   : > { %v1770_v58 = vpop.f32.mrf.mxu0  ;;  %v1842_v59 = vpop.f32.mrf.mxu1 }
  0xef   : > { %v2470_v60 = vadd.f32 %v1770_v58, %v1769_v56  ;;  %v2472_v61 = vadd.f32 %v1842_v59, %v1841_v57 }
  0xf0   : > { %v1772_v62 = vpop.f32.mrf.mxu0  ;;  %v1844_v63 = vpop.f32.mrf.mxu1 }
  0xf1   : > { %2824 = vst [vmem:[#allocation2_spill] sm:$0xff] %v2472_v61 }
  0xf2   : > { %v1773_v0 = vpop.f32.mrf.mxu0  ;;  %v1845_v1 = vpop.f32.mrf.mxu1 }
  0xf3   : > { %v2474_v2 = vadd.f32 %v1773_v0, %v1772_v62  ;;  %v2476_v3 = vadd.f32 %v1845_v1, %v1844_v63 }
  0xf4   : > { %v1775_v4 = vpop.f32.mrf.mxu0  ;;  %v1847_v5 = vpop.f32.mrf.mxu1 }
  0xf5   : > { %2825 = vst [vmem:[#allocation3_spill] sm:$0xff] %v2476_v3 }
  0xf6   : > { %v1776_v6 = vpop.f32.mrf.mxu0  ;;  %v1848_v7 = vpop.f32.mrf.mxu1 }
  0xf7   : > { %v2478_v8 = vadd.f32 %v1776_v6, %v1775_v4  ;;  %v2480_v9 = vadd.f32 %v1848_v7, %v1847_v5 }
  0xf8   : > { %v1778_v10 = vpop.f32.mrf.mxu0  ;;  %v1850_v11 = vpop.f32.mrf.mxu1 }
  0xf9   : > { %2826 = vst [vmem:[#allocation4_spill] sm:$0xff] %v2480_v9  ;;  %v2601_v9 = vld [vmem:[%s2822_s2] ss:$0 sm:$0xff] }
  0xfa   : > { %v1779_v12 = vpop.f32.mrf.mxu0  ;;  %v1851_v13 = vpop.f32.mrf.mxu1 }
  0xfb   : > { %v2482_v14 = vadd.f32 %v1779_v12, %v1778_v10  ;;  %v2484_v15 = vadd.f32 %v1851_v13, %v1850_v11 }
  0xfc   : > { %v1781_v16 = vpop.f32.mrf.mxu0  ;;  %v1853_v17 = vpop.f32.mrf.mxu1 }
  0xfd   : > { %2827 = vst [vmem:[#allocation5_spill] sm:$0xff] %v2484_v15 }
  0xfe   : > { %v1782_v18 = vpop.f32.mrf.mxu0  ;;  %v1854_v19 = vpop.f32.mrf.mxu1 }
  0xff   : > { %v2486_v20 = vadd.f32 %v1782_v18, %v1781_v16  ;;  %v2488_v21 = vadd.f32 %v1854_v19, %v1853_v17 }
 0x100   : > { %v1784_v22 = vpop.f32.mrf.mxu0  ;;  %v1856_v23 = vpop.f32.mrf.mxu1 }
 0x101   : > { %2828 = vst [vmem:[#allocation6_spill] sm:$0xff] %v2488_v21 }
 0x102   : > { %v1785_v24 = vpop.f32.mrf.mxu0  ;;  %v1857_v25 = vpop.f32.mrf.mxu1 }
 0x103   : > { %v2490_v26 = vadd.f32 %v1785_v24, %v1784_v22  ;;  %v2492_v27 = vadd.f32 %v1857_v25, %v1856_v23 }
 0x104   : > { %v1787_v28 = vpop.f32.mrf.mxu0  ;;  %v1859_v29 = vpop.f32.mrf.mxu1 }
 0x105   : > { %2829 = vst [vmem:[#allocation7_spill] sm:$0xff] %v2492_v27 }
 0x106   : > { %v1788_v30 = vpop.f32.mrf.mxu0  ;;  %v1860_v31 = vpop.f32.mrf.mxu1 }
 0x107   : > { %v2494_v32 = vadd.f32 %v1788_v30, %v1787_v28  ;;  %v2496_v33 = vadd.f32 %v1860_v31, %v1859_v29 }
 0x108   : > { %v1790_v34 = vpop.f32.mrf.mxu0  ;;  %v1862_v35 = vpop.f32.mrf.mxu1 }
 0x109   : > { %2830 = vst [vmem:[#allocation8_spill] sm:$0xff] %v2496_v33 }
 0x10a   : > { %v1791_v36 = vpop.f32.mrf.mxu0  ;;  %v1863_v37 = vpop.f32.mrf.mxu1 }
 0x10b   : > { %v2498_v38 = vadd.f32 %v1791_v36, %v1790_v34  ;;  %v2500_v39 = vadd.f32 %v1863_v37, %v1862_v35 }
 0x10c   : > { %v1793_v40 = vpop.f32.mrf.mxu0  ;;  %v2502_v41 = vpop.f32.mrf.mxu1 }
 0x10d   : > { %2831 = vst [vmem:[#allocation9_spill] sm:$0xff] %v2500_v39 }
 0x10e   : > { %v1794_v42 = vpop.f32.mrf.mxu0  ;;  %v2504_v43 = vpop.f32.mrf.mxu1 }
 0x10f   : > { %v2506_v44 = vadd.f32 %v1794_v42, %v1793_v40 }
 0x110   : > { %v1796_v45 = vpop.f32.mrf.mxu0  ;;  %v2508_v46 = vpop.f32.mrf.mxu1 }
 0x112   : > { %v1797_v47 = vpop.f32.mrf.mxu0  ;;  %v2510_v48 = vpop.f32.mrf.mxu1 }
 0x113   : > { %v2512_v49 = vadd.f32 %v1797_v47, %v1796_v45 }
 0x114   : > { %v1799_v50 = vpop.f32.mrf.mxu0  ;;  %v1887_v51 = vpop.f32.mrf.mxu1 }
 0x116   : > { %v1800_v52 = vpop.f32.mrf.mxu0  ;;  %v1888_v53 = vpop.f32.mrf.mxu1 }
 0x117   : > { %v2514_v54 = vadd.f32 %v1800_v52, %v1799_v50  ;;  %v1889_v61 = vadd.f32 %v1888_v53, %v1887_v51  ;;  %v1052_v51 = vadd.f32 %v2470_v60, %v2601_v9 }
 0x118   : > { %v1802_v55 = vpop.f32.mrf.mxu0  ;;  %v1890_v56 = vpop.f32.mrf.mxu1 }
 0x11a   : > { %v1803_v57 = vpop.f32.mrf.mxu0  ;;  %v1891_v58 = vpop.f32.mrf.mxu1 }
 0x11b   : > { %v2516_v59 = vadd.f32 %v1803_v57, %v1802_v55  ;;  %v1892_v53 = vadd.f32 %v1891_v58, %v1890_v56 }
 0x11c   : > { %v1805_v62 = vpop.f32.mrf.mxu0  ;;  %v2518_v63 = vpop.f32.mrf.mxu1 }
 0x11e   : > { %v1806_v0 = vpop.f32.mrf.mxu0  ;;  %v2520_v1 = vpop.f32.mrf.mxu1 }
 0x11f   : > { %v2522_v4 = vadd.f32 %v1806_v0, %v1805_v62 }
 0x120   : > { %v1808_v5 = vpop.f32.mrf.mxu0  ;;  %v2524_v6 = vpop.f32.mrf.mxu1 }
 0x122   : > { %v1809_v7 = vpop.f32.mrf.mxu0  ;;  %v2526_v10 = vpop.f32.mrf.mxu1 }
 0x123   : > { %v2528_v11 = vadd.f32 %v1809_v7, %v1808_v5 }
 0x124   : > { %v2530_v12 = vpop.f32.mrf.mxu0  ;;  %v1899_v13 = vpop.f32.mrf.mxu1 }
 0x126   : > { %v2532_v16 = vpop.f32.mrf.mxu0  ;;  %v1900_v17 = vpop.f32.mrf.mxu1 }
 0x127   : > { %v1901_v56 = vadd.f32 %v1900_v17, %v1899_v13  ;;  %v1068_v13 = vadd.f32 %v2486_v20, %v2601_v9  ;;  %v1898_v20 = vadd.f32 %v2526_v10, %v2524_v6 }
 0x128   : > { %v2534_v18 = vpop.f32.mrf.mxu0  ;;  %v2536_v19 = vpop.f32.mrf.mxu1 }
 0x12a   : > { %v2538_v22 = vpop.f32.mrf.mxu0  ;;  %v2540_v23 = vpop.f32.mrf.mxu1 }
 0x12c   : > { %v2542_v24 = vpop.f32.mrf.mxu0  ;;  %v2544_v25 = vpop.f32.mrf.mxu1 }
 0x12e   : > { %v2546_v28 = vpop.f32.mrf.mxu0  ;;  %v2548_v29 = vpop.f32.mrf.mxu1 }
 0x130   : > { %v2550_v30 = vpop.f32.mrf.mxu0  ;;  %v2552_v31 = vpop.f32.mrf.mxu1 }
 0x131   : > { %2832 = vst [vmem:[#allocation10_spill] sm:$0xff] %v2550_v30 }
 0x132   : > { %v2554_v34 = vpop.f32.mrf.mxu0  ;;  %v2556_v35 = vpop.f32.mrf.mxu1 }
 0x133   : > { %2833 = vst [vmem:[#allocation11_spill] sm:$0xff] %v2554_v34 }
 0x134   : > { %v2558_v36 = vpop.f32.mrf.mxu0  ;;  %v2560_v37 = vpop.f32.mrf.mxu1 }
 0x136   : > { %v2562_v40 = vpop.f32.mrf.mxu0  ;;  %v2564_v42 = vpop.f32.mrf.mxu1 }
 0x138   : > { %v2566_v45 = vpop.f32.mrf.mxu0  ;;  %v2568_v47 = vpop.f32.mrf.mxu1 }
 0x13a   : > { %v2570_v50 = vpop.f32.mrf.mxu0  ;;  %v2572_v52 = vpop.f32.mrf.mxu1 }
 0x13b   : > { %2834 = vst [vmem:[#allocation12_spill] sm:$0xff] %v2570_v50  ;;  %v1063_v50 = vadd.f32 %v2482_v14, %v2601_v9 }
 0x13c   : > { %v2574_v55 = vpop.f32.mrf.mxu0  ;;  %v2576_v57 = vpop.f32.mrf.mxu1 }
 0x13d   : > { %2835 = vst [vmem:[#allocation13_spill] sm:$0xff] %v2574_v55  ;;  %v1883_v55 = vadd.f32 %v2504_v43, %v2502_v41 }
 0x13e   : > { %v2578_v62 = vpop.f32.mrf.mxu0  ;;  %v2580_v0 = vpop.f32.mrf.mxu1 }
 0x13f   : > { %2836 = vst [vmem:[#allocation14_spill] sm:$0xff] %v2578_v62  ;;  %v1060_v62 = vadd.f32 %v2478_v8, %v2601_v9  ;;  %v1886_v8 = vadd.f32 %v2510_v48, %v2508_v46  ;;  %v1213_v43 = vadd.f32 %v1883_v55, %v1052_v51  ;;  %v1224_v46 = vadd.f32 %v1892_v53, %v1063_v50 }
 0x140   : > { %v2582_v5 = vpop.f32.mrf.mxu0  ;;  %v2584_v7 = vpop.f32.mrf.mxu1  ;;  %v1076_v48 = vadd.f32 %v2494_v32, %v2601_v9  ;;  %v1895_v55 = vadd.f32 %v2520_v1, %v2518_v63  ;;  %v1904_v32 = vadd.f32 %v2540_v23, %v2536_v19 }
 0x141   : > { %2837 = vst [vmem:[#allocation15_spill] sm:$0xff] %v2582_v5  ;;  %v1221_v34 = vadd.f32 %v1889_v61, %v1060_v62 }
 0x142   : > { %v2586_v39 = vpop.f32.mrf.mxu0  ;;  %v2588_v33 = vpop.f32.mrf.mxu1  ;;  %v1237_v1 = vadd.f32 %v1901_v56, %v1076_v48  ;;  %v1229_v23 = vadd.f32 %v1895_v55, %v1068_v13 }
 0x143   : > { %2838 = vst [vmem:[#allocation16_spill] sm:$0xff] %v2586_v39 }
 0x144   : > { %v2590_v27 = vpop.f32.mrf.mxu0  ;;  %v2592_v21 = vpop.f32.mrf.mxu1 }
 0x145   : > { %2839 = vst [vmem:[#allocation17_spill] sm:$0xff] %v2590_v27 }
 0x146   : > { %v2594_v3 = vpop.f32.mrf.mxu0  ;;  %v2596_v15 = vpop.f32.mrf.mxu1 }
 0x147   : > { %2840 = vst [vmem:[#allocation18_spill] sm:$0xff] %v2594_v3 }
 0x148   : > { %v2603_v5 = vpop.f32.mrf.mxu0  ;;  %v2605_v39 = vpop.f32.mrf.mxu1 }
 0x149   : > { %2841 = vst [vmem:[#allocation19_spill] sm:$0xff] %v2603_v5 }
 0x14a   : > { %v2611_v27 = vpop.f32.mrf.mxu0  ;;  %v2613_v3 = vpop.f32.mrf.mxu1 }
 0x14b   : > { %2842 = vst [vmem:[#allocation20_spill] sm:$0xff] %v2611_v27  ;;  %v1055_v27 = vadd.f32 %v2474_v2, %v2601_v9 }
 0x14c   : > { %v2618_v30 = vpop.f32.mrf.mxu1  ;;  %v2019_v5 = vpop.f32.mrf.mxu0 }
 0x14d   : > { %v1382_v41 = vadd.f32 %v2019_v5, %v1221_v34  ;;  %v1216_v51 = vadd.f32 %v1886_v8, %v1055_v27 }
 0x14e   : > { %v2631_v60 = vpop.f32.mrf.mxu1  ;;  %v1373_v61 = vpop.f32.mrf.mxu0 }
 0x14f   : > { %v1502_v14 = vmax.f32 %v1382_v41, 0.0  ;;  %v1374_v58 = vadd.f32 %v1373_v61, %v1213_v43  ;;  %v1079_v41 = vadd.f32 %v2498_v38, %v2601_v9  ;;  %v1071_v61 = vadd.f32 %v2490_v26, %v2601_v9 }
 0x150   : > { %v2635_v34 = vpop.f32.mrf.mxu1  ;;  %v2020_v2 = vpop.f32.mrf.mxu0  ;;  %v1913_v38 = vadd.f32 %v2564_v42, %v2560_v37  ;;  %v1907_v26 = vadd.f32 %v2548_v29, %v2544_v25 }
 0x151   : > { %1535 = vst.msk [vmem:[%s2629_s30 + $0x10] sm:$0xff] %vm1532_vm0, %v1502_v14  ;;  %v1500_v62 = vmax.f32 %v1374_v58, 0.0  ;;  %v1385_v5 = vadd.f32 %v2020_v2, %v1224_v46  ;;  %v1240_v10 = vadd.f32 %v1904_v32, %v1079_v41  ;;  %v1092_v46 = vadd.f32 %v2514_v54, %v2601_v9 }
 0x152   : > { %v2643_v17 = vpop.f32.mrf.mxu1  ;;  %v1376_v50 = vpop.f32.mrf.mxu0  ;;  %v1232_v42 = vadd.f32 %v1898_v20, %v1071_v61  ;;  %v1916_v54 = vadd.f32 %v2572_v52, %v2568_v47  ;;  %v1813_v32 = vadd.f32 %v2532_v16, %v2530_v12  ;;  %v1087_v41 = vadd.f32 %v2512_v49, %v2601_v9 }
 0x153   : > { %1533 = vst.msk [vmem:[%s2629_s30] sm:$0xff] %vm1532_vm0, %v1500_v62  ;;  %v1503_v53 = vmax.f32 %v1385_v5, 0.0  ;;  %v1377_v63 = vadd.f32 %v1376_v50, %v1216_v51  ;;  %v1084_v62 = vadd.f32 %v2506_v44, %v2601_v9  ;;  %v1253_v29 = vadd.f32 %v1913_v38, %v1092_v46 }
 0x154   : > { %v2651_v43 = vpop.f32.mrf.mxu1  ;;  %v2023_v27 = vpop.f32.mrf.mxu0  ;;  %v1095_v50 = vadd.f32 %v2516_v59, %v2601_v9  ;;  %v1925_v12 = vadd.f32 %v2596_v15, %v2592_v21  ;;  %v1108_v20 = vadd.f32 %v1813_v32, %v2601_v9  ;;  %v2845_v32 = vld [vmem:[#allocation11_spill] sm:$0xff] }
 0x155   : > { %1536 = vst.msk [vmem:[%s2629_s30 + $0x18] sm:$0xff] %vm1532_vm0, %v1503_v53  ;;  %v1501_v8 = vmax.f32 %v1377_v63, 0.0  ;;  %v1398_v19 = vadd.f32 %v2023_v27, %v1237_v1  ;;  %v1910_v63 = vadd.f32 %v2556_v35, %v2552_v31  ;;  %v1245_v1 = vadd.f32 %v1907_v26, %v1084_v62 }
 0x156   : > { %v2659_v14 = vpop.f32.mrf.mxu1  ;;  %v1389_v56 = vpop.f32.mrf.mxu0  ;;  %v1256_v35 = vadd.f32 %v1916_v54, %v1095_v50  ;;  %v2843_v54 = vld [vmem:[#allocation12_spill] sm:$0xff]  ;;  %v2844_v50 = vld [vmem:[#allocation10_spill] sm:$0xff] }
 0x157   : > { %1534 = vst.msk [vmem:[%s2629_s30 + $0x8] sm:$0xff] %vm1532_vm0, %v1501_v8  ;;  %v1506_v58 = vmax.f32 %v1398_v19, 0.0  ;;  %v1390_v6 = vadd.f32 %v1389_v56, %v1229_v23  ;;  %v1816_v8 = vadd.f32 %v2538_v22, %v2534_v18  ;;  %v1919_v23 = vadd.f32 %v2580_v0, %v2576_v57 }
 0x158   : > { %v2667_v48 = vpop.f32.mrf.mxu1  ;;  %v2024_v2 = vpop.f32.mrf.mxu0  ;;  %v1248_v61 = vadd.f32 %v1910_v63, %v1087_v41  ;;  %v1100_v56 = vadd.f32 %v2522_v4, %v2601_v9  ;;  %v1928_v18 = vadd.f32 %v2613_v3, %v2605_v39  ;;  %v1269_v57 = vadd.f32 %v1925_v12, %v1108_v20  ;;  %v2846_v41 = vld [vmem:[#allocation17_spill] sm:$0xff] }
 0x159   : > { %1539 = vst.msk [vmem:[%s2629_s30 + $0x30] sm:$0xff] %vm1532_vm0, %v1506_v58  ;;  %v1504_v55 = vmax.f32 %v1390_v6, 0.0  ;;  %v1401_v37 = vadd.f32 %v2024_v2, %v1240_v10  ;;  %v1111_v0 = vadd.f32 %v1816_v8, %v2601_v9  ;;  %v1825_v10 = vadd.f32 %v2562_v40, %v2558_v36 }
 0x15a   : > { %v2675_v5 = vpop.f32.mrf.mxu1  ;;  %v1392_v51 = vpop.f32.mrf.mxu0  ;;  %v1922_v4 = vadd.f32 %v2588_v33, %v2584_v7  ;;  %v1261_v39 = vadd.f32 %v1919_v23, %v1100_v56  ;;  %v1937_v36 = vadd.f32 %v2659_v14, %v2651_v43  ;;  %v2849_v23 = vld [vmem:[#allocation14_spill] sm:$0xff] }
 0x15b   : > { %1537 = vst.msk [vmem:[%s2629_s30 + $0x20] sm:$0xff] %vm1532_vm0, %v1504_v55  ;;  %v1507_v13 = vmax.f32 %v1401_v37, 0.0  ;;  %v1393_v25 = vadd.f32 %v1392_v51, %v1232_v42  ;;  %v1103_v55 = vadd.f32 %v2528_v11, %v2601_v9  ;;  %v1819_v37 = vadd.f32 %v2546_v28, %v2542_v24 }
 0x15c   : > { %v2685_v53 = vpop.f32.mrf.mxu1  ;;  %v2027_v44 = vpop.f32.mrf.mxu0  ;;  %v1272_v7 = vadd.f32 %v1928_v18, %v1111_v0  ;;  %v1124_v51 = vadd.f32 %v1825_v10, %v2601_v9  ;;  %v1931_v24 = vadd.f32 %v2631_v60, %v2618_v30 }
 0x15d   : > { %1540 = vst.msk [vmem:[%s2629_s30 + $0x38] sm:$0xff] %vm1532_vm0, %v1507_v13  ;;  %v1505_v47 = vmax.f32 %v1393_v25, 0.0  ;;  %v1414_v52 = vadd.f32 %v2027_v44, %v1253_v29  ;;  %v1828_v13 = vadd.f32 %v2843_v54, %v2566_v45  ;;  %v1264_v14 = vadd.f32 %v1922_v4, %v1103_v55  ;;  %v2853_v55 = vld [vmem:[#allocation16_spill] sm:$0xff] }
 0x15e   : > { %v2693_v27 = vpop.f32.mrf.mxu1  ;;  %v1405_v59 = vpop.f32.mrf.mxu0  ;;  %v1116_v29 = vadd.f32 %v1819_v37, %v2601_v9  ;;  %v1822_v44 = vadd.f32 %v2845_v32, %v2844_v50  ;;  %v1940_v45 = vadd.f32 %v2675_v5, %v2667_v48  ;;  %v1285_v60 = vadd.f32 %v1937_v36, %v1124_v51 }
 0x15f   : > { %1538 = vst.msk [vmem:[%s2629_s30 + $0x28] sm:$0xff] %vm1532_vm0, %v1505_v47  ;;  %v1510_v16 = vmax.f32 %v1414_v52, 0.0  ;;  %v1406_v31 = vadd.f32 %v1405_v59, %v1245_v1  ;;  %v1127_v1 = vadd.f32 %v1828_v13, %v2601_v9  ;;  %v2847_v59 = vld [vmem:[#allocation18_spill] sm:$0xff] }
 0x160   : > { %v2702_v19 = vpop.f32.mrf.mxu1  ;;  %v2028_v49 = vpop.f32.mrf.mxu0  ;;  %v1837_v12 = vadd.f32 %v2847_v59, %v2846_v41  ;;  %v1277_v5 = vadd.f32 %v1931_v24, %v1116_v29  ;;  %v1119_v8 = vadd.f32 %v1822_v44, %v2601_v9  ;;  %v2854_v44 = vld [vmem:[#allocation4_spill] sm:$0xff] }
 0x161   : > { %1543 = vst.msk [vmem:[%s2629_s30 + $0x50] sm:$0xff] %vm1532_vm0, %v1510_v16  ;;  %v1508_v15 = vmax.f32 %v1406_v31, 0.0  ;;  %v1417_v21 = vadd.f32 %v2028_v49, %v1256_v35  ;;  %v1934_v35 = vadd.f32 %v2643_v17, %v2635_v34  ;;  %v2848_v49 = vld [vmem:[#allocation13_spill] sm:$0xff]  ;;  %v1288_v34 = vadd.f32 %v1940_v45, %v1127_v1 }
 0x162   : > { %v2710_v38 = vpop.f32.mrf.mxu1  ;;  %v1408_v58 = vpop.f32.mrf.mxu0  ;;  %v1140_v17 = vadd.f32 %v1837_v12, %v2601_v9 }
 0x163   : > { %1541 = vst.msk [vmem:[%s2629_s30 + $0x40] sm:$0xff] %vm1532_vm0, %v1508_v15  ;;  %v1511_v22 = vmax.f32 %v1417_v21, 0.0  ;;  %v1409_v6 = vadd.f32 %v1408_v58, %v1248_v61  ;;  %v1831_v15 = vadd.f32 %v2849_v23, %v2848_v49  ;;  %v1946_v54 = vadd.f32 %v2710_v38, %v2702_v19 }
 0x164   : > { %v1947_v46 = vpop.f32.mrf.mxu1  ;;  %v2031_v2 = vpop.f32.mrf.mxu0  ;;  %v1156_v19 = vadd.f32 %v2854_v44, %v2601_v9  ;;  %v2861_v44 = vld [vmem:[#allocation9_spill] sm:$0xff] }
 0x165   : > { %1544 = vst.msk [vmem:[%s2629_s30 + $0x58] sm:$0xff] %vm1532_vm0, %v1511_v22  ;;  %v1509_v26 = vmax.f32 %v1409_v6, 0.0  ;;  %v1430_v3 = vadd.f32 %v2031_v2, %v1269_v57  ;;  %v2850_v22 = vld [vmem:[#allocation19_spill] sm:$0xff]  ;;  %v2851_v6 = vld [vmem:[#allocation20_spill] sm:$0xff]  ;;  %v1943_v2 = vadd.f32 %v2693_v27, %v2685_v53 }
 0x166   : > { %v1948_v42 = vpop.f32.mrf.mxu1  ;;  %v1421_v62 = vpop.f32.mrf.mxu0  ;;  %v1840_v57 = vadd.f32 %v2851_v6, %v2850_v22 }
 0x167   : > { %1542 = vst.msk [vmem:[%s2629_s30 + $0x48] sm:$0xff] %vm1532_vm0, %v1509_v26  ;;  %v1514_v33 = vmax.f32 %v1430_v3, 0.0  ;;  %v1422_v40 = vadd.f32 %v1421_v62, %v1261_v39  ;;  %v1949_v56 = vadd.f32 %v1948_v42, %v1947_v46  ;;  %v1280_v26 = vadd.f32 %v1934_v35, %v1119_v8  ;;  %v2852_v39 = vld [vmem:[#allocation15_spill] sm:$0xff] }
 0x168   : > { %v1950_v11 = vpop.f32.mrf.mxu1  ;;  %v2032_v25 = vpop.f32.mrf.mxu0  ;;  %v1132_v3 = vadd.f32 %v1831_v15, %v2601_v9  ;;  %v1834_v37 = vadd.f32 %v2853_v55, %v2852_v39  ;;  %v1143_v27 = vadd.f32 %v1840_v57, %v2601_v9 }
 0x169   : > { %1547 = vst.msk [vmem:[%s2629_s30 + $0x70] sm:$0xff] %vm1532_vm0, %v1514_v33  ;;  %v1512_v28 = vmax.f32 %v1422_v40, 0.0  ;;  %v1433_v43 = vadd.f32 %v2032_v25, %v1272_v7  ;;  %v1301_v53 = vadd.f32 %v1949_v56, %v1140_v17 }
 0x16a   : > { %v1951_v63 = vpop.f32.mrf.mxu1  ;;  %v1424_v47 = vpop.f32.mrf.mxu0  ;;  %v1293_v24 = vadd.f32 %v1943_v2, %v1132_v3  ;;  %v2858_v3 = vld [vmem:[#allocation6_spill] sm:$0xff] }
 0x16b   : > { %1545 = vst.msk [vmem:[%s2629_s30 + $0x60] sm:$0xff] %vm1532_vm0, %v1512_v28  ;;  %v1515_v52 = vmax.f32 %v1433_v43, 0.0  ;;  %v1425_v30 = vadd.f32 %v1424_v47, %v1264_v14  ;;  %v1952_v36 = vadd.f32 %v1951_v63, %v1950_v11  ;;  %v1135_v11 = vadd.f32 %v1834_v37, %v2601_v9 }
 0x16c   : > { %v1953_v16 = vpop.f32.mrf.mxu1  ;;  %v2035_v31 = vpop.f32.mrf.mxu0  ;;  %v1164_v39 = vadd.f32 %v2858_v3, %v2601_v9 }
 0x16d   : > { %1548 = vst.msk [vmem:[%s2629_s30 + $0x78] sm:$0xff] %vm1532_vm0, %v1515_v52  ;;  %v1513_v20 = vmax.f32 %v1425_v30, 0.0  ;;  %v1446_v48 = vadd.f32 %v2035_v31, %v1285_v60  ;;  %v1304_v32 = vadd.f32 %v1952_v36, %v1143_v27  ;;  %v1296_v30 = vadd.f32 %v1946_v54, %v1135_v11  ;;  %v2855_v60 = vld [vmem:[#allocation2_spill] sm:$0xff]  ;;  %v2860_v54 = vld [vmem:[#allocation8_spill] sm:$0xff] }
 0x16e   : > { %v1954_v21 = vpop.f32.mrf.mxu1  ;;  %v1437_v61 = vpop.f32.mrf.mxu0  ;;  %v1148_v1 = vadd.f32 %v2855_v60, %v2601_v9 }
 0x16f   : > { %1546 = vst.msk [vmem:[%s2629_s30 + $0x68] sm:$0xff] %vm1532_vm0, %v1513_v20  ;;  %v1518_v58 = vmax.f32 %v1446_v48, 0.0  ;;  %v1438_v18 = vadd.f32 %v1437_v61, %v1277_v5  ;;  %v1955_v47 = vadd.f32 %v1954_v21, %v1953_v16  ;;  %v2856_v16 = vld [vmem:[#allocation5_spill] sm:$0xff] }
 0x170   : > { %v1956_v0 = vpop.f32.mrf.mxu1  ;;  %v2036_v10 = vpop.f32.mrf.mxu0  ;;  %v1159_v48 = vadd.f32 %v2856_v16, %v2601_v9 }
 0x171   : > { %1551 = vst.msk [vmem:[%s2629_s30 + $0x90] sm:$0xff] %vm1532_vm0, %v1518_v58  ;;  %v1516_v4 = vmax.f32 %v1438_v18, 0.0  ;;  %v1449_v46 = vadd.f32 %v2036_v10, %v1288_v34  ;;  %v1309_v21 = vadd.f32 %v1955_v47, %v1148_v1  ;;  %v2857_v58 = vld [vmem:[#allocation3_spill] sm:$0xff] }
 0x172   : > { %v1957_v42 = vpop.f32.mrf.mxu1  ;;  %v1440_v62 = vpop.f32.mrf.mxu0  ;;  %v1151_v18 = vadd.f32 %v2857_v58, %v2601_v9 }
 0x173   : > { %1549 = vst.msk [vmem:[%s2629_s30 + $0x80] sm:$0xff] %vm1532_vm0, %v1516_v4  ;;  %v1519_v33 = vmax.f32 %v1449_v46, 0.0  ;;  %v1441_v40 = vadd.f32 %v1440_v62, %v1280_v26  ;;  %v1958_v49 = vadd.f32 %v1957_v42, %v1956_v0 }
 0x174   : > { %v1959_v7 = vpop.f32.mrf.mxu1  ;;  %v2039_v51 = vpop.f32.mrf.mxu0 }
 0x175   : > { %1552 = vst.msk [vmem:[%s2629_s30 + $0x98] sm:$0xff] %vm1532_vm0, %v1519_v33  ;;  %v1517_v13 = vmax.f32 %v1441_v40, 0.0  ;;  %v1462_v25 = vadd.f32 %v2039_v51, %v1301_v53  ;;  %v1312_v4 = vadd.f32 %v1958_v49, %v1151_v18 }
 0x176   : > { %v1960_v28 = vpop.f32.mrf.mxu1  ;;  %v1453_v43 = vpop.f32.mrf.mxu0 }
 0x177   : > { %1550 = vst.msk [vmem:[%s2629_s30 + $0x88] sm:$0xff] %vm1532_vm0, %v1517_v13  ;;  %v1522_v14 = vmax.f32 %v1462_v25, 0.0  ;;  %v1961_v29 = vadd.f32 %v1960_v28, %v1959_v7  ;;  %v1454_v50 = vadd.f32 %v1453_v43, %v1293_v24  ;;  %v2859_v7 = vld [vmem:[#allocation7_spill] sm:$0xff]  ;;  %v1172_v13 = vadd.f32 %v2860_v54, %v2601_v9 }
 0x178   : > { %v1962_v38 = vpop.f32.mrf.mxu1  ;;  %v2040_v63 = vpop.f32.mrf.mxu0  ;;  %v1167_v51 = vadd.f32 %v2859_v7, %v2601_v9 }
 0x179   : > { %1555 = vst.msk [vmem:[%s2629_s30 + $0xb0] sm:$0xff] %vm1532_vm0, %v1522_v14  ;;  %v1520_v45 = vmax.f32 %v1454_v50, 0.0  ;;  %v1465_v52 = vadd.f32 %v2040_v63, %v1304_v32  ;;  %v1317_v20 = vadd.f32 %v1961_v29, %v1156_v19  ;;  %v1175_v19 = vadd.f32 %v2861_v44, %v2601_v9 }
 0x17a   : > { %v1963_v41 = vpop.f32.mrf.mxu1  ;;  %v1456_v59 = vpop.f32.mrf.mxu0 }
 0x17b   : > { %1553 = vst.msk [vmem:[%s2629_s30 + $0xa0] sm:$0xff] %vm1532_vm0, %v1520_v45  ;;  %v1523_v12 = vmax.f32 %v1465_v52, 0.0  ;;  %v1964_v31 = vadd.f32 %v1963_v41, %v1962_v38  ;;  %v1457_v35 = vadd.f32 %v1456_v59, %v1296_v30 }
 0x17c   : > { %v1965_v5 = vpop.f32.mrf.mxu1  ;;  %v2043_v8 = vpop.f32.mrf.mxu0 }
 0x17d   : > { %1556 = vst.msk [vmem:[%s2629_s30 + $0xb8] sm:$0xff] %vm1532_vm0, %v1523_v12  ;;  %v1521_v23 = vmax.f32 %v1457_v35, 0.0  ;;  %v1478_v15 = vadd.f32 %v2043_v8, %v1317_v20  ;;  %v1320_v22 = vadd.f32 %v1964_v31, %v1159_v48 }
 0x17e   : > { %v1966_v61 = vpop.f32.mrf.mxu1  ;;  %v1469_v56 = vpop.f32.mrf.mxu0 }
 0x17f   : > { %1554 = vst.msk [vmem:[%s2629_s30 + $0xa8] sm:$0xff] %vm1532_vm0, %v1521_v23  ;;  %v1526_v34 = vmax.f32 %v1478_v15, 0.0  ;;  %v1470_v17 = vadd.f32 %v1469_v56, %v1309_v21  ;;  %v1967_v0 = vadd.f32 %v1966_v61, %v1965_v5 }
 0x180   : > { %v1968_v6 = vpop.f32.mrf.mxu1  ;;  %v2044_v57 = vpop.f32.mrf.mxu0 }
 0x181   : > { %1559 = vst.msk [vmem:[%s2629_s30 + $0xd0] sm:$0xff] %vm1532_vm0, %v1526_v34  ;;  %v1524_v10 = vmax.f32 %v1470_v17, 0.0  ;;  %v1481_v2 = vadd.f32 %v2044_v57, %v1320_v22  ;;  %v1325_v40 = vadd.f32 %v1967_v0, %v1164_v39 }
 0x182   : > { %v1969_v46 = vpop.f32.mrf.mxu1  ;;  %v1472_v26 = vpop.f32.mrf.mxu0 }
 0x183   : > { %1557 = vst.msk [vmem:[%s2629_s30 + $0xc0] sm:$0xff] %vm1532_vm0, %v1524_v10  ;;  %v1527_v55 = vmax.f32 %v1481_v2, 0.0  ;;  %v1473_v37 = vadd.f32 %v1472_v26, %v1312_v4  ;;  %v1970_v36 = vadd.f32 %v1969_v46, %v1968_v6 }
 0x184   : > { %v1971_v42 = vpop.f32.mrf.mxu1  ;;  %v2047_v62 = vpop.f32.mrf.mxu0 }
 0x185   : > { %1560 = vst.msk [vmem:[%s2629_s30 + $0xd8] sm:$0xff] %vm1532_vm0, %v1527_v55  ;;  %v1525_v33 = vmax.f32 %v1473_v37, 0.0  ;;  %v1328_v29 = vadd.f32 %v1970_v36, %v1167_v51 }
 0x186   : > { %v1972_v53 = vpop.f32.mrf.mxu1  ;;  %v1485_v27 = vpop.f32.mrf.mxu0 }
 0x187   : > { %1558 = vst.msk [vmem:[%s2629_s30 + $0xc8] sm:$0xff] %vm1532_vm0, %v1525_v33  ;;  %v1973_v25 = vadd.f32 %v1972_v53, %v1971_v42  ;;  %v1486_v24 = vadd.f32 %v1485_v27, %v1325_v40 }
 0x188   : > { %v1974_v11 = vpop.f32.mrf.mxu1  ;;  %v2048_v28 = vpop.f32.mrf.mxu0 }
 0x189   : > { %v1333_v43 = vadd.f32 %v1973_v25, %v1172_v13  ;;  %v1528_v14 = vmax.f32 %v1486_v24, 0.0 }
 0x18a   : > { %v1975_v50 = vpop.f32.mrf.mxu1  ;;  %v1488_v32 = vpop.f32.mrf.mxu0 }
 0x18b   : > { %v1494_v38 = vadd.f32 %v2047_v62, %v1333_v43  ;;  %1561 = vst.msk [vmem:[%s2629_s30 + $0xe0] sm:$0xff] %vm1532_vm0, %v1528_v14  ;;  %v1976_v63 = vadd.f32 %v1975_v50, %v1974_v11  ;;  %v1489_v47 = vadd.f32 %v1488_v32, %v1328_v29 }
 0x18d   : > { %v1530_v45 = vmax.f32 %v1494_v38, 0.0  ;;  %v1336_v52 = vadd.f32 %v1976_v63, %v1175_v19  ;;  %v1529_v30 = vmax.f32 %v1489_v47, 0.0 }
 0x18f   : > { %1563 = vst.msk [vmem:[%s2629_s30 + $0xf0] sm:$0xff] %vm1532_vm0, %v1530_v45  ;;  %v1497_v60 = vadd.f32 %v2048_v28, %v1336_v52  ;;  %1562 = vst.msk [vmem:[%s2629_s30 + $0xe8] sm:$0xff] %vm1532_vm0, %v1529_v30 }
 0x191   : > { %v1531_v1 = vmax.f32 %v1497_v60, 0.0 }
 0x193   : > { %1564 = vst.msk [vmem:[%s2629_s30 + $0xf8] sm:$0xff] %vm1532_vm0, %v1531_v1 }
 0x194 PF: > { %s13_s12 = sadd.s32 1, %s2232_s12  }
 0x195   : > { %p10_p4 = scmp.ge.s32.totalorder %s13_s12, 4  }
 0x197   :  { %12 = sbr.rel (!%p10_p4) target bundleno = 1 (0x1), region = 62 }

// kernel: _lambda_.18
= control target key start
LH: loop header
LB: loop body
LE: loop exit
PB: predicated region body
PF: predicated region fallthrough
CT: control target
= control target key end

     0   :  { %s2386_s15 = smov 0   ;;  %s2996_s0 = inlined_call_operand.vmem [shape: bf16[512,640], index: 0, kind: input, shape index: {}]   ;;  %s2997_s1 = inlined_call_operand.vmem [shape: bf16[640,64], index: 1, kind: input, shape index: {}]   ;;  %s2998_s2 = inlined_call_operand.vmem [shape: f32[1,64], index: 2, kind: input, shape index: {}]   ;;  %s2999_s3 = inlined_call_operand.vmem [shape: f32[512,64], index: 3, kind: input, shape index: {}]   ;;  %s3000_s4 = inlined_call_operand.vmem [shape: f32[512,64], index: 4, kind: output, shape index: {}]  }
   0x1 LB: > { %s1746_s16 = sadd.s32 4294967295, %s2359_s15   ;;  %p1750_p0 = scmp.ge.s32.totalorder %s2359_s15, 1  ;;  %s2359_s15 = sphi %s2386_s15, %s14_s15  }
   0x2   : > { %p175_p1 = scmp.lt.s32.totalorder %s2359_s15, 3 }
   0x4   : > { %p176_p2 = pnand %p1750_p0, %p175_p1 }
   0x6   : > { %179 = sbr.rel (%p176_p2) target bundleno = 406 (0x196), region = 36 }
   0xb   : > { %v2201_v0 = vld [vmem:[%s2997_s1 + $0x78] sm:$0xff]   ;;  %s1751_s19 = sshll.u32 %s1746_s16, 5  ;;  %v2203_v2 = vld [vmem:[%s2997_s1 + $0x70] sm:$0xff]   ;;  %v2205_v4 = vld [vmem:[%s2997_s1 + $0x68] sm:$0xff]   ;;  %vm1645_vm0 = vcmask 523264  }
   0xc   : > { %v2202_v1 = vld [vmem:[%s2997_s1 + $0x38] sm:$0xff]   ;;  %1880 = vmatprep.subr.bf16.mxu0 %v2201_v0  ;;  %2176 = vmatprep.subr.bf16.mxu1 %v2201_v0  ;;  %p208_p3 = scmp.lt.s32.totalorder %s1751_s19, 63  ;;  %v2204_v3 = vld [vmem:[%s2997_s1 + $0x30] sm:$0xff]   ;;  %v2206_v5 = vld [vmem:[%s2997_s1 + $0x28] sm:$0xff]  }
   0xd   : > { %1881 = vmatpush3.bf16.msra.mxu0 %v2202_v1  ;;  %2184 = vmatpush3.bf16.msra.mxu1 %v2202_v1  ;;  %v2207_v6 = vld [vmem:[%s2997_s1 + $0x60] sm:$0xff]   ;;  %v2209_v8 = vld [vmem:[%s2997_s1 + $0x58] sm:$0xff]   ;;  %v2211_v10 = vld [vmem:[%s2997_s1 + $0x50] sm:$0xff]  }
   0xe   : > { %1882 = vmatprep.subr.bf16.mxu0 %v2203_v2  ;;  %2177 = vmatprep.subr.bf16.mxu1 %v2203_v2  ;;  %s3044_s19 = smov (!%p208_p3, %s1751_s19), 63  ;;  %v2208_v7 = vld [vmem:[%s2997_s1 + $0x20] sm:$0xff]   ;;  %v2210_v9 = vld [vmem:[%s2997_s1 + $0x18] sm:$0xff]   ;;  %v2212_v13 = vld [vmem:[%s2997_s1 + $0x10] sm:$0xff]  }
   0xf   : > { %s2192_s6 = smul.u32 20, %s3044_s19  ;;  %v2213_v14 = vld [vmem:[%s2997_s1 + $0x48] sm:$0xff]   ;;  %v2215_v16 = vld [vmem:[%s2997_s1 + $0x40] sm:$0xff]   ;;  %v2223_v18 = vld [vmem:[%s2997_s1 + $0xf8] sm:$0xff]  }
  0x10   : > { %v2214_v15 = vld [vmem:[%s2997_s1 + $0x8] sm:$0xff]   ;;  %v2216_v17 = vld [vmem:[%s2997_s1] sm:$0xff]   ;;  %v2226_v19 = vld [vmem:[%s2997_s1 + $0x138] sm:$0xff]  }
  0x11   : > { %1883 = vmatpush3.bf16.msra.mxu0 %v2204_v3  ;;  %2185 = vmatpush3.bf16.msra.mxu1 %v2204_v3  ;;  %s2427_s13 = scalar_lea.vmem %s2996_s0, %s2192_s6  ;;  %v2224_v22 = vld [vmem:[%s2997_s1 + $0xb8] sm:$0xff]   ;;  %v2225_v23 = vld [vmem:[%s2997_s1 + $0xf0] sm:$0xff]   ;;  %v2234_v29 = vld [vmem:[%s2997_s1 + $0xe8] sm:$0xff]  }
  0x12   : > { %1884 = vmatprep.subr.bf16.mxu0 %v2205_v4  ;;  %2178 = vmatprep.subr.bf16.mxu1 %v2205_v4  ;;  %v2219_v11 = vld [vmem:[%s2427_s13 + $0x4] ss:$20 sps:$4 sm:$0xff]   ;;  %v2217_v20 = vld [vmem:[%s2427_s13] ss:$20 sps:$4 sm:$0xff]   ;;  %v2232_v28 = vld [vmem:[%s2427_s13 + $0x28] ss:$20 sps:$4 sm:$0xff]  }
  0x13   : > { %v2222_v12 = vld [vmem:[%s2427_s13 + $0x1e4] ss:$20 sps:$4 sm:$0xff]   ;;  %1098 = vmatprep.mubr.bf16.mxu0 %v2219_v11  ;;  %v2220_v21 = vld [vmem:[%s2427_s13 + $0x1e0] ss:$20 sps:$4 sm:$0xff]   ;;  %v2233_v30 = vld [vmem:[%s2427_s13 + $0x208] ss:$20 sps:$4 sm:$0xff]  }
  0x14   : > { %1194 = vmatprep.mubr.bf16.mxu1 %v2222_v12  ;;  %v2228_v24 = vld [vmem:[%s2427_s13 + $0x2c] ss:$20 sps:$4 sm:$0xff]   ;;  %v2245_v26 = vld [vmem:[%s2997_s1 + $0x130] sm:$0xff]   ;;  %v2244_v36 = vld [vmem:[%s2997_s1 + $0xd8] sm:$0xff]  }
  0x15   : > { %1885 = vmatpush3.bf16.msra.mxu0 %v2206_v5  ;;  %2186 = vmatpush3.bf16.msra.mxu1 %v2206_v5  ;;  %v2230_v25 = vld [vmem:[%s2427_s13 + $0x20c] ss:$20 sps:$4 sm:$0xff]   ;;  %v2227_v27 = vld [vmem:[%s2997_s1 + $0xb0] sm:$0xff]   ;;  %v2246_v40 = vld [vmem:[%s2997_s1 + $0x98] sm:$0xff]  }
  0x16   : > { %1886 = vmatprep.subr.bf16.mxu0 %v2207_v6  ;;  %2179 = vmatprep.subr.bf16.mxu1 %v2207_v6  ;;  %v2235_v31 = vld [vmem:[%s2997_s1 + $0xa8] sm:$0xff]   ;;  %v2236_v33 = vld [vmem:[%s2997_s1 + $0xe0] sm:$0xff]   ;;  %v2247_v41 = vld [vmem:[%s2997_s1 + $0xd0] sm:$0xff]  }
  0x17   : > { %v2238_v32 = vld [vmem:[%s2427_s13 + $0x54] ss:$20 sps:$4 sm:$0xff]   ;;  %v2237_v35 = vld [vmem:[%s2997_s1 + $0xa0] sm:$0xff]   ;;  %v2249_v42 = vld [vmem:[%s2427_s13 + $0x7c] ss:$20 sps:$4 sm:$0xff]  }
  0x18   : > { %v2240_v34 = vld [vmem:[%s2427_s13 + $0x234] ss:$20 sps:$4 sm:$0xff]   ;;  %v2242_v37 = vld [vmem:[%s2427_s13 + $0x50] ss:$20 sps:$4 sm:$0xff]   ;;  %v2253_v46 = vld [vmem:[%s2427_s13 + $0x78] ss:$20 sps:$4 sm:$0xff]  }
  0x19   : > { %1887 = vmatpush3.bf16.msra.mxu0 %v2208_v7  ;;  %2187 = vmatpush3.bf16.msra.mxu1 %v2208_v7  ;;  %v2258_v38 = vld [vmem:[%s2997_s1 + $0x128] sm:$0xff]   ;;  %v2243_v39 = vld [vmem:[%s2427_s13 + $0x230] ss:$20 sps:$4 sm:$0xff]   ;;  %v2279_v52 = vld [vmem:[%s2997_s1 + $0x118] sm:$0xff]  }
  0x1a   : > { %1888 = vmatprep.subr.bf16.mxu0 %v2209_v8  ;;  %2180 = vmatprep.subr.bf16.mxu1 %v2209_v8  ;;  %v2251_v43 = vld [vmem:[%s2427_s13 + $0x25c] ss:$20 sps:$4 sm:$0xff]   ;;  %v2272_v45 = vld [vmem:[%s2997_s1 + $0x120] sm:$0xff]   ;;  %v2254_v47 = vld [vmem:[%s2427_s13 + $0x258] ss:$20 sps:$4 sm:$0xff]  }
  0x1b   : > { %v2248_v44 = vld [vmem:[%s2997_s1 + $0x90] sm:$0xff]   ;;  %v2255_v48 = vld [vmem:[%s2997_s1 + $0xc8] sm:$0xff]   ;;  %v2257_v50 = vld [vmem:[%s2997_s1 + $0xc0] sm:$0xff]  }
  0x1c   : > { %v2256_v49 = vld [vmem:[%s2997_s1 + $0x88] sm:$0xff]   ;;  %v2260_v51 = vld [vmem:[%s2427_s13 + $0xa4] ss:$20 sps:$4 sm:$0xff]   ;;  %v2265_v56 = vld [vmem:[%s2427_s13 + $0xa0] ss:$20 sps:$4 sm:$0xff]  }
  0x1d   : > { %1889 = vmatpush3.bf16.msra.mxu0 %v2210_v9  ;;  %2188 = vmatpush3.bf16.msra.mxu1 %v2210_v9  ;;  %v2264_v53 = vld [vmem:[%s2427_s13 + $0xc] ss:$20 sps:$4 sm:$0xff]   ;;  %v2262_v55 = vld [vmem:[%s2427_s13 + $0x8] ss:$20 sps:$4 sm:$0xff]   ;;  %v2292_v57 = vld [vmem:[%s2997_s1 + $0x110] sm:$0xff]  }
  0x1e   : > { %1890 = vmatprep.subr.bf16.mxu0 %v2211_v10  ;;  %2181 = vmatprep.subr.bf16.mxu1 %v2211_v10  ;;  %v2259_v54 = vld [vmem:[%s2997_s1 + $0x80] sm:$0xff]   ;;  %v2268_v59 = vld [vmem:[%s2427_s13 + $0x34] ss:$20 sps:$4 sm:$0xff]   ;;  %v2275_v0 = vld [vmem:[%s2427_s13 + $0x5c] ss:$20 sps:$4 sm:$0xff]  }
  0x1f   : > { %v2266_v58 = vld [vmem:[%s2427_s13 + $0xcc] ss:$20 sps:$4 sm:$0xff]   ;;  %v2270_v61 = vld [vmem:[%s2427_s13 + $0xc8] ss:$20 sps:$4 sm:$0xff]   ;;  %v2271_v62 = vld [vmem:[%s2427_s13 + $0x30] ss:$20 sps:$4 sm:$0xff]  }
  0x20   : > { %v2299_v60 = vld [vmem:[%s2997_s1 + $0x108] sm:$0xff]   ;;  %v2312_v1 = vld [vmem:[%s2997_s1 + $0x100] sm:$0xff]   ;;  %v2280_v4 = vld [vmem:[%s2427_s13 + $0x11c] ss:$20 sps:$4 sm:$0xff]  }
  0x21   : > { %1891 = vmatpush3.bf16.msra.mxu0 %v2212_v13  ;;  %2189 = vmatpush3.bf16.msra.mxu1 %v2212_v13  ;;  %v2273_v63 = vld [vmem:[%s2427_s13 + $0xf4] ss:$20 sps:$4 sm:$0xff]   ;;  %v2277_v2 = vld [vmem:[%s2427_s13 + $0xf0] ss:$20 sps:$4 sm:$0xff]   ;;  %v2278_v3 = vld [vmem:[%s2427_s13 + $0x58] ss:$20 sps:$4 sm:$0xff]  }
  0x22   : > { %1892 = vmatprep.subr.bf16.mxu0 %v2213_v14  ;;  %2182 = vmatprep.subr.bf16.mxu1 %v2213_v14  ;;  %v2282_v5 = vld [vmem:[%s2427_s13 + $0x84] ss:$20 sps:$4 sm:$0xff]   ;;  %v2285_v7 = vld [vmem:[%s2427_s13 + $0x80] ss:$20 sps:$4 sm:$0xff]   ;;  %v2291_v11 = vld [vmem:[%s2427_s13 + $0xa8] ss:$20 sps:$4 sm:$0xff]  }
  0x23   : > { %v2284_v6 = vld [vmem:[%s2427_s13 + $0x118] ss:$20 sps:$4 sm:$0xff]   ;;  %v2290_v10 = vld [vmem:[%s2427_s13 + $0x140] ss:$20 sps:$4 sm:$0xff]   ;;  %v2297_v14 = vld [vmem:[%s2427_s13 + $0x168] ss:$20 sps:$4 sm:$0xff]  }
  0x24   : > { %v2286_v8 = vld [vmem:[%s2427_s13 + $0x144] ss:$20 sps:$4 sm:$0xff]   ;;  %v2288_v9 = vld [vmem:[%s2427_s13 + $0xac] ss:$20 sps:$4 sm:$0xff]   ;;  %v2295_v13 = vld [vmem:[%s2427_s13 + $0xd4] ss:$20 sps:$4 sm:$0xff]  }
  0x25   : > { %1893 = vmatpush3.bf16.msra.mxu0 %v2214_v15  ;;  %2190 = vmatpush3.bf16.msra.mxu1 %v2214_v15  ;;  %v2293_v12 = vld [vmem:[%s2427_s13 + $0x16c] ss:$20 sps:$4 sm:$0xff]   ;;  %v2298_v15 = vld [vmem:[%s2427_s13 + $0xd0] ss:$20 sps:$4 sm:$0xff]  }
  0x26   : > { %1894 = vmatprep.subr.bf16.mxu0 %v2215_v16  ;;  %2183 = vmatprep.subr.bf16.mxu1 %v2215_v16  ;;  %v2300_v16 = vld [vmem:[%s2427_s13 + $0x194] ss:$20 sps:$4 sm:$0xff]  }
  0x29   : > { %1895 = vmatpush3.bf16.msra.mxu0 %v2216_v17  ;;  %2191 = vmatpush3.bf16.msra.mxu1 %v2216_v17  ;;  %v2302_v17 = vld [vmem:[%s2427_s13 + $0xfc] ss:$20 sps:$4 sm:$0xff]  }
  0x2a   : > { %1992 = vmatprep.subr.bf16.mxu1 %v2223_v18  ;;  %2128 = vmatprep.subr.bf16.mxu0 %v2226_v19  ;;  %v2304_v18 = vld [vmem:[%s2427_s13 + $0x190] ss:$20 sps:$4 sm:$0xff]  }
  0x2c   : > { %1099 = vmatmul.mubr.bf16.vlgmr.msra.gmra.mxu0 %v2217_v20  ;;  %1195 = vmatmul.mubr.bf16.vlgmr.msra.gmra.mxu1 %v2220_v21  ;;  %v2306_v20 = vld [vmem:[%s2427_s13 + $0x1bc] ss:$20 sps:$4 sm:$0xff]   ;;  %v2308_v21 = vld [vmem:[%s2427_s13 + $0x124] ss:$20 sps:$4 sm:$0xff]  }
  0x2d   : > { %1993 = vmatpush3.bf16.msra.mxu1 %v2224_v22  ;;  %2129 = vmatpush3.bf16.msra.mxu0 %v2226_v19  ;;  %v2305_v19 = vld [vmem:[%s2427_s13 + $0xf8] ss:$20 sps:$4 sm:$0xff]  }
  0x2e   : > { %1994 = vmatprep.subr.bf16.mxu1 %v2225_v23  ;;  %1106 = vmatprep.mubr.bf16.mxu0 %v2228_v24  ;;  %v2310_v22 = vld [vmem:[%s2427_s13 + $0x1b8] ss:$20 sps:$4 sm:$0xff]   ;;  %v2311_v23 = vld [vmem:[%s2427_s13 + $0x120] ss:$20 sps:$4 sm:$0xff]  }
  0x2f   : > { %1202 = vmatprep.mubr.bf16.mxu1 %v2230_v25  ;;  %2130 = vmatprep.subr.bf16.mxu0 %v2245_v26  ;;  %v2313_v24 = vld [vmem:[%s2427_s13 + $0x14c] ss:$20 sps:$4 sm:$0xff]   ;;  %v2315_v25 = vld [vmem:[%s2427_s13 + $0x10] ss:$20 sps:$4 sm:$0xff]  }
  0x31   : > { %1995 = vmatpush3.bf16.msra.mxu1 %v2227_v27  ;;  %2131 = vmatpush3.bf16.msra.mxu0 %v2245_v26  ;;  %v2316_v26 = vld [vmem:[%s2427_s13 + $0x148] ss:$20 sps:$4 sm:$0xff]   ;;  %v2317_v27 = vld [vmem:[%s2427_s13 + $0x38] ss:$20 sps:$4 sm:$0xff]  }
  0x32   : > { %1996 = vmatprep.subr.bf16.mxu1 %v2234_v29  ;;  %2132 = vmatprep.subr.bf16.mxu0 %v2258_v38  ;;  %v2320_v29 = vld [vmem:[%s2427_s13 + $0x60] ss:$20 sps:$4 sm:$0xff]  }
  0x34   : > { %1107 = vmatmul.mubr.bf16.gmra.mxu0 %v2232_v28  ;;  %1203 = vmatmul.mubr.bf16.gmra.mxu1 %v2233_v30  ;;  %v2318_v28 = vld [vmem:[%s2427_s13 + $0x174] ss:$20 sps:$4 sm:$0xff]   ;;  %v2321_v30 = vld [vmem:[%s2427_s13 + $0x170] ss:$20 sps:$4 sm:$0xff]  }
  0x35   : > { %1997 = vmatpush3.bf16.msra.mxu1 %v2235_v31  ;;  %1114 = vmatprep.mubr.bf16.mxu0 %v2238_v32  ;;  %v2322_v31 = vld [vmem:[%s2427_s13 + $0x88] ss:$20 sps:$4 sm:$0xff]  }
  0x36   : > { %1998 = vmatprep.subr.bf16.mxu1 %v2236_v33  ;;  %1210 = vmatprep.mubr.bf16.mxu1 %v2240_v34  ;;  %v2323_v32 = vld [vmem:[%s2427_s13 + $0x19c] ss:$20 sps:$4 sm:$0xff]   ;;  %v2326_v34 = vld [vmem:[%s2427_s13 + $0x198] ss:$20 sps:$4 sm:$0xff]  }
  0x37   : > { %2133 = vmatpush3.bf16.msra.mxu0 %v2258_v38  ;;  %v2325_v33 = vld [vmem:[%s2427_s13 + $0xb0] ss:$20 sps:$4 sm:$0xff]   ;;  %v2331_v38 = vld [vmem:[%s2427_s13 + $0x1c0] ss:$20 sps:$4 sm:$0xff]  }
  0x38   : > { %2134 = vmatprep.subr.bf16.mxu0 %v2272_v45 }
  0x39   : > { %1999 = vmatpush3.bf16.msra.mxu1 %v2237_v35  ;;  %v2327_v35 = vld [vmem:[%s2427_s13 + $0xd8] ss:$20 sps:$4 sm:$0xff]  }
  0x3a   : > { %2000 = vmatprep.subr.bf16.mxu1 %v2244_v36  ;;  %v2328_v36 = vld [vmem:[%s2427_s13 + $0x1c4] ss:$20 sps:$4 sm:$0xff]  }
  0x3b   : > { %2135 = vmatpush3.bf16.msra.mxu0 %v2272_v45  ;;  %v2340_v45 = vld [vmem:[%s2427_s13 + $0x1a0] ss:$20 sps:$4 sm:$0xff]  }
  0x3c   : > { %1115 = vmatmul.mubr.bf16.gmra.mxu0 %v2242_v37  ;;  %1211 = vmatmul.mubr.bf16.gmra.mxu1 %v2243_v39  ;;  %v2330_v37 = vld [vmem:[%s2427_s13 + $0x100] ss:$20 sps:$4 sm:$0xff]   ;;  %v2332_v39 = vld [vmem:[%s2427_s13 + $0x128] ss:$20 sps:$4 sm:$0xff]  }
  0x3d   : > { %2001 = vmatpush3.bf16.msra.mxu1 %v2246_v40  ;;  %1122 = vmatprep.mubr.bf16.mxu0 %v2249_v42  ;;  %v2333_v40 = vld [vmem:[%s2427_s13 + $0x1ec] ss:$20 sps:$4 sm:$0xff]   ;;  %v2336_v42 = vld [vmem:[%s2427_s13 + $0x1e8] ss:$20 sps:$4 sm:$0xff]  }
  0x3e   : > { %2002 = vmatprep.subr.bf16.mxu1 %v2247_v41  ;;  %1218 = vmatprep.mubr.bf16.mxu1 %v2251_v43  ;;  %v2335_v41 = vld [vmem:[%s2427_s13 + $0x150] ss:$20 sps:$4 sm:$0xff]   ;;  %v2337_v43 = vld [vmem:[%s2427_s13 + $0x178] ss:$20 sps:$4 sm:$0xff]  }
  0x3f   : > { %2136 = vmatprep.subr.bf16.mxu0 %v2279_v52 }
  0x40   : > { %2137 = vmatpush3.bf16.msra.mxu0 %v2279_v52  ;;  %v2348_v52 = vld [vmem:[%s2427_s13 + $0x264] ss:$20 sps:$4 sm:$0xff]  }
  0x41   : > { %2003 = vmatpush3.bf16.msra.mxu1 %v2248_v44  ;;  %2138 = vmatprep.subr.bf16.mxu0 %v2292_v57  ;;  %v2338_v44 = vld [vmem:[%s2427_s13 + $0x214] ss:$20 sps:$4 sm:$0xff]  }
  0x42   : > { %2004 = vmatprep.subr.bf16.mxu1 %v2255_v48  ;;  %v2343_v48 = vld [vmem:[%s2427_s13 + $0x23c] ss:$20 sps:$4 sm:$0xff]  }
  0x44   : > { %1123 = vmatmul.mubr.bf16.gmra.mxu0 %v2253_v46  ;;  %1219 = vmatmul.mubr.bf16.gmra.mxu1 %v2254_v47  ;;  %v2341_v46 = vld [vmem:[%s2427_s13 + $0x210] ss:$20 sps:$4 sm:$0xff]   ;;  %v2342_v47 = vld [vmem:[%s2427_s13 + $0x1c8] ss:$20 sps:$4 sm:$0xff]  }
  0x45   : > { %2005 = vmatpush3.bf16.msra.mxu1 %v2256_v49  ;;  %1130 = vmatprep.mubr.bf16.mxu0 %v2260_v51  ;;  %v2345_v49 = vld [vmem:[%s2427_s13 + $0x1f0] ss:$20 sps:$4 sm:$0xff]   ;;  %v2347_v51 = vld [vmem:[%s2427_s13 + $0x218] ss:$20 sps:$4 sm:$0xff]  }
  0x46   : > { %2006 = vmatprep.subr.bf16.mxu1 %v2257_v50  ;;  %1259 = vmatprep.mubr.bf16.mxu1 %v2264_v53  ;;  %v2346_v50 = vld [vmem:[%s2427_s13 + $0x238] ss:$20 sps:$4 sm:$0xff]   ;;  %v2350_v53 = vld [vmem:[%s2427_s13 + $0x240] ss:$20 sps:$4 sm:$0xff]  }
  0x47   : > { %2139 = vmatpush3.bf16.msra.mxu0 %v2292_v57 }
  0x48   : > { %2140 = vmatprep.subr.bf16.mxu0 %v2299_v60 }
  0x49   : > { %2007 = vmatpush3.bf16.msra.mxu1 %v2259_v54  ;;  %v2351_v54 = vld [vmem:[%s2427_s13 + $0x260] ss:$20 sps:$4 sm:$0xff]  }
  0x4b   : > { %2141 = vmatpush3.bf16.msra.mxu0 %v2299_v60 }
  0x4c   : > { %1131 = vmatmul.mubr.bf16.gmra.mxu0 %v2265_v56  ;;  %1260 = vmatmul.mubr.bf16.vlgmr.msra.gmra.mxu1 %v2262_v55  ;;  %v2352_v55 = vld [vmem:[%s2427_s13 + $0x268] ss:$20 sps:$4 sm:$0xff]   ;;  %s1754_s13 = sshll.u32 %s3044_s19, 3 }
  0x4d   : > { %1138 = vmatprep.mubr.bf16.mxu0 %v2266_v58  ;;  %1267 = vmatprep.mubr.bf16.mxu1 %v2268_v59  ;;  %s2749_s10 = scalar_lea.vmem %s2999_s3, %s1754_s13  ;;  %s2776_s14 = scalar_lea.vmem %s3000_s4, %s1754_s13 }
  0x4e   : > { %2142 = vmatprep.subr.bf16.mxu0 %v2312_v1 }
  0x4f   : > { %2143 = vmatpush3.bf16.msra.mxu0 %v2312_v1 }
  0x54   : > { %1139 = vmatmul.mubr.bf16.gmra.mxu0 %v2270_v61  ;;  %1268 = vmatmul.mubr.bf16.gmra.mxu1 %v2271_v62 }
  0x55   : > { %1146 = vmatprep.mubr.bf16.mxu0 %v2273_v63  ;;  %1275 = vmatprep.mubr.bf16.mxu1 %v2275_v0 }
  0x5c   : > { %1147 = vmatmul.mubr.bf16.gmra.mxu0 %v2277_v2  ;;  %1276 = vmatmul.mubr.bf16.gmra.mxu1 %v2278_v3 }
  0x5d   : > { %1154 = vmatprep.mubr.bf16.mxu0 %v2280_v4  ;;  %1283 = vmatprep.mubr.bf16.mxu1 %v2282_v5 }
  0x64   : > { %1155 = vmatmul.mubr.bf16.gmra.mxu0 %v2284_v6  ;;  %1284 = vmatmul.mubr.bf16.gmra.mxu1 %v2285_v7 }
  0x65   : > { %1162 = vmatprep.mubr.bf16.mxu0 %v2286_v8  ;;  %1291 = vmatprep.mubr.bf16.mxu1 %v2288_v9 }
  0x6c   : > { %1163 = vmatmul.mubr.bf16.gmra.mxu0 %v2290_v10  ;;  %1292 = vmatmul.mubr.bf16.gmra.mxu1 %v2291_v11 }
  0x6d   : > { %1170 = vmatprep.mubr.bf16.mxu0 %v2293_v12  ;;  %1299 = vmatprep.mubr.bf16.mxu1 %v2295_v13 }
  0x74   : > { %1171 = vmatmul.mubr.bf16.gmra.mxu0 %v2297_v14  ;;  %1300 = vmatmul.mubr.bf16.gmra.mxu1 %v2298_v15 }
  0x75   : > { %1178 = vmatprep.mubr.bf16.mxu0 %v2300_v16  ;;  %1307 = vmatprep.mubr.bf16.mxu1 %v2302_v17 }
  0x7c   : > { %1179 = vmatmul.mubr.bf16.gmra.mxu0 %v2304_v18  ;;  %1308 = vmatmul.mubr.bf16.gmra.mxu1 %v2305_v19 }
  0x7d   : > { %1186 = vmatprep.mubr.bf16.mxu0 %v2306_v20  ;;  %1315 = vmatprep.mubr.bf16.mxu1 %v2308_v21 }
  0x84   : > { %1187 = vmatmul.mubr.bf16.gmra.mxu0 %v2310_v22  ;;  %1316 = vmatmul.mubr.bf16.gmra.mxu1 %v2311_v23 }
  0x85   : > { %1323 = vmatprep.mubr.bf16.mxu1 %v2313_v24  ;;  %2144 = vmatprep.mubr.bf16.mxu0 %v2315_v25 }
  0x8c   : > { %1324 = vmatmul.mubr.bf16.gmra.mxu1 %v2316_v26  ;;  %2145 = vmatmul.mubr.bf16.vlgmr.msra.gmra.mxu0 %v2317_v27 }
  0x8d   : > { %1331 = vmatprep.mubr.bf16.mxu1 %v2318_v28  ;;  %2148 = vmatprep.mubr.bf16.mxu0 %v2320_v29 }
  0x94   : > { %1332 = vmatmul.mubr.bf16.gmra.mxu1 %v2321_v30  ;;  %2149 = vmatmul.mubr.bf16.gmra.mxu0 %v2322_v31 }
  0x95   : > { %1339 = vmatprep.mubr.bf16.mxu1 %v2323_v32  ;;  %2152 = vmatprep.mubr.bf16.mxu0 %v2325_v33 }
  0x9c   : > { %1340 = vmatmul.mubr.bf16.gmra.mxu1 %v2326_v34  ;;  %2153 = vmatmul.mubr.bf16.gmra.mxu0 %v2327_v35 }
  0x9d   : > { %1347 = vmatprep.mubr.bf16.mxu1 %v2328_v36  ;;  %2156 = vmatprep.mubr.bf16.mxu0 %v2330_v37 }
  0xa4   : > { %1348 = vmatmul.mubr.bf16.gmra.mxu1 %v2331_v38  ;;  %2157 = vmatmul.mubr.bf16.gmra.mxu0 %v2332_v39 }
  0xa5   : > { %1355 = vmatprep.mubr.bf16.mxu1 %v2333_v40  ;;  %2160 = vmatprep.mubr.bf16.mxu0 %v2335_v41 }
  0xac   : > { %1356 = vmatmul.mubr.bf16.gmra.mxu1 %v2336_v42  ;;  %2161 = vmatmul.mubr.bf16.gmra.mxu0 %v2337_v43 }
  0xad   : > { %1363 = vmatprep.mubr.bf16.mxu1 %v2338_v44  ;;  %2164 = vmatprep.mubr.bf16.mxu0 %v2340_v45 }
  0xb4   : > { %1364 = vmatmul.mubr.bf16.gmra.mxu1 %v2341_v46  ;;  %2165 = vmatmul.mubr.bf16.gmra.mxu0 %v2342_v47 }
  0xb5   : > { %1371 = vmatprep.mubr.bf16.mxu1 %v2343_v48  ;;  %2168 = vmatprep.mubr.bf16.mxu0 %v2345_v49 }
  0xbc   : > { %1372 = vmatmul.mubr.bf16.gmra.mxu1 %v2346_v50  ;;  %2169 = vmatmul.mubr.bf16.gmra.mxu0 %v2347_v51 }
  0xbd   : > { %1379 = vmatprep.mubr.bf16.mxu1 %v2348_v52  ;;  %2172 = vmatprep.mubr.bf16.mxu0 %v2350_v53 }
  0xc4   : > { %1380 = vmatmul.mubr.bf16.gmra.mxu1 %v2351_v54  ;;  %2173 = vmatmul.mubr.bf16.gmra.mxu0 %v2352_v55 }
  0xec   : > { %v1896_v56 = vpop.f32.mrf.mxu0  ;;  %v1968_v57 = vpop.f32.mrf.mxu1 }
  0xee   : > { %v1897_v58 = vpop.f32.mrf.mxu0  ;;  %v1969_v59 = vpop.f32.mrf.mxu1 }
  0xef   : > { %v2602_v60 = vadd.f32 %v1897_v58, %v1896_v56  ;;  %v2604_v61 = vadd.f32 %v1969_v59, %v1968_v57 }
  0xf0   : > { %v1899_v62 = vpop.f32.mrf.mxu0  ;;  %v1971_v63 = vpop.f32.mrf.mxu1 }
  0xf1   : > { %3001 = vst [vmem:[#allocation2_spill] sm:$0xff] %v2604_v61 }
  0xf2   : > { %v1900_v0 = vpop.f32.mrf.mxu0  ;;  %v1972_v1 = vpop.f32.mrf.mxu1 }
  0xf3   : > { %v2606_v2 = vadd.f32 %v1900_v0, %v1899_v62  ;;  %v2608_v3 = vadd.f32 %v1972_v1, %v1971_v63 }
  0xf4   : > { %v1902_v4 = vpop.f32.mrf.mxu0  ;;  %v1974_v5 = vpop.f32.mrf.mxu1 }
  0xf5   : > { %3002 = vst [vmem:[#allocation3_spill] sm:$0xff] %v2608_v3 }
  0xf6   : > { %v1903_v6 = vpop.f32.mrf.mxu0  ;;  %v1975_v7 = vpop.f32.mrf.mxu1 }
  0xf7   : > { %v2610_v8 = vadd.f32 %v1903_v6, %v1902_v4  ;;  %v2612_v9 = vadd.f32 %v1975_v7, %v1974_v5 }
  0xf8   : > { %v1905_v10 = vpop.f32.mrf.mxu0  ;;  %v1977_v11 = vpop.f32.mrf.mxu1 }
  0xf9   : > { %3003 = vst [vmem:[#allocation4_spill] sm:$0xff] %v2612_v9  ;;  %v2734_v9 = vld [vmem:[%s2998_s2] ss:$0 sm:$0xff] }
  0xfa   : > { %v1906_v12 = vpop.f32.mrf.mxu0  ;;  %v1978_v13 = vpop.f32.mrf.mxu1 }
  0xfb   : > { %v2614_v14 = vadd.f32 %v1906_v12, %v1905_v10  ;;  %v2616_v15 = vadd.f32 %v1978_v13, %v1977_v11 }
  0xfc   : > { %v1908_v16 = vpop.f32.mrf.mxu0  ;;  %v1980_v17 = vpop.f32.mrf.mxu1 }
  0xfd   : > { %3004 = vst [vmem:[#allocation5_spill] sm:$0xff] %v2616_v15 }
  0xfe   : > { %v1909_v18 = vpop.f32.mrf.mxu0  ;;  %v1981_v19 = vpop.f32.mrf.mxu1 }
  0xff   : > { %v2618_v20 = vadd.f32 %v1909_v18, %v1908_v16  ;;  %v2620_v21 = vadd.f32 %v1981_v19, %v1980_v17 }
 0x100   : > { %v1911_v22 = vpop.f32.mrf.mxu0  ;;  %v1983_v23 = vpop.f32.mrf.mxu1 }
 0x101   : > { %3005 = vst [vmem:[#allocation6_spill] sm:$0xff] %v2620_v21 }
 0x102   : > { %v1912_v24 = vpop.f32.mrf.mxu0  ;;  %v1984_v25 = vpop.f32.mrf.mxu1 }
 0x103   : > { %v2622_v26 = vadd.f32 %v1912_v24, %v1911_v22  ;;  %v2624_v27 = vadd.f32 %v1984_v25, %v1983_v23 }
 0x104   : > { %v1914_v28 = vpop.f32.mrf.mxu0  ;;  %v1986_v29 = vpop.f32.mrf.mxu1 }
 0x105   : > { %3006 = vst [vmem:[#allocation7_spill] sm:$0xff] %v2624_v27 }
 0x106   : > { %v1915_v30 = vpop.f32.mrf.mxu0  ;;  %v1987_v31 = vpop.f32.mrf.mxu1 }
 0x107   : > { %v2626_v32 = vadd.f32 %v1915_v30, %v1914_v28  ;;  %v2628_v33 = vadd.f32 %v1987_v31, %v1986_v29 }
 0x108   : > { %v1917_v34 = vpop.f32.mrf.mxu0  ;;  %v1989_v35 = vpop.f32.mrf.mxu1 }
 0x109   : > { %3007 = vst [vmem:[#allocation8_spill] sm:$0xff] %v2628_v33 }
 0x10a   : > { %v1918_v36 = vpop.f32.mrf.mxu0  ;;  %v1990_v37 = vpop.f32.mrf.mxu1 }
 0x10b   : > { %v2630_v38 = vadd.f32 %v1918_v36, %v1917_v34  ;;  %v2632_v39 = vadd.f32 %v1990_v37, %v1989_v35 }
 0x10c   : > { %v1920_v40 = vpop.f32.mrf.mxu0  ;;  %v2634_v41 = vpop.f32.mrf.mxu1 }
 0x10d   : > { %3008 = vst [vmem:[#allocation9_spill] sm:$0xff] %v2632_v39 }
 0x10e   : > { %v1921_v42 = vpop.f32.mrf.mxu0  ;;  %v2636_v43 = vpop.f32.mrf.mxu1 }
 0x10f   : > { %v2638_v44 = vadd.f32 %v1921_v42, %v1920_v40 }
 0x110   : > { %v1923_v45 = vpop.f32.mrf.mxu0  ;;  %v2640_v46 = vpop.f32.mrf.mxu1 }
 0x112   : > { %v1924_v47 = vpop.f32.mrf.mxu0  ;;  %v2642_v48 = vpop.f32.mrf.mxu1 }
 0x113   : > { %v2644_v49 = vadd.f32 %v1924_v47, %v1923_v45 }
 0x114   : > { %v1926_v50 = vpop.f32.mrf.mxu0  ;;  %v2014_v51 = vpop.f32.mrf.mxu1 }
 0x116   : > { %v1927_v52 = vpop.f32.mrf.mxu0  ;;  %v2015_v53 = vpop.f32.mrf.mxu1 }
 0x117   : > { %v2646_v54 = vadd.f32 %v1927_v52, %v1926_v50  ;;  %v2016_v61 = vadd.f32 %v2015_v53, %v2014_v51 }
 0x118   : > { %v1929_v55 = vpop.f32.mrf.mxu0  ;;  %v2017_v56 = vpop.f32.mrf.mxu1 }
 0x11a   : > { %v1930_v57 = vpop.f32.mrf.mxu0  ;;  %v2018_v58 = vpop.f32.mrf.mxu1 }
 0x11b   : > { %v2648_v59 = vadd.f32 %v1930_v57, %v1929_v55 }
 0x11c   : > { %v1932_v62 = vpop.f32.mrf.mxu0  ;;  %v2650_v63 = vpop.f32.mrf.mxu1 }
 0x11e   : > { %v1933_v0 = vpop.f32.mrf.mxu0  ;;  %v2652_v1 = vpop.f32.mrf.mxu1 }
 0x11f   : > { %v2654_v4 = vadd.f32 %v1933_v0, %v1932_v62 }
 0x120   : > { %v1935_v5 = vpop.f32.mrf.mxu0  ;;  %v2656_v6 = vpop.f32.mrf.mxu1 }
 0x122   : > { %v1936_v7 = vpop.f32.mrf.mxu0  ;;  %v2658_v10 = vpop.f32.mrf.mxu1 }
 0x123   : > { %v2660_v11 = vadd.f32 %v1936_v7, %v1935_v5 }
 0x124   : > { %v2662_v12 = vpop.f32.mrf.mxu0  ;;  %v2026_v13 = vpop.f32.mrf.mxu1 }
 0x126   : > { %v2664_v16 = vpop.f32.mrf.mxu0  ;;  %v2027_v17 = vpop.f32.mrf.mxu1 }
 0x128   : > { %v2666_v18 = vpop.f32.mrf.mxu0  ;;  %v2668_v19 = vpop.f32.mrf.mxu1 }
 0x12a   : > { %v2670_v22 = vpop.f32.mrf.mxu0  ;;  %v2672_v23 = vpop.f32.mrf.mxu1 }
 0x12c   : > { %v2674_v24 = vpop.f32.mrf.mxu0  ;;  %v2676_v25 = vpop.f32.mrf.mxu1 }
 0x12e   : > { %v2678_v28 = vpop.f32.mrf.mxu0  ;;  %v2680_v29 = vpop.f32.mrf.mxu1 }
 0x130   : > { %v2682_v30 = vpop.f32.mrf.mxu0  ;;  %v2684_v31 = vpop.f32.mrf.mxu1 }
 0x131   : > { %3009 = vst [vmem:[#allocation10_spill] sm:$0xff] %v2682_v30  ;;  %v1112_v30 = vadd.f32 %v2614_v14, %v2734_v9 }
 0x132   : > { %v2686_v34 = vpop.f32.mrf.mxu0  ;;  %v2688_v35 = vpop.f32.mrf.mxu1 }
 0x133   : > { %3010 = vst [vmem:[#allocation11_spill] sm:$0xff] %v2686_v34  ;;  %v1551_v34 = vld [vmem:[%s2749_s10 + $0x10] sm:$0xff] }
 0x134   : > { %v2690_v36 = vpop.f32.mrf.mxu0  ;;  %v2692_v37 = vpop.f32.mrf.mxu1 }
 0x136   : > { %v2694_v40 = vpop.f32.mrf.mxu0  ;;  %v2696_v42 = vpop.f32.mrf.mxu1 }
 0x138   : > { %v2698_v45 = vpop.f32.mrf.mxu0  ;;  %v2700_v47 = vpop.f32.mrf.mxu1 }
 0x139   : > { %3011 = vst [vmem:[#allocation12_spill] sm:$0xff] %v2698_v45  ;;  %v1104_v45 = vadd.f32 %v2606_v2, %v2734_v9 }
 0x13a   : > { %v2702_v50 = vpop.f32.mrf.mxu0  ;;  %v2704_v52 = vpop.f32.mrf.mxu1 }
 0x13b   : > { %3012 = vst [vmem:[#allocation13_spill] sm:$0xff] %v2702_v50 }
 0x13c   : > { %v2706_v55 = vpop.f32.mrf.mxu0  ;;  %v2708_v57 = vpop.f32.mrf.mxu1 }
 0x13d   : > { %3013 = vst [vmem:[#allocation14_spill] sm:$0xff] %v2706_v55  ;;  %v2010_v55 = vadd.f32 %v2636_v43, %v2634_v41  ;;  %v2013_v41 = vadd.f32 %v2642_v48, %v2640_v46 }
 0x13e   : > { %v2710_v62 = vpop.f32.mrf.mxu0  ;;  %v2712_v0 = vpop.f32.mrf.mxu1 }
 0x13f   : > { %3014 = vst [vmem:[#allocation15_spill] sm:$0xff] %v2710_v62  ;;  %v1109_v62 = vadd.f32 %v2610_v8, %v2734_v9 }
 0x140   : > { %v2714_v5 = vpop.f32.mrf.mxu0  ;;  %v2716_v7 = vpop.f32.mrf.mxu1 }
 0x141   : > { %3015 = vst [vmem:[#allocation16_spill] sm:$0xff] %v2714_v5  ;;  %v1270_v8 = vadd.f32 %v2016_v61, %v1109_v62 }
 0x142   : > { %v2718_v39 = vpop.f32.mrf.mxu0  ;;  %v2720_v33 = vpop.f32.mrf.mxu1 }
 0x143   : > { %3016 = vst [vmem:[#allocation17_spill] sm:$0xff] %v2718_v39 }
 0x144   : > { %v2722_v27 = vpop.f32.mrf.mxu0  ;;  %v2724_v21 = vpop.f32.mrf.mxu1 }
 0x145   : > { %3017 = vst [vmem:[#allocation18_spill] sm:$0xff] %v2722_v27 }
 0x146   : > { %v2726_v3 = vpop.f32.mrf.mxu0  ;;  %v2728_v15 = vpop.f32.mrf.mxu1 }
 0x147   : > { %3018 = vst [vmem:[#allocation19_spill] sm:$0xff] %v2726_v3  ;;  %v2019_v3 = vadd.f32 %v2018_v58, %v2017_v56  ;;  %v1549_v56 = vld [vmem:[%s2749_s10] sm:$0xff]  ;;  %v2028_v58 = vadd.f32 %v2027_v17, %v2026_v13  ;;  %v1265_v13 = vadd.f32 %v2013_v41, %v1104_v45  ;;  %v1128_v41 = vadd.f32 %v2630_v38, %v2734_v9 }
 0x148   : > { %v2736_v5 = vpop.f32.mrf.mxu0  ;;  %v2738_v39 = vpop.f32.mrf.mxu1 }
 0x149   : > { %3019 = vst [vmem:[#allocation20_spill] sm:$0xff] %v2736_v5  ;;  %v1101_v5 = vadd.f32 %v2602_v60, %v2734_v9  ;;  %v1273_v62 = vadd.f32 %v2019_v3, %v1112_v30  ;;  %v2022_v3 = vadd.f32 %v2652_v1, %v2650_v63 }
 0x14a   : > { %v2751_v51 = vpop.f32.mrf.mxu0  ;;  %v2753_v53 = vpop.f32.mrf.mxu1 }
 0x14b   : > { %3020 = vst [vmem:[#allocation21_spill] sm:$0xff] %v2751_v51  ;;  %v1262_v50 = vadd.f32 %v2010_v55, %v1101_v5 }
 0x14c   : > { %v2759_v43 = vpop.f32.mrf.mxu1  ;;  %v2146_v27 = vpop.f32.mrf.mxu0 }
 0x14d   : > { %3021 = vst [vmem:[#allocation22_spill] sm:$0xff] %v2759_v43  ;;  %v1431_v51 = vadd.f32 %v2146_v27, %v1270_v8  ;;  %v1125_v43 = vadd.f32 %v2626_v32, %v2734_v9  ;;  %v1552_v27 = vld [vmem:[%s2749_s10 + $0x18] sm:$0xff] }
 0x14e   : > { %v2766_v60 = vpop.f32.mrf.mxu1  ;;  %v1422_v61 = vpop.f32.mrf.mxu0 }
 0x14f   : > { %v1583_v46 = vadd.f32 %v1551_v34, %v1431_v51  ;;  %v1423_v48 = vadd.f32 %v1422_v61, %v1262_v50  ;;  %v1117_v34 = vadd.f32 %v2618_v20, %v2734_v9  ;;  %v2031_v50 = vadd.f32 %v2672_v23, %v2668_v19  ;;  %v1550_v51 = vld [vmem:[%s2749_s10 + $0x8] sm:$0xff]  ;;  %v1555_v23 = vld [vmem:[%s2749_s10 + $0x30] sm:$0xff] }
 0x150   : > { %v2778_v2 = vpop.f32.mrf.mxu1  ;;  %v2147_v14 = vpop.f32.mrf.mxu0  ;;  %v1286_v1 = vadd.f32 %v2028_v58, %v1125_v43  ;;  %v2025_v20 = vadd.f32 %v2658_v10, %v2656_v6  ;;  %v1120_v43 = vadd.f32 %v2622_v26, %v2734_v9  ;;  %v2040_v10 = vadd.f32 %v2696_v42, %v2692_v37 }
 0x151   : > { %v1615_v17 = vmax.f32 %v1583_v46, 0.0  ;;  %v1581_v30 = vadd.f32 %v1549_v56, %v1423_v48  ;;  %v1434_v32 = vadd.f32 %v2147_v14, %v1273_v62  ;;  %v1278_v62 = vadd.f32 %v2022_v3, %v1117_v34  ;;  %v1553_v14 = vld [vmem:[%s2749_s10 + $0x20] sm:$0xff] }
 0x152   : > { %v2787_v55 = vpop.f32.mrf.mxu1  ;;  %v1425_v5 = vpop.f32.mrf.mxu0  ;;  %v1289_v6 = vadd.f32 %v2031_v50, %v1128_v41  ;;  %v1141_v3 = vadd.f32 %v2646_v54, %v2734_v9  ;;  %v1281_v34 = vadd.f32 %v2025_v20, %v1120_v43  ;;  %v2034_v50 = vadd.f32 %v2680_v29, %v2676_v25 }
 0x153   : > { %1648 = vst.msk [vmem:[%s2776_s14 + $0x10] sm:$0xff] %vm1645_vm0, %v1615_v17  ;;  %v1613_v45 = vmax.f32 %v1581_v30, 0.0  ;;  %v1584_v8 = vadd.f32 %v1552_v27, %v1434_v32  ;;  %v1426_v63 = vadd.f32 %v1425_v5, %v1265_v13  ;;  %v1556_v32 = vld [vmem:[%s2749_s10 + $0x38] sm:$0xff]  ;;  %v2043_v54 = vadd.f32 %v2704_v52, %v2700_v47 }
 0x154   : > { %v2796_v61 = vpop.f32.mrf.mxu1  ;;  %v2150_v19 = vpop.f32.mrf.mxu0  ;;  %v1302_v41 = vadd.f32 %v2040_v10, %v1141_v3  ;;  %v1144_v20 = vadd.f32 %v2648_v59, %v2734_v9  ;;  %v2037_v47 = vadd.f32 %v2688_v35, %v2684_v31  ;;  %v1136_v59 = vadd.f32 %v2644_v49, %v2734_v9 }
 0x155   : > { %1646 = vst.msk [vmem:[%s2776_s14] sm:$0xff] %vm1645_vm0, %v1613_v45  ;;  %v1616_v56 = vmax.f32 %v1584_v8, 0.0  ;;  %v1582_v46 = vadd.f32 %v1550_v51, %v1426_v63  ;;  %v1447_v48 = vadd.f32 %v2150_v19, %v1286_v1  ;;  %v1133_v51 = vadd.f32 %v2638_v44, %v2734_v9  ;;  %v1554_v63 = vld [vmem:[%s2749_s10 + $0x28] sm:$0xff] }
 0x156   : > { %v2803_v38 = vpop.f32.mrf.mxu1  ;;  %v1438_v58 = vpop.f32.mrf.mxu0  ;;  %v1940_v44 = vadd.f32 %v2664_v16, %v2662_v12  ;;  %v1557_v16 = vld [vmem:[%s2749_s10 + $0x40] sm:$0xff]  ;;  %v1305_v31 = vadd.f32 %v2043_v54, %v1144_v20  ;;  %v2052_v35 = vadd.f32 %v2728_v15, %v2724_v21  ;;  %v1943_v49 = vadd.f32 %v2670_v22, %v2666_v18 }
 0x157   : > { %1649 = vst.msk [vmem:[%s2776_s14 + $0x18] sm:$0xff] %vm1645_vm0, %v1616_v56  ;;  %v1614_v27 = vmax.f32 %v1582_v46, 0.0  ;;  %v1587_v13 = vadd.f32 %v1555_v23, %v1447_v48  ;;  %v1439_v17 = vadd.f32 %v1438_v58, %v1278_v62  ;;  %v1559_v23 = vld [vmem:[%s2749_s10 + $0x50] sm:$0xff]  ;;  %v1294_v62 = vadd.f32 %v2034_v50, %v1133_v51 }
 0x158   : > { %v2812_v26 = vpop.f32.mrf.mxu1  ;;  %v2151_v30 = vpop.f32.mrf.mxu0  ;;  %v1157_v10 = vadd.f32 %v1940_v44, %v2734_v9  ;;  %v1297_v3 = vadd.f32 %v2037_v47, %v1136_v59  ;;  %v2046_v15 = vadd.f32 %v2712_v0, %v2708_v57  ;;  %v2055_v18 = vadd.f32 %v2753_v53, %v2738_v39 }
 0x159   : > { %1647 = vst.msk [vmem:[%s2776_s14 + $0x8] sm:$0xff] %vm1645_vm0, %v1614_v27  ;;  %v1619_v37 = vmax.f32 %v1587_v13, 0.0  ;;  %v1585_v42 = vadd.f32 %v1553_v14, %v1439_v17  ;;  %v1450_v5 = vadd.f32 %v2151_v30, %v1289_v6  ;;  %v1560_v17 = vld [vmem:[%s2749_s10 + $0x58] sm:$0xff]  ;;  %v1160_v51 = vadd.f32 %v1943_v49, %v2734_v9 }
 0x15a   : > { %v2823_v45 = vpop.f32.mrf.mxu1  ;;  %v1441_v8 = vpop.f32.mrf.mxu0  ;;  %v2049_v54 = vadd.f32 %v2720_v33, %v2716_v7  ;;  %v1561_v7 = vld [vmem:[%s2749_s10 + $0x60] sm:$0xff]  ;;  %v2064_v44 = vadd.f32 %v2803_v38, %v2796_v61 }
 0x15b   : > { %1652 = vst.msk [vmem:[%s2776_s14 + $0x30] sm:$0xff] %vm1645_vm0, %v1619_v37  ;;  %v1617_v25 = vmax.f32 %v1585_v42, 0.0  ;;  %v1588_v29 = vadd.f32 %v1556_v32, %v1450_v5  ;;  %v1442_v1 = vadd.f32 %v1441_v8, %v1281_v34  ;;  %v1149_v34 = vadd.f32 %v2654_v4, %v2734_v9  ;;  %v1558_v37 = vld [vmem:[%s2749_s10 + $0x48] sm:$0xff]  ;;  %v1563_v8 = vld [vmem:[%s2749_s10 + $0x70] sm:$0xff] }
 0x15c   : > { %v2834_v52 = vpop.f32.mrf.mxu1  ;;  %v2154_v19 = vpop.f32.mrf.mxu0  ;;  %v1318_v5 = vadd.f32 %v2052_v35, %v1157_v10  ;;  %v1952_v4 = vadd.f32 %v2694_v40, %v2690_v36  ;;  %v1946_v36 = vadd.f32 %v2678_v28, %v2674_v24  ;;  %v1321_v20 = vadd.f32 %v2055_v18, %v1160_v51 }
 0x15d   : > { %1650 = vst.msk [vmem:[%s2776_s14 + $0x20] sm:$0xff] %vm1645_vm0, %v1617_v25  ;;  %v1620_v56 = vmax.f32 %v1588_v29, 0.0  ;;  %v1586_v46 = vadd.f32 %v1554_v63, %v1442_v1  ;;  %v1463_v48 = vadd.f32 %v2154_v19, %v1302_v41  ;;  %v1310_v1 = vadd.f32 %v2046_v15, %v1149_v34  ;;  %v3028_v34 = vld [vmem:[#allocation19_spill] sm:$0xff] }
 0x15e   : > { %v2841_v43 = vpop.f32.mrf.mxu1  ;;  %v1454_v12 = vpop.f32.mrf.mxu0  ;;  %v1152_v41 = vadd.f32 %v2660_v11, %v2734_v9  ;;  %v3023_v11 = vld [vmem:[#allocation13_spill] sm:$0xff]  ;;  %v1165_v35 = vadd.f32 %v1946_v36, %v2734_v9  ;;  %v2067_v10 = vadd.f32 %v2823_v45, %v2812_v26 }
 0x15f   : > { %1653 = vst.msk [vmem:[%s2776_s14 + $0x38] sm:$0xff] %vm1645_vm0, %v1620_v56  ;;  %v1618_v58 = vmax.f32 %v1586_v46, 0.0  ;;  %v1591_v14 = vadd.f32 %v1559_v23, %v1463_v48  ;;  %v1455_v6 = vadd.f32 %v1454_v12, %v1294_v62  ;;  %v1173_v56 = vadd.f32 %v1952_v4, %v2734_v9  ;;  %v3022_v46 = vld [vmem:[#allocation12_spill] sm:$0xff]  ;;  %v1564_v62 = vld [vmem:[%s2749_s10 + $0x78] sm:$0xff]  ;;  %v3024_v12 = vld [vmem:[#allocation22_spill] sm:$0xff] }
 0x160   : > { %v2851_v27 = vpop.f32.mrf.mxu1  ;;  %v2155_v13 = vpop.f32.mrf.mxu0  ;;  %v1955_v48 = vadd.f32 %v3023_v11, %v3022_v46  ;;  %v1313_v59 = vadd.f32 %v2049_v54, %v1152_v41  ;;  %v3029_v4 = vld [vmem:[#allocation14_spill] sm:$0xff]  ;;  %v3030_v54 = vld [vmem:[#allocation15_spill] sm:$0xff] }
 0x161   : > { %1651 = vst.msk [vmem:[%s2776_s14 + $0x28] sm:$0xff] %vm1645_vm0, %v1618_v58  ;;  %v1623_v21 = vmax.f32 %v1591_v14, 0.0  ;;  %v1589_v30 = vadd.f32 %v1557_v16, %v1455_v6  ;;  %v1466_v32 = vadd.f32 %v2155_v13, %v1305_v31  ;;  %v2058_v16 = vadd.f32 %v2766_v60, %v3024_v12  ;;  %v3025_v58 = vld [vmem:[#allocation10_spill] sm:$0xff]  ;;  %v3026_v14 = vld [vmem:[#allocation11_spill] sm:$0xff] }
 0x162   : > { %v2862_v22 = vpop.f32.mrf.mxu1  ;;  %v1457_v50 = vpop.f32.mrf.mxu0  ;;  %v1949_v6 = vadd.f32 %v3026_v14, %v3025_v58 }
 0x163   : > { %1656 = vst.msk [vmem:[%s2776_s14 + $0x50] sm:$0xff] %vm1645_vm0, %v1623_v21  ;;  %v1621_v57 = vmax.f32 %v1589_v30, 0.0  ;;  %v1592_v0 = vadd.f32 %v1560_v17, %v1466_v32  ;;  %v1458_v42 = vadd.f32 %v1457_v50, %v1297_v3  ;;  %v1562_v17 = vld [vmem:[%s2749_s10 + $0x68] sm:$0xff]  ;;  %v1334_v21 = vadd.f32 %v2064_v44, %v1173_v56  ;;  %v3027_v32 = vld [vmem:[#allocation18_spill] sm:$0xff] }
 0x164   : > { %v2074_v39 = vpop.f32.mrf.mxu1  ;;  %v2158_v53 = vpop.f32.mrf.mxu0  ;;  %v1176_v30 = vadd.f32 %v1955_v48, %v2734_v9  ;;  %v1964_v18 = vadd.f32 %v3028_v34, %v3027_v32  ;;  %v2061_v50 = vadd.f32 %v2787_v55, %v2778_v2  ;;  %v1168_v51 = vadd.f32 %v1949_v6, %v2734_v9  ;;  %v1565_v55 = vld [vmem:[%s2749_s10 + $0x80] sm:$0xff]  ;;  %v3033_v48 = vld [vmem:[#allocation16_spill] sm:$0xff] }
 0x165   : > { %1654 = vst.msk [vmem:[%s2776_s14 + $0x40] sm:$0xff] %vm1645_vm0, %v1621_v57  ;;  %v1624_v63 = vmax.f32 %v1592_v0, 0.0  ;;  %v1590_v25 = vadd.f32 %v1558_v37, %v1458_v42  ;;  %v1479_v29 = vadd.f32 %v2158_v53, %v1318_v5  ;;  %v1567_v37 = vld [vmem:[%s2749_s10 + $0x90] sm:$0xff]  ;;  %v1326_v5 = vadd.f32 %v2058_v16, %v1165_v35 }
 0x166   : > { %v2075_v40 = vpop.f32.mrf.mxu1  ;;  %v1470_v33 = vpop.f32.mrf.mxu0  ;;  %v1958_v53 = vadd.f32 %v3030_v54, %v3029_v4  ;;  %v1189_v36 = vadd.f32 %v1964_v18, %v2734_v9  ;;  %v2070_v56 = vadd.f32 %v2841_v43, %v2834_v52  ;;  %v2073_v58 = vadd.f32 %v2862_v22, %v2851_v27  ;;  %v3035_v18 = vld [vmem:[#allocation4_spill] sm:$0xff]  ;;  %v3036_v54 = vld [vmem:[#allocation2_spill] sm:$0xff] }
 0x167   : > { %1657 = vst.msk [vmem:[%s2776_s14 + $0x58] sm:$0xff] %vm1645_vm0, %v1624_v63  ;;  %v1622_v47 = vmax.f32 %v1590_v25, 0.0  ;;  %v1595_v19 = vadd.f32 %v1563_v8, %v1479_v29  ;;  %v1471_v23 = vadd.f32 %v1470_v33, %v1310_v1  ;;  %v1337_v63 = vadd.f32 %v2067_v10, %v1176_v30  ;;  %v3031_v33 = vld [vmem:[#allocation20_spill] sm:$0xff] }
 0x168   : > { %v2077_v24 = vpop.f32.mrf.mxu1  ;;  %v2159_v28 = vpop.f32.mrf.mxu0  ;;  %v2076_v25 = vadd.f32 %v2075_v40, %v2074_v39  ;;  %v1181_v11 = vadd.f32 %v1958_v53, %v2734_v9  ;;  %v1571_v10 = vld [vmem:[%s2749_s10 + $0xb0] sm:$0xff]  ;;  %v1197_v53 = vadd.f32 %v3036_v54, %v2734_v9 }
 0x169   : > { %1655 = vst.msk [vmem:[%s2776_s14 + $0x48] sm:$0xff] %vm1645_vm0, %v1622_v47  ;;  %v1627_v61 = vmax.f32 %v1595_v19, 0.0  ;;  %v1593_v38 = vadd.f32 %v1561_v7, %v1471_v23  ;;  %v1482_v31 = vadd.f32 %v2159_v28, %v1321_v20  ;;  %v3032_v7 = vld [vmem:[#allocation21_spill] sm:$0xff]  ;;  %v1329_v23 = vadd.f32 %v2061_v50, %v1168_v51 }
 0x16a   : > { %v2078_v49 = vpop.f32.mrf.mxu1  ;;  %v1473_v13 = vpop.f32.mrf.mxu0  ;;  %v1967_v20 = vadd.f32 %v3032_v7, %v3031_v33  ;;  %v1568_v19 = vld [vmem:[%s2749_s10 + $0x98] sm:$0xff]  ;;  %v1205_v50 = vadd.f32 %v3035_v18, %v2734_v9 }
 0x16b   : > { %1660 = vst.msk [vmem:[%s2776_s14 + $0x70] sm:$0xff] %vm1645_vm0, %v1627_v61  ;;  %v1625_v60 = vmax.f32 %v1593_v38, 0.0  ;;  %v1596_v3 = vadd.f32 %v1564_v62, %v1482_v31  ;;  %v1474_v15 = vadd.f32 %v1473_v13, %v1313_v59  ;;  %v3034_v28 = vld [vmem:[#allocation17_spill] sm:$0xff]  ;;  %v2079_v59 = vadd.f32 %v2078_v49, %v2077_v24  ;;  %v1566_v61 = vld [vmem:[%s2749_s10 + $0x88] sm:$0xff] }
 0x16c   : > { %v2905_v26 = vpop.f32.mrf.mxu1  ;;  %v2162_v45 = vpop.f32.mrf.mxu0  ;;  %v1961_v62 = vadd.f32 %v3034_v28, %v3033_v48  ;;  %v1350_v31 = vadd.f32 %v2076_v25, %v1189_v36  ;;  %v1192_v35 = vadd.f32 %v1967_v20, %v2734_v9  ;;  %v1573_v28 = vld [vmem:[%s2749_s10 + $0xc0] sm:$0xff] }
 0x16d   : > { %1658 = vst.msk [vmem:[%s2776_s14 + $0x60] sm:$0xff] %vm1645_vm0, %v1625_v60  ;;  %v1628_v57 = vmax.f32 %v1596_v3, 0.0  ;;  %v1594_v0 = vadd.f32 %v1562_v17, %v1474_v15  ;;  %v1495_v42 = vadd.f32 %v2162_v45, %v1334_v21  ;;  %v1342_v17 = vadd.f32 %v2070_v56, %v1181_v11  ;;  %v1569_v21 = vld [vmem:[%s2749_s10 + $0xa0] sm:$0xff] }
 0x16e   : > { %v2081_v8 = vpop.f32.mrf.mxu1  ;;  %v1486_v2 = vpop.f32.mrf.mxu0  ;;  %v1184_v60 = vadd.f32 %v1961_v62, %v2734_v9  ;;  %v1353_v30 = vadd.f32 %v2079_v59, %v1192_v35 }
 0x16f   : > { %1661 = vst.msk [vmem:[%s2776_s14 + $0x78] sm:$0xff] %vm1645_vm0, %v1628_v57  ;;  %v1626_v29 = vmax.f32 %v1594_v0, 0.0  ;;  %v1599_v1 = vadd.f32 %v1567_v37, %v1495_v42  ;;  %v1487_v41 = vadd.f32 %v1486_v2, %v1326_v5  ;;  %v1572_v57 = vld [vmem:[%s2749_s10 + $0xb8] sm:$0xff]  ;;  %v2082_v42 = vadd.f32 %v2081_v8, %v2905_v26 }
 0x170   : > { %v2083_v44 = vpop.f32.mrf.mxu1  ;;  %v2163_v47 = vpop.f32.mrf.mxu0  ;;  %v1345_v0 = vadd.f32 %v2073_v58, %v1184_v60 }
 0x171   : > { %1659 = vst.msk [vmem:[%s2776_s14 + $0x68] sm:$0xff] %vm1645_vm0, %v1626_v29  ;;  %v1631_v39 = vmax.f32 %v1599_v1, 0.0  ;;  %v1597_v40 = vadd.f32 %v1565_v55, %v1487_v41  ;;  %v1498_v46 = vadd.f32 %v2163_v47, %v1337_v63  ;;  %v1570_v63 = vld [vmem:[%s2749_s10 + $0xa8] sm:$0xff]  ;;  %v3037_v41 = vld [vmem:[#allocation5_spill] sm:$0xff]  ;;  %v1575_v47 = vld [vmem:[%s2749_s10 + $0xd0] sm:$0xff] }
 0x172   : > { %v2084_v12 = vpop.f32.mrf.mxu1  ;;  %v1489_v16 = vpop.f32.mrf.mxu0  ;;  %v1208_v36 = vadd.f32 %v3037_v41, %v2734_v9 }
 0x173   : > { %1664 = vst.msk [vmem:[%s2776_s14 + $0x90] sm:$0xff] %vm1645_vm0, %v1631_v39  ;;  %v1629_v38 = vmax.f32 %v1597_v40, 0.0  ;;  %v1600_v52 = vadd.f32 %v1568_v19, %v1498_v46  ;;  %v1490_v43 = vadd.f32 %v1489_v16, %v1329_v23  ;;  %v2085_v33 = vadd.f32 %v2084_v12, %v2083_v44  ;;  %v3038_v40 = vld [vmem:[#allocation3_spill] sm:$0xff] }
 0x174   : > { %v2086_v14 = vpop.f32.mrf.mxu1  ;;  %v2166_v6 = vpop.f32.mrf.mxu0  ;;  %v1358_v39 = vadd.f32 %v2082_v42, %v1197_v53  ;;  %v1200_v46 = vadd.f32 %v3038_v40, %v2734_v9 }
 0x175   : > { %1662 = vst.msk [vmem:[%s2776_s14 + $0x80] sm:$0xff] %vm1645_vm0, %v1629_v38  ;;  %v1632_v24 = vmax.f32 %v1600_v52, 0.0  ;;  %v1598_v49 = vadd.f32 %v1566_v61, %v1490_v43  ;;  %v1511_v13 = vadd.f32 %v2166_v6, %v1350_v31  ;;  %v1576_v38 = vld [vmem:[%s2749_s10 + $0xd8] sm:$0xff] }
 0x176   : > { %v2087_v3 = vpop.f32.mrf.mxu1  ;;  %v1502_v15 = vpop.f32.mrf.mxu0  ;;  %v1361_v52 = vadd.f32 %v2085_v33, %v1200_v46 }
 0x177   : > { %1665 = vst.msk [vmem:[%s2776_s14 + $0x98] sm:$0xff] %vm1645_vm0, %v1632_v24  ;;  %v1630_v27 = vmax.f32 %v1598_v49, 0.0  ;;  %v1603_v22 = vadd.f32 %v1571_v10, %v1511_v13  ;;  %v2088_v32 = vadd.f32 %v2087_v3, %v2086_v14  ;;  %v1503_v34 = vadd.f32 %v1502_v15, %v1342_v17  ;;  %v1574_v10 = vld [vmem:[%s2749_s10 + $0xc8] sm:$0xff]  ;;  %v3039_v24 = vld [vmem:[#allocation6_spill] sm:$0xff] }
 0x178   : > { %v2089_v45 = vpop.f32.mrf.mxu1  ;;  %v2167_v37 = vpop.f32.mrf.mxu0  ;;  %v1213_v49 = vadd.f32 %v3039_v24, %v2734_v9 }
 0x179   : > { %1663 = vst.msk [vmem:[%s2776_s14 + $0x88] sm:$0xff] %vm1645_vm0, %v1630_v27  ;;  %v1635_v5 = vmax.f32 %v1603_v22, 0.0  ;;  %v1601_v51 = vadd.f32 %v1569_v21, %v1503_v34  ;;  %v1514_v4 = vadd.f32 %v2167_v37, %v1353_v30  ;;  %v1366_v25 = vadd.f32 %v2088_v32, %v1205_v50  ;;  %v3040_v32 = vld [vmem:[#allocation7_spill] sm:$0xff]  ;;  %v3041_v37 = vld [vmem:[#allocation8_spill] sm:$0xff] }
 0x17a   : > { %v2090_v2 = vpop.f32.mrf.mxu1  ;;  %v1505_v55 = vpop.f32.mrf.mxu0  ;;  %v1216_v34 = vadd.f32 %v3040_v32, %v2734_v9 }
 0x17b   : > { %1668 = vst.msk [vmem:[%s2776_s14 + $0xb0] sm:$0xff] %vm1645_vm0, %v1635_v5  ;;  %v1633_v29 = vmax.f32 %v1601_v51, 0.0  ;;  %v1604_v1 = vadd.f32 %v1572_v57, %v1514_v4  ;;  %v2091_v26 = vadd.f32 %v2090_v2, %v2089_v45  ;;  %v1506_v8 = vadd.f32 %v1505_v55, %v1345_v0  ;;  %v1577_v45 = vld [vmem:[%s2749_s10 + $0xe0] sm:$0xff]  ;;  %v3042_v55 = vld [vmem:[#allocation9_spill] sm:$0xff] }
 0x17c   : > { %v2092_v7 = vpop.f32.mrf.mxu1  ;;  %v2170_v20 = vpop.f32.mrf.mxu0  ;;  %v1221_v57 = vadd.f32 %v3041_v37, %v2734_v9 }
 0x17d   : > { %1666 = vst.msk [vmem:[%s2776_s14 + $0xa0] sm:$0xff] %vm1645_vm0, %v1633_v29  ;;  %v1636_v19 = vmax.f32 %v1604_v1, 0.0  ;;  %v1602_v23 = vadd.f32 %v1570_v63, %v1506_v8  ;;  %v1527_v56 = vadd.f32 %v2170_v20, %v1366_v25  ;;  %v1369_v12 = vadd.f32 %v2091_v26, %v1208_v36  ;;  %v1579_v25 = vld [vmem:[%s2749_s10 + $0xf0] sm:$0xff]  ;;  %v1578_v26 = vld [vmem:[%s2749_s10 + $0xe8] sm:$0xff] }
 0x17e   : > { %v2093_v11 = vpop.f32.mrf.mxu1  ;;  %v1518_v48 = vpop.f32.mrf.mxu0  ;;  %v1224_v63 = vadd.f32 %v3042_v55, %v2734_v9 }
 0x17f   : > { %1669 = vst.msk [vmem:[%s2776_s14 + $0xb8] sm:$0xff] %vm1645_vm0, %v1636_v19  ;;  %v1634_v44 = vmax.f32 %v1602_v23, 0.0  ;;  %v1607_v62 = vadd.f32 %v1575_v47, %v1527_v56  ;;  %v1519_v59 = vadd.f32 %v1518_v48, %v1358_v39  ;;  %v2094_v31 = vadd.f32 %v2093_v11, %v2092_v7  ;;  %v1580_v19 = vld [vmem:[%s2749_s10 + $0xf8] sm:$0xff] }
 0x180   : > { %v2095_v16 = vpop.f32.mrf.mxu1  ;;  %v2171_v61 = vpop.f32.mrf.mxu0 }
 0x181   : > { %1667 = vst.msk [vmem:[%s2776_s14 + $0xa8] sm:$0xff] %vm1645_vm0, %v1634_v44  ;;  %v1639_v43 = vmax.f32 %v1607_v62, 0.0  ;;  %v1605_v35 = vadd.f32 %v1573_v28, %v1519_v59  ;;  %v1530_v58 = vadd.f32 %v2171_v61, %v1369_v12  ;;  %v1374_v22 = vadd.f32 %v2094_v31, %v1213_v49 }
 0x182   : > { %v2096_v14 = vpop.f32.mrf.mxu1  ;;  %v1521_v6 = vpop.f32.mrf.mxu0 }
 0x183   : > { %1672 = vst.msk [vmem:[%s2776_s14 + $0xd0] sm:$0xff] %vm1645_vm0, %v1639_v43  ;;  %v1637_v13 = vmax.f32 %v1605_v35, 0.0  ;;  %v1608_v17 = vadd.f32 %v1576_v38, %v1530_v58  ;;  %v1522_v60 = vadd.f32 %v1521_v6, %v1361_v52  ;;  %v2097_v30 = vadd.f32 %v2096_v14, %v2095_v16 }
 0x184   : > { %v2098_v3 = vpop.f32.mrf.mxu1  ;;  %v2174_v15 = vpop.f32.mrf.mxu0 }
 0x185   : > { %1670 = vst.msk [vmem:[%s2776_s14 + $0xc0] sm:$0xff] %vm1645_vm0, %v1637_v13  ;;  %v1640_v21 = vmax.f32 %v1608_v17, 0.0  ;;  %v1606_v27 = vadd.f32 %v1574_v10, %v1522_v60  ;;  %v1377_v2 = vadd.f32 %v2097_v30, %v1216_v34 }
 0x186   : > { %v2099_v18 = vpop.f32.mrf.mxu1  ;;  %v1534_v50 = vpop.f32.mrf.mxu0 }
 0x187   : > { %1673 = vst.msk [vmem:[%s2776_s14 + $0xd8] sm:$0xff] %vm1645_vm0, %v1640_v21  ;;  %v1638_v0 = vmax.f32 %v1606_v27, 0.0  ;;  %v2100_v42 = vadd.f32 %v2099_v18, %v2098_v3  ;;  %v1535_v5 = vadd.f32 %v1534_v50, %v1374_v22 }
 0x188   : > { %v2101_v51 = vpop.f32.mrf.mxu1  ;;  %v2175_v4 = vpop.f32.mrf.mxu0 }
 0x189   : > { %1671 = vst.msk [vmem:[%s2776_s14 + $0xc8] sm:$0xff] %vm1645_vm0, %v1638_v0  ;;  %v1382_v54 = vadd.f32 %v2100_v42, %v1221_v57  ;;  %v1609_v53 = vadd.f32 %v1577_v45, %v1535_v5 }
 0x18a   : > { %v2102_v29 = vpop.f32.mrf.mxu1  ;;  %v1537_v1 = vpop.f32.mrf.mxu0 }
 0x18b   : > { %v1543_v8 = vadd.f32 %v2174_v15, %v1382_v54  ;;  %v1641_v41 = vmax.f32 %v1609_v53, 0.0  ;;  %v2103_v36 = vadd.f32 %v2102_v29, %v2101_v51  ;;  %v1538_v33 = vadd.f32 %v1537_v1, %v1377_v2 }
 0x18d   : > { %v1611_v7 = vadd.f32 %v1579_v25, %v1543_v8  ;;  %1674 = vst.msk [vmem:[%s2776_s14 + $0xe0] sm:$0xff] %vm1645_vm0, %v1641_v41  ;;  %v1385_v20 = vadd.f32 %v2103_v36, %v1224_v63  ;;  %v1610_v47 = vadd.f32 %v1578_v26, %v1538_v33 }
 0x18f   : > { %v1643_v23 = vmax.f32 %v1611_v7, 0.0  ;;  %v1546_v56 = vadd.f32 %v2175_v4, %v1385_v20  ;;  %v1642_v9 = vmax.f32 %v1610_v47, 0.0 }
 0x191   : > { %1676 = vst.msk [vmem:[%s2776_s14 + $0xf0] sm:$0xff] %vm1645_vm0, %v1643_v23  ;;  %v1612_v39 = vadd.f32 %v1580_v19, %v1546_v56  ;;  %1675 = vst.msk [vmem:[%s2776_s14 + $0xe8] sm:$0xff] %vm1645_vm0, %v1642_v9 }
 0x193   : > { %v1644_v40 = vmax.f32 %v1612_v39, 0.0 }
 0x195   : > { %1677 = vst.msk [vmem:[%s2776_s14 + $0xf8] sm:$0xff] %vm1645_vm0, %v1644_v40 }
 0x196 PF: > { %s14_s15 = sadd.s32 1, %s2359_s15  }
 0x197   : > { %p11_p4 = scmp.ge.s32.totalorder %s14_s15, 4  }
 0x199   :  { %13 = sbr.rel (!%p11_p4) target bundleno = 1 (0x1), region = 69 }

// kernel: _lambda_.21
= control target key start
LH: loop header
LB: loop body
LE: loop exit
PB: predicated region body
PF: predicated region fallthrough
CT: control target
= control target key end

     0   :  { %s1773_s1 = inlined_call_operand.vmem [shape: bf16[640,128], index: 1, kind: input, shape index: {}]   ;;  %s1774_s0 = inlined_call_operand.vmem [shape: bf16[128,640], index: 0, kind: input, shape index: {}]   ;;  %s1775_s2 = inlined_call_operand.vmem [shape: f32[1,128], index: 2, kind: input, shape index: {}]   ;;  %s1776_s3 = inlined_call_operand.vmem [shape: f32[128,128], index: 3, kind: output, shape index: {}]  }
   0x1   :  { %v1217_v0 = vld [vmem:[%s1773_s1 + $0x78] sm:$0xff]   ;;  %v1221_v4 = vld [vmem:[%s1773_s1 + $0x70] sm:$0xff]   ;;  %v1225_v8 = vld [vmem:[%s1773_s1 + $0x68] sm:$0xff]  }
   0x2   :  { %v1218_v1 = vld [vmem:[%s1773_s1 + $0xf8] sm:$0xff]   ;;  %1025 = vmatprep.subr.bf16.mxu0 %v1217_v0  ;;  %v1222_v5 = vld [vmem:[%s1773_s1 + $0xf0] sm:$0xff]   ;;  %v1226_v9 = vld [vmem:[%s1773_s1 + $0xe8] sm:$0xff]  }
   0x3   :  { %v1219_v2 = vld [vmem:[%s1773_s1 + $0x38] sm:$0xff]   ;;  %1089 = vmatprep.subr.bf16.mxu1 %v1218_v1  ;;  %v1223_v6 = vld [vmem:[%s1773_s1 + $0x30] sm:$0xff]   ;;  %v1227_v10 = vld [vmem:[%s1773_s1 + $0x28] sm:$0xff]  }
   0x4   :  { %v1220_v3 = vld [vmem:[%s1773_s1 + $0xb8] sm:$0xff]   ;;  %1026 = vmatpush3.bf16.msra.mxu0 %v1219_v2  ;;  %v1224_v7 = vld [vmem:[%s1773_s1 + $0xb0] sm:$0xff]   ;;  %v1228_v11 = vld [vmem:[%s1773_s1 + $0xa8] sm:$0xff]  }
   0x5   :  { %1090 = vmatpush3.bf16.msra.mxu1 %v1220_v3  ;;  %1027 = vmatprep.subr.bf16.mxu0 %v1221_v4  ;;  %v1229_v12 = vld [vmem:[%s1773_s1 + $0x60] sm:$0xff]   ;;  %v1233_v16 = vld [vmem:[%s1773_s1 + $0x58] sm:$0xff]   ;;  %v1237_v20 = vld [vmem:[%s1773_s1 + $0x50] sm:$0xff]  }
   0x6   :  { %1091 = vmatprep.subr.bf16.mxu1 %v1222_v5  ;;  %v1230_v13 = vld [vmem:[%s1773_s1 + $0xe0] sm:$0xff]   ;;  %v1234_v17 = vld [vmem:[%s1773_s1 + $0xd8] sm:$0xff]   ;;  %v1238_v21 = vld [vmem:[%s1773_s1 + $0xd0] sm:$0xff]  }
   0x7   :  { %v1231_v14 = vld [vmem:[%s1773_s1 + $0x20] sm:$0xff]   ;;  %v1235_v18 = vld [vmem:[%s1773_s1 + $0x18] sm:$0xff]   ;;  %v1239_v22 = vld [vmem:[%s1773_s1 + $0x10] sm:$0xff]  }
   0x8   :  { %1028 = vmatpush3.bf16.msra.mxu0 %v1223_v6  ;;  %v1232_v15 = vld [vmem:[%s1773_s1 + $0xa0] sm:$0xff]   ;;  %v1236_v19 = vld [vmem:[%s1773_s1 + $0x98] sm:$0xff]   ;;  %v1240_v23 = vld [vmem:[%s1773_s1 + $0x90] sm:$0xff]  }
   0x9   :  { %1092 = vmatpush3.bf16.msra.mxu1 %v1224_v7  ;;  %1029 = vmatprep.subr.bf16.mxu0 %v1225_v8  ;;  %v1241_v24 = vld [vmem:[%s1773_s1 + $0x48] sm:$0xff]   ;;  %v1245_v28 = vld [vmem:[%s1773_s1 + $0x40] sm:$0xff]   ;;  %v1255_v36 = vld [vmem:[%s1773_s1 + $0x138] sm:$0xff]  }
   0xa   :  { %1093 = vmatprep.subr.bf16.mxu1 %v1226_v9  ;;  %v1242_v25 = vld [vmem:[%s1773_s1 + $0xc8] sm:$0xff]   ;;  %v1246_v29 = vld [vmem:[%s1773_s1 + $0xc0] sm:$0xff]   ;;  %v1262_v39 = vld [vmem:[%s1773_s1 + $0x130] sm:$0xff]  }
   0xb   :  { %v1243_v26 = vld [vmem:[%s1773_s1 + $0x8] sm:$0xff]   ;;  %v1247_v30 = vld [vmem:[%s1773_s1] sm:$0xff]   ;;  %v1265_v43 = vld [vmem:[%s1774_s0 + $0x5c] ss:$20 sps:$4 sm:$0xff]  }
   0xc   :  { %1030 = vmatpush3.bf16.msra.mxu0 %v1227_v10  ;;  %v1244_v27 = vld [vmem:[%s1773_s1 + $0x88] sm:$0xff]   ;;  %v1248_v31 = vld [vmem:[%s1773_s1 + $0x80] sm:$0xff]   ;;  %v1270_v48 = vld [vmem:[%s1774_s0 + $0x7c] ss:$20 sps:$4 sm:$0xff]  }
   0xd   :  { %1094 = vmatpush3.bf16.msra.mxu1 %v1228_v11  ;;  %1031 = vmatprep.subr.bf16.mxu0 %v1229_v12  ;;  %v1249_v32 = vld [vmem:[%s1774_s0] ss:$20 sps:$4 sm:$0xff]   ;;  %v1251_v33 = vld [vmem:[%s1774_s0 + $0x4] ss:$20 sps:$4 sm:$0xff]   ;;  %v1252_v34 = vld [vmem:[%s1774_s0 + $0x8] ss:$20 sps:$4 sm:$0xff]  }
   0xe   :  { %1095 = vmatprep.subr.bf16.mxu1 %v1230_v13  ;;  %v1254_v35 = vld [vmem:[%s1774_s0 + $0xc] ss:$20 sps:$4 sm:$0xff]   ;;  %630 = vmatprep.mubr.bf16.mxu0 %v1251_v33  ;;  %v1258_v38 = vld [vmem:[%s1774_s0 + $0x34] ss:$20 sps:$4 sm:$0xff]   ;;  %v1261_v41 = vld [vmem:[%s1774_s0 + $0x30] ss:$20 sps:$4 sm:$0xff]  }
   0xf   :  { %727 = vmatprep.mubr.bf16.mxu1 %v1254_v35  ;;  %v1256_v37 = vld [vmem:[%s1774_s0 + $0x2c] ss:$20 sps:$4 sm:$0xff]   ;;  %v1260_v40 = vld [vmem:[%s1774_s0 + $0x28] ss:$20 sps:$4 sm:$0xff]   ;;  %v1267_v46 = vld [vmem:[%s1774_s0 + $0x50] ss:$20 sps:$4 sm:$0xff]  }
  0x10   :  { %1032 = vmatpush3.bf16.msra.mxu0 %v1231_v14  ;;  %v1263_v42 = vld [vmem:[%s1774_s0 + $0x54] ss:$20 sps:$4 sm:$0xff]   ;;  %v1276_v45 = vld [vmem:[%s1773_s1 + $0x120] sm:$0xff]   ;;  %v1268_v47 = vld [vmem:[%s1774_s0 + $0x58] ss:$20 sps:$4 sm:$0xff]  }
  0x11   :  { %1096 = vmatpush3.bf16.msra.mxu1 %v1232_v15  ;;  %1033 = vmatprep.subr.bf16.mxu0 %v1233_v16  ;;  %v1269_v44 = vld [vmem:[%s1773_s1 + $0x128] sm:$0xff]   ;;  %v1272_v49 = vld [vmem:[%s1774_s0 + $0x84] ss:$20 sps:$4 sm:$0xff]   ;;  %v1290_v51 = vld [vmem:[%s1773_s1 + $0x110] sm:$0xff]  }
  0x12   :  { %1097 = vmatprep.subr.bf16.mxu1 %v1234_v17  ;;  %v1283_v50 = vld [vmem:[%s1773_s1 + $0x118] sm:$0xff]   ;;  %v1275_v53 = vld [vmem:[%s1774_s0 + $0x80] ss:$20 sps:$4 sm:$0xff]   ;;  %v1297_v55 = vld [vmem:[%s1773_s1 + $0x108] sm:$0xff]  }
  0x13   :  { %v1274_v52 = vld [vmem:[%s1774_s0 + $0x78] ss:$20 sps:$4 sm:$0xff]   ;;  %v1304_v57 = vld [vmem:[%s1773_s1 + $0x100] sm:$0xff]   ;;  %v1282_v59 = vld [vmem:[%s1774_s0 + $0xa8] ss:$20 sps:$4 sm:$0xff]  }
  0x14   :  { %1034 = vmatpush3.bf16.msra.mxu0 %v1235_v18  ;;  %v1277_v54 = vld [vmem:[%s1774_s0 + $0xa4] ss:$20 sps:$4 sm:$0xff]   ;;  %v1279_v56 = vld [vmem:[%s1774_s0 + $0xac] ss:$20 sps:$4 sm:$0xff]   ;;  %v1286_v61 = vld [vmem:[%s1774_s0 + $0xd4] ss:$20 sps:$4 sm:$0xff]  }
  0x15   :  { %1098 = vmatpush3.bf16.msra.mxu1 %v1236_v19  ;;  %1035 = vmatprep.subr.bf16.mxu0 %v1237_v20  ;;  %v1281_v58 = vld [vmem:[%s1774_s0 + $0xa0] ss:$20 sps:$4 sm:$0xff]   ;;  %v1288_v62 = vld [vmem:[%s1774_s0 + $0xc8] ss:$20 sps:$4 sm:$0xff]   ;;  %v1289_v63 = vld [vmem:[%s1774_s0 + $0xd0] ss:$20 sps:$4 sm:$0xff]  }
  0x16   :  { %1099 = vmatprep.subr.bf16.mxu1 %v1238_v21  ;;  %v1284_v60 = vld [vmem:[%s1774_s0 + $0xcc] ss:$20 sps:$4 sm:$0xff]   ;;  %v1291_v0 = vld [vmem:[%s1774_s0 + $0xf4] ss:$20 sps:$4 sm:$0xff]   ;;  %v1293_v1 = vld [vmem:[%s1774_s0 + $0xfc] ss:$20 sps:$4 sm:$0xff]  }
  0x17   :  { %v1295_v2 = vld [vmem:[%s1774_s0 + $0xf0] ss:$20 sps:$4 sm:$0xff]   ;;  %v1296_v3 = vld [vmem:[%s1774_s0 + $0xf8] ss:$20 sps:$4 sm:$0xff]   ;;  %v1303_v7 = vld [vmem:[%s1774_s0 + $0x120] ss:$20 sps:$4 sm:$0xff]  }
  0x18   :  { %1036 = vmatpush3.bf16.msra.mxu0 %v1239_v22  ;;  %v1298_v4 = vld [vmem:[%s1774_s0 + $0x11c] ss:$20 sps:$4 sm:$0xff]   ;;  %v1300_v5 = vld [vmem:[%s1774_s0 + $0x124] ss:$20 sps:$4 sm:$0xff]   ;;  %v1309_v12 = vld [vmem:[%s1774_s0 + $0x60] ss:$20 sps:$4 sm:$0xff]  }
  0x19   :  { %1100 = vmatpush3.bf16.msra.mxu1 %v1240_v23  ;;  %1037 = vmatprep.subr.bf16.mxu0 %v1241_v24  ;;  %v1302_v6 = vld [vmem:[%s1774_s0 + $0x118] ss:$20 sps:$4 sm:$0xff]   ;;  %v1305_v8 = vld [vmem:[%s1774_s0 + $0x10] ss:$20 sps:$4 sm:$0xff]   ;;  %v1310_v13 = vld [vmem:[%s1774_s0 + $0x100] ss:$20 sps:$4 sm:$0xff]  }
  0x1a   :  { %1101 = vmatprep.subr.bf16.mxu1 %v1242_v25  ;;  %v1306_v9 = vld [vmem:[%s1774_s0 + $0xb0] ss:$20 sps:$4 sm:$0xff]   ;;  %v1307_v10 = vld [vmem:[%s1774_s0 + $0x38] ss:$20 sps:$4 sm:$0xff]   ;;  %v1311_v14 = vld [vmem:[%s1774_s0 + $0x88] ss:$20 sps:$4 sm:$0xff]  }
  0x1b   :  { %v1308_v11 = vld [vmem:[%s1774_s0 + $0xd8] ss:$20 sps:$4 sm:$0xff]   ;;  %v1312_v15 = vld [vmem:[%s1774_s0 + $0x128] ss:$20 sps:$4 sm:$0xff]  }
  0x1c   :  { %1038 = vmatpush3.bf16.msra.mxu0 %v1243_v26 }
  0x1d   :  { %1102 = vmatpush3.bf16.msra.mxu1 %v1244_v27  ;;  %1039 = vmatprep.subr.bf16.mxu0 %v1245_v28 }
  0x1e   :  { %1103 = vmatprep.subr.bf16.mxu1 %v1246_v29 }
  0x20   :  { %1040 = vmatpush3.bf16.msra.mxu0 %v1247_v30 }
  0x21   :  { %1104 = vmatpush3.bf16.msra.mxu1 %v1248_v31  ;;  %1169 = vmatprep.subr.bf16.mxu0 %v1255_v36 }
  0x22   :  { %1201 = vmatprep.subr.bf16.mxu1 %v1255_v36 }
  0x23   :  { %631 = vmatmul.mubr.bf16.vlgmr.msra.gmra.mxu0 %v1249_v32 }
  0x24   :  { %728 = vmatmul.mubr.bf16.vlgmr.msra.gmra.mxu1 %v1252_v34  ;;  %1170 = vmatpush3.bf16.msra.mxu0 %v1255_v36 }
  0x25   :  { %1209 = vmatpush3.bf16.msra.mxu1 %v1255_v36  ;;  %638 = vmatprep.mubr.bf16.mxu0 %v1256_v37 }
  0x26   :  { %735 = vmatprep.mubr.bf16.mxu1 %v1258_v38  ;;  %1171 = vmatprep.subr.bf16.mxu0 %v1262_v39 }
  0x27   :  { %1202 = vmatprep.subr.bf16.mxu1 %v1262_v39 }
  0x28   :  { %1172 = vmatpush3.bf16.msra.mxu0 %v1262_v39 }
  0x29   :  { %1210 = vmatpush3.bf16.msra.mxu1 %v1262_v39  ;;  %1173 = vmatprep.subr.bf16.mxu0 %v1269_v44 }
  0x2a   :  { %1203 = vmatprep.subr.bf16.mxu1 %v1269_v44 }
  0x2b   :  { %639 = vmatmul.mubr.bf16.gmra.mxu0 %v1260_v40 }
  0x2c   :  { %736 = vmatmul.mubr.bf16.gmra.mxu1 %v1261_v41  ;;  %646 = vmatprep.mubr.bf16.mxu0 %v1263_v42 }
  0x2d   :  { %743 = vmatprep.mubr.bf16.mxu1 %v1265_v43  ;;  %1174 = vmatpush3.bf16.msra.mxu0 %v1269_v44 }
  0x2e   :  { %1211 = vmatpush3.bf16.msra.mxu1 %v1269_v44  ;;  %1175 = vmatprep.subr.bf16.mxu0 %v1276_v45 }
  0x2f   :  { %1204 = vmatprep.subr.bf16.mxu1 %v1276_v45 }
  0x31   :  { %1176 = vmatpush3.bf16.msra.mxu0 %v1276_v45 }
  0x32   :  { %1212 = vmatpush3.bf16.msra.mxu1 %v1276_v45  ;;  %1177 = vmatprep.subr.bf16.mxu0 %v1283_v50 }
  0x33   :  { %647 = vmatmul.mubr.bf16.gmra.mxu0 %v1267_v46  ;;  %1205 = vmatprep.subr.bf16.mxu1 %v1283_v50 }
  0x34   :  { %744 = vmatmul.mubr.bf16.gmra.mxu1 %v1268_v47  ;;  %654 = vmatprep.mubr.bf16.mxu0 %v1270_v48 }
  0x35   :  { %751 = vmatprep.mubr.bf16.mxu1 %v1272_v49  ;;  %1178 = vmatpush3.bf16.msra.mxu0 %v1283_v50 }
  0x36   :  { %1213 = vmatpush3.bf16.msra.mxu1 %v1283_v50  ;;  %1179 = vmatprep.subr.bf16.mxu0 %v1290_v51 }
  0x37   :  { %1206 = vmatprep.subr.bf16.mxu1 %v1290_v51 }
  0x39   :  { %1180 = vmatpush3.bf16.msra.mxu0 %v1290_v51 }
  0x3a   :  { %1214 = vmatpush3.bf16.msra.mxu1 %v1290_v51  ;;  %1181 = vmatprep.subr.bf16.mxu0 %v1297_v55 }
  0x3b   :  { %655 = vmatmul.mubr.bf16.gmra.mxu0 %v1274_v52  ;;  %1207 = vmatprep.subr.bf16.mxu1 %v1297_v55 }
  0x3c   :  { %752 = vmatmul.mubr.bf16.gmra.mxu1 %v1275_v53  ;;  %662 = vmatprep.mubr.bf16.mxu0 %v1277_v54 }
  0x3d   :  { %759 = vmatprep.mubr.bf16.mxu1 %v1279_v56  ;;  %1182 = vmatpush3.bf16.msra.mxu0 %v1297_v55 }
  0x3e   :  { %1215 = vmatpush3.bf16.msra.mxu1 %v1297_v55  ;;  %1183 = vmatprep.subr.bf16.mxu0 %v1304_v57 }
  0x3f   :  { %1208 = vmatprep.subr.bf16.mxu1 %v1304_v57 }
  0x41   :  { %1184 = vmatpush3.bf16.msra.mxu0 %v1304_v57 }
  0x42   :  { %1216 = vmatpush3.bf16.msra.mxu1 %v1304_v57 }
  0x43   :  { %663 = vmatmul.mubr.bf16.gmra.mxu0 %v1281_v58 }
  0x44   :  { %760 = vmatmul.mubr.bf16.gmra.mxu1 %v1282_v59  ;;  %670 = vmatprep.mubr.bf16.mxu0 %v1284_v60 }
  0x45   :  { %767 = vmatprep.mubr.bf16.mxu1 %v1286_v61 }
  0x4b   :  { %671 = vmatmul.mubr.bf16.gmra.mxu0 %v1288_v62 }
  0x4c   :  { %768 = vmatmul.mubr.bf16.gmra.mxu1 %v1289_v63  ;;  %678 = vmatprep.mubr.bf16.mxu0 %v1291_v0 }
  0x4d   :  { %775 = vmatprep.mubr.bf16.mxu1 %v1293_v1 }
  0x53   :  { %679 = vmatmul.mubr.bf16.gmra.mxu0 %v1295_v2 }
  0x54   :  { %776 = vmatmul.mubr.bf16.gmra.mxu1 %v1296_v3  ;;  %686 = vmatprep.mubr.bf16.mxu0 %v1298_v4  ;;  %v889_v3 = vlaneseq }
  0x55   :  { %783 = vmatprep.mubr.bf16.mxu1 %v1300_v5 }
  0x5b   :  { %687 = vmatmul.mubr.bf16.gmra.mxu0 %v1302_v6 }
  0x5c   :  { %784 = vmatmul.mubr.bf16.gmra.mxu1 %v1303_v7  ;;  %1185 = vmatprep.mubr.bf16.mxu0 %v1305_v8  ;;  %v1622_v8 = vld [vmem:[%s1775_s2] ss:$0 sm:$0xff] }
  0x5d   :  { %1193 = vmatprep.mubr.bf16.mxu1 %v1306_v9 }
  0x63   :  { %1186 = vmatmul.mubr.bf16.vlgmr.msra.gmra.mxu0 %v1307_v10 }
  0x64   :  { %1194 = vmatmul.mubr.bf16.vlgmr.msra.gmra.mxu1 %v1308_v11  ;;  %1189 = vmatprep.mubr.bf16.mxu0 %v1309_v12 }
  0x65   :  { %1197 = vmatprep.mubr.bf16.mxu1 %v1310_v13 }
  0x6b   :  { %1190 = vmatmul.mubr.bf16.gmra.mxu0 %v1311_v14  ;;  %v1630_v14 = vand.u32 127, %v889_v3 }
  0x6c   :  { %1198 = vmatmul.mubr.bf16.gmra.mxu1 %v1312_v15 }
  0x6d   :  { %vm891_vm0 = vcmp.lt.s32.totalorder %v1630_v14, 64 }
  0xe3   :  { %v1041_v16 = vpop.f32.mrf.mxu0 }
  0xe4   :  { %v1573_v17 = vpop.f32.mrf.mxu1 }
  0xe5   :  { %v1042_v18 = vpop.f32.mrf.mxu0 }
  0xe6   :  { %v1106_v19 = vpop.f32.mrf.mxu1  ;;  %v1043_v4 = vadd.f32 %v1042_v18, %v1041_v16 }
  0xe7   :  { %v1044_v20 = vpop.f32.mrf.mxu0  ;;  %v1107_v16 = vadd.f32 %v1106_v19, %v1573_v17 }
  0xe8   :  { %v1575_v21 = vpop.f32.mrf.mxu1  ;;  %v633_v15 = vadd.f32 %v1043_v4, %v1622_v8 }
  0xe9   :  { %v1045_v22 = vpop.f32.mrf.mxu0 }
  0xea   :  { %v1109_v23 = vpop.f32.mrf.mxu1  ;;  %v1046_v5 = vadd.f32 %v1045_v22, %v1044_v20 }
  0xeb   :  { %v1047_v24 = vpop.f32.mrf.mxu0 }
  0xec   :  { %v1577_v25 = vpop.f32.mrf.mxu1  ;;  %v636_v18 = vadd.f32 %v1046_v5, %v1622_v8 }
  0xed   :  { %v1048_v26 = vpop.f32.mrf.mxu0 }
  0xee   :  { %v1579_v27 = vpop.f32.mrf.mxu1  ;;  %v1049_v6 = vadd.f32 %v1048_v26, %v1047_v24  ;;  %v1110_v24 = vadd.f32 %v1109_v23, %v1575_v21 }
  0xef   :  { %v1050_v28 = vpop.f32.mrf.mxu0 }
  0xf0   :  { %v1581_v29 = vpop.f32.mrf.mxu1  ;;  %v641_v20 = vadd.f32 %v1049_v6, %v1622_v8 }
  0xf1   :  { %v1051_v30 = vpop.f32.mrf.mxu0 }
  0xf2   :  { %v1583_v31 = vpop.f32.mrf.mxu1  ;;  %v1052_v9 = vadd.f32 %v1051_v30, %v1050_v28 }
  0xf3   :  { %v1053_v32 = vpop.f32.mrf.mxu0  ;;  %v1116_v5 = vadd.f32 %v1583_v31, %v1581_v29 }
  0xf4   :  { %v1585_v33 = vpop.f32.mrf.mxu1  ;;  %v644_v26 = vadd.f32 %v1052_v9, %v1622_v8 }
  0xf5   :  { %v1054_v34 = vpop.f32.mrf.mxu0 }
  0xf6   :  { %v1118_v35 = vpop.f32.mrf.mxu1  ;;  %v1055_v10 = vadd.f32 %v1054_v34, %v1053_v32  ;;  %v1113_v34 = vadd.f32 %v1579_v27, %v1577_v25 }
  0xf7   :  { %v1587_v36 = vpop.f32.mrf.mxu0  ;;  %v1119_v6 = vadd.f32 %v1118_v35, %v1585_v33 }
  0xf8   :  { %v1589_v37 = vpop.f32.mrf.mxu1  ;;  %v649_v28 = vadd.f32 %v1055_v10, %v1622_v8 }
  0xf9   :  { %v1591_v38 = vpop.f32.mrf.mxu0 }
  0xfa   :  { %v1593_v39 = vpop.f32.mrf.mxu1  ;;  %v1058_v25 = vadd.f32 %v1591_v38, %v1587_v36 }
  0xfb   :  { %v1059_v40 = vpop.f32.mrf.mxu0  ;;  %v1654_v29 = vadd.f32 %v1593_v39, %v1589_v37 }
  0xfc   :  { %v1595_v41 = vpop.f32.mrf.mxu1  ;;  %v1670_v10 = vadd.f32 %v1058_v25, %v1622_v8 }
  0xfd   :  { %v1060_v42 = vpop.f32.mrf.mxu0 }
  0xfe   :  { %v1597_v43 = vpop.f32.mrf.mxu1  ;;  %v1061_v3 = vadd.f32 %v1060_v42, %v1059_v40  ;;  %v741_v42 = vadd.f32 %v1116_v5, %v644_v26 }
  0xff   :  { %v1062_v44 = vpop.f32.mrf.mxu0 }
 0x100   :  { %v1599_v45 = vpop.f32.mrf.mxu1  ;;  %v657_v31 = vadd.f32 %v1061_v3, %v1622_v8 }
 0x101   :  { %v1063_v46 = vpop.f32.mrf.mxu0 }
 0x102   :  { %v1601_v47 = vpop.f32.mrf.mxu1  ;;  %v1064_v4 = vadd.f32 %v1063_v46, %v1062_v44  ;;  %v1650_v44 = vadd.f32 %v1119_v6, %v649_v28 }
 0x103   :  { %v1065_v48 = vpop.f32.mrf.mxu0  ;;  %v1128_v37 = vadd.f32 %v1601_v47, %v1599_v45 }
 0x104   :  { %v1603_v49 = vpop.f32.mrf.mxu1  ;;  %v660_v33 = vadd.f32 %v1064_v4, %v1622_v8 }
 0x105   :  { %v1066_v50 = vpop.f32.mrf.mxu0 }
 0x106   :  { %v1605_v51 = vpop.f32.mrf.mxu1  ;;  %v1067_v17 = vadd.f32 %v1066_v50, %v1065_v48  ;;  %v1676_v47 = vadd.f32 %v1128_v37, %v660_v33 }
 0x107   :  { %v1068_v52 = vpop.f32.mrf.mxu0  ;;  %v1131_v39 = vadd.f32 %v1605_v51, %v1603_v49 }
 0x108   :  { %v1607_v53 = vpop.f32.mrf.mxu1  ;;  %v665_v35 = vadd.f32 %v1067_v17, %v1622_v8 }
 0x109   :  { %v1069_v54 = vpop.f32.mrf.mxu0 }
 0x10a   :  { %v1609_v55 = vpop.f32.mrf.mxu1 }
 0x10b   :  { %v1071_v56 = vpop.f32.mrf.mxu0 }
 0x10c   :  { %v1135_v57 = vpop.f32.mrf.mxu1 }
 0x10d   :  { %v1072_v58 = vpop.f32.mrf.mxu0 }
 0x10e   :  { %v1136_v59 = vpop.f32.mrf.mxu1  ;;  %v1073_v30 = vadd.f32 %v1072_v58, %v1071_v56  ;;  %v730_v56 = vadd.f32 %v1107_v16, %v633_v15  ;;  %v733_v58 = vadd.f32 %v1110_v24, %v636_v18  ;;  %v762_v15 = vadd.f32 %v1131_v39, %v665_v35 }
 0x10f   :  { %v1074_v60 = vpop.f32.mrf.mxu0  ;;  %v1137_v38 = vadd.f32 %v1136_v59, %v1135_v57  ;;  %v1134_v57 = vadd.f32 %v1609_v55, %v1607_v53 }
 0x110   :  { %v1611_v61 = vpop.f32.mrf.mxu1  ;;  %v673_v27 = vadd.f32 %v1073_v30, %v1622_v8 }
 0x111   :  { %v1075_v62 = vpop.f32.mrf.mxu0 }
 0x112   :  { %v1613_v63 = vpop.f32.mrf.mxu1  ;;  %v1076_v21 = vadd.f32 %v1075_v62, %v1074_v60 }
 0x113   :  { %v1077_v0 = vpop.f32.mrf.mxu0  ;;  %v1140_v59 = vadd.f32 %v1613_v63, %v1611_v61 }
 0x114   :  { %v1615_v1 = vpop.f32.mrf.mxu1  ;;  %v676_v48 = vadd.f32 %v1076_v21, %v1622_v8 }
 0x115   :  { %v1078_v2 = vpop.f32.mrf.mxu0 }
 0x116   :  { %v1617_v7 = vpop.f32.mrf.mxu1  ;;  %v1079_v50 = vadd.f32 %v1078_v2, %v1077_v0  ;;  %v770_v2 = vadd.f32 %v1137_v38, %v673_v27  ;;  %v773_v18 = vadd.f32 %v1140_v59, %v676_v48 }
 0x117   :  { %v1624_v11 = vpop.f32.mrf.mxu0  ;;  %v1143_v53 = vadd.f32 %v1617_v7, %v1615_v1 }
 0x118   :  { %v1626_v12 = vpop.f32.mrf.mxu1  ;;  %v681_v49 = vadd.f32 %v1079_v50, %v1622_v8 }
 0x119   :  { %1777 = vst [vmem:[#allocation2_spill] sm:$0xff] %v1626_v12  ;;  %v1628_v13 = vpop.f32.mrf.mxu0  ;;  %v738_v12 = vadd.f32 %v1113_v34, %v641_v20 }
 0x11a   :  { %v1636_v22 = vpop.f32.mrf.mxu1  ;;  %v778_v5 = vadd.f32 %v1143_v53, %v681_v49 }
 0x11b   :  { %1778 = vst [vmem:[#allocation3_spill] sm:$0xff] %v1636_v22  ;;  %v1083_v32 = vpop.f32.mrf.mxu0  ;;  %v1070_v22 = vadd.f32 %v1069_v54, %v1068_v52  ;;  %v1125_v54 = vadd.f32 %v1597_v43, %v1595_v41 }
 0x11c   :  { %v1147_v19 = vpop.f32.mrf.mxu1 }
 0x11d   :  { %v1084_v23 = vpop.f32.mrf.mxu0  ;;  %v668_v36 = vadd.f32 %v1070_v22, %v1622_v8  ;;  %v754_v45 = vadd.f32 %v1125_v54, %v657_v31 }
 0x11e   :  { %v1148_v9 = vpop.f32.mrf.mxu1  ;;  %v1085_v60 = vadd.f32 %v1084_v23, %v1083_v32 }
 0x11f   :  { %v1086_v40 = vpop.f32.mrf.mxu0  ;;  %v765_v20 = vadd.f32 %v1134_v57, %v668_v36  ;;  %v1149_v32 = vadd.f32 %v1148_v9, %v1147_v19 }
 0x120   :  { %v1659_v46 = vpop.f32.mrf.mxu1  ;;  %v689_v55 = vadd.f32 %v1085_v60, %v1622_v8  ;;  %v1779_v54 = vld [vmem:[#allocation2_spill] sm:$0xff] }
 0x121   :  { %v1087_v52 = vpop.f32.mrf.mxu0 }
 0x122   :  { %v1151_v62 = vpop.f32.mrf.mxu1  ;;  %v1088_v24 = vadd.f32 %v1087_v52, %v1086_v40  ;;  %v786_v9 = vadd.f32 %v1149_v32, %v689_v55  ;;  %v1780_v37 = vld [vmem:[#allocation3_spill] sm:$0xff] }
 0x123   :  { %v1187_v0 = vpop.f32.mrf.mxu0  ;;  %v1152_v38 = vadd.f32 %v1151_v62, %v1659_v46  ;;  %v1146_v39 = vadd.f32 %v1780_v37, %v1779_v54 }
 0x124   :  { %v835_v41 = vadd.f32 %v1187_v0, %v738_v12  ;;  %v1195_v43 = vpop.f32.mrf.mxu1  ;;  %v1082_v12 = vadd.f32 %v1628_v13, %v1624_v11 }
 0x125   :  { %v867_v51 = vadd.f32 %v1195_v43, %v770_v2  ;;  %v826_v16 = vpop.f32.mrf.mxu0 }
 0x126   :  { %v894_v61 = vmax.f32 %v835_v41, 0.0  ;;  %v827_v63 = vadd.f32 %v826_v16, %v730_v56  ;;  %v858_v22 = vpop.f32.mrf.mxu1  ;;  %v692_v56 = vadd.f32 %v1088_v24, %v1622_v8  ;;  %v684_v31 = vadd.f32 %v1082_v12, %v1622_v8 }
 0x127   :  { %v902_v26 = vmax.f32 %v867_v51, 0.0  ;;  %v859_v28 = vadd.f32 %v858_v22, %v762_v15  ;;  %v1188_v30 = vpop.f32.mrf.mxu0 }
 0x128   :  { %v910_v34 = vsel %vm891_vm0, %v894_v61, %v835_v41  ;;  %v892_v3 = vmax.f32 %v827_v63, 0.0  ;;  %v838_v4 = vadd.f32 %v1188_v30, %v741_v42  ;;  %v1196_v17 = vpop.f32.mrf.mxu1  ;;  %v789_v43 = vadd.f32 %v1152_v38, %v692_v56 }
 0x129   :  { %926 = vst [vmem:[%s1776_s3 + $0x10] sm:$0xff] %v910_v34  ;;  %v918_v1 = vsel %vm891_vm0, %v902_v26, %v867_v51  ;;  %v900_v7 = vmax.f32 %v859_v28, 0.0  ;;  %v870_v11 = vadd.f32 %v1196_v17, %v773_v18  ;;  %v829_v13 = vpop.f32.mrf.mxu0  ;;  %v749_v51 = vadd.f32 %v1654_v29, %v1670_v10 }
 0x12a   :  { %934 = vst [vmem:[%s1776_s3 + $0x50] sm:$0xff] %v918_v1  ;;  %v908_v19 = vsel %vm891_vm0, %v892_v3, %v827_v63  ;;  %v895_v6 = vmax.f32 %v838_v4, 0.0  ;;  %v830_v21 = vadd.f32 %v829_v13, %v733_v58  ;;  %v861_v23 = vpop.f32.mrf.mxu1  ;;  %v781_v55 = vadd.f32 %v1146_v39, %v684_v31 }
 0x12b   :  { %924 = vst [vmem:[%s1776_s3] sm:$0xff] %v908_v19  ;;  %v916_v25 = vsel %vm891_vm0, %v900_v7, %v859_v28  ;;  %v903_v27 = vmax.f32 %v870_v11, 0.0  ;;  %v862_v40 = vadd.f32 %v861_v23, %v765_v20  ;;  %v1191_v42 = vpop.f32.mrf.mxu0 }
 0x12c   :  { %932 = vst [vmem:[%s1776_s3 + $0x40] sm:$0xff] %v916_v25  ;;  %v911_v58 = vsel %vm891_vm0, %v895_v6, %v838_v4  ;;  %v893_v33 = vmax.f32 %v830_v21, 0.0  ;;  %v851_v35 = vadd.f32 %v1191_v42, %v754_v45  ;;  %v1199_v36 = vpop.f32.mrf.mxu1 }
 0x12d   :  { %927 = vst [vmem:[%s1776_s3 + $0x18] sm:$0xff] %v911_v58  ;;  %v919_v48 = vsel %vm891_vm0, %v903_v27, %v870_v11  ;;  %v901_v8 = vmax.f32 %v862_v40, 0.0  ;;  %v883_v50 = vadd.f32 %v1199_v36, %v786_v9  ;;  %v842_v52 = vpop.f32.mrf.mxu0 }
 0x12e   :  { %935 = vst [vmem:[%s1776_s3 + $0x58] sm:$0xff] %v919_v48  ;;  %v909_v46 = vsel %vm891_vm0, %v893_v33, %v830_v21  ;;  %v898_v60 = vmax.f32 %v851_v35, 0.0  ;;  %v843_v62 = vadd.f32 %v842_v52, %v1650_v44  ;;  %v874_v57 = vpop.f32.mrf.mxu1 }
 0x12f   :  { %925 = vst [vmem:[%s1776_s3 + $0x8] sm:$0xff] %v909_v46  ;;  %v917_v59 = vsel %vm891_vm0, %v901_v8, %v862_v40  ;;  %v906_v0 = vmax.f32 %v883_v50, 0.0  ;;  %v875_v2 = vadd.f32 %v874_v57, %v778_v5  ;;  %v1192_v41 = vpop.f32.mrf.mxu0 }
 0x130   :  { %933 = vst [vmem:[%s1776_s3 + $0x48] sm:$0xff] %v917_v59  ;;  %v914_v15 = vsel %vm891_vm0, %v898_v60, %v851_v35  ;;  %v896_v44 = vmax.f32 %v843_v62, 0.0  ;;  %v854_v45 = vadd.f32 %v1192_v41, %v1676_v47  ;;  %v1200_v49 = vpop.f32.mrf.mxu1 }
 0x131   :  { %930 = vst [vmem:[%s1776_s3 + $0x30] sm:$0xff] %v914_v15  ;;  %v922_v16 = vsel %vm891_vm0, %v906_v0, %v883_v50  ;;  %v904_v18 = vmax.f32 %v875_v2, 0.0  ;;  %v886_v20 = vadd.f32 %v1200_v49, %v789_v43  ;;  %v845_v53 = vpop.f32.mrf.mxu0 }
 0x132   :  { %938 = vst [vmem:[%s1776_s3 + $0x70] sm:$0xff] %v922_v16  ;;  %v912_v47 = vsel %vm891_vm0, %v896_v44, %v843_v62  ;;  %v899_v61 = vmax.f32 %v854_v45, 0.0  ;;  %v846_v29 = vadd.f32 %v845_v53, %v749_v51  ;;  %v877_v10 = vpop.f32.mrf.mxu1 }
 0x133   :  { %928 = vst [vmem:[%s1776_s3 + $0x20] sm:$0xff] %v912_v47  ;;  %v920_v63 = vsel %vm891_vm0, %v904_v18, %v875_v2  ;;  %v907_v22 = vmax.f32 %v886_v20, 0.0  ;;  %v878_v12 = vadd.f32 %v877_v10, %v781_v55 }
 0x134   :  { %936 = vst [vmem:[%s1776_s3 + $0x60] sm:$0xff] %v920_v63  ;;  %v915_v24 = vsel %vm891_vm0, %v899_v61, %v854_v45  ;;  %v897_v26 = vmax.f32 %v846_v29, 0.0 }
 0x135   :  { %931 = vst [vmem:[%s1776_s3 + $0x38] sm:$0xff] %v915_v24  ;;  %v923_v28 = vsel %vm891_vm0, %v907_v22, %v886_v20  ;;  %v905_v30 = vmax.f32 %v878_v12, 0.0 }
 0x136   :  { %939 = vst [vmem:[%s1776_s3 + $0x78] sm:$0xff] %v923_v28  ;;  %v913_v32 = vsel %vm891_vm0, %v897_v26, %v846_v29 }
 0x137   :  { %929 = vst [vmem:[%s1776_s3 + $0x28] sm:$0xff] %v913_v32  ;;  %v921_v34 = vsel %vm891_vm0, %v905_v30, %v878_v12 }
 0x138   :  { %937 = vst [vmem:[%s1776_s3 + $0x68] sm:$0xff] %v921_v34 }

// kernel: _lambda_.23
= control target key start
LH: loop header
LB: loop body
LE: loop exit
PB: predicated region body
PF: predicated region fallthrough
CT: control target
= control target key end

     0   :  { %vm905_vm0 = vcmask 523264   ;;  %s1733_s1 = inlined_call_operand.vmem [shape: bf16[640,64], index: 1, kind: input, shape index: {}]   ;;  %s1734_s0 = inlined_call_operand.vmem [shape: bf16[128,640], index: 0, kind: input, shape index: {}]   ;;  %s1735_s2 = inlined_call_operand.vmem [shape: f32[1,64], index: 2, kind: input, shape index: {}]   ;;  %s1736_s3 = inlined_call_operand.vmem [shape: f32[128,64], index: 3, kind: output, shape index: {}]  }
   0x1   :  { %v1199_v0 = vld [vmem:[%s1733_s1 + $0x78] sm:$0xff]   ;;  %v1203_v4 = vld [vmem:[%s1733_s1 + $0x70] sm:$0xff]   ;;  %v1207_v8 = vld [vmem:[%s1733_s1 + $0x68] sm:$0xff]  }
   0x2   :  { %v1200_v1 = vld [vmem:[%s1733_s1 + $0xf8] sm:$0xff]   ;;  %1007 = vmatprep.subr.bf16.mxu0 %v1199_v0  ;;  %v1204_v5 = vld [vmem:[%s1733_s1 + $0xf0] sm:$0xff]   ;;  %v1208_v9 = vld [vmem:[%s1733_s1 + $0xe8] sm:$0xff]  }
   0x3   :  { %v1201_v2 = vld [vmem:[%s1733_s1 + $0x38] sm:$0xff]   ;;  %1071 = vmatprep.subr.bf16.mxu1 %v1200_v1  ;;  %v1205_v6 = vld [vmem:[%s1733_s1 + $0x30] sm:$0xff]   ;;  %v1209_v10 = vld [vmem:[%s1733_s1 + $0x28] sm:$0xff]  }
   0x4   :  { %v1202_v3 = vld [vmem:[%s1733_s1 + $0xb8] sm:$0xff]   ;;  %1008 = vmatpush3.bf16.msra.mxu0 %v1201_v2  ;;  %v1206_v7 = vld [vmem:[%s1733_s1 + $0xb0] sm:$0xff]   ;;  %v1210_v11 = vld [vmem:[%s1733_s1 + $0xa8] sm:$0xff]  }
   0x5   :  { %1072 = vmatpush3.bf16.msra.mxu1 %v1202_v3  ;;  %1009 = vmatprep.subr.bf16.mxu0 %v1203_v4  ;;  %v1211_v12 = vld [vmem:[%s1733_s1 + $0x60] sm:$0xff]   ;;  %v1215_v16 = vld [vmem:[%s1733_s1 + $0x58] sm:$0xff]   ;;  %v1219_v20 = vld [vmem:[%s1733_s1 + $0x50] sm:$0xff]  }
   0x6   :  { %1073 = vmatprep.subr.bf16.mxu1 %v1204_v5  ;;  %v1212_v13 = vld [vmem:[%s1733_s1 + $0xe0] sm:$0xff]   ;;  %v1216_v17 = vld [vmem:[%s1733_s1 + $0xd8] sm:$0xff]   ;;  %v1220_v21 = vld [vmem:[%s1733_s1 + $0xd0] sm:$0xff]  }
   0x7   :  { %v1213_v14 = vld [vmem:[%s1733_s1 + $0x20] sm:$0xff]   ;;  %v1217_v18 = vld [vmem:[%s1733_s1 + $0x18] sm:$0xff]   ;;  %v1221_v22 = vld [vmem:[%s1733_s1 + $0x10] sm:$0xff]  }
   0x8   :  { %1010 = vmatpush3.bf16.msra.mxu0 %v1205_v6  ;;  %v1214_v15 = vld [vmem:[%s1733_s1 + $0xa0] sm:$0xff]   ;;  %v1218_v19 = vld [vmem:[%s1733_s1 + $0x98] sm:$0xff]   ;;  %v1222_v23 = vld [vmem:[%s1733_s1 + $0x90] sm:$0xff]  }
   0x9   :  { %1074 = vmatpush3.bf16.msra.mxu1 %v1206_v7  ;;  %1011 = vmatprep.subr.bf16.mxu0 %v1207_v8  ;;  %v1223_v24 = vld [vmem:[%s1733_s1 + $0x48] sm:$0xff]   ;;  %v1227_v28 = vld [vmem:[%s1733_s1 + $0x40] sm:$0xff]   ;;  %v1237_v36 = vld [vmem:[%s1733_s1 + $0x138] sm:$0xff]  }
   0xa   :  { %1075 = vmatprep.subr.bf16.mxu1 %v1208_v9  ;;  %v1224_v25 = vld [vmem:[%s1733_s1 + $0xc8] sm:$0xff]   ;;  %v1228_v29 = vld [vmem:[%s1733_s1 + $0xc0] sm:$0xff]   ;;  %v1244_v39 = vld [vmem:[%s1733_s1 + $0x130] sm:$0xff]  }
   0xb   :  { %v1225_v26 = vld [vmem:[%s1733_s1 + $0x8] sm:$0xff]   ;;  %v1229_v30 = vld [vmem:[%s1733_s1] sm:$0xff]   ;;  %v1247_v43 = vld [vmem:[%s1734_s0 + $0x5c] ss:$20 sps:$4 sm:$0xff]  }
   0xc   :  { %1012 = vmatpush3.bf16.msra.mxu0 %v1209_v10  ;;  %v1226_v27 = vld [vmem:[%s1733_s1 + $0x88] sm:$0xff]   ;;  %v1230_v31 = vld [vmem:[%s1733_s1 + $0x80] sm:$0xff]   ;;  %v1252_v48 = vld [vmem:[%s1734_s0 + $0x7c] ss:$20 sps:$4 sm:$0xff]  }
   0xd   :  { %1076 = vmatpush3.bf16.msra.mxu1 %v1210_v11  ;;  %1013 = vmatprep.subr.bf16.mxu0 %v1211_v12  ;;  %v1231_v32 = vld [vmem:[%s1734_s0] ss:$20 sps:$4 sm:$0xff]   ;;  %v1233_v33 = vld [vmem:[%s1734_s0 + $0x4] ss:$20 sps:$4 sm:$0xff]   ;;  %v1234_v34 = vld [vmem:[%s1734_s0 + $0x8] ss:$20 sps:$4 sm:$0xff]  }
   0xe   :  { %1077 = vmatprep.subr.bf16.mxu1 %v1212_v13  ;;  %v1236_v35 = vld [vmem:[%s1734_s0 + $0xc] ss:$20 sps:$4 sm:$0xff]   ;;  %630 = vmatprep.mubr.bf16.mxu0 %v1233_v33  ;;  %v1240_v38 = vld [vmem:[%s1734_s0 + $0x34] ss:$20 sps:$4 sm:$0xff]   ;;  %v1243_v41 = vld [vmem:[%s1734_s0 + $0x30] ss:$20 sps:$4 sm:$0xff]  }
   0xf   :  { %727 = vmatprep.mubr.bf16.mxu1 %v1236_v35  ;;  %v1238_v37 = vld [vmem:[%s1734_s0 + $0x2c] ss:$20 sps:$4 sm:$0xff]   ;;  %v1242_v40 = vld [vmem:[%s1734_s0 + $0x28] ss:$20 sps:$4 sm:$0xff]   ;;  %v1249_v46 = vld [vmem:[%s1734_s0 + $0x50] ss:$20 sps:$4 sm:$0xff]  }
  0x10   :  { %1014 = vmatpush3.bf16.msra.mxu0 %v1213_v14  ;;  %v1245_v42 = vld [vmem:[%s1734_s0 + $0x54] ss:$20 sps:$4 sm:$0xff]   ;;  %v1258_v45 = vld [vmem:[%s1733_s1 + $0x120] sm:$0xff]   ;;  %v1250_v47 = vld [vmem:[%s1734_s0 + $0x58] ss:$20 sps:$4 sm:$0xff]  }
  0x11   :  { %1078 = vmatpush3.bf16.msra.mxu1 %v1214_v15  ;;  %1015 = vmatprep.subr.bf16.mxu0 %v1215_v16  ;;  %v1251_v44 = vld [vmem:[%s1733_s1 + $0x128] sm:$0xff]   ;;  %v1254_v49 = vld [vmem:[%s1734_s0 + $0x84] ss:$20 sps:$4 sm:$0xff]   ;;  %v1272_v51 = vld [vmem:[%s1733_s1 + $0x110] sm:$0xff]  }
  0x12   :  { %1079 = vmatprep.subr.bf16.mxu1 %v1216_v17  ;;  %v1265_v50 = vld [vmem:[%s1733_s1 + $0x118] sm:$0xff]   ;;  %v1257_v53 = vld [vmem:[%s1734_s0 + $0x80] ss:$20 sps:$4 sm:$0xff]   ;;  %v1279_v55 = vld [vmem:[%s1733_s1 + $0x108] sm:$0xff]  }
  0x13   :  { %v1256_v52 = vld [vmem:[%s1734_s0 + $0x78] ss:$20 sps:$4 sm:$0xff]   ;;  %v1286_v57 = vld [vmem:[%s1733_s1 + $0x100] sm:$0xff]   ;;  %v1264_v59 = vld [vmem:[%s1734_s0 + $0xa8] ss:$20 sps:$4 sm:$0xff]  }
  0x14   :  { %1016 = vmatpush3.bf16.msra.mxu0 %v1217_v18  ;;  %v1259_v54 = vld [vmem:[%s1734_s0 + $0xa4] ss:$20 sps:$4 sm:$0xff]   ;;  %v1261_v56 = vld [vmem:[%s1734_s0 + $0xac] ss:$20 sps:$4 sm:$0xff]   ;;  %v1268_v61 = vld [vmem:[%s1734_s0 + $0xd4] ss:$20 sps:$4 sm:$0xff]  }
  0x15   :  { %1080 = vmatpush3.bf16.msra.mxu1 %v1218_v19  ;;  %1017 = vmatprep.subr.bf16.mxu0 %v1219_v20  ;;  %v1263_v58 = vld [vmem:[%s1734_s0 + $0xa0] ss:$20 sps:$4 sm:$0xff]   ;;  %v1270_v62 = vld [vmem:[%s1734_s0 + $0xc8] ss:$20 sps:$4 sm:$0xff]   ;;  %v1271_v63 = vld [vmem:[%s1734_s0 + $0xd0] ss:$20 sps:$4 sm:$0xff]  }
  0x16   :  { %1081 = vmatprep.subr.bf16.mxu1 %v1220_v21  ;;  %v1266_v60 = vld [vmem:[%s1734_s0 + $0xcc] ss:$20 sps:$4 sm:$0xff]   ;;  %v1273_v0 = vld [vmem:[%s1734_s0 + $0xf4] ss:$20 sps:$4 sm:$0xff]   ;;  %v1275_v1 = vld [vmem:[%s1734_s0 + $0xfc] ss:$20 sps:$4 sm:$0xff]  }
  0x17   :  { %v1277_v2 = vld [vmem:[%s1734_s0 + $0xf0] ss:$20 sps:$4 sm:$0xff]   ;;  %v1278_v3 = vld [vmem:[%s1734_s0 + $0xf8] ss:$20 sps:$4 sm:$0xff]   ;;  %v1285_v7 = vld [vmem:[%s1734_s0 + $0x120] ss:$20 sps:$4 sm:$0xff]  }
  0x18   :  { %1018 = vmatpush3.bf16.msra.mxu0 %v1221_v22  ;;  %v1280_v4 = vld [vmem:[%s1734_s0 + $0x11c] ss:$20 sps:$4 sm:$0xff]   ;;  %v1282_v5 = vld [vmem:[%s1734_s0 + $0x124] ss:$20 sps:$4 sm:$0xff]   ;;  %v1291_v12 = vld [vmem:[%s1734_s0 + $0x60] ss:$20 sps:$4 sm:$0xff]  }
  0x19   :  { %1082 = vmatpush3.bf16.msra.mxu1 %v1222_v23  ;;  %1019 = vmatprep.subr.bf16.mxu0 %v1223_v24  ;;  %v1284_v6 = vld [vmem:[%s1734_s0 + $0x118] ss:$20 sps:$4 sm:$0xff]   ;;  %v1287_v8 = vld [vmem:[%s1734_s0 + $0x10] ss:$20 sps:$4 sm:$0xff]   ;;  %v1292_v13 = vld [vmem:[%s1734_s0 + $0x100] ss:$20 sps:$4 sm:$0xff]  }
  0x1a   :  { %1083 = vmatprep.subr.bf16.mxu1 %v1224_v25  ;;  %v1288_v9 = vld [vmem:[%s1734_s0 + $0xb0] ss:$20 sps:$4 sm:$0xff]   ;;  %v1289_v10 = vld [vmem:[%s1734_s0 + $0x38] ss:$20 sps:$4 sm:$0xff]   ;;  %v1293_v14 = vld [vmem:[%s1734_s0 + $0x88] ss:$20 sps:$4 sm:$0xff]  }
  0x1b   :  { %v1290_v11 = vld [vmem:[%s1734_s0 + $0xd8] ss:$20 sps:$4 sm:$0xff]   ;;  %v1294_v15 = vld [vmem:[%s1734_s0 + $0x128] ss:$20 sps:$4 sm:$0xff]  }
  0x1c   :  { %1020 = vmatpush3.bf16.msra.mxu0 %v1225_v26 }
  0x1d   :  { %1084 = vmatpush3.bf16.msra.mxu1 %v1226_v27  ;;  %1021 = vmatprep.subr.bf16.mxu0 %v1227_v28 }
  0x1e   :  { %1085 = vmatprep.subr.bf16.mxu1 %v1228_v29 }
  0x20   :  { %1022 = vmatpush3.bf16.msra.mxu0 %v1229_v30 }
  0x21   :  { %1086 = vmatpush3.bf16.msra.mxu1 %v1230_v31  ;;  %1151 = vmatprep.subr.bf16.mxu0 %v1237_v36 }
  0x22   :  { %1183 = vmatprep.subr.bf16.mxu1 %v1237_v36 }
  0x23   :  { %631 = vmatmul.mubr.bf16.vlgmr.msra.gmra.mxu0 %v1231_v32 }
  0x24   :  { %728 = vmatmul.mubr.bf16.vlgmr.msra.gmra.mxu1 %v1234_v34  ;;  %1152 = vmatpush3.bf16.msra.mxu0 %v1237_v36 }
  0x25   :  { %1191 = vmatpush3.bf16.msra.mxu1 %v1237_v36  ;;  %638 = vmatprep.mubr.bf16.mxu0 %v1238_v37 }
  0x26   :  { %735 = vmatprep.mubr.bf16.mxu1 %v1240_v38  ;;  %1153 = vmatprep.subr.bf16.mxu0 %v1244_v39 }
  0x27   :  { %1184 = vmatprep.subr.bf16.mxu1 %v1244_v39 }
  0x28   :  { %1154 = vmatpush3.bf16.msra.mxu0 %v1244_v39 }
  0x29   :  { %1192 = vmatpush3.bf16.msra.mxu1 %v1244_v39  ;;  %1155 = vmatprep.subr.bf16.mxu0 %v1251_v44 }
  0x2a   :  { %1185 = vmatprep.subr.bf16.mxu1 %v1251_v44 }
  0x2b   :  { %639 = vmatmul.mubr.bf16.gmra.mxu0 %v1242_v40 }
  0x2c   :  { %736 = vmatmul.mubr.bf16.gmra.mxu1 %v1243_v41  ;;  %646 = vmatprep.mubr.bf16.mxu0 %v1245_v42 }
  0x2d   :  { %743 = vmatprep.mubr.bf16.mxu1 %v1247_v43  ;;  %1156 = vmatpush3.bf16.msra.mxu0 %v1251_v44 }
  0x2e   :  { %1193 = vmatpush3.bf16.msra.mxu1 %v1251_v44  ;;  %1157 = vmatprep.subr.bf16.mxu0 %v1258_v45 }
  0x2f   :  { %1186 = vmatprep.subr.bf16.mxu1 %v1258_v45 }
  0x31   :  { %1158 = vmatpush3.bf16.msra.mxu0 %v1258_v45 }
  0x32   :  { %1194 = vmatpush3.bf16.msra.mxu1 %v1258_v45  ;;  %1159 = vmatprep.subr.bf16.mxu0 %v1265_v50 }
  0x33   :  { %647 = vmatmul.mubr.bf16.gmra.mxu0 %v1249_v46  ;;  %1187 = vmatprep.subr.bf16.mxu1 %v1265_v50 }
  0x34   :  { %744 = vmatmul.mubr.bf16.gmra.mxu1 %v1250_v47  ;;  %654 = vmatprep.mubr.bf16.mxu0 %v1252_v48 }
  0x35   :  { %751 = vmatprep.mubr.bf16.mxu1 %v1254_v49  ;;  %1160 = vmatpush3.bf16.msra.mxu0 %v1265_v50 }
  0x36   :  { %1195 = vmatpush3.bf16.msra.mxu1 %v1265_v50  ;;  %1161 = vmatprep.subr.bf16.mxu0 %v1272_v51 }
  0x37   :  { %1188 = vmatprep.subr.bf16.mxu1 %v1272_v51 }
  0x39   :  { %1162 = vmatpush3.bf16.msra.mxu0 %v1272_v51 }
  0x3a   :  { %1196 = vmatpush3.bf16.msra.mxu1 %v1272_v51  ;;  %1163 = vmatprep.subr.bf16.mxu0 %v1279_v55 }
  0x3b   :  { %655 = vmatmul.mubr.bf16.gmra.mxu0 %v1256_v52  ;;  %1189 = vmatprep.subr.bf16.mxu1 %v1279_v55 }
  0x3c   :  { %752 = vmatmul.mubr.bf16.gmra.mxu1 %v1257_v53  ;;  %662 = vmatprep.mubr.bf16.mxu0 %v1259_v54 }
  0x3d   :  { %759 = vmatprep.mubr.bf16.mxu1 %v1261_v56  ;;  %1164 = vmatpush3.bf16.msra.mxu0 %v1279_v55 }
  0x3e   :  { %1197 = vmatpush3.bf16.msra.mxu1 %v1279_v55  ;;  %1165 = vmatprep.subr.bf16.mxu0 %v1286_v57 }
  0x3f   :  { %1190 = vmatprep.subr.bf16.mxu1 %v1286_v57 }
  0x41   :  { %1166 = vmatpush3.bf16.msra.mxu0 %v1286_v57 }
  0x42   :  { %1198 = vmatpush3.bf16.msra.mxu1 %v1286_v57 }
  0x43   :  { %663 = vmatmul.mubr.bf16.gmra.mxu0 %v1263_v58 }
  0x44   :  { %760 = vmatmul.mubr.bf16.gmra.mxu1 %v1264_v59  ;;  %670 = vmatprep.mubr.bf16.mxu0 %v1266_v60 }
  0x45   :  { %767 = vmatprep.mubr.bf16.mxu1 %v1268_v61 }
  0x4b   :  { %671 = vmatmul.mubr.bf16.gmra.mxu0 %v1270_v62 }
  0x4c   :  { %768 = vmatmul.mubr.bf16.gmra.mxu1 %v1271_v63  ;;  %678 = vmatprep.mubr.bf16.mxu0 %v1273_v0 }
  0x4d   :  { %775 = vmatprep.mubr.bf16.mxu1 %v1275_v1 }
  0x53   :  { %679 = vmatmul.mubr.bf16.gmra.mxu0 %v1277_v2 }
  0x54   :  { %776 = vmatmul.mubr.bf16.gmra.mxu1 %v1278_v3  ;;  %686 = vmatprep.mubr.bf16.mxu0 %v1280_v4 }
  0x55   :  { %783 = vmatprep.mubr.bf16.mxu1 %v1282_v5 }
  0x5b   :  { %687 = vmatmul.mubr.bf16.gmra.mxu0 %v1284_v6  ;;  %v1606_v6 = vld [vmem:[%s1735_s2] ss:$0 sm:$0xff] }
  0x5c   :  { %784 = vmatmul.mubr.bf16.gmra.mxu1 %v1285_v7  ;;  %1167 = vmatprep.mubr.bf16.mxu0 %v1287_v8 }
  0x5d   :  { %1175 = vmatprep.mubr.bf16.mxu1 %v1288_v9 }
  0x63   :  { %1168 = vmatmul.mubr.bf16.vlgmr.msra.gmra.mxu0 %v1289_v10 }
  0x64   :  { %1176 = vmatmul.mubr.bf16.vlgmr.msra.gmra.mxu1 %v1290_v11  ;;  %1171 = vmatprep.mubr.bf16.mxu0 %v1291_v12 }
  0x65   :  { %1179 = vmatprep.mubr.bf16.mxu1 %v1292_v13 }
  0x6b   :  { %1172 = vmatmul.mubr.bf16.gmra.mxu0 %v1293_v14 }
  0x6c   :  { %1180 = vmatmul.mubr.bf16.gmra.mxu1 %v1294_v15 }
  0xe3   :  { %v1023_v16 = vpop.f32.mrf.mxu0 }
  0xe4   :  { %v1555_v17 = vpop.f32.mrf.mxu1 }
  0xe5   :  { %v1024_v18 = vpop.f32.mrf.mxu0 }
  0xe6   :  { %v1557_v19 = vpop.f32.mrf.mxu1  ;;  %v1025_v4 = vadd.f32 %v1024_v18, %v1023_v16 }
  0xe7   :  { %v1026_v20 = vpop.f32.mrf.mxu0  ;;  %v1089_v18 = vadd.f32 %v1557_v19, %v1555_v17 }
  0xe8   :  { %v1559_v21 = vpop.f32.mrf.mxu1  ;;  %v633_v14 = vadd.f32 %v1025_v4, %v1606_v6 }
  0xe9   :  { %v1027_v22 = vpop.f32.mrf.mxu0 }
  0xea   :  { %v1091_v23 = vpop.f32.mrf.mxu1  ;;  %v1028_v7 = vadd.f32 %v1027_v22, %v1026_v20 }
  0xeb   :  { %v1029_v24 = vpop.f32.mrf.mxu0  ;;  %v1092_v20 = vadd.f32 %v1091_v23, %v1559_v21  ;;  %v730_v21 = vadd.f32 %v1089_v18, %v633_v14 }
  0xec   :  { %v1561_v25 = vpop.f32.mrf.mxu1 }
  0xed   :  { %v1030_v26 = vpop.f32.mrf.mxu0 }
  0xee   :  { %v1563_v27 = vpop.f32.mrf.mxu1  ;;  %v1031_v9 = vadd.f32 %v1030_v26, %v1029_v24 }
  0xef   :  { %v1032_v28 = vpop.f32.mrf.mxu0  ;;  %v1095_v17 = vadd.f32 %v1563_v27, %v1561_v25 }
  0xf0   :  { %v1565_v29 = vpop.f32.mrf.mxu1  ;;  %v641_v22 = vadd.f32 %v1031_v9, %v1606_v6 }
  0xf1   :  { %v1033_v30 = vpop.f32.mrf.mxu0 }
  0xf2   :  { %v1567_v31 = vpop.f32.mrf.mxu1  ;;  %v1034_v11 = vadd.f32 %v1033_v30, %v1032_v28 }
  0xf3   :  { %v1035_v32 = vpop.f32.mrf.mxu0  ;;  %v1098_v23 = vadd.f32 %v1567_v31, %v1565_v29 }
  0xf4   :  { %v1569_v33 = vpop.f32.mrf.mxu1  ;;  %v644_v30 = vadd.f32 %v1034_v11, %v1606_v6 }
  0xf5   :  { %v1036_v34 = vpop.f32.mrf.mxu0 }
  0xf6   :  { %v1571_v35 = vpop.f32.mrf.mxu1  ;;  %v1037_v12 = vadd.f32 %v1036_v34, %v1035_v32  ;;  %v741_v31 = vadd.f32 %v1098_v23, %v644_v30 }
  0xf7   :  { %v1038_v36 = vpop.f32.mrf.mxu0 }
  0xf8   :  { %v1573_v37 = vpop.f32.mrf.mxu1  ;;  %v649_v32 = vadd.f32 %v1037_v12, %v1606_v6 }
  0xf9   :  { %1737 = vst [vmem:[#allocation2_spill] sm:$0xff] %v1573_v37  ;;  %v1039_v38 = vpop.f32.mrf.mxu0 }
  0xfa   :  { %v1575_v39 = vpop.f32.mrf.mxu1  ;;  %v1040_v34 = vadd.f32 %v1039_v38, %v1038_v36 }
  0xfb   :  { %1738 = vst [vmem:[#allocation3_spill] sm:$0xff] %v1575_v39  ;;  %v1041_v40 = vpop.f32.mrf.mxu0  ;;  %v636_v39 = vadd.f32 %v1028_v7, %v1606_v6 }
  0xfc   :  { %v1577_v41 = vpop.f32.mrf.mxu1 }
  0xfd   :  { %v1042_v42 = vpop.f32.mrf.mxu0  ;;  %v733_v36 = vadd.f32 %v1092_v20, %v636_v39 }
  0xfe   :  { %v1579_v43 = vpop.f32.mrf.mxu1  ;;  %v1043_v24 = vadd.f32 %v1042_v42, %v1041_v40  ;;  %v1101_v40 = vadd.f32 %v1571_v35, %v1569_v33 }
  0xff   :  { %v1581_v44 = vpop.f32.mrf.mxu0  ;;  %v1107_v33 = vadd.f32 %v1579_v43, %v1577_v41 }
 0x100   :  { %v1583_v45 = vpop.f32.mrf.mxu1  ;;  %v657_v38 = vadd.f32 %v1043_v24, %v1606_v6  ;;  %v1639_v9 = vadd.f32 %v1101_v40, %v649_v32 }
 0x101   :  { %v1585_v46 = vpop.f32.mrf.mxu0 }
 0x102   :  { %v1587_v47 = vpop.f32.mrf.mxu1  ;;  %v754_v24 = vadd.f32 %v1107_v33, %v657_v38 }
 0x103   :  { %v1047_v48 = vpop.f32.mrf.mxu0 }
 0x104   :  { %v1589_v49 = vpop.f32.mrf.mxu1 }
 0x105   :  { %v1048_v50 = vpop.f32.mrf.mxu0 }
 0x106   :  { %v1591_v51 = vpop.f32.mrf.mxu1  ;;  %v1049_v26 = vadd.f32 %v1048_v50, %v1047_v48 }
 0x107   :  { %v1050_v52 = vpop.f32.mrf.mxu0  ;;  %v1113_v35 = vadd.f32 %v1591_v51, %v1589_v49 }
 0x108   :  { %v1593_v53 = vpop.f32.mrf.mxu1  ;;  %v665_v50 = vadd.f32 %v1049_v26, %v1606_v6 }
 0x109   :  { %v1051_v54 = vpop.f32.mrf.mxu0 }
 0x10a   :  { %v1595_v55 = vpop.f32.mrf.mxu1  ;;  %v1052_v42 = vadd.f32 %v1051_v54, %v1050_v52 }
 0x10b   :  { %v1053_v56 = vpop.f32.mrf.mxu0  ;;  %v1116_v41 = vadd.f32 %v1595_v55, %v1593_v53 }
 0x10c   :  { %v1117_v57 = vpop.f32.mrf.mxu1 }
 0x10d   :  { %v1054_v58 = vpop.f32.mrf.mxu0 }
 0x10e   :  { %v1118_v59 = vpop.f32.mrf.mxu1  ;;  %v1055_v15 = vadd.f32 %v1054_v58, %v1053_v56 }
 0x10f   :  { %v1056_v60 = vpop.f32.mrf.mxu0  ;;  %v1119_v25 = vadd.f32 %v1118_v59, %v1117_v57  ;;  %v668_v57 = vadd.f32 %v1052_v42, %v1606_v6 }
 0x110   :  { %v1120_v61 = vpop.f32.mrf.mxu1  ;;  %v673_v19 = vadd.f32 %v1055_v15, %v1606_v6  ;;  %v1046_v15 = vadd.f32 %v1585_v46, %v1581_v44 }
 0x111   :  { %v1057_v62 = vpop.f32.mrf.mxu0  ;;  %v765_v55 = vadd.f32 %v1116_v41, %v668_v57 }
 0x112   :  { %v1121_v63 = vpop.f32.mrf.mxu1  ;;  %v1058_v56 = vadd.f32 %v1057_v62, %v1056_v60  ;;  %v738_v60 = vadd.f32 %v1095_v17, %v641_v22  ;;  %v1636_v62 = vadd.f32 %v1040_v34, %v1606_v6  ;;  %v770_v54 = vadd.f32 %v1119_v25, %v673_v19 }
 0x113   :  { %v1059_v0 = vpop.f32.mrf.mxu0  ;;  %v1122_v59 = vadd.f32 %v1121_v63, %v1120_v61  ;;  %v762_v22 = vadd.f32 %v1113_v35, %v665_v50  ;;  %v660_v19 = vadd.f32 %v1046_v15, %v1606_v6 }
 0x114   :  { %v1597_v1 = vpop.f32.mrf.mxu1  ;;  %v676_v7 = vadd.f32 %v1058_v56, %v1606_v6 }
 0x115   :  { %v1060_v2 = vpop.f32.mrf.mxu0 }
 0x116   :  { %v1599_v3 = vpop.f32.mrf.mxu1  ;;  %v1061_v11 = vadd.f32 %v1060_v2, %v1059_v0 }
 0x117   :  { %v1601_v5 = vpop.f32.mrf.mxu0 }
 0x118   :  { %v1608_v8 = vpop.f32.mrf.mxu1 }
 0x119   :  { %v1610_v10 = vpop.f32.mrf.mxu0 }
 0x11a   :  { %v1612_v13 = vpop.f32.mrf.mxu1  ;;  %v1064_v30 = vadd.f32 %v1610_v10, %v1601_v5 }
 0x11b   :  { %v1065_v16 = vpop.f32.mrf.mxu0 }
 0x11c   :  { %v1618_v37 = vpop.f32.mrf.mxu1  ;;  %v684_v25 = vadd.f32 %v1064_v30, %v1606_v6 }
 0x11d   :  { %v1066_v28 = vpop.f32.mrf.mxu0 }
 0x11e   :  { %v1130_v58 = vpop.f32.mrf.mxu1  ;;  %v1067_v39 = vadd.f32 %v1066_v28, %v1065_v16  ;;  %v773_v16 = vadd.f32 %v1122_v59, %v676_v7  ;;  %v681_v28 = vadd.f32 %v1061_v11, %v1606_v6  ;;  %v1739_v7 = vld [vmem:[#allocation2_spill] sm:$0xff] }
 0x11f   :  { %v1068_v4 = vpop.f32.mrf.mxu0  ;;  %v1131_v32 = vadd.f32 %v1130_v58, %v1618_v37 }
 0x120   :  { %v1631_v48 = vpop.f32.mrf.mxu1  ;;  %v689_v26 = vadd.f32 %v1067_v39, %v1606_v6  ;;  %v1128_v39 = vadd.f32 %v1612_v13, %v1608_v8 }
 0x121   :  { %v1069_v27 = vpop.f32.mrf.mxu0 }
 0x122   :  { %v1133_v29 = vpop.f32.mrf.mxu1  ;;  %v1070_v61 = vadd.f32 %v1069_v27, %v1068_v4  ;;  %v1125_v4 = vadd.f32 %v1599_v3, %v1597_v1  ;;  %v786_v42 = vadd.f32 %v1131_v32, %v689_v26  ;;  %v1110_v1 = vadd.f32 %v1587_v47, %v1583_v45 }
 0x123   :  { %v1169_v52 = vpop.f32.mrf.mxu0  ;;  %v1134_v27 = vadd.f32 %v1133_v29, %v1631_v48 }
 0x124   :  { %v835_v12 = vadd.f32 %v1169_v52, %v738_v60  ;;  %v1177_v14 = vpop.f32.mrf.mxu1  ;;  %v692_v58 = vadd.f32 %v1070_v61, %v1606_v6  ;;  %v778_v50 = vadd.f32 %v1125_v4, %v681_v28  ;;  %v757_v29 = vadd.f32 %v1110_v1, %v660_v19 }
 0x125   :  { %v867_v18 = vadd.f32 %v1177_v14, %v770_v54  ;;  %v826_v20 = vpop.f32.mrf.mxu0 }
 0x126   :  { %v891_v43 = vmax.f32 %v835_v12, 0.0  ;;  %v827_v49 = vadd.f32 %v826_v20, %v730_v21  ;;  %v858_v51 = vpop.f32.mrf.mxu1  ;;  %v789_v59 = vadd.f32 %v1134_v27, %v692_v58 }
 0x127   :  { %v899_v63 = vmax.f32 %v867_v18, 0.0  ;;  %v859_v0 = vadd.f32 %v858_v51, %v762_v22  ;;  %v1170_v2 = vpop.f32.mrf.mxu0  ;;  %v781_v18 = vadd.f32 %v1128_v39, %v684_v25 }
 0x128   :  { %908 = vst.msk [vmem:[%s1736_s3 + $0x10] sm:$0xff] %vm905_vm0, %v891_v43  ;;  %v889_v44 = vmax.f32 %v827_v49, 0.0  ;;  %v838_v46 = vadd.f32 %v1170_v2, %v741_v31  ;;  %v1178_v53 = vpop.f32.mrf.mxu1  ;;  %v1740_v31 = vld [vmem:[#allocation3_spill] sm:$0xff] }
 0x129   :  { %916 = vst.msk [vmem:[%s1736_s3 + $0x50] sm:$0xff] %vm905_vm0, %v899_v63  ;;  %v897_v34 = vmax.f32 %v859_v0, 0.0  ;;  %v870_v56 = vadd.f32 %v1178_v53, %v773_v16  ;;  %v829_v17 = vpop.f32.mrf.mxu0  ;;  %v1104_v33 = vadd.f32 %v1740_v31, %v1739_v7 }
 0x12a   :  { %906 = vst.msk [vmem:[%s1736_s3] sm:$0xff] %vm905_vm0, %v889_v44  ;;  %v892_v5 = vmax.f32 %v838_v46, 0.0  ;;  %v830_v37 = vadd.f32 %v829_v17, %v733_v36  ;;  %v861_v10 = vpop.f32.mrf.mxu1 }
 0x12b   :  { %914 = vst.msk [vmem:[%s1736_s3 + $0x40] sm:$0xff] %vm905_vm0, %v897_v34  ;;  %v900_v21 = vmax.f32 %v870_v56, 0.0  ;;  %v862_v23 = vadd.f32 %v861_v10, %v765_v55  ;;  %v1173_v40 = vpop.f32.mrf.mxu0  ;;  %v749_v14 = vadd.f32 %v1104_v33, %v1636_v62 }
 0x12c   :  { %909 = vst.msk [vmem:[%s1736_s3 + $0x18] sm:$0xff] %vm905_vm0, %v892_v5  ;;  %v890_v3 = vmax.f32 %v830_v37, 0.0  ;;  %v851_v36 = vadd.f32 %v1173_v40, %v754_v24  ;;  %v1181_v38 = vpop.f32.mrf.mxu1 }
 0x12d   :  { %917 = vst.msk [vmem:[%s1736_s3 + $0x58] sm:$0xff] %vm905_vm0, %v900_v21  ;;  %v898_v60 = vmax.f32 %v862_v23, 0.0  ;;  %v883_v45 = vadd.f32 %v1181_v38, %v786_v42  ;;  %v842_v47 = vpop.f32.mrf.mxu0 }
 0x12e   :  { %907 = vst.msk [vmem:[%s1736_s3 + $0x8] sm:$0xff] %vm905_vm0, %v890_v3  ;;  %v895_v35 = vmax.f32 %v851_v36, 0.0  ;;  %v843_v6 = vadd.f32 %v842_v47, %v1639_v9  ;;  %v874_v48 = vpop.f32.mrf.mxu1 }
 0x12f   :  { %915 = vst.msk [vmem:[%s1736_s3 + $0x48] sm:$0xff] %vm905_vm0, %v898_v60  ;;  %v903_v52 = vmax.f32 %v883_v45, 0.0  ;;  %v875_v54 = vadd.f32 %v874_v48, %v778_v50  ;;  %v1174_v57 = vpop.f32.mrf.mxu0 }
 0x130   :  { %912 = vst.msk [vmem:[%s1736_s3 + $0x30] sm:$0xff] %vm905_vm0, %v895_v35  ;;  %v893_v9 = vmax.f32 %v843_v6, 0.0  ;;  %v854_v11 = vadd.f32 %v1174_v57, %v757_v29  ;;  %v1182_v12 = vpop.f32.mrf.mxu1 }
 0x131   :  { %920 = vst.msk [vmem:[%s1736_s3 + $0x70] sm:$0xff] %vm905_vm0, %v903_v52  ;;  %v901_v8 = vmax.f32 %v875_v54, 0.0  ;;  %v886_v13 = vadd.f32 %v1182_v12, %v789_v59  ;;  %v845_v15 = vpop.f32.mrf.mxu0 }
 0x132   :  { %910 = vst.msk [vmem:[%s1736_s3 + $0x20] sm:$0xff] %vm905_vm0, %v893_v9  ;;  %v896_v20 = vmax.f32 %v854_v11, 0.0  ;;  %v846_v22 = vadd.f32 %v845_v15, %v749_v14  ;;  %v877_v24 = vpop.f32.mrf.mxu1 }
 0x133   :  { %918 = vst.msk [vmem:[%s1736_s3 + $0x60] sm:$0xff] %vm905_vm0, %v901_v8  ;;  %v904_v62 = vmax.f32 %v886_v13, 0.0  ;;  %v878_v41 = vadd.f32 %v877_v24, %v781_v18 }
 0x134   :  { %913 = vst.msk [vmem:[%s1736_s3 + $0x38] sm:$0xff] %vm905_vm0, %v896_v20  ;;  %v894_v43 = vmax.f32 %v846_v22, 0.0 }
 0x135   :  { %921 = vst.msk [vmem:[%s1736_s3 + $0x78] sm:$0xff] %vm905_vm0, %v904_v62  ;;  %v902_v49 = vmax.f32 %v878_v41, 0.0 }
 0x136   :  { %911 = vst.msk [vmem:[%s1736_s3 + $0x28] sm:$0xff] %vm905_vm0, %v894_v43 }
 0x137   :  { %919 = vst.msk [vmem:[%s1736_s3 + $0x68] sm:$0xff] %vm905_vm0, %v902_v49 }

// kernel: _lambda_.22
= control target key start
LH: loop header
LB: loop body
LE: loop exit
PB: predicated region body
PF: predicated region fallthrough
CT: control target
= control target key end

     0   :  { %vm940_vm0 = vcmask 523264   ;;  %s1818_s1 = inlined_call_operand.vmem [shape: bf16[640,64], index: 1, kind: input, shape index: {}]   ;;  %s1819_s0 = inlined_call_operand.vmem [shape: bf16[128,640], index: 0, kind: input, shape index: {}]   ;;  %s1820_s2 = inlined_call_operand.vmem [shape: f32[1,64], index: 2, kind: input, shape index: {}]   ;;  %s1821_s3 = inlined_call_operand.vmem [shape: f32[128,64], index: 3, kind: input, shape index: {}]   ;;  %s1822_s4 = inlined_call_operand.vmem [shape: f32[128,64], index: 4, kind: output, shape index: {}]  }
   0x1   :  { %v1234_v0 = vld [vmem:[%s1818_s1 + $0x78] sm:$0xff]   ;;  %v1238_v4 = vld [vmem:[%s1818_s1 + $0x70] sm:$0xff]   ;;  %v1242_v8 = vld [vmem:[%s1818_s1 + $0x68] sm:$0xff]  }
   0x2   :  { %v1235_v1 = vld [vmem:[%s1818_s1 + $0xf8] sm:$0xff]   ;;  %1042 = vmatprep.subr.bf16.mxu0 %v1234_v0  ;;  %v1239_v5 = vld [vmem:[%s1818_s1 + $0xf0] sm:$0xff]   ;;  %v1243_v9 = vld [vmem:[%s1818_s1 + $0xe8] sm:$0xff]  }
   0x3   :  { %v1236_v2 = vld [vmem:[%s1818_s1 + $0x38] sm:$0xff]   ;;  %1106 = vmatprep.subr.bf16.mxu1 %v1235_v1  ;;  %v1240_v6 = vld [vmem:[%s1818_s1 + $0x30] sm:$0xff]   ;;  %v1244_v10 = vld [vmem:[%s1818_s1 + $0x28] sm:$0xff]  }
   0x4   :  { %v1237_v3 = vld [vmem:[%s1818_s1 + $0xb8] sm:$0xff]   ;;  %1043 = vmatpush3.bf16.msra.mxu0 %v1236_v2  ;;  %v1241_v7 = vld [vmem:[%s1818_s1 + $0xb0] sm:$0xff]   ;;  %v1245_v11 = vld [vmem:[%s1818_s1 + $0xa8] sm:$0xff]  }
   0x5   :  { %1107 = vmatpush3.bf16.msra.mxu1 %v1237_v3  ;;  %1044 = vmatprep.subr.bf16.mxu0 %v1238_v4  ;;  %v1246_v12 = vld [vmem:[%s1818_s1 + $0x60] sm:$0xff]   ;;  %v1250_v16 = vld [vmem:[%s1818_s1 + $0x58] sm:$0xff]   ;;  %v1254_v20 = vld [vmem:[%s1818_s1 + $0x50] sm:$0xff]  }
   0x6   :  { %1108 = vmatprep.subr.bf16.mxu1 %v1239_v5  ;;  %v1247_v13 = vld [vmem:[%s1818_s1 + $0xe0] sm:$0xff]   ;;  %v1251_v17 = vld [vmem:[%s1818_s1 + $0xd8] sm:$0xff]   ;;  %v1255_v21 = vld [vmem:[%s1818_s1 + $0xd0] sm:$0xff]  }
   0x7   :  { %v1248_v14 = vld [vmem:[%s1818_s1 + $0x20] sm:$0xff]   ;;  %v1252_v18 = vld [vmem:[%s1818_s1 + $0x18] sm:$0xff]   ;;  %v1256_v22 = vld [vmem:[%s1818_s1 + $0x10] sm:$0xff]  }
   0x8   :  { %1045 = vmatpush3.bf16.msra.mxu0 %v1240_v6  ;;  %v1249_v15 = vld [vmem:[%s1818_s1 + $0xa0] sm:$0xff]   ;;  %v1253_v19 = vld [vmem:[%s1818_s1 + $0x98] sm:$0xff]   ;;  %v1257_v23 = vld [vmem:[%s1818_s1 + $0x90] sm:$0xff]  }
   0x9   :  { %1109 = vmatpush3.bf16.msra.mxu1 %v1241_v7  ;;  %1046 = vmatprep.subr.bf16.mxu0 %v1242_v8  ;;  %v1258_v24 = vld [vmem:[%s1818_s1 + $0x48] sm:$0xff]   ;;  %v1262_v28 = vld [vmem:[%s1818_s1 + $0x40] sm:$0xff]   ;;  %v1272_v36 = vld [vmem:[%s1818_s1 + $0x138] sm:$0xff]  }
   0xa   :  { %1110 = vmatprep.subr.bf16.mxu1 %v1243_v9  ;;  %v1259_v25 = vld [vmem:[%s1818_s1 + $0xc8] sm:$0xff]   ;;  %v1263_v29 = vld [vmem:[%s1818_s1 + $0xc0] sm:$0xff]   ;;  %v1279_v39 = vld [vmem:[%s1818_s1 + $0x130] sm:$0xff]  }
   0xb   :  { %v1260_v26 = vld [vmem:[%s1818_s1 + $0x8] sm:$0xff]   ;;  %v1264_v30 = vld [vmem:[%s1818_s1] sm:$0xff]   ;;  %v1282_v43 = vld [vmem:[%s1819_s0 + $0x5c] ss:$20 sps:$4 sm:$0xff]  }
   0xc   :  { %1047 = vmatpush3.bf16.msra.mxu0 %v1244_v10  ;;  %v1261_v27 = vld [vmem:[%s1818_s1 + $0x88] sm:$0xff]   ;;  %v1265_v31 = vld [vmem:[%s1818_s1 + $0x80] sm:$0xff]   ;;  %v1287_v48 = vld [vmem:[%s1819_s0 + $0x7c] ss:$20 sps:$4 sm:$0xff]  }
   0xd   :  { %1111 = vmatpush3.bf16.msra.mxu1 %v1245_v11  ;;  %1048 = vmatprep.subr.bf16.mxu0 %v1246_v12  ;;  %v1266_v32 = vld [vmem:[%s1819_s0] ss:$20 sps:$4 sm:$0xff]   ;;  %v1268_v33 = vld [vmem:[%s1819_s0 + $0x4] ss:$20 sps:$4 sm:$0xff]   ;;  %v1269_v34 = vld [vmem:[%s1819_s0 + $0x8] ss:$20 sps:$4 sm:$0xff]  }
   0xe   :  { %1112 = vmatprep.subr.bf16.mxu1 %v1247_v13  ;;  %v1271_v35 = vld [vmem:[%s1819_s0 + $0xc] ss:$20 sps:$4 sm:$0xff]   ;;  %633 = vmatprep.mubr.bf16.mxu0 %v1268_v33  ;;  %v1275_v38 = vld [vmem:[%s1819_s0 + $0x34] ss:$20 sps:$4 sm:$0xff]   ;;  %v1278_v41 = vld [vmem:[%s1819_s0 + $0x30] ss:$20 sps:$4 sm:$0xff]  }
   0xf   :  { %730 = vmatprep.mubr.bf16.mxu1 %v1271_v35  ;;  %v1273_v37 = vld [vmem:[%s1819_s0 + $0x2c] ss:$20 sps:$4 sm:$0xff]   ;;  %v1277_v40 = vld [vmem:[%s1819_s0 + $0x28] ss:$20 sps:$4 sm:$0xff]   ;;  %v1284_v46 = vld [vmem:[%s1819_s0 + $0x50] ss:$20 sps:$4 sm:$0xff]  }
  0x10   :  { %1049 = vmatpush3.bf16.msra.mxu0 %v1248_v14  ;;  %v1280_v42 = vld [vmem:[%s1819_s0 + $0x54] ss:$20 sps:$4 sm:$0xff]   ;;  %v1293_v45 = vld [vmem:[%s1818_s1 + $0x120] sm:$0xff]   ;;  %v1285_v47 = vld [vmem:[%s1819_s0 + $0x58] ss:$20 sps:$4 sm:$0xff]  }
  0x11   :  { %1113 = vmatpush3.bf16.msra.mxu1 %v1249_v15  ;;  %1050 = vmatprep.subr.bf16.mxu0 %v1250_v16  ;;  %v1286_v44 = vld [vmem:[%s1818_s1 + $0x128] sm:$0xff]   ;;  %v1289_v49 = vld [vmem:[%s1819_s0 + $0x84] ss:$20 sps:$4 sm:$0xff]   ;;  %v1307_v51 = vld [vmem:[%s1818_s1 + $0x110] sm:$0xff]  }
  0x12   :  { %1114 = vmatprep.subr.bf16.mxu1 %v1251_v17  ;;  %v1300_v50 = vld [vmem:[%s1818_s1 + $0x118] sm:$0xff]   ;;  %v1292_v53 = vld [vmem:[%s1819_s0 + $0x80] ss:$20 sps:$4 sm:$0xff]   ;;  %v1314_v55 = vld [vmem:[%s1818_s1 + $0x108] sm:$0xff]  }
  0x13   :  { %v1291_v52 = vld [vmem:[%s1819_s0 + $0x78] ss:$20 sps:$4 sm:$0xff]   ;;  %v1321_v57 = vld [vmem:[%s1818_s1 + $0x100] sm:$0xff]   ;;  %v1299_v59 = vld [vmem:[%s1819_s0 + $0xa8] ss:$20 sps:$4 sm:$0xff]  }
  0x14   :  { %1051 = vmatpush3.bf16.msra.mxu0 %v1252_v18  ;;  %v1294_v54 = vld [vmem:[%s1819_s0 + $0xa4] ss:$20 sps:$4 sm:$0xff]   ;;  %v1296_v56 = vld [vmem:[%s1819_s0 + $0xac] ss:$20 sps:$4 sm:$0xff]   ;;  %v1303_v61 = vld [vmem:[%s1819_s0 + $0xd4] ss:$20 sps:$4 sm:$0xff]  }
  0x15   :  { %1115 = vmatpush3.bf16.msra.mxu1 %v1253_v19  ;;  %1052 = vmatprep.subr.bf16.mxu0 %v1254_v20  ;;  %v1298_v58 = vld [vmem:[%s1819_s0 + $0xa0] ss:$20 sps:$4 sm:$0xff]   ;;  %v1305_v62 = vld [vmem:[%s1819_s0 + $0xc8] ss:$20 sps:$4 sm:$0xff]   ;;  %v1306_v63 = vld [vmem:[%s1819_s0 + $0xd0] ss:$20 sps:$4 sm:$0xff]  }
  0x16   :  { %1116 = vmatprep.subr.bf16.mxu1 %v1255_v21  ;;  %v1301_v60 = vld [vmem:[%s1819_s0 + $0xcc] ss:$20 sps:$4 sm:$0xff]   ;;  %v1308_v0 = vld [vmem:[%s1819_s0 + $0xf4] ss:$20 sps:$4 sm:$0xff]   ;;  %v1310_v1 = vld [vmem:[%s1819_s0 + $0xfc] ss:$20 sps:$4 sm:$0xff]  }
  0x17   :  { %v1312_v2 = vld [vmem:[%s1819_s0 + $0xf0] ss:$20 sps:$4 sm:$0xff]   ;;  %v1313_v3 = vld [vmem:[%s1819_s0 + $0xf8] ss:$20 sps:$4 sm:$0xff]   ;;  %v1320_v7 = vld [vmem:[%s1819_s0 + $0x120] ss:$20 sps:$4 sm:$0xff]  }
  0x18   :  { %1053 = vmatpush3.bf16.msra.mxu0 %v1256_v22  ;;  %v1315_v4 = vld [vmem:[%s1819_s0 + $0x11c] ss:$20 sps:$4 sm:$0xff]   ;;  %v1317_v5 = vld [vmem:[%s1819_s0 + $0x124] ss:$20 sps:$4 sm:$0xff]   ;;  %v1326_v12 = vld [vmem:[%s1819_s0 + $0x60] ss:$20 sps:$4 sm:$0xff]  }
  0x19   :  { %1117 = vmatpush3.bf16.msra.mxu1 %v1257_v23  ;;  %1054 = vmatprep.subr.bf16.mxu0 %v1258_v24  ;;  %v1319_v6 = vld [vmem:[%s1819_s0 + $0x118] ss:$20 sps:$4 sm:$0xff]   ;;  %v1322_v8 = vld [vmem:[%s1819_s0 + $0x10] ss:$20 sps:$4 sm:$0xff]   ;;  %v1327_v13 = vld [vmem:[%s1819_s0 + $0x100] ss:$20 sps:$4 sm:$0xff]  }
  0x1a   :  { %1118 = vmatprep.subr.bf16.mxu1 %v1259_v25  ;;  %v1323_v9 = vld [vmem:[%s1819_s0 + $0xb0] ss:$20 sps:$4 sm:$0xff]   ;;  %v1324_v10 = vld [vmem:[%s1819_s0 + $0x38] ss:$20 sps:$4 sm:$0xff]   ;;  %v1328_v14 = vld [vmem:[%s1819_s0 + $0x88] ss:$20 sps:$4 sm:$0xff]  }
  0x1b   :  { %v1325_v11 = vld [vmem:[%s1819_s0 + $0xd8] ss:$20 sps:$4 sm:$0xff]   ;;  %v1329_v15 = vld [vmem:[%s1819_s0 + $0x128] ss:$20 sps:$4 sm:$0xff]  }
  0x1c   :  { %1055 = vmatpush3.bf16.msra.mxu0 %v1260_v26 }
  0x1d   :  { %1119 = vmatpush3.bf16.msra.mxu1 %v1261_v27  ;;  %1056 = vmatprep.subr.bf16.mxu0 %v1262_v28 }
  0x1e   :  { %1120 = vmatprep.subr.bf16.mxu1 %v1263_v29 }
  0x20   :  { %1057 = vmatpush3.bf16.msra.mxu0 %v1264_v30 }
  0x21   :  { %1121 = vmatpush3.bf16.msra.mxu1 %v1265_v31  ;;  %1186 = vmatprep.subr.bf16.mxu0 %v1272_v36 }
  0x22   :  { %1218 = vmatprep.subr.bf16.mxu1 %v1272_v36 }
  0x23   :  { %634 = vmatmul.mubr.bf16.vlgmr.msra.gmra.mxu0 %v1266_v32 }
  0x24   :  { %731 = vmatmul.mubr.bf16.vlgmr.msra.gmra.mxu1 %v1269_v34  ;;  %1187 = vmatpush3.bf16.msra.mxu0 %v1272_v36 }
  0x25   :  { %1226 = vmatpush3.bf16.msra.mxu1 %v1272_v36  ;;  %641 = vmatprep.mubr.bf16.mxu0 %v1273_v37 }
  0x26   :  { %738 = vmatprep.mubr.bf16.mxu1 %v1275_v38  ;;  %1188 = vmatprep.subr.bf16.mxu0 %v1279_v39 }
  0x27   :  { %1219 = vmatprep.subr.bf16.mxu1 %v1279_v39 }
  0x28   :  { %1189 = vmatpush3.bf16.msra.mxu0 %v1279_v39 }
  0x29   :  { %1227 = vmatpush3.bf16.msra.mxu1 %v1279_v39  ;;  %1190 = vmatprep.subr.bf16.mxu0 %v1286_v44 }
  0x2a   :  { %1220 = vmatprep.subr.bf16.mxu1 %v1286_v44 }
  0x2b   :  { %642 = vmatmul.mubr.bf16.gmra.mxu0 %v1277_v40 }
  0x2c   :  { %739 = vmatmul.mubr.bf16.gmra.mxu1 %v1278_v41  ;;  %649 = vmatprep.mubr.bf16.mxu0 %v1280_v42 }
  0x2d   :  { %746 = vmatprep.mubr.bf16.mxu1 %v1282_v43  ;;  %1191 = vmatpush3.bf16.msra.mxu0 %v1286_v44 }
  0x2e   :  { %1228 = vmatpush3.bf16.msra.mxu1 %v1286_v44  ;;  %1192 = vmatprep.subr.bf16.mxu0 %v1293_v45 }
  0x2f   :  { %1221 = vmatprep.subr.bf16.mxu1 %v1293_v45 }
  0x31   :  { %1193 = vmatpush3.bf16.msra.mxu0 %v1293_v45 }
  0x32   :  { %1229 = vmatpush3.bf16.msra.mxu1 %v1293_v45  ;;  %1194 = vmatprep.subr.bf16.mxu0 %v1300_v50 }
  0x33   :  { %650 = vmatmul.mubr.bf16.gmra.mxu0 %v1284_v46  ;;  %1222 = vmatprep.subr.bf16.mxu1 %v1300_v50 }
  0x34   :  { %747 = vmatmul.mubr.bf16.gmra.mxu1 %v1285_v47  ;;  %657 = vmatprep.mubr.bf16.mxu0 %v1287_v48 }
  0x35   :  { %754 = vmatprep.mubr.bf16.mxu1 %v1289_v49  ;;  %1195 = vmatpush3.bf16.msra.mxu0 %v1300_v50 }
  0x36   :  { %1230 = vmatpush3.bf16.msra.mxu1 %v1300_v50  ;;  %1196 = vmatprep.subr.bf16.mxu0 %v1307_v51 }
  0x37   :  { %1223 = vmatprep.subr.bf16.mxu1 %v1307_v51 }
  0x39   :  { %1197 = vmatpush3.bf16.msra.mxu0 %v1307_v51 }
  0x3a   :  { %1231 = vmatpush3.bf16.msra.mxu1 %v1307_v51  ;;  %1198 = vmatprep.subr.bf16.mxu0 %v1314_v55 }
  0x3b   :  { %658 = vmatmul.mubr.bf16.gmra.mxu0 %v1291_v52  ;;  %1224 = vmatprep.subr.bf16.mxu1 %v1314_v55 }
  0x3c   :  { %755 = vmatmul.mubr.bf16.gmra.mxu1 %v1292_v53  ;;  %665 = vmatprep.mubr.bf16.mxu0 %v1294_v54 }
  0x3d   :  { %762 = vmatprep.mubr.bf16.mxu1 %v1296_v56  ;;  %1199 = vmatpush3.bf16.msra.mxu0 %v1314_v55 }
  0x3e   :  { %1232 = vmatpush3.bf16.msra.mxu1 %v1314_v55  ;;  %1200 = vmatprep.subr.bf16.mxu0 %v1321_v57 }
  0x3f   :  { %1225 = vmatprep.subr.bf16.mxu1 %v1321_v57 }
  0x41   :  { %1201 = vmatpush3.bf16.msra.mxu0 %v1321_v57 }
  0x42   :  { %1233 = vmatpush3.bf16.msra.mxu1 %v1321_v57 }
  0x43   :  { %666 = vmatmul.mubr.bf16.gmra.mxu0 %v1298_v58 }
  0x44   :  { %763 = vmatmul.mubr.bf16.gmra.mxu1 %v1299_v59  ;;  %673 = vmatprep.mubr.bf16.mxu0 %v1301_v60 }
  0x45   :  { %770 = vmatprep.mubr.bf16.mxu1 %v1303_v61 }
  0x4b   :  { %674 = vmatmul.mubr.bf16.gmra.mxu0 %v1305_v62 }
  0x4c   :  { %771 = vmatmul.mubr.bf16.gmra.mxu1 %v1306_v63  ;;  %681 = vmatprep.mubr.bf16.mxu0 %v1308_v0 }
  0x4d   :  { %778 = vmatprep.mubr.bf16.mxu1 %v1310_v1 }
  0x53   :  { %682 = vmatmul.mubr.bf16.gmra.mxu0 %v1312_v2 }
  0x54   :  { %779 = vmatmul.mubr.bf16.gmra.mxu1 %v1313_v3  ;;  %689 = vmatprep.mubr.bf16.mxu0 %v1315_v4 }
  0x55   :  { %786 = vmatprep.mubr.bf16.mxu1 %v1317_v5 }
  0x5b   :  { %690 = vmatmul.mubr.bf16.gmra.mxu0 %v1319_v6 }
  0x5c   :  { %787 = vmatmul.mubr.bf16.gmra.mxu1 %v1320_v7  ;;  %1202 = vmatprep.mubr.bf16.mxu0 %v1322_v8  ;;  %v1634_v7 = vld [vmem:[%s1820_s2] ss:$0 sm:$0xff] }
  0x5d   :  { %1210 = vmatprep.mubr.bf16.mxu1 %v1323_v9 }
  0x63   :  { %1203 = vmatmul.mubr.bf16.vlgmr.msra.gmra.mxu0 %v1324_v10 }
  0x64   :  { %1211 = vmatmul.mubr.bf16.vlgmr.msra.gmra.mxu1 %v1325_v11  ;;  %1206 = vmatprep.mubr.bf16.mxu0 %v1326_v12 }
  0x65   :  { %1214 = vmatprep.mubr.bf16.mxu1 %v1327_v13 }
  0x6b   :  { %1207 = vmatmul.mubr.bf16.gmra.mxu0 %v1328_v14 }
  0x6c   :  { %1215 = vmatmul.mubr.bf16.gmra.mxu1 %v1329_v15 }
  0xe3   :  { %v1058_v16 = vpop.f32.mrf.mxu0 }
  0xe4   :  { %v1122_v17 = vpop.f32.mrf.mxu1 }
  0xe5   :  { %v1059_v18 = vpop.f32.mrf.mxu0 }
  0xe6   :  { %v1123_v19 = vpop.f32.mrf.mxu1  ;;  %v1060_v3 = vadd.f32 %v1059_v18, %v1058_v16 }
  0xe7   :  { %v1061_v20 = vpop.f32.mrf.mxu0  ;;  %v1124_v14 = vadd.f32 %v1123_v19, %v1122_v17 }
  0xe8   :  { %v1125_v21 = vpop.f32.mrf.mxu1  ;;  %v636_v13 = vadd.f32 %v1060_v3, %v1634_v7 }
  0xe9   :  { %v1062_v22 = vpop.f32.mrf.mxu0 }
  0xea   :  { %v1126_v23 = vpop.f32.mrf.mxu1  ;;  %v1063_v4 = vadd.f32 %v1062_v22, %v1061_v20 }
  0xeb   :  { %v1064_v24 = vpop.f32.mrf.mxu0  ;;  %v1127_v20 = vadd.f32 %v1126_v23, %v1125_v21 }
  0xec   :  { %v1595_v25 = vpop.f32.mrf.mxu1  ;;  %v639_v15 = vadd.f32 %v1063_v4, %v1634_v7 }
  0xed   :  { %v1065_v26 = vpop.f32.mrf.mxu0 }
  0xee   :  { %v1129_v27 = vpop.f32.mrf.mxu1  ;;  %v1066_v5 = vadd.f32 %v1065_v26, %v1064_v24 }
  0xef   :  { %v1067_v28 = vpop.f32.mrf.mxu0 }
  0xf0   :  { %v1597_v29 = vpop.f32.mrf.mxu1  ;;  %v644_v16 = vadd.f32 %v1066_v5, %v1634_v7 }
  0xf1   :  { %v1068_v30 = vpop.f32.mrf.mxu0 }
  0xf2   :  { %v1132_v31 = vpop.f32.mrf.mxu1  ;;  %v1069_v8 = vadd.f32 %v1068_v30, %v1067_v28  ;;  %v1130_v30 = vadd.f32 %v1129_v27, %v1595_v25 }
  0xf3   :  { %v1070_v32 = vpop.f32.mrf.mxu0  ;;  %v1133_v17 = vadd.f32 %v1132_v31, %v1597_v29 }
  0xf4   :  { %v1134_v33 = vpop.f32.mrf.mxu1  ;;  %v647_v22 = vadd.f32 %v1069_v8, %v1634_v7  ;;  %v741_v23 = vadd.f32 %v1130_v30, %v644_v16  ;;  %v733_v8 = vadd.f32 %v1124_v14, %v636_v13 }
  0xf5   :  { %v1071_v34 = vpop.f32.mrf.mxu0 }
  0xf6   :  { %v1135_v35 = vpop.f32.mrf.mxu1  ;;  %v1072_v9 = vadd.f32 %v1071_v34, %v1070_v32 }
  0xf7   :  { %v1599_v36 = vpop.f32.mrf.mxu0  ;;  %v1136_v19 = vadd.f32 %v1135_v35, %v1134_v33 }
  0xf8   :  { %v1601_v37 = vpop.f32.mrf.mxu1  ;;  %v652_v24 = vadd.f32 %v1072_v9, %v1634_v7 }
  0xf9   :  { %v1603_v38 = vpop.f32.mrf.mxu0 }
  0xfa   :  { %v1605_v39 = vpop.f32.mrf.mxu1 }
  0xfb   :  { %v1076_v40 = vpop.f32.mrf.mxu0  ;;  %v1662_v29 = vadd.f32 %v1605_v39, %v1601_v37 }
  0xfc   :  { %v1607_v41 = vpop.f32.mrf.mxu1 }
  0xfd   :  { %v1077_v42 = vpop.f32.mrf.mxu0 }
  0xfe   :  { %v1609_v43 = vpop.f32.mrf.mxu1  ;;  %v1078_v32 = vadd.f32 %v1077_v42, %v1076_v40  ;;  %v744_v40 = vadd.f32 %v1133_v17, %v647_v22  ;;  %v1658_v42 = vadd.f32 %v1136_v19, %v652_v24 }
  0xff   :  { %v1079_v44 = vpop.f32.mrf.mxu0 }
 0x100   :  { %v1611_v45 = vpop.f32.mrf.mxu1  ;;  %v660_v31 = vadd.f32 %v1078_v32, %v1634_v7 }
 0x101   :  { %v1080_v46 = vpop.f32.mrf.mxu0 }
 0x102   :  { %v1613_v47 = vpop.f32.mrf.mxu1  ;;  %v1081_v34 = vadd.f32 %v1080_v46, %v1079_v44 }
 0x103   :  { %v1082_v48 = vpop.f32.mrf.mxu0  ;;  %v1145_v37 = vadd.f32 %v1613_v47, %v1611_v45 }
 0x104   :  { %v1615_v49 = vpop.f32.mrf.mxu1  ;;  %v663_v33 = vadd.f32 %v1081_v34, %v1634_v7 }
 0x105   :  { %v1083_v50 = vpop.f32.mrf.mxu0 }
 0x106   :  { %v1617_v51 = vpop.f32.mrf.mxu1 }
 0x107   :  { %v1085_v52 = vpop.f32.mrf.mxu0  ;;  %v1148_v39 = vadd.f32 %v1617_v51, %v1615_v49  ;;  %v902_v49 = vld [vmem:[%s1821_s3 + $0x50] sm:$0xff] }
 0x108   :  { %v1619_v53 = vpop.f32.mrf.mxu1 }
 0x109   :  { %v1086_v54 = vpop.f32.mrf.mxu0 }
 0x10a   :  { %v1621_v55 = vpop.f32.mrf.mxu1  ;;  %v1087_v4 = vadd.f32 %v1086_v54, %v1085_v52  ;;  %v1142_v52 = vadd.f32 %v1609_v43, %v1607_v41  ;;  %v894_v41 = vld [vmem:[%s1821_s3 + $0x10] sm:$0xff] }
 0x10b   :  { %v1088_v56 = vpop.f32.mrf.mxu0 }
 0x10c   :  { %v1152_v57 = vpop.f32.mrf.mxu1 }
 0x10d   :  { %v1089_v58 = vpop.f32.mrf.mxu0 }
 0x10e   :  { %v1153_v59 = vpop.f32.mrf.mxu1  ;;  %v1090_v26 = vadd.f32 %v1089_v58, %v1088_v56  ;;  %v1075_v56 = vadd.f32 %v1603_v38, %v1599_v36  ;;  %v671_v36 = vadd.f32 %v1087_v4, %v1634_v7 }
 0x10f   :  { %v1091_v60 = vpop.f32.mrf.mxu0  ;;  %v1154_v38 = vadd.f32 %v1153_v59, %v1152_v57  ;;  %v1151_v57 = vadd.f32 %v1621_v55, %v1619_v53 }
 0x110   :  { %v1623_v61 = vpop.f32.mrf.mxu1  ;;  %v676_v25 = vadd.f32 %v1090_v26, %v1634_v7 }
 0x111   :  { %v1092_v62 = vpop.f32.mrf.mxu0 }
 0x112   :  { %v1625_v63 = vpop.f32.mrf.mxu1  ;;  %v1093_v5 = vadd.f32 %v1092_v62, %v1091_v60  ;;  %v1680_v60 = vadd.f32 %v1075_v56, %v1634_v7  ;;  %v773_v43 = vadd.f32 %v1154_v38, %v676_v25  ;;  %v893_v25 = vld [vmem:[%s1821_s3 + $0x8] sm:$0xff] }
 0x113   :  { %v1094_v0 = vpop.f32.mrf.mxu0  ;;  %v1157_v59 = vadd.f32 %v1625_v63, %v1623_v61  ;;  %v892_v63 = vld [vmem:[%s1821_s3] sm:$0xff] }
 0x114   :  { %v1627_v1 = vpop.f32.mrf.mxu1  ;;  %v679_v46 = vadd.f32 %v1093_v5, %v1634_v7  ;;  %v903_v5 = vld [vmem:[%s1821_s3 + $0x58] sm:$0xff] }
 0x115   :  { %v1095_v2 = vpop.f32.mrf.mxu0 }
 0x116   :  { %v1629_v6 = vpop.f32.mrf.mxu1  ;;  %v776_v9 = vadd.f32 %v1157_v59, %v679_v46  ;;  %v906_v59 = vld [vmem:[%s1821_s3 + $0x70] sm:$0xff] }
 0x117   :  { %v1636_v10 = vpop.f32.mrf.mxu0  ;;  %v1160_v13 = vadd.f32 %v1629_v6, %v1627_v1  ;;  %v895_v1 = vld [vmem:[%s1821_s3 + $0x18] sm:$0xff] }
 0x118   :  { %v1638_v11 = vpop.f32.mrf.mxu1 }
 0x119   :  { %1823 = vst [vmem:[#allocation2_spill] sm:$0xff] %v1638_v11  ;;  %v1640_v12 = vpop.f32.mrf.mxu0  ;;  %v1084_v11 = vadd.f32 %v1083_v50, %v1082_v48  ;;  %v1096_v48 = vadd.f32 %v1095_v2, %v1094_v0  ;;  %v757_v0 = vadd.f32 %v1142_v52, %v660_v31  ;;  %v1692_v2 = vadd.f32 %v1145_v37, %v663_v33  ;;  %v901_v33 = vld [vmem:[%s1821_s3 + $0x48] sm:$0xff] }
 0x11a   :  { %1824 = vst [vmem:[#allocation3_spill] sm:$0xff] %v1640_v12  ;;  %v1645_v18 = vpop.f32.mrf.mxu1  ;;  %v1653_v12 = vadd.f32 %v1127_v20, %v639_v15  ;;  %v900_v20 = vld [vmem:[%s1821_s3 + $0x40] sm:$0xff] }
 0x11b   :  { %1825 = vst [vmem:[#allocation4_spill] sm:$0xff] %v1645_v18  ;;  %v1100_v28 = vpop.f32.mrf.mxu0  ;;  %v668_v35 = vadd.f32 %v1084_v11, %v1634_v7  ;;  %v684_v53 = vadd.f32 %v1096_v48, %v1634_v7  ;;  %v768_v11 = vadd.f32 %v1151_v57, %v671_v36 }
 0x11c   :  { %v1650_v3 = vpop.f32.mrf.mxu1 }
 0x11d   :  { %v1101_v18 = vpop.f32.mrf.mxu0  ;;  %v765_v51 = vadd.f32 %v1148_v39, %v668_v35 }
 0x11e   :  { %v1165_v21 = vpop.f32.mrf.mxu1  ;;  %v1102_v54 = vadd.f32 %v1101_v18, %v1100_v28 }
 0x11f   :  { %v1103_v27 = vpop.f32.mrf.mxu0  ;;  %v1166_v6 = vadd.f32 %v1165_v21, %v1650_v3 }
 0x120   :  { %v1667_v44 = vpop.f32.mrf.mxu1  ;;  %v692_v14 = vadd.f32 %v1102_v54, %v1634_v7 }
 0x121   :  { %v1104_v50 = vpop.f32.mrf.mxu0  ;;  %v1826_v22 = vld [vmem:[#allocation3_spill] sm:$0xff] }
 0x122   :  { %v1677_v58 = vpop.f32.mrf.mxu1  ;;  %v1099_v24 = vadd.f32 %v1826_v22, %v1636_v10  ;;  %v1105_v26 = vadd.f32 %v1104_v50, %v1103_v27  ;;  %v781_v27 = vadd.f32 %v1160_v13, %v684_v53  ;;  %v789_v35 = vadd.f32 %v1166_v6, %v692_v14  ;;  %v899_v14 = vld [vmem:[%s1821_s3 + $0x38] sm:$0xff] }
 0x123   :  { %v1204_v62 = vpop.f32.mrf.mxu0  ;;  %v907_v22 = vld [vmem:[%s1821_s3 + $0x78] sm:$0xff] }
 0x124   :  { %v838_v45 = vadd.f32 %v1204_v62, %v741_v23  ;;  %v1212_v47 = vpop.f32.mrf.mxu1  ;;  %v695_v36 = vadd.f32 %v1105_v26, %v1634_v7  ;;  %v687_v52 = vadd.f32 %v1099_v24, %v1634_v7  ;;  %v1169_v62 = vadd.f32 %v1677_v58, %v1667_v44 }
 0x125   :  { %v870_v55 = vadd.f32 %v1212_v47, %v773_v43  ;;  %v829_v61 = vpop.f32.mrf.mxu0  ;;  %v896_v47 = vld [vmem:[%s1821_s3 + $0x20] sm:$0xff]  ;;  %v752_v24 = vadd.f32 %v1662_v29, %v1680_v60 }
 0x126   :  { %v910_v15 = vadd.f32 %v894_v41, %v838_v45  ;;  %v830_v16 = vadd.f32 %v829_v61, %v733_v8  ;;  %v861_v18 = vpop.f32.mrf.mxu1  ;;  %v904_v61 = vld [vmem:[%s1821_s3 + $0x60] sm:$0xff] }
 0x127   :  { %v918_v28 = vadd.f32 %v902_v49, %v870_v55  ;;  %v862_v30 = vadd.f32 %v861_v18, %v765_v51  ;;  %v1205_v32 = vpop.f32.mrf.mxu0  ;;  %v1827_v49 = vld [vmem:[#allocation2_spill] sm:$0xff]  ;;  %v1828_v51 = vld [vmem:[#allocation4_spill] sm:$0xff] }
 0x128   :  { %v926_v34 = vmax.f32 %v910_v15, 0.0  ;;  %v908_v17 = vadd.f32 %v892_v63, %v830_v16  ;;  %v841_v19 = vadd.f32 %v1205_v32, %v744_v40  ;;  %v1213_v4 = vpop.f32.mrf.mxu1  ;;  %v792_v15 = vadd.f32 %v1169_v62, %v695_v36 }
 0x129   :  { %v934_v23 = vmax.f32 %v918_v28, 0.0  ;;  %v916_v10 = vadd.f32 %v900_v20, %v862_v30  ;;  %v873_v8 = vadd.f32 %v1213_v4, %v776_v9  ;;  %v832_v56 = vpop.f32.mrf.mxu0 }
 0x12a   :  { %943 = vst.msk [vmem:[%s1822_s4 + $0x10] sm:$0xff] %vm940_vm0, %v926_v34  ;;  %v924_v3 = vmax.f32 %v908_v17, 0.0  ;;  %v911_v21 = vadd.f32 %v895_v1, %v841_v19  ;;  %v833_v40 = vadd.f32 %v832_v56, %v1653_v12  ;;  %v864_v31 = vpop.f32.mrf.mxu1  ;;  %v898_v12 = vld [vmem:[%s1821_s3 + $0x30] sm:$0xff]  ;;  %v905_v17 = vld [vmem:[%s1821_s3 + $0x68] sm:$0xff] }
 0x12b   :  { %951 = vst.msk [vmem:[%s1822_s4 + $0x50] sm:$0xff] %vm940_vm0, %v934_v23  ;;  %v932_v38 = vmax.f32 %v916_v10, 0.0  ;;  %v919_v46 = vadd.f32 %v903_v5, %v873_v8  ;;  %v865_v48 = vadd.f32 %v864_v31, %v768_v11  ;;  %v1208_v50 = vpop.f32.mrf.mxu0 }
 0x12c   :  { %941 = vst.msk [vmem:[%s1822_s4] sm:$0xff] %vm940_vm0, %v924_v3  ;;  %v927_v37 = vmax.f32 %v911_v21, 0.0  ;;  %v909_v39 = vadd.f32 %v893_v25, %v833_v40  ;;  %v854_v54 = vadd.f32 %v1208_v50, %v757_v0  ;;  %v1216_v57 = vpop.f32.mrf.mxu1  ;;  %v1163_v0 = vadd.f32 %v1828_v51, %v1827_v49 }
 0x12d   :  { %949 = vst.msk [vmem:[%s1822_s4 + $0x40] sm:$0xff] %vm940_vm0, %v932_v38  ;;  %v935_v7 = vmax.f32 %v919_v46, 0.0  ;;  %v917_v41 = vadd.f32 %v901_v33, %v865_v48  ;;  %v886_v43 = vadd.f32 %v1216_v57, %v789_v35  ;;  %v845_v45 = vpop.f32.mrf.mxu0 }
 0x12e   :  { %944 = vst.msk [vmem:[%s1822_s4 + $0x18] sm:$0xff] %vm940_vm0, %v927_v37  ;;  %v925_v44 = vmax.f32 %v909_v39, 0.0  ;;  %v914_v58 = vadd.f32 %v898_v12, %v854_v54  ;;  %v846_v53 = vadd.f32 %v845_v45, %v1658_v42  ;;  %v877_v55 = vpop.f32.mrf.mxu1  ;;  %v784_v1 = vadd.f32 %v1163_v0, %v687_v52 }
 0x12f   :  { %952 = vst.msk [vmem:[%s1822_s4 + $0x58] sm:$0xff] %vm940_vm0, %v935_v7  ;;  %v933_v63 = vmax.f32 %v917_v41, 0.0  ;;  %v922_v9 = vadd.f32 %v906_v59, %v886_v43  ;;  %v878_v11 = vadd.f32 %v877_v55, %v781_v27  ;;  %v1209_v13 = vpop.f32.mrf.mxu0 }
 0x130   :  { %942 = vst.msk [vmem:[%s1822_s4 + $0x8] sm:$0xff] %vm940_vm0, %v925_v44  ;;  %v930_v42 = vmax.f32 %v914_v58, 0.0  ;;  %v912_v16 = vadd.f32 %v896_v47, %v846_v53  ;;  %v857_v18 = vadd.f32 %v1209_v13, %v1692_v2  ;;  %v1217_v20 = vpop.f32.mrf.mxu1  ;;  %v897_v2 = vld [vmem:[%s1821_s3 + $0x28] sm:$0xff] }
 0x131   :  { %950 = vst.msk [vmem:[%s1822_s4 + $0x48] sm:$0xff] %vm940_vm0, %v933_v63  ;;  %v938_v26 = vmax.f32 %v922_v9, 0.0  ;;  %v920_v28 = vadd.f32 %v904_v61, %v878_v11  ;;  %v889_v30 = vadd.f32 %v1217_v20, %v792_v15  ;;  %v848_v32 = vpop.f32.mrf.mxu0 }
 0x132   :  { %947 = vst.msk [vmem:[%s1822_s4 + $0x30] sm:$0xff] %vm940_vm0, %v930_v42  ;;  %v928_v29 = vmax.f32 %v912_v16, 0.0  ;;  %v915_v60 = vadd.f32 %v899_v14, %v857_v18  ;;  %v849_v6 = vadd.f32 %v848_v32, %v752_v24  ;;  %v880_v34 = vpop.f32.mrf.mxu1 }
 0x133   :  { %955 = vst.msk [vmem:[%s1822_s4 + $0x70] sm:$0xff] %vm940_vm0, %v938_v26  ;;  %v936_v19 = vmax.f32 %v920_v28, 0.0  ;;  %v923_v4 = vadd.f32 %v907_v22, %v889_v30  ;;  %v881_v5 = vadd.f32 %v880_v34, %v784_v1 }
 0x134   :  { %945 = vst.msk [vmem:[%s1822_s4 + $0x20] sm:$0xff] %vm940_vm0, %v928_v29  ;;  %v931_v23 = vmax.f32 %v915_v60, 0.0  ;;  %v913_v10 = vadd.f32 %v897_v2, %v849_v6 }
 0x135   :  { %953 = vst.msk [vmem:[%s1822_s4 + $0x60] sm:$0xff] %vm940_vm0, %v936_v19  ;;  %v939_v8 = vmax.f32 %v923_v4, 0.0  ;;  %v921_v56 = vadd.f32 %v905_v17, %v881_v5 }
 0x136   :  { %948 = vst.msk [vmem:[%s1822_s4 + $0x38] sm:$0xff] %vm940_vm0, %v931_v23  ;;  %v929_v25 = vmax.f32 %v913_v10, 0.0 }
 0x137   :  { %956 = vst.msk [vmem:[%s1822_s4 + $0x78] sm:$0xff] %vm940_vm0, %v939_v8  ;;  %v937_v27 = vmax.f32 %v921_v56, 0.0 }
 0x138   :  { %946 = vst.msk [vmem:[%s1822_s4 + $0x28] sm:$0xff] %vm940_vm0, %v929_v25 }
 0x139   :  { %954 = vst.msk [vmem:[%s1822_s4 + $0x68] sm:$0xff] %vm940_vm0, %v937_v27 }

// kernel: _lambda_.25
= control target key start
LH: loop header
LB: loop body
LE: loop exit
PB: predicated region body
PF: predicated region fallthrough
CT: control target
= control target key end

     0   :  { %s1716_s1 = inlined_call_operand.vmem [shape: bf16[640,128], index: 1, kind: input, shape index: {}]   ;;  %s1717_s0 = inlined_call_operand.vmem [shape: bf16[128,640], index: 0, kind: input, shape index: {}]   ;;  %s1718_s2 = inlined_call_operand.vmem [shape: f32[1,128], index: 2, kind: input, shape index: {}]   ;;  %s1719_s3 = inlined_call_operand.vmem [shape: f32[128,128], index: 3, kind: output, shape index: {}]  }
   0x1   :  { %v1198_v0 = vld [vmem:[%s1716_s1 + $0x78] sm:$0xff]   ;;  %v1202_v4 = vld [vmem:[%s1716_s1 + $0x70] sm:$0xff]   ;;  %v1206_v8 = vld [vmem:[%s1716_s1 + $0x68] sm:$0xff]  }
   0x2   :  { %v1199_v1 = vld [vmem:[%s1716_s1 + $0xf8] sm:$0xff]   ;;  %1006 = vmatprep.subr.bf16.mxu0 %v1198_v0  ;;  %v1203_v5 = vld [vmem:[%s1716_s1 + $0xf0] sm:$0xff]   ;;  %v1207_v9 = vld [vmem:[%s1716_s1 + $0xe8] sm:$0xff]  }
   0x3   :  { %v1200_v2 = vld [vmem:[%s1716_s1 + $0x38] sm:$0xff]   ;;  %1070 = vmatprep.subr.bf16.mxu1 %v1199_v1  ;;  %v1204_v6 = vld [vmem:[%s1716_s1 + $0x30] sm:$0xff]   ;;  %v1208_v10 = vld [vmem:[%s1716_s1 + $0x28] sm:$0xff]  }
   0x4   :  { %v1201_v3 = vld [vmem:[%s1716_s1 + $0xb8] sm:$0xff]   ;;  %1007 = vmatpush3.bf16.msra.mxu0 %v1200_v2  ;;  %v1205_v7 = vld [vmem:[%s1716_s1 + $0xb0] sm:$0xff]   ;;  %v1209_v11 = vld [vmem:[%s1716_s1 + $0xa8] sm:$0xff]  }
   0x5   :  { %1071 = vmatpush3.bf16.msra.mxu1 %v1201_v3  ;;  %1008 = vmatprep.subr.bf16.mxu0 %v1202_v4  ;;  %v1210_v12 = vld [vmem:[%s1716_s1 + $0x60] sm:$0xff]   ;;  %v1214_v16 = vld [vmem:[%s1716_s1 + $0x58] sm:$0xff]   ;;  %v1218_v20 = vld [vmem:[%s1716_s1 + $0x50] sm:$0xff]  }
   0x6   :  { %1072 = vmatprep.subr.bf16.mxu1 %v1203_v5  ;;  %v1211_v13 = vld [vmem:[%s1716_s1 + $0xe0] sm:$0xff]   ;;  %v1215_v17 = vld [vmem:[%s1716_s1 + $0xd8] sm:$0xff]   ;;  %v1219_v21 = vld [vmem:[%s1716_s1 + $0xd0] sm:$0xff]  }
   0x7   :  { %v1212_v14 = vld [vmem:[%s1716_s1 + $0x20] sm:$0xff]   ;;  %v1216_v18 = vld [vmem:[%s1716_s1 + $0x18] sm:$0xff]   ;;  %v1220_v22 = vld [vmem:[%s1716_s1 + $0x10] sm:$0xff]  }
   0x8   :  { %1009 = vmatpush3.bf16.msra.mxu0 %v1204_v6  ;;  %v1213_v15 = vld [vmem:[%s1716_s1 + $0xa0] sm:$0xff]   ;;  %v1217_v19 = vld [vmem:[%s1716_s1 + $0x98] sm:$0xff]   ;;  %v1221_v23 = vld [vmem:[%s1716_s1 + $0x90] sm:$0xff]  }
   0x9   :  { %1073 = vmatpush3.bf16.msra.mxu1 %v1205_v7  ;;  %1010 = vmatprep.subr.bf16.mxu0 %v1206_v8  ;;  %v1222_v24 = vld [vmem:[%s1716_s1 + $0x48] sm:$0xff]   ;;  %v1226_v28 = vld [vmem:[%s1716_s1 + $0x40] sm:$0xff]   ;;  %v1236_v36 = vld [vmem:[%s1716_s1 + $0x138] sm:$0xff]  }
   0xa   :  { %1074 = vmatprep.subr.bf16.mxu1 %v1207_v9  ;;  %v1223_v25 = vld [vmem:[%s1716_s1 + $0xc8] sm:$0xff]   ;;  %v1227_v29 = vld [vmem:[%s1716_s1 + $0xc0] sm:$0xff]   ;;  %v1243_v39 = vld [vmem:[%s1716_s1 + $0x130] sm:$0xff]  }
   0xb   :  { %v1224_v26 = vld [vmem:[%s1716_s1 + $0x8] sm:$0xff]   ;;  %v1228_v30 = vld [vmem:[%s1716_s1] sm:$0xff]   ;;  %v1246_v43 = vld [vmem:[%s1717_s0 + $0x5c] ss:$20 sps:$4 sm:$0xff]  }
   0xc   :  { %1011 = vmatpush3.bf16.msra.mxu0 %v1208_v10  ;;  %v1225_v27 = vld [vmem:[%s1716_s1 + $0x88] sm:$0xff]   ;;  %v1229_v31 = vld [vmem:[%s1716_s1 + $0x80] sm:$0xff]   ;;  %v1251_v48 = vld [vmem:[%s1717_s0 + $0x7c] ss:$20 sps:$4 sm:$0xff]  }
   0xd   :  { %1075 = vmatpush3.bf16.msra.mxu1 %v1209_v11  ;;  %1012 = vmatprep.subr.bf16.mxu0 %v1210_v12  ;;  %v1230_v32 = vld [vmem:[%s1717_s0] ss:$20 sps:$4 sm:$0xff]   ;;  %v1232_v33 = vld [vmem:[%s1717_s0 + $0x4] ss:$20 sps:$4 sm:$0xff]   ;;  %v1233_v34 = vld [vmem:[%s1717_s0 + $0x8] ss:$20 sps:$4 sm:$0xff]  }
   0xe   :  { %1076 = vmatprep.subr.bf16.mxu1 %v1211_v13  ;;  %v1235_v35 = vld [vmem:[%s1717_s0 + $0xc] ss:$20 sps:$4 sm:$0xff]   ;;  %630 = vmatprep.mubr.bf16.mxu0 %v1232_v33  ;;  %v1239_v38 = vld [vmem:[%s1717_s0 + $0x34] ss:$20 sps:$4 sm:$0xff]   ;;  %v1242_v41 = vld [vmem:[%s1717_s0 + $0x30] ss:$20 sps:$4 sm:$0xff]  }
   0xf   :  { %727 = vmatprep.mubr.bf16.mxu1 %v1235_v35  ;;  %v1237_v37 = vld [vmem:[%s1717_s0 + $0x2c] ss:$20 sps:$4 sm:$0xff]   ;;  %v1241_v40 = vld [vmem:[%s1717_s0 + $0x28] ss:$20 sps:$4 sm:$0xff]   ;;  %v1248_v46 = vld [vmem:[%s1717_s0 + $0x50] ss:$20 sps:$4 sm:$0xff]  }
  0x10   :  { %1013 = vmatpush3.bf16.msra.mxu0 %v1212_v14  ;;  %v1244_v42 = vld [vmem:[%s1717_s0 + $0x54] ss:$20 sps:$4 sm:$0xff]   ;;  %v1257_v45 = vld [vmem:[%s1716_s1 + $0x120] sm:$0xff]   ;;  %v1249_v47 = vld [vmem:[%s1717_s0 + $0x58] ss:$20 sps:$4 sm:$0xff]  }
  0x11   :  { %1077 = vmatpush3.bf16.msra.mxu1 %v1213_v15  ;;  %1014 = vmatprep.subr.bf16.mxu0 %v1214_v16  ;;  %v1250_v44 = vld [vmem:[%s1716_s1 + $0x128] sm:$0xff]   ;;  %v1253_v49 = vld [vmem:[%s1717_s0 + $0x84] ss:$20 sps:$4 sm:$0xff]   ;;  %v1271_v51 = vld [vmem:[%s1716_s1 + $0x110] sm:$0xff]  }
  0x12   :  { %1078 = vmatprep.subr.bf16.mxu1 %v1215_v17  ;;  %v1264_v50 = vld [vmem:[%s1716_s1 + $0x118] sm:$0xff]   ;;  %v1256_v53 = vld [vmem:[%s1717_s0 + $0x80] ss:$20 sps:$4 sm:$0xff]   ;;  %v1278_v55 = vld [vmem:[%s1716_s1 + $0x108] sm:$0xff]  }
  0x13   :  { %v1255_v52 = vld [vmem:[%s1717_s0 + $0x78] ss:$20 sps:$4 sm:$0xff]   ;;  %v1285_v57 = vld [vmem:[%s1716_s1 + $0x100] sm:$0xff]   ;;  %v1263_v59 = vld [vmem:[%s1717_s0 + $0xa8] ss:$20 sps:$4 sm:$0xff]  }
  0x14   :  { %1015 = vmatpush3.bf16.msra.mxu0 %v1216_v18  ;;  %v1258_v54 = vld [vmem:[%s1717_s0 + $0xa4] ss:$20 sps:$4 sm:$0xff]   ;;  %v1260_v56 = vld [vmem:[%s1717_s0 + $0xac] ss:$20 sps:$4 sm:$0xff]   ;;  %v1267_v61 = vld [vmem:[%s1717_s0 + $0xd4] ss:$20 sps:$4 sm:$0xff]  }
  0x15   :  { %1079 = vmatpush3.bf16.msra.mxu1 %v1217_v19  ;;  %1016 = vmatprep.subr.bf16.mxu0 %v1218_v20  ;;  %v1262_v58 = vld [vmem:[%s1717_s0 + $0xa0] ss:$20 sps:$4 sm:$0xff]   ;;  %v1269_v62 = vld [vmem:[%s1717_s0 + $0xc8] ss:$20 sps:$4 sm:$0xff]   ;;  %v1270_v63 = vld [vmem:[%s1717_s0 + $0xd0] ss:$20 sps:$4 sm:$0xff]  }
  0x16   :  { %1080 = vmatprep.subr.bf16.mxu1 %v1219_v21  ;;  %v1265_v60 = vld [vmem:[%s1717_s0 + $0xcc] ss:$20 sps:$4 sm:$0xff]   ;;  %v1272_v0 = vld [vmem:[%s1717_s0 + $0xf4] ss:$20 sps:$4 sm:$0xff]   ;;  %v1274_v1 = vld [vmem:[%s1717_s0 + $0xfc] ss:$20 sps:$4 sm:$0xff]  }
  0x17   :  { %v1276_v2 = vld [vmem:[%s1717_s0 + $0xf0] ss:$20 sps:$4 sm:$0xff]   ;;  %v1277_v3 = vld [vmem:[%s1717_s0 + $0xf8] ss:$20 sps:$4 sm:$0xff]   ;;  %v1284_v7 = vld [vmem:[%s1717_s0 + $0x120] ss:$20 sps:$4 sm:$0xff]  }
  0x18   :  { %1017 = vmatpush3.bf16.msra.mxu0 %v1220_v22  ;;  %v1279_v4 = vld [vmem:[%s1717_s0 + $0x11c] ss:$20 sps:$4 sm:$0xff]   ;;  %v1281_v5 = vld [vmem:[%s1717_s0 + $0x124] ss:$20 sps:$4 sm:$0xff]   ;;  %v1290_v12 = vld [vmem:[%s1717_s0 + $0x60] ss:$20 sps:$4 sm:$0xff]  }
  0x19   :  { %1081 = vmatpush3.bf16.msra.mxu1 %v1221_v23  ;;  %1018 = vmatprep.subr.bf16.mxu0 %v1222_v24  ;;  %v1283_v6 = vld [vmem:[%s1717_s0 + $0x118] ss:$20 sps:$4 sm:$0xff]   ;;  %v1286_v8 = vld [vmem:[%s1717_s0 + $0x10] ss:$20 sps:$4 sm:$0xff]   ;;  %v1291_v13 = vld [vmem:[%s1717_s0 + $0x100] ss:$20 sps:$4 sm:$0xff]  }
  0x1a   :  { %1082 = vmatprep.subr.bf16.mxu1 %v1223_v25  ;;  %v1287_v9 = vld [vmem:[%s1717_s0 + $0xb0] ss:$20 sps:$4 sm:$0xff]   ;;  %v1288_v10 = vld [vmem:[%s1717_s0 + $0x38] ss:$20 sps:$4 sm:$0xff]   ;;  %v1292_v14 = vld [vmem:[%s1717_s0 + $0x88] ss:$20 sps:$4 sm:$0xff]  }
  0x1b   :  { %v1289_v11 = vld [vmem:[%s1717_s0 + $0xd8] ss:$20 sps:$4 sm:$0xff]   ;;  %v1293_v15 = vld [vmem:[%s1717_s0 + $0x128] ss:$20 sps:$4 sm:$0xff]  }
  0x1c   :  { %1019 = vmatpush3.bf16.msra.mxu0 %v1224_v26 }
  0x1d   :  { %1083 = vmatpush3.bf16.msra.mxu1 %v1225_v27  ;;  %1020 = vmatprep.subr.bf16.mxu0 %v1226_v28 }
  0x1e   :  { %1084 = vmatprep.subr.bf16.mxu1 %v1227_v29 }
  0x20   :  { %1021 = vmatpush3.bf16.msra.mxu0 %v1228_v30 }
  0x21   :  { %1085 = vmatpush3.bf16.msra.mxu1 %v1229_v31  ;;  %1150 = vmatprep.subr.bf16.mxu0 %v1236_v36 }
  0x22   :  { %1182 = vmatprep.subr.bf16.mxu1 %v1236_v36 }
  0x23   :  { %631 = vmatmul.mubr.bf16.vlgmr.msra.gmra.mxu0 %v1230_v32 }
  0x24   :  { %728 = vmatmul.mubr.bf16.vlgmr.msra.gmra.mxu1 %v1233_v34  ;;  %1151 = vmatpush3.bf16.msra.mxu0 %v1236_v36 }
  0x25   :  { %1190 = vmatpush3.bf16.msra.mxu1 %v1236_v36  ;;  %638 = vmatprep.mubr.bf16.mxu0 %v1237_v37 }
  0x26   :  { %735 = vmatprep.mubr.bf16.mxu1 %v1239_v38  ;;  %1152 = vmatprep.subr.bf16.mxu0 %v1243_v39 }
  0x27   :  { %1183 = vmatprep.subr.bf16.mxu1 %v1243_v39 }
  0x28   :  { %1153 = vmatpush3.bf16.msra.mxu0 %v1243_v39 }
  0x29   :  { %1191 = vmatpush3.bf16.msra.mxu1 %v1243_v39  ;;  %1154 = vmatprep.subr.bf16.mxu0 %v1250_v44 }
  0x2a   :  { %1184 = vmatprep.subr.bf16.mxu1 %v1250_v44 }
  0x2b   :  { %639 = vmatmul.mubr.bf16.gmra.mxu0 %v1241_v40 }
  0x2c   :  { %736 = vmatmul.mubr.bf16.gmra.mxu1 %v1242_v41  ;;  %646 = vmatprep.mubr.bf16.mxu0 %v1244_v42 }
  0x2d   :  { %743 = vmatprep.mubr.bf16.mxu1 %v1246_v43  ;;  %1155 = vmatpush3.bf16.msra.mxu0 %v1250_v44 }
  0x2e   :  { %1192 = vmatpush3.bf16.msra.mxu1 %v1250_v44  ;;  %1156 = vmatprep.subr.bf16.mxu0 %v1257_v45 }
  0x2f   :  { %1185 = vmatprep.subr.bf16.mxu1 %v1257_v45 }
  0x31   :  { %1157 = vmatpush3.bf16.msra.mxu0 %v1257_v45 }
  0x32   :  { %1193 = vmatpush3.bf16.msra.mxu1 %v1257_v45  ;;  %1158 = vmatprep.subr.bf16.mxu0 %v1264_v50 }
  0x33   :  { %647 = vmatmul.mubr.bf16.gmra.mxu0 %v1248_v46  ;;  %1186 = vmatprep.subr.bf16.mxu1 %v1264_v50 }
  0x34   :  { %744 = vmatmul.mubr.bf16.gmra.mxu1 %v1249_v47  ;;  %654 = vmatprep.mubr.bf16.mxu0 %v1251_v48 }
  0x35   :  { %751 = vmatprep.mubr.bf16.mxu1 %v1253_v49  ;;  %1159 = vmatpush3.bf16.msra.mxu0 %v1264_v50 }
  0x36   :  { %1194 = vmatpush3.bf16.msra.mxu1 %v1264_v50  ;;  %1160 = vmatprep.subr.bf16.mxu0 %v1271_v51 }
  0x37   :  { %1187 = vmatprep.subr.bf16.mxu1 %v1271_v51 }
  0x39   :  { %1161 = vmatpush3.bf16.msra.mxu0 %v1271_v51 }
  0x3a   :  { %1195 = vmatpush3.bf16.msra.mxu1 %v1271_v51  ;;  %1162 = vmatprep.subr.bf16.mxu0 %v1278_v55 }
  0x3b   :  { %655 = vmatmul.mubr.bf16.gmra.mxu0 %v1255_v52  ;;  %1188 = vmatprep.subr.bf16.mxu1 %v1278_v55 }
  0x3c   :  { %752 = vmatmul.mubr.bf16.gmra.mxu1 %v1256_v53  ;;  %662 = vmatprep.mubr.bf16.mxu0 %v1258_v54 }
  0x3d   :  { %759 = vmatprep.mubr.bf16.mxu1 %v1260_v56  ;;  %1163 = vmatpush3.bf16.msra.mxu0 %v1278_v55 }
  0x3e   :  { %1196 = vmatpush3.bf16.msra.mxu1 %v1278_v55  ;;  %1164 = vmatprep.subr.bf16.mxu0 %v1285_v57 }
  0x3f   :  { %1189 = vmatprep.subr.bf16.mxu1 %v1285_v57 }
  0x41   :  { %1165 = vmatpush3.bf16.msra.mxu0 %v1285_v57 }
  0x42   :  { %1197 = vmatpush3.bf16.msra.mxu1 %v1285_v57 }
  0x43   :  { %663 = vmatmul.mubr.bf16.gmra.mxu0 %v1262_v58 }
  0x44   :  { %760 = vmatmul.mubr.bf16.gmra.mxu1 %v1263_v59  ;;  %670 = vmatprep.mubr.bf16.mxu0 %v1265_v60 }
  0x45   :  { %767 = vmatprep.mubr.bf16.mxu1 %v1267_v61 }
  0x4b   :  { %671 = vmatmul.mubr.bf16.gmra.mxu0 %v1269_v62 }
  0x4c   :  { %768 = vmatmul.mubr.bf16.gmra.mxu1 %v1270_v63  ;;  %678 = vmatprep.mubr.bf16.mxu0 %v1272_v0 }
  0x4d   :  { %775 = vmatprep.mubr.bf16.mxu1 %v1274_v1 }
  0x53   :  { %679 = vmatmul.mubr.bf16.gmra.mxu0 %v1276_v2 }
  0x54   :  { %776 = vmatmul.mubr.bf16.gmra.mxu1 %v1277_v3  ;;  %686 = vmatprep.mubr.bf16.mxu0 %v1279_v4 }
  0x55   :  { %783 = vmatprep.mubr.bf16.mxu1 %v1281_v5 }
  0x5b   :  { %687 = vmatmul.mubr.bf16.gmra.mxu0 %v1283_v6  ;;  %v1605_v6 = vld [vmem:[%s1718_s2] ss:$0 sm:$0xff] }
  0x5c   :  { %784 = vmatmul.mubr.bf16.gmra.mxu1 %v1284_v7  ;;  %1166 = vmatprep.mubr.bf16.mxu0 %v1286_v8 }
  0x5d   :  { %1174 = vmatprep.mubr.bf16.mxu1 %v1287_v9 }
  0x63   :  { %1167 = vmatmul.mubr.bf16.vlgmr.msra.gmra.mxu0 %v1288_v10 }
  0x64   :  { %1175 = vmatmul.mubr.bf16.vlgmr.msra.gmra.mxu1 %v1289_v11  ;;  %1170 = vmatprep.mubr.bf16.mxu0 %v1290_v12 }
  0x65   :  { %1178 = vmatprep.mubr.bf16.mxu1 %v1291_v13 }
  0x6b   :  { %1171 = vmatmul.mubr.bf16.gmra.mxu0 %v1292_v14 }
  0x6c   :  { %1179 = vmatmul.mubr.bf16.gmra.mxu1 %v1293_v15 }
  0xe3   :  { %v1022_v16 = vpop.f32.mrf.mxu0 }
  0xe4   :  { %v1554_v17 = vpop.f32.mrf.mxu1 }
  0xe5   :  { %v1023_v18 = vpop.f32.mrf.mxu0 }
  0xe6   :  { %v1556_v19 = vpop.f32.mrf.mxu1  ;;  %v1024_v4 = vadd.f32 %v1023_v18, %v1022_v16 }
  0xe7   :  { %v1025_v20 = vpop.f32.mrf.mxu0  ;;  %v1088_v18 = vadd.f32 %v1556_v19, %v1554_v17 }
  0xe8   :  { %v1558_v21 = vpop.f32.mrf.mxu1  ;;  %v633_v14 = vadd.f32 %v1024_v4, %v1605_v6 }
  0xe9   :  { %v1026_v22 = vpop.f32.mrf.mxu0 }
  0xea   :  { %v1090_v23 = vpop.f32.mrf.mxu1  ;;  %v1027_v7 = vadd.f32 %v1026_v22, %v1025_v20 }
  0xeb   :  { %v1028_v24 = vpop.f32.mrf.mxu0  ;;  %v1091_v20 = vadd.f32 %v1090_v23, %v1558_v21 }
  0xec   :  { %v1560_v25 = vpop.f32.mrf.mxu1 }
  0xed   :  { %v1029_v26 = vpop.f32.mrf.mxu0 }
  0xee   :  { %v1562_v27 = vpop.f32.mrf.mxu1  ;;  %v1030_v9 = vadd.f32 %v1029_v26, %v1028_v24 }
  0xef   :  { %v1031_v28 = vpop.f32.mrf.mxu0  ;;  %v1094_v17 = vadd.f32 %v1562_v27, %v1560_v25 }
  0xf0   :  { %v1564_v29 = vpop.f32.mrf.mxu1  ;;  %v641_v22 = vadd.f32 %v1030_v9, %v1605_v6 }
  0xf1   :  { %v1032_v30 = vpop.f32.mrf.mxu0 }
  0xf2   :  { %v1566_v31 = vpop.f32.mrf.mxu1  ;;  %v1033_v11 = vadd.f32 %v1032_v30, %v1031_v28  ;;  %v738_v27 = vadd.f32 %v1094_v17, %v641_v22 }
  0xf3   :  { %v1034_v32 = vpop.f32.mrf.mxu0  ;;  %v1097_v21 = vadd.f32 %v1566_v31, %v1564_v29 }
  0xf4   :  { %v1568_v33 = vpop.f32.mrf.mxu1  ;;  %v644_v30 = vadd.f32 %v1033_v11, %v1605_v6 }
  0xf5   :  { %v1035_v34 = vpop.f32.mrf.mxu0 }
  0xf6   :  { %v1570_v35 = vpop.f32.mrf.mxu1  ;;  %v1036_v12 = vadd.f32 %v1035_v34, %v1034_v32  ;;  %v741_v31 = vadd.f32 %v1097_v21, %v644_v30 }
  0xf7   :  { %v1037_v36 = vpop.f32.mrf.mxu0  ;;  %v1100_v23 = vadd.f32 %v1570_v35, %v1568_v33 }
  0xf8   :  { %v1572_v37 = vpop.f32.mrf.mxu1  ;;  %v649_v32 = vadd.f32 %v1036_v12, %v1605_v6 }
  0xf9   :  { %1720 = vst [vmem:[#allocation2_spill] sm:$0xff] %v1572_v37  ;;  %v1038_v38 = vpop.f32.mrf.mxu0 }
  0xfa   :  { %v1574_v39 = vpop.f32.mrf.mxu1  ;;  %v1039_v34 = vadd.f32 %v1038_v38, %v1037_v36  ;;  %v1638_v9 = vadd.f32 %v1100_v23, %v649_v32 }
  0xfb   :  { %1721 = vst [vmem:[#allocation3_spill] sm:$0xff] %v1574_v39  ;;  %v1040_v40 = vpop.f32.mrf.mxu0  ;;  %v636_v39 = vadd.f32 %v1027_v7, %v1605_v6  ;;  %v730_v7 = vadd.f32 %v1088_v18, %v633_v14 }
  0xfc   :  { %v1576_v41 = vpop.f32.mrf.mxu1 }
  0xfd   :  { %v1041_v42 = vpop.f32.mrf.mxu0 }
  0xfe   :  { %v1578_v43 = vpop.f32.mrf.mxu1  ;;  %v1042_v24 = vadd.f32 %v1041_v42, %v1040_v40 }
  0xff   :  { %v1580_v44 = vpop.f32.mrf.mxu0  ;;  %v1106_v33 = vadd.f32 %v1578_v43, %v1576_v41 }
 0x100   :  { %v1582_v45 = vpop.f32.mrf.mxu1  ;;  %v657_v36 = vadd.f32 %v1042_v24, %v1605_v6 }
 0x101   :  { %v1584_v46 = vpop.f32.mrf.mxu0 }
 0x102   :  { %v1586_v47 = vpop.f32.mrf.mxu1  ;;  %v754_v24 = vadd.f32 %v1106_v33, %v657_v36 }
 0x103   :  { %v1046_v48 = vpop.f32.mrf.mxu0 }
 0x104   :  { %v1588_v49 = vpop.f32.mrf.mxu1 }
 0x105   :  { %v1047_v50 = vpop.f32.mrf.mxu0 }
 0x106   :  { %v1590_v51 = vpop.f32.mrf.mxu1  ;;  %v1048_v26 = vadd.f32 %v1047_v50, %v1046_v48  ;;  %v733_v48 = vadd.f32 %v1091_v20, %v636_v39 }
 0x107   :  { %v1049_v52 = vpop.f32.mrf.mxu0  ;;  %v1112_v35 = vadd.f32 %v1590_v51, %v1588_v49 }
 0x108   :  { %v1592_v53 = vpop.f32.mrf.mxu1  ;;  %v665_v38 = vadd.f32 %v1048_v26, %v1605_v6 }
 0x109   :  { %v1050_v54 = vpop.f32.mrf.mxu0 }
 0x10a   :  { %v1594_v55 = vpop.f32.mrf.mxu1  ;;  %v1051_v40 = vadd.f32 %v1050_v54, %v1049_v52  ;;  %v762_v22 = vadd.f32 %v1112_v35, %v665_v38 }
 0x10b   :  { %v1052_v56 = vpop.f32.mrf.mxu0  ;;  %v1115_v41 = vadd.f32 %v1594_v55, %v1592_v53 }
 0x10c   :  { %v1116_v57 = vpop.f32.mrf.mxu1 }
 0x10d   :  { %v1053_v58 = vpop.f32.mrf.mxu0 }
 0x10e   :  { %v1117_v59 = vpop.f32.mrf.mxu1  ;;  %v1054_v15 = vadd.f32 %v1053_v58, %v1052_v56 }
 0x10f   :  { %v1055_v60 = vpop.f32.mrf.mxu0  ;;  %v1118_v50 = vadd.f32 %v1117_v59, %v1116_v57  ;;  %v668_v57 = vadd.f32 %v1051_v40, %v1605_v6 }
 0x110   :  { %v1119_v61 = vpop.f32.mrf.mxu1  ;;  %v673_v19 = vadd.f32 %v1054_v15, %v1605_v6  ;;  %v1045_v15 = vadd.f32 %v1584_v46, %v1580_v44 }
 0x111   :  { %v1056_v62 = vpop.f32.mrf.mxu0  ;;  %v765_v53 = vadd.f32 %v1115_v41, %v668_v57 }
 0x112   :  { %v1120_v63 = vpop.f32.mrf.mxu1  ;;  %v1057_v56 = vadd.f32 %v1056_v62, %v1055_v60  ;;  %v1635_v60 = vadd.f32 %v1039_v34, %v1605_v6  ;;  %v770_v54 = vadd.f32 %v1118_v50, %v673_v19  ;;  %v660_v19 = vadd.f32 %v1045_v15, %v1605_v6 }
 0x113   :  { %v1058_v0 = vpop.f32.mrf.mxu0  ;;  %v1121_v59 = vadd.f32 %v1120_v63, %v1119_v61 }
 0x114   :  { %v1596_v1 = vpop.f32.mrf.mxu1  ;;  %v676_v62 = vadd.f32 %v1057_v56, %v1605_v6 }
 0x115   :  { %v1059_v2 = vpop.f32.mrf.mxu0 }
 0x116   :  { %v1598_v3 = vpop.f32.mrf.mxu1  ;;  %v1060_v11 = vadd.f32 %v1059_v2, %v1058_v0 }
 0x117   :  { %v1600_v5 = vpop.f32.mrf.mxu0 }
 0x118   :  { %v1607_v8 = vpop.f32.mrf.mxu1 }
 0x119   :  { %v1609_v10 = vpop.f32.mrf.mxu0 }
 0x11a   :  { %v1611_v13 = vpop.f32.mrf.mxu1  ;;  %v1063_v55 = vadd.f32 %v1609_v10, %v1600_v5 }
 0x11b   :  { %v1064_v16 = vpop.f32.mrf.mxu0 }
 0x11c   :  { %v1617_v37 = vpop.f32.mrf.mxu1  ;;  %v684_v50 = vadd.f32 %v1063_v55, %v1605_v6 }
 0x11d   :  { %v1065_v28 = vpop.f32.mrf.mxu0 }
 0x11e   :  { %v1129_v58 = vpop.f32.mrf.mxu1  ;;  %v1066_v39 = vadd.f32 %v1065_v28, %v1064_v16  ;;  %v773_v16 = vadd.f32 %v1121_v59, %v676_v62  ;;  %v681_v28 = vadd.f32 %v1060_v11, %v1605_v6 }
 0x11f   :  { %v1067_v4 = vpop.f32.mrf.mxu0  ;;  %v1130_v32 = vadd.f32 %v1129_v58, %v1617_v37 }
 0x120   :  { %v1630_v42 = vpop.f32.mrf.mxu1  ;;  %v689_v26 = vadd.f32 %v1066_v39, %v1605_v6 }
 0x121   :  { %v1068_v25 = vpop.f32.mrf.mxu0 }
 0x122   :  { %v1132_v29 = vpop.f32.mrf.mxu1  ;;  %v1069_v61 = vadd.f32 %v1068_v25, %v1067_v4  ;;  %v1124_v4 = vadd.f32 %v1598_v3, %v1596_v1  ;;  %v786_v40 = vadd.f32 %v1130_v32, %v689_v26  ;;  %v1109_v1 = vadd.f32 %v1586_v47, %v1582_v45  ;;  %v1722_v45 = vld [vmem:[#allocation2_spill] sm:$0xff]  ;;  %v1723_v47 = vld [vmem:[#allocation3_spill] sm:$0xff] }
 0x123   :  { %v1168_v52 = vpop.f32.mrf.mxu0  ;;  %v1133_v25 = vadd.f32 %v1132_v29, %v1630_v42  ;;  %v1103_v33 = vadd.f32 %v1723_v47, %v1722_v45  ;;  %v1127_v42 = vadd.f32 %v1611_v13, %v1607_v8 }
 0x124   :  { %v835_v12 = vadd.f32 %v1168_v52, %v738_v27  ;;  %v1176_v14 = vpop.f32.mrf.mxu1  ;;  %v692_v37 = vadd.f32 %v1069_v61, %v1605_v6  ;;  %v778_v38 = vadd.f32 %v1124_v4, %v681_v28  ;;  %v757_v52 = vadd.f32 %v1109_v1, %v660_v19 }
 0x125   :  { %v867_v18 = vadd.f32 %v1176_v14, %v770_v54  ;;  %v826_v20 = vpop.f32.mrf.mxu0  ;;  %v749_v14 = vadd.f32 %v1103_v33, %v1635_v60 }
 0x126   :  { %v891_v43 = vmax.f32 %v835_v12, 0.0  ;;  %v827_v49 = vadd.f32 %v826_v20, %v730_v7  ;;  %v858_v51 = vpop.f32.mrf.mxu1  ;;  %v789_v59 = vadd.f32 %v1133_v25, %v692_v37 }
 0x127   :  { %v899_v63 = vmax.f32 %v867_v18, 0.0  ;;  %v859_v0 = vadd.f32 %v858_v51, %v762_v22  ;;  %v1169_v2 = vpop.f32.mrf.mxu0  ;;  %v781_v18 = vadd.f32 %v1127_v42, %v684_v50 }
 0x128   :  { %907 = vst [vmem:[%s1719_s3 + $0x10] sm:$0xff] %v891_v43  ;;  %v889_v44 = vmax.f32 %v827_v49, 0.0  ;;  %v838_v46 = vadd.f32 %v1169_v2, %v741_v31  ;;  %v1177_v30 = vpop.f32.mrf.mxu1 }
 0x129   :  { %915 = vst [vmem:[%s1719_s3 + $0x50] sm:$0xff] %v899_v63  ;;  %v897_v34 = vmax.f32 %v859_v0, 0.0  ;;  %v870_v56 = vadd.f32 %v1177_v30, %v773_v16  ;;  %v829_v17 = vpop.f32.mrf.mxu0 }
 0x12a   :  { %905 = vst [vmem:[%s1719_s3] sm:$0xff] %v889_v44  ;;  %v892_v7 = vmax.f32 %v838_v46, 0.0  ;;  %v830_v5 = vadd.f32 %v829_v17, %v733_v48  ;;  %v861_v10 = vpop.f32.mrf.mxu1 }
 0x12b   :  { %913 = vst [vmem:[%s1719_s3 + $0x40] sm:$0xff] %v897_v34  ;;  %v900_v58 = vmax.f32 %v870_v56, 0.0  ;;  %v862_v21 = vadd.f32 %v861_v10, %v765_v53  ;;  %v1172_v23 = vpop.f32.mrf.mxu0 }
 0x12c   :  { %908 = vst [vmem:[%s1719_s3 + $0x18] sm:$0xff] %v892_v7  ;;  %v890_v3 = vmax.f32 %v830_v5, 0.0  ;;  %v851_v48 = vadd.f32 %v1172_v23, %v754_v24  ;;  %v1180_v36 = vpop.f32.mrf.mxu1 }
 0x12d   :  { %916 = vst [vmem:[%s1719_s3 + $0x58] sm:$0xff] %v900_v58  ;;  %v898_v27 = vmax.f32 %v862_v21, 0.0  ;;  %v883_v62 = vadd.f32 %v1180_v36, %v786_v40  ;;  %v842_v31 = vpop.f32.mrf.mxu0 }
 0x12e   :  { %906 = vst [vmem:[%s1719_s3 + $0x8] sm:$0xff] %v890_v3  ;;  %v895_v35 = vmax.f32 %v851_v48, 0.0  ;;  %v843_v39 = vadd.f32 %v842_v31, %v1638_v9  ;;  %v874_v6 = vpop.f32.mrf.mxu1 }
 0x12f   :  { %914 = vst [vmem:[%s1719_s3 + $0x48] sm:$0xff] %v898_v27  ;;  %v903_v29 = vmax.f32 %v883_v62, 0.0  ;;  %v875_v54 = vadd.f32 %v874_v6, %v778_v38  ;;  %v1173_v57 = vpop.f32.mrf.mxu0 }
 0x130   :  { %911 = vst [vmem:[%s1719_s3 + $0x30] sm:$0xff] %v895_v35  ;;  %v893_v11 = vmax.f32 %v843_v39, 0.0  ;;  %v854_v12 = vadd.f32 %v1173_v57, %v757_v52  ;;  %v1181_v9 = vpop.f32.mrf.mxu1 }
 0x131   :  { %919 = vst [vmem:[%s1719_s3 + $0x70] sm:$0xff] %v903_v29  ;;  %v901_v8 = vmax.f32 %v875_v54, 0.0  ;;  %v886_v13 = vadd.f32 %v1181_v9, %v789_v59  ;;  %v845_v15 = vpop.f32.mrf.mxu0 }
 0x132   :  { %909 = vst [vmem:[%s1719_s3 + $0x20] sm:$0xff] %v893_v11  ;;  %v896_v20 = vmax.f32 %v854_v12, 0.0  ;;  %v846_v22 = vadd.f32 %v845_v15, %v749_v14  ;;  %v877_v24 = vpop.f32.mrf.mxu1 }
 0x133   :  { %917 = vst [vmem:[%s1719_s3 + $0x60] sm:$0xff] %v901_v8  ;;  %v904_v60 = vmax.f32 %v886_v13, 0.0  ;;  %v878_v41 = vadd.f32 %v877_v24, %v781_v18 }
 0x134   :  { %912 = vst [vmem:[%s1719_s3 + $0x38] sm:$0xff] %v896_v20  ;;  %v894_v43 = vmax.f32 %v846_v22, 0.0 }
 0x135   :  { %920 = vst [vmem:[%s1719_s3 + $0x78] sm:$0xff] %v904_v60  ;;  %v902_v49 = vmax.f32 %v878_v41, 0.0 }
 0x136   :  { %910 = vst [vmem:[%s1719_s3 + $0x28] sm:$0xff] %v894_v43 }
 0x137   :  { %918 = vst [vmem:[%s1719_s3 + $0x68] sm:$0xff] %v902_v49 }

// kernel: _lambda_.26
= control target key start
LH: loop header
LB: loop body
LE: loop exit
PB: predicated region body
PF: predicated region fallthrough
CT: control target
= control target key end

     0   :  { %s259_s6 = smov 0   ;;  %s276_s0 = inlined_call_operand.vmem [shape: f32[2,4,2,4,256], index: 0, kind: input, shape index: {}]   ;;  %s277_s1 = inlined_call_operand.vmem [shape: f32[2,4,4,128], index: 1, kind: output, shape index: {}]  }
   0x1 LB: > { %s220_s7 = sadd.s32 4294967295, %s247_s6   ;;  %p224_p0 = scmp.ge.s32.totalorder %s247_s6, 1  ;;  %s247_s6 = sphi %s259_s6, %s11_s6  }
   0x2   : > { %p87_p1 = scmp.lt.s32.totalorder %s247_s6, 3 }
   0x4   : > { %p88_p2 = pnand %p224_p0, %p87_p1 }
   0x5   : > { %p107_p3 = scmp.lt.s32.totalorder (!%p88_p2), %s220_s7, 1 }
   0x6   : > { %91 = sbr.rel (%p88_p2) target bundleno = 26 (0x1a), region = 24 }
   0xb   : > { %s279_s7 = smov (!%p107_p3, %s220_s7), 1 }
   0xc   : > { %s231_s8 = sshll.u32 %s279_s7, 6  ;;  %s232_s12 = sshll.u32 %s279_s7, 4 }
   0xd   : > { %s111_s11 = scalar_lea.vmem %s276_s0, %s231_s8  ;;  %s116_s15 = scalar_lea.vmem %s277_s1, %s232_s12 }
   0xe   : > { %v117_v0 = vld [vmem:[%s111_s11] sm:$0xff]  ;;  %v118_v1 = vld [vmem:[%s111_s11 + $0x8] sm:$0xff]  ;;  %v119_v2 = vld [vmem:[%s111_s11 + $0x10] sm:$0xff] }
   0xf   : > { %v129_v3 = vrot.slane %v117_v0, 4  ;;  %v120_v4 = vld [vmem:[%s111_s11 + $0x18] sm:$0xff]  ;;  %v130_v5 = vrot.slane %v119_v2, 4  ;;  %v121_v6 = vld [vmem:[%s111_s11 + $0x20] sm:$0xff]  ;;  %v122_v7 = vld [vmem:[%s111_s11 + $0x28] sm:$0xff]  ;;  %v149_v8 = vrot.slane %v118_v1, 4 }
  0x10   : > { %v131_v9 = vrot.slane %v121_v6, 4  ;;  %v123_v10 = vld [vmem:[%s111_s11 + $0x30] sm:$0xff]  ;;  %v124_v11 = vld [vmem:[%s111_s11 + $0x38] sm:$0xff]  ;;  %v150_v14 = vrot.slane %v120_v4, 4  ;;  %v151_v17 = vrot.slane %v122_v7, 4 }
  0x11   : > { %v137_v12 = vmax.f32 %v117_v0, %v129_v3  ;;  %v138_v13 = vmax.f32 %v119_v2, %v130_v5  ;;  %v132_v15 = vrot.slane %v123_v10, 4  ;;  %v152_v21 = vrot.slane %v124_v11, 4 }
  0x12   : > { %v139_v16 = vmax.f32 %v121_v6, %v131_v9 }
  0x13   : > { %v141_v18 = vmax.f32 %v137_v12, %v118_v1  ;;  %v142_v19 = vmax.f32 %v138_v13, %v120_v4  ;;  %v140_v20 = vmax.f32 %v123_v10, %v132_v15 }
  0x14   : > { %v143_v22 = vmax.f32 %v139_v16, %v122_v7 }
  0x15   : > { %v157_v23 = vmax.f32 %v141_v18, %v149_v8  ;;  %v158_v24 = vmax.f32 %v142_v19, %v150_v14  ;;  %v144_v25 = vmax.f32 %v140_v20, %v124_v11 }
  0x16   : > { %v159_v26 = vmax.f32 %v143_v22, %v151_v17 }
  0x17   : > { %161 = vst [vmem:[%s116_s15] sm:$0xf] %v157_v23  ;;  %162 = vst [vmem:[%s116_s15 + $0x4] sm:$0xf] %v158_v24  ;;  %v160_v27 = vmax.f32 %v144_v25, %v152_v21 }
  0x18   : > { %163 = vst [vmem:[%s116_s15 + $0x8] sm:$0xf] %v159_v26 }
  0x19   : > { %164 = vst [vmem:[%s116_s15 + $0xc] sm:$0xf] %v160_v27 }
  0x1a PF: > { %s11_s6 = sadd.s32 1, %s247_s6  }
  0x1b   : > { %p8_p4 = scmp.ge.s32.totalorder %s11_s6, 4  }
  0x1d   :  { %10 = sbr.rel (!%p8_p4) target bundleno = 1 (0x1), region = 54 }

// kernel: _lambda_.28
= control target key start
LH: loop header
LB: loop body
LE: loop exit
PB: predicated region body
PF: predicated region fallthrough
CT: control target
= control target key end

     0   :  { %s242_s6 = smov 0   ;;  %s259_s0 = inlined_call_operand.vmem [shape: f32[2,2,2,2,128], index: 0, kind: input, shape index: {}]   ;;  %s260_s1 = inlined_call_operand.vmem [shape: f32[2,2,2,64], index: 1, kind: output, shape index: {}]  }
   0x1 LB: > { %s201_s7 = sadd.s32 4294967295, %s229_s6   ;;  %p205_p0 = scmp.ge.s32.totalorder %s229_s6, 1  ;;  %s229_s6 = sphi %s242_s6, %s11_s6  }
   0x2   : > { %p87_p1 = scmp.lt.s32.totalorder %s229_s6, 3 }
   0x4   : > { %p88_p2 = pnand %p205_p0, %p87_p1 }
   0x5   : > { %p107_p3 = scmp.lt.s32.totalorder (!%p88_p2), %s201_s7, 1  ;;  %s231_s12 = smov (!%p88_p2), 64  }
   0x6   : > { %91 = sbr.rel (%p88_p2) target bundleno = 141 (0x8d), region = 24 }
   0xb   : > { %s262_s7 = smov (!%p107_p3, %s201_s7), 1  ;;  %vm143_vm0 = vcmask 517120  }
   0xc   : > { %s212_s8 = sshll.u32 %s262_s7, 3  ;;  %s213_s13 = sshll.u32 %s262_s7, 2 }
   0xd   : > { %s111_s11 = scalar_lea.vmem %s259_s0, %s212_s8  ;;  %s116_s16 = scalar_lea.vmem %s260_s1, %s213_s13 }
   0xe   : > { %v117_v0 = vld [vmem:[%s111_s11] sm:$0x3]  ;;  %v118_v1 = vld [vmem:[%s111_s11 + $0x2] sm:$0x3]  ;;  %v119_v2 = vld [vmem:[%s111_s11 + $0x4] sm:$0x3] }
   0xf   : > { %123 = vrot.lane.b32.xlu0 %v117_v0, %s231_s12  ;;  %135 = vrot.lane.b32.xlu1 %v118_v1, %s231_s12  ;;  %v120_v3 = vld [vmem:[%s111_s11 + $0x6] sm:$0x3] }
  0x13   : > { %125 = vrot.lane.b32.xlu0 %v119_v2, %s231_s12  ;;  %137 = vrot.lane.b32.xlu1 %v120_v3, %s231_s12 }
  0x81   : > { %v124_v4 = vpop.permute.xlu0 %123  ;;  %v136_v5 = vpop.permute.xlu1 %135 }
  0x82   : > { %v129_v6 = vmax.f32 %v117_v0, %v124_v4 }
  0x84   : > { %v131_v7 = vmax.f32 %v129_v6, %v118_v1 }
  0x85   : > { %v126_v8 = vpop.permute.xlu0 %125  ;;  %v138_v11 = vpop.permute.xlu1 %137 }
  0x86   : > { %v141_v9 = vmax.f32 %v131_v7, %v136_v5  ;;  %v130_v10 = vmax.f32 %v119_v2, %v126_v8 }
  0x88   : > { %144 = vst.msk [vmem:[%s116_s16] sm:$0x3] %vm143_vm0, %v141_v9  ;;  %v132_v12 = vmax.f32 %v130_v10, %v120_v3 }
  0x8a   : > { %v142_v13 = vmax.f32 %v132_v12, %v138_v11 }
  0x8c   : > { %145 = vst.msk [vmem:[%s116_s16 + $0x2] sm:$0x3] %vm143_vm0, %v142_v13 }
  0x8d PF: > { %s11_s6 = sadd.s32 1, %s229_s6  }
  0x8e   : > { %p8_p4 = scmp.ge.s32.totalorder %s11_s6, 4  }
  0x90   :  { %10 = sbr.rel (!%p8_p4) target bundleno = 1 (0x1), region = 54 }

// kernel: _lambda_.27
= control target key start
LH: loop header
LB: loop body
LE: loop exit
PB: predicated region body
PF: predicated region fallthrough
CT: control target
= control target key end

     0   :  { %vm959_vm0 = vcmask 523264   ;;  %s1608_s1 = inlined_call_operand.vmem [shape: bf16[1152,64], index: 1, kind: input, shape index: {}]   ;;  %s1609_s0 = inlined_call_operand.vmem [shape: bf16[32,1152], index: 0, kind: input, shape index: {}]   ;;  %s1610_s2 = inlined_call_operand.vmem [shape: f32[1,64], index: 2, kind: input, shape index: {}]   ;;  %s1611_s3 = inlined_call_operand.vmem [shape: f32[32,64], index: 3, kind: output, shape index: {}]  }
   0x1   :  { %v1201_v0 = vld [vmem:[%s1608_s1 + $0x78] sm:$0xff]   ;;  %v1205_v4 = vld [vmem:[%s1608_s1 + $0x70] sm:$0xff]   ;;  %v1209_v8 = vld [vmem:[%s1608_s1 + $0x68] sm:$0xff]  }
   0x2   :  { %v1202_v1 = vld [vmem:[%s1608_s1 + $0x38] sm:$0xff]   ;;  %1059 = vmatprep.subr.bf16.mxu0 %v1201_v0  ;;  %v1206_v5 = vld [vmem:[%s1608_s1 + $0x30] sm:$0xff]   ;;  %v1210_v9 = vld [vmem:[%s1608_s1 + $0x28] sm:$0xff]  }
   0x3   :  { %v1203_v2 = vld [vmem:[%s1608_s1 + $0xf8] sm:$0xff]   ;;  %1060 = vmatpush3.bf16.msra.mxu0 %v1202_v1  ;;  %v1207_v6 = vld [vmem:[%s1608_s1 + $0xf0] sm:$0xff]   ;;  %v1211_v10 = vld [vmem:[%s1608_s1 + $0xe8] sm:$0xff]  }
   0x4   :  { %v1204_v3 = vld [vmem:[%s1608_s1 + $0xb8] sm:$0xff]   ;;  %1087 = vmatprep.subr.bf16.mxu1 %v1203_v2  ;;  %1061 = vmatprep.subr.bf16.mxu0 %v1205_v4  ;;  %v1208_v7 = vld [vmem:[%s1608_s1 + $0xb0] sm:$0xff]   ;;  %v1212_v11 = vld [vmem:[%s1608_s1 + $0xa8] sm:$0xff]  }
   0x5   :  { %1088 = vmatpush3.bf16.msra.mxu1 %v1204_v3  ;;  %v1213_v12 = vld [vmem:[%s1608_s1 + $0x60] sm:$0xff]   ;;  %v1217_v16 = vld [vmem:[%s1608_s1 + $0x58] sm:$0xff]   ;;  %v1221_v20 = vld [vmem:[%s1608_s1 + $0x50] sm:$0xff]  }
   0x6   :  { %1089 = vmatprep.subr.bf16.mxu1 %v1207_v6  ;;  %v1214_v13 = vld [vmem:[%s1608_s1 + $0x20] sm:$0xff]   ;;  %v1218_v17 = vld [vmem:[%s1608_s1 + $0x18] sm:$0xff]   ;;  %v1222_v21 = vld [vmem:[%s1608_s1 + $0x10] sm:$0xff]  }
   0x7   :  { %1062 = vmatpush3.bf16.msra.mxu0 %v1206_v5  ;;  %v1215_v14 = vld [vmem:[%s1608_s1 + $0xe0] sm:$0xff]   ;;  %v1219_v18 = vld [vmem:[%s1608_s1 + $0xd8] sm:$0xff]   ;;  %v1223_v22 = vld [vmem:[%s1608_s1 + $0xd0] sm:$0xff]  }
   0x8   :  { %1063 = vmatprep.subr.bf16.mxu0 %v1209_v8  ;;  %v1216_v15 = vld [vmem:[%s1608_s1 + $0xa0] sm:$0xff]   ;;  %v1220_v19 = vld [vmem:[%s1608_s1 + $0x98] sm:$0xff]   ;;  %v1224_v23 = vld [vmem:[%s1608_s1 + $0x90] sm:$0xff]  }
   0x9   :  { %1090 = vmatpush3.bf16.msra.mxu1 %v1208_v7  ;;  %v1225_v24 = vld [vmem:[%s1608_s1 + $0x48] sm:$0xff]   ;;  %v1229_v28 = vld [vmem:[%s1608_s1 + $0x40] sm:$0xff]   ;;  %v1236_v34 = vld [vmem:[%s1608_s1 + $0x178] sm:$0xff]  }
   0xa   :  { %1091 = vmatprep.subr.bf16.mxu1 %v1211_v10  ;;  %v1226_v25 = vld [vmem:[%s1608_s1 + $0x8] sm:$0xff]   ;;  %v1230_v29 = vld [vmem:[%s1608_s1] sm:$0xff]   ;;  %v1240_v37 = vld [vmem:[%s1608_s1 + $0x138] sm:$0xff]  }
   0xb   :  { %1064 = vmatpush3.bf16.msra.mxu0 %v1210_v9  ;;  %v1227_v26 = vld [vmem:[%s1608_s1 + $0xc8] sm:$0xff]   ;;  %v1231_v30 = vld [vmem:[%s1608_s1 + $0xc0] sm:$0xff]   ;;  %v1241_v38 = vld [vmem:[%s1608_s1 + $0x1f8] sm:$0xff]  }
   0xc   :  { %1065 = vmatprep.subr.bf16.mxu0 %v1213_v12  ;;  %v1228_v27 = vld [vmem:[%s1608_s1 + $0x88] sm:$0xff]   ;;  %v1232_v31 = vld [vmem:[%s1609_s0] ss:$36 sps:$4 sm:$0xff]   ;;  %v1242_v39 = vld [vmem:[%s1608_s1 + $0x1b8] sm:$0xff]  }
   0xd   :  { %1092 = vmatpush3.bf16.msra.mxu1 %v1212_v11  ;;  %v1234_v32 = vld [vmem:[%s1609_s0 + $0x4] ss:$36 sps:$4 sm:$0xff]   ;;  %v1239_v36 = vld [vmem:[%s1609_s0 + $0xc] ss:$36 sps:$4 sm:$0xff]   ;;  %v1255_v52 = vld [vmem:[%s1608_s1 + $0x158] sm:$0xff]  }
   0xe   :  { %1093 = vmatprep.subr.bf16.mxu1 %v1215_v14  ;;  %v1235_v33 = vld [vmem:[%s1608_s1 + $0x80] sm:$0xff]   ;;  %742 = vmatprep.mubr.bf16.mxu0 %v1234_v32  ;;  %v1237_v35 = vld [vmem:[%s1609_s0 + $0x8] ss:$36 sps:$4 sm:$0xff]   ;;  %v1243_v40 = vld [vmem:[%s1608_s1 + $0x170] sm:$0xff]  }
   0xf   :  { %1066 = vmatpush3.bf16.msra.mxu0 %v1214_v13  ;;  %791 = vmatprep.mubr.bf16.mxu1 %v1239_v36  ;;  %v1244_v41 = vld [vmem:[%s1608_s1 + $0x130] sm:$0xff]   ;;  %v1247_v44 = vld [vmem:[%s1608_s1 + $0x168] sm:$0xff]   ;;  %v1251_v48 = vld [vmem:[%s1608_s1 + $0x160] sm:$0xff]  }
  0x10   :  { %1067 = vmatprep.subr.bf16.mxu0 %v1217_v16  ;;  %v1245_v42 = vld [vmem:[%s1608_s1 + $0x1f0] sm:$0xff]   ;;  %v1248_v45 = vld [vmem:[%s1608_s1 + $0x128] sm:$0xff]   ;;  %v1252_v49 = vld [vmem:[%s1608_s1 + $0x120] sm:$0xff]  }
  0x11   :  { %1094 = vmatpush3.bf16.msra.mxu1 %v1216_v15  ;;  %v1246_v43 = vld [vmem:[%s1608_s1 + $0x1b0] sm:$0xff]   ;;  %v1249_v46 = vld [vmem:[%s1608_s1 + $0x1e8] sm:$0xff]   ;;  %v1253_v50 = vld [vmem:[%s1608_s1 + $0x1e0] sm:$0xff]  }
  0x12   :  { %1095 = vmatprep.subr.bf16.mxu1 %v1219_v18  ;;  %v1250_v47 = vld [vmem:[%s1608_s1 + $0x1a8] sm:$0xff]   ;;  %v1254_v51 = vld [vmem:[%s1608_s1 + $0x1a0] sm:$0xff]   ;;  %v1256_v53 = vld [vmem:[%s1608_s1 + $0x118] sm:$0xff]  }
  0x13   :  { %1068 = vmatpush3.bf16.msra.mxu0 %v1218_v17  ;;  %v1257_v54 = vld [vmem:[%s1609_s0 + $0x4c] ss:$36 sps:$4 sm:$0xff]   ;;  %v1259_v55 = vld [vmem:[%s1608_s1 + $0x1d8] sm:$0xff]   ;;  %v1273_v4 = vld [vmem:[%s1608_s1 + $0x140] sm:$0xff]  }
  0x14   :  { %1069 = vmatprep.subr.bf16.mxu0 %v1221_v20  ;;  %v1260_v56 = vld [vmem:[%s1609_s0 + $0x48] ss:$36 sps:$4 sm:$0xff]   ;;  %v1261_v57 = vld [vmem:[%s1608_s1 + $0x198] sm:$0xff]   ;;  %v1264_v59 = vld [vmem:[%s1608_s1 + $0x150] sm:$0xff]  }
  0x15   :  { %1096 = vmatpush3.bf16.msra.mxu1 %v1220_v19  ;;  %v1262_v58 = vld [vmem:[%s1609_s0 + $0x54] ss:$36 sps:$4 sm:$0xff]   ;;  %v1269_v0 = vld [vmem:[%s1608_s1 + $0x148] sm:$0xff]   ;;  %v1274_v5 = vld [vmem:[%s1608_s1 + $0x100] sm:$0xff]  }
  0x16   :  { %1097 = vmatprep.subr.bf16.mxu1 %v1223_v22  ;;  %v1265_v60 = vld [vmem:[%s1609_s0 + $0x50] ss:$36 sps:$4 sm:$0xff]   ;;  %v1270_v1 = vld [vmem:[%s1608_s1 + $0x108] sm:$0xff]   ;;  %v1275_v6 = vld [vmem:[%s1608_s1 + $0x1c0] sm:$0xff]  }
  0x17   :  { %1070 = vmatpush3.bf16.msra.mxu0 %v1222_v21  ;;  %v1266_v61 = vld [vmem:[%s1608_s1 + $0x110] sm:$0xff]   ;;  %v1271_v2 = vld [vmem:[%s1608_s1 + $0x1c8] sm:$0xff]   ;;  %v1279_v9 = vld [vmem:[%s1608_s1 + $0x180] sm:$0xff]  }
  0x18   :  { %1071 = vmatprep.subr.bf16.mxu0 %v1225_v24  ;;  %v1267_v62 = vld [vmem:[%s1608_s1 + $0x1d0] sm:$0xff]   ;;  %v1272_v3 = vld [vmem:[%s1608_s1 + $0x188] sm:$0xff]   ;;  %v1280_v10 = vld [vmem:[%s1608_s1 + $0x238] sm:$0xff]  }
  0x19   :  { %1098 = vmatpush3.bf16.msra.mxu1 %v1224_v23  ;;  %v1268_v63 = vld [vmem:[%s1608_s1 + $0x190] sm:$0xff]   ;;  %v1281_v11 = vld [vmem:[%s1609_s0 + $0x18] ss:$36 sps:$4 sm:$0xff]   ;;  %v1288_v16 = vld [vmem:[%s1608_s1 + $0x228] sm:$0xff]  }
  0x1a   :  { %1099 = vmatprep.subr.bf16.mxu1 %v1227_v26  ;;  %v1276_v7 = vld [vmem:[%s1609_s0 + $0x10] ss:$36 sps:$4 sm:$0xff]   ;;  %v1283_v12 = vld [vmem:[%s1609_s0 + $0x1c] ss:$36 sps:$4 sm:$0xff]   ;;  %v1289_v17 = vld [vmem:[%s1609_s0 + $0x64] ss:$36 sps:$4 sm:$0xff]  }
  0x1b   :  { %1072 = vmatpush3.bf16.msra.mxu0 %v1226_v25  ;;  %v1278_v8 = vld [vmem:[%s1609_s0 + $0x14] ss:$36 sps:$4 sm:$0xff]   ;;  %v1285_v14 = vld [vmem:[%s1609_s0 + $0x5c] ss:$36 sps:$4 sm:$0xff]   ;;  %v1295_v23 = vld [vmem:[%s1608_s1 + $0x208] sm:$0xff]  }
  0x1c   :  { %1073 = vmatprep.subr.bf16.mxu0 %v1229_v28  ;;  %v1284_v13 = vld [vmem:[%s1608_s1 + $0x230] sm:$0xff]   ;;  %v1287_v15 = vld [vmem:[%s1609_s0 + $0x58] ss:$36 sps:$4 sm:$0xff]   ;;  %v1291_v18 = vld [vmem:[%s1609_s0 + $0x60] ss:$36 sps:$4 sm:$0xff]  }
  0x1d   :  { %1100 = vmatpush3.bf16.msra.mxu1 %v1228_v27  ;;  %v1292_v19 = vld [vmem:[%s1608_s1 + $0x220] sm:$0xff]   ;;  %v1293_v20 = vld [vmem:[%s1608_s1 + $0x218] sm:$0xff]   ;;  %v1294_v22 = vld [vmem:[%s1608_s1 + $0x210] sm:$0xff]  }
  0x1e   :  { %1101 = vmatprep.subr.bf16.mxu1 %v1231_v30  ;;  %v1297_v21 = vld [vmem:[%s1609_s0 + $0x20] ss:$36 sps:$4 sm:$0xff]   ;;  %v1298_v25 = vld [vmem:[%s1609_s0 + $0x68] ss:$36 sps:$4 sm:$0xff]  }
  0x1f   :  { %1074 = vmatpush3.bf16.msra.mxu0 %v1230_v29  ;;  %v1296_v24 = vld [vmem:[%s1608_s1 + $0x200] sm:$0xff]  }
  0x20   :  { %1115 = vmatprep.subr.bf16.mxu0 %v1236_v34 }
  0x21   :  { %1102 = vmatpush3.bf16.msra.mxu1 %v1235_v33 }
  0x22   :  { %743 = vmatmul.mubr.bf16.vlgmr.msra.gmra.mxu0 %v1232_v31  ;;  %1143 = vmatprep.subr.bf16.mxu1 %v1241_v38 }
  0x23   :  { %1116 = vmatpush3.bf16.msra.mxu0 %v1240_v37  ;;  %750 = vmatprep.mubr.bf16.mxu0 %v1257_v54 }
  0x24   :  { %792 = vmatmul.mubr.bf16.vlgmr.msra.gmra.mxu1 %v1237_v35  ;;  %1117 = vmatprep.subr.bf16.mxu0 %v1243_v40 }
  0x25   :  { %1144 = vmatpush3.bf16.msra.mxu1 %v1242_v39  ;;  %799 = vmatprep.mubr.bf16.mxu1 %v1262_v58 }
  0x26   :  { %1145 = vmatprep.subr.bf16.mxu1 %v1245_v42 }
  0x27   :  { %1118 = vmatpush3.bf16.msra.mxu0 %v1244_v41 }
  0x28   :  { %1119 = vmatprep.subr.bf16.mxu0 %v1247_v44 }
  0x29   :  { %1146 = vmatpush3.bf16.msra.mxu1 %v1246_v43 }
  0x2a   :  { %1147 = vmatprep.subr.bf16.mxu1 %v1249_v46  ;;  %751 = vmatmul.mubr.bf16.gmra.mxu0 %v1260_v56 }
  0x2b   :  { %1120 = vmatpush3.bf16.msra.mxu0 %v1248_v45  ;;  %840 = vmatprep.mubr.bf16.mxu0 %v1278_v8 }
  0x2c   :  { %1121 = vmatprep.subr.bf16.mxu0 %v1251_v48  ;;  %800 = vmatmul.mubr.bf16.gmra.mxu1 %v1265_v60 }
  0x2d   :  { %1148 = vmatpush3.bf16.msra.mxu1 %v1250_v47  ;;  %889 = vmatprep.mubr.bf16.mxu1 %v1283_v12 }
  0x2e   :  { %1149 = vmatprep.subr.bf16.mxu1 %v1253_v50 }
  0x2f   :  { %1122 = vmatpush3.bf16.msra.mxu0 %v1252_v49 }
  0x30   :  { %1123 = vmatprep.subr.bf16.mxu0 %v1255_v52 }
  0x31   :  { %1150 = vmatpush3.bf16.msra.mxu1 %v1254_v51 }
  0x32   :  { %1151 = vmatprep.subr.bf16.mxu1 %v1259_v55  ;;  %v968_v55 = vld [vmem:[%s1610_s2] ss:$0 sm:$0xff] }
  0x33   :  { %1124 = vmatpush3.bf16.msra.mxu0 %v1256_v53 }
  0x34   :  { %1125 = vmatprep.subr.bf16.mxu0 %v1264_v59 }
  0x35   :  { %1152 = vmatpush3.bf16.msra.mxu1 %v1261_v57 }
  0x36   :  { %1153 = vmatprep.subr.bf16.mxu1 %v1267_v62 }
  0x37   :  { %1126 = vmatpush3.bf16.msra.mxu0 %v1266_v61 }
  0x38   :  { %1127 = vmatprep.subr.bf16.mxu0 %v1269_v0 }
  0x39   :  { %1154 = vmatpush3.bf16.msra.mxu1 %v1268_v63 }
  0x3a   :  { %1155 = vmatprep.subr.bf16.mxu1 %v1271_v2 }
  0x3b   :  { %1128 = vmatpush3.bf16.msra.mxu0 %v1270_v1 }
  0x3c   :  { %1129 = vmatprep.subr.bf16.mxu0 %v1273_v4 }
  0x3d   :  { %1156 = vmatpush3.bf16.msra.mxu1 %v1272_v3 }
  0x3e   :  { %1157 = vmatprep.subr.bf16.mxu1 %v1275_v6 }
  0x3f   :  { %1130 = vmatpush3.bf16.msra.mxu0 %v1274_v5 }
  0x40   :  { %1181 = vmatprep.subr.bf16.mxu0 %v1280_v10 }
  0x41   :  { %1158 = vmatpush3.bf16.msra.mxu1 %v1279_v9 }
  0x42   :  { %841 = vmatmul.mubr.bf16.vlgmr.msra.gmra.mxu0 %v1276_v7 }
  0x43   :  { %1182 = vmatpush3.bf16.msra.mxu0 %v1280_v10  ;;  %848 = vmatprep.mubr.bf16.mxu0 %v1285_v14 }
  0x44   :  { %890 = vmatmul.mubr.bf16.vlgmr.msra.gmra.mxu1 %v1281_v11  ;;  %1183 = vmatprep.subr.bf16.mxu0 %v1284_v13 }
  0x45   :  { %897 = vmatprep.mubr.bf16.mxu1 %v1289_v17 }
  0x47   :  { %1184 = vmatpush3.bf16.msra.mxu0 %v1284_v13 }
  0x48   :  { %1185 = vmatprep.subr.bf16.mxu0 %v1288_v16 }
  0x4a   :  { %849 = vmatmul.mubr.bf16.gmra.mxu0 %v1287_v15 }
  0x4b   :  { %1186 = vmatpush3.bf16.msra.mxu0 %v1288_v16  ;;  %1197 = vmatprep.mubr.bf16.mxu0 %v1297_v21 }
  0x4c   :  { %898 = vmatmul.mubr.bf16.gmra.mxu1 %v1291_v18  ;;  %1187 = vmatprep.subr.bf16.mxu0 %v1292_v19 }
  0x4f   :  { %1188 = vmatpush3.bf16.msra.mxu0 %v1292_v19 }
  0x50   :  { %1189 = vmatprep.subr.bf16.mxu0 %v1293_v20 }
  0x53   :  { %1190 = vmatpush3.bf16.msra.mxu0 %v1293_v20 }
  0x54   :  { %1191 = vmatprep.subr.bf16.mxu0 %v1294_v22 }
  0x57   :  { %1192 = vmatpush3.bf16.msra.mxu0 %v1294_v22 }
  0x58   :  { %1193 = vmatprep.subr.bf16.mxu0 %v1295_v23 }
  0x5b   :  { %1194 = vmatpush3.bf16.msra.mxu0 %v1295_v23 }
  0x5c   :  { %1195 = vmatprep.subr.bf16.mxu0 %v1296_v24 }
  0x5f   :  { %1196 = vmatpush3.bf16.msra.mxu0 %v1296_v24 }
  0x62   :  { %1198 = vmatmul.mubr.bf16.vlgmr.msra.gmra.mxu0 %v1298_v25 }
  0xe2   :  { %v1075_v26 = vpop.f32.mrf.mxu0 }
  0xe4   :  { %v1103_v27 = vpop.f32.mrf.mxu1  ;;  %v1076_v28 = vpop.f32.mrf.mxu0 }
  0xe5   :  { %v1077_v54 = vadd.f32 %v1076_v28, %v1075_v26 }
  0xe6   :  { %v1104_v29 = vpop.f32.mrf.mxu1  ;;  %v1078_v30 = vpop.f32.mrf.mxu0 }
  0xe7   :  { %v745_v61 = vadd.f32 %v1077_v54, %v968_v55  ;;  %v1105_v62 = vadd.f32 %v1104_v29, %v1103_v27 }
  0xe8   :  { %v1106_v31 = vpop.f32.mrf.mxu1  ;;  %v1079_v32 = vpop.f32.mrf.mxu0 }
  0xe9   :  { %v1080_v63 = vadd.f32 %v1079_v32, %v1078_v30  ;;  %v794_v7 = vadd.f32 %v1105_v62, %v745_v61 }
  0xea   :  { %v1081_v33 = vpop.f32.mrf.mxu0  ;;  %v1107_v34 = vpop.f32.mrf.mxu1 }
  0xeb   :  { %v748_v8 = vadd.f32 %v1080_v63, %v968_v55  ;;  %v1108_v9 = vadd.f32 %v1107_v34, %v1106_v31 }
  0xec   :  { %v1109_v35 = vpop.f32.mrf.mxu1  ;;  %v1082_v36 = vpop.f32.mrf.mxu0 }
  0xed   :  { %v1083_v53 = vadd.f32 %v1082_v36, %v1081_v33  ;;  %v797_v18 = vadd.f32 %v1108_v9, %v748_v8 }
  0xee   :  { %v1110_v37 = vpop.f32.mrf.mxu1  ;;  %v1084_v38 = vpop.f32.mrf.mxu0 }
  0xef   :  { %v753_v58 = vadd.f32 %v1083_v53, %v968_v55  ;;  %v1111_v59 = vadd.f32 %v1110_v37, %v1109_v35 }
  0xf0   :  { %v1112_v39 = vpop.f32.mrf.mxu1  ;;  %v1085_v40 = vpop.f32.mrf.mxu0 }
  0xf1   :  { %v1086_v60 = vadd.f32 %v1085_v40, %v1084_v38  ;;  %v802_v3 = vadd.f32 %v1111_v59, %v753_v58 }
  0xf2   :  { %v1113_v42 = vpop.f32.mrf.mxu1 }
  0xf3   :  { %v756_v4 = vadd.f32 %v1086_v60, %v968_v55  ;;  %v1114_v5 = vadd.f32 %v1113_v42, %v1112_v39 }
  0xf5   :  { %v805_v14 = vadd.f32 %v1114_v5, %v756_v4 }
 0x102   :  { %v1131_v41 = vpop.f32.mrf.mxu0 }
 0x104   :  { %v1132_v43 = vpop.f32.mrf.mxu0  ;;  %v1159_v44 = vpop.f32.mrf.mxu1 }
 0x105   :  { %v1133_v6 = vadd.f32 %v1132_v43, %v1131_v41 }
 0x106   :  { %v1134_v45 = vpop.f32.mrf.mxu0  ;;  %v1160_v46 = vpop.f32.mrf.mxu1 }
 0x107   :  { %v843_v15 = vadd.f32 %v1133_v6, %v794_v7  ;;  %v1161_v16 = vadd.f32 %v1160_v46, %v1159_v44 }
 0x108   :  { %v1135_v47 = vpop.f32.mrf.mxu0  ;;  %v1162_v48 = vpop.f32.mrf.mxu1 }
 0x109   :  { %v1136_v17 = vadd.f32 %v1135_v47, %v1134_v45  ;;  %v892_v26 = vadd.f32 %v1161_v16, %v843_v15 }
 0x10a   :  { %v1137_v49 = vpop.f32.mrf.mxu0  ;;  %v1163_v50 = vpop.f32.mrf.mxu1 }
 0x10b   :  { %v846_v23 = vadd.f32 %v1136_v17, %v797_v18  ;;  %v1164_v24 = vadd.f32 %v1163_v50, %v1162_v48 }
 0x10c   :  { %v1138_v51 = vpop.f32.mrf.mxu0  ;;  %v1165_v52 = vpop.f32.mrf.mxu1 }
 0x10d   :  { %v1139_v0 = vadd.f32 %v1138_v51, %v1137_v49  ;;  %v895_v34 = vadd.f32 %v1164_v24, %v846_v23 }
 0x10e   :  { %v1140_v56 = vpop.f32.mrf.mxu0  ;;  %v1166_v57 = vpop.f32.mrf.mxu1 }
 0x10f   :  { %v851_v10 = vadd.f32 %v1139_v0, %v802_v3  ;;  %v1167_v11 = vadd.f32 %v1166_v57, %v1165_v52 }
 0x110   :  { %v1141_v1 = vpop.f32.mrf.mxu0  ;;  %v1168_v2 = vpop.f32.mrf.mxu1 }
 0x111   :  { %v1142_v12 = vadd.f32 %v1141_v1, %v1140_v56  ;;  %v900_v21 = vadd.f32 %v1167_v11, %v851_v10 }
 0x112   :  { %v1169_v13 = vpop.f32.mrf.mxu1 }
 0x113   :  { %v854_v19 = vadd.f32 %v1142_v12, %v805_v14  ;;  %v1170_v20 = vadd.f32 %v1169_v13, %v1168_v2 }
 0x115   :  { %v903_v30 = vadd.f32 %v1170_v20, %v854_v19 }
 0x122   :  { %v1199_v22 = vpop.f32.mrf.mxu0 }
 0x123   :  { %v949_v25 = vadd.f32 %v1199_v22, %v900_v21 }
 0x124   :  { %v940_v27 = vpop.f32.mrf.mxu0 }
 0x125   :  { %v957_v28 = vmax.f32 %v949_v25, 0.0  ;;  %v941_v29 = vadd.f32 %v940_v27, %v892_v26 }
 0x126   :  { %v1200_v31 = vpop.f32.mrf.mxu0 }
 0x127   :  { %962 = vst.msk [vmem:[%s1611_s3 + $0x10] sm:$0xff] %vm959_vm0, %v957_v28  ;;  %v955_v32 = vmax.f32 %v941_v29, 0.0  ;;  %v952_v33 = vadd.f32 %v1200_v31, %v903_v30 }
 0x128   :  { %v943_v35 = vpop.f32.mrf.mxu0 }
 0x129   :  { %960 = vst.msk [vmem:[%s1611_s3] sm:$0xff] %vm959_vm0, %v955_v32  ;;  %v958_v36 = vmax.f32 %v952_v33, 0.0  ;;  %v944_v37 = vadd.f32 %v943_v35, %v895_v34 }
 0x12b   :  { %963 = vst.msk [vmem:[%s1611_s3 + $0x18] sm:$0xff] %vm959_vm0, %v958_v36  ;;  %v956_v38 = vmax.f32 %v944_v37, 0.0 }
 0x12d   :  { %961 = vst.msk [vmem:[%s1611_s3 + $0x8] sm:$0xff] %vm959_vm0, %v956_v38 }

// kernel: _lambda_.29
= control target key start
LH: loop header
LB: loop body
LE: loop exit
PB: predicated region body
PF: predicated region fallthrough
CT: control target
= control target key end

     0   :  { %v690_v35 = vmov 0.0   ;;  %vm691_vm0 = vmmov 0   ;;  %s848_s0 = inlined_call_operand.vmem [shape: bf16[8,640], index: 0, kind: input, shape index: {}]   ;;  %s849_s1 = inlined_call_operand.vmem [shape: bf16[640,64], index: 1, kind: input, shape index: {}]   ;;  %s850_s2 = inlined_call_operand.vmem [shape: f32[1,64], index: 2, kind: input, shape index: {}]   ;;  %s851_s3 = inlined_call_operand.hbm [shape: f32[8,64], index: 3, kind: output, shape index: {}]  }
   0x1   :  { %v623_v0 = vld [vmem:[%s849_s1 + $0x78] sm:$0xff]   ;;  %v627_v4 = vld [vmem:[%s849_s1 + $0x70] sm:$0xff]   ;;  %v631_v8 = vld [vmem:[%s849_s1 + $0x68] sm:$0xff]  }
   0x2   :  { %v624_v1 = vld [vmem:[%s849_s1 + $0x38] sm:$0xff]   ;;  %547 = vmatprep.subr.bf16.mxu0 %v623_v0  ;;  %v628_v5 = vld [vmem:[%s849_s1 + $0x30] sm:$0xff]   ;;  %v632_v9 = vld [vmem:[%s849_s1 + $0x28] sm:$0xff]  }
   0x3   :  { %v625_v2 = vld [vmem:[%s849_s1 + $0xf8] sm:$0xff]   ;;  %548 = vmatpush3.bf16.msra.mxu0 %v624_v1  ;;  %v629_v6 = vld [vmem:[%s849_s1 + $0xf0] sm:$0xff]   ;;  %v633_v10 = vld [vmem:[%s849_s1 + $0xe8] sm:$0xff]  }
   0x4   :  { %v626_v3 = vld [vmem:[%s849_s1 + $0xb8] sm:$0xff]   ;;  %569 = vmatprep.subr.bf16.mxu1 %v625_v2  ;;  %549 = vmatprep.subr.bf16.mxu0 %v627_v4  ;;  %v630_v7 = vld [vmem:[%s849_s1 + $0xb0] sm:$0xff]   ;;  %v634_v11 = vld [vmem:[%s849_s1 + $0xa8] sm:$0xff]  }
   0x5   :  { %570 = vmatpush3.bf16.msra.mxu1 %v626_v3  ;;  %v635_v12 = vld [vmem:[%s849_s1 + $0x60] sm:$0xff]   ;;  %v639_v16 = vld [vmem:[%s849_s1 + $0x58] sm:$0xff]   ;;  %v643_v20 = vld [vmem:[%s849_s1 + $0x50] sm:$0xff]  }
   0x6   :  { %571 = vmatprep.subr.bf16.mxu1 %v629_v6  ;;  %v636_v13 = vld [vmem:[%s849_s1 + $0x20] sm:$0xff]   ;;  %v640_v17 = vld [vmem:[%s849_s1 + $0x18] sm:$0xff]   ;;  %v644_v21 = vld [vmem:[%s849_s1 + $0x10] sm:$0xff]  }
   0x7   :  { %550 = vmatpush3.bf16.msra.mxu0 %v628_v5  ;;  %v637_v14 = vld [vmem:[%s849_s1 + $0xe0] sm:$0xff]   ;;  %v641_v18 = vld [vmem:[%s849_s1 + $0xd8] sm:$0xff]   ;;  %v645_v22 = vld [vmem:[%s849_s1 + $0xd0] sm:$0xff]  }
   0x8   :  { %551 = vmatprep.subr.bf16.mxu0 %v631_v8  ;;  %v638_v15 = vld [vmem:[%s849_s1 + $0xa0] sm:$0xff]   ;;  %v642_v19 = vld [vmem:[%s849_s1 + $0x98] sm:$0xff]   ;;  %v646_v23 = vld [vmem:[%s849_s1 + $0x90] sm:$0xff]  }
   0x9   :  { %572 = vmatpush3.bf16.msra.mxu1 %v630_v7  ;;  %v647_v24 = vld [vmem:[%s849_s1 + $0x48] sm:$0xff]   ;;  %v651_v28 = vld [vmem:[%s849_s1 + $0x40] sm:$0xff]   ;;  %v659_v39 = vld [vmem:[%s849_s1 + $0x138] sm:$0xff]  }
   0xa   :  { %573 = vmatprep.subr.bf16.mxu1 %v633_v10  ;;  %v648_v25 = vld [vmem:[%s849_s1 + $0x8] sm:$0xff]   ;;  %v652_v29 = vld [vmem:[%s849_s1] sm:$0xff]   ;;  %v660_v40 = vld [vmem:[%s849_s1 + $0x130] sm:$0xff]  }
   0xb   :  { %552 = vmatpush3.bf16.msra.mxu0 %v632_v9  ;;  %v649_v26 = vld [vmem:[%s849_s1 + $0xc8] sm:$0xff]   ;;  %v653_v30 = vld [vmem:[%s849_s1 + $0xc0] sm:$0xff]  }
   0xc   :  { %553 = vmatprep.subr.bf16.mxu0 %v635_v12  ;;  %v650_v27 = vld [vmem:[%s849_s1 + $0x88] sm:$0xff]   ;;  %v16_v31 = vld [vmem:[%s848_s0] sm:$0xff] }
   0xd   :  { %574 = vmatpush3.bf16.msra.mxu1 %v634_v11  ;;  %v502_v32 = vcombine.low %v16_v31, %v16_v31  ;;  %v503_v33 = vcombine.high %v16_v31, %v16_v31  ;;  %v656_v34 = vld [vmem:[%s849_s1 + $0x80] sm:$0xff]   ;;  %v17_v36 = vld [vmem:[%s848_s0 + $0x8] sm:$0xff] }
   0xe   :  { %575 = vmatprep.subr.bf16.mxu1 %v637_v14  ;;  %v504_v37 = vcombine.low %v17_v36, %v17_v36  ;;  %v505_v38 = vcombine.high %v17_v36, %v17_v36  ;;  %v661_v41 = vld [vmem:[%s849_s1 + $0x128] sm:$0xff]  }
   0xf   :  { %554 = vmatpush3.bf16.msra.mxu0 %v636_v13  ;;  %396 = vmatprep.mubr.bf16.mxu0 %v503_v33 }
  0x10   :  { %555 = vmatprep.subr.bf16.mxu0 %v639_v16  ;;  %436 = vmatprep.mubr.bf16.mxu1 %v505_v38 }
  0x11   :  { %576 = vmatpush3.bf16.msra.mxu1 %v638_v15 }
  0x12   :  { %577 = vmatprep.subr.bf16.mxu1 %v641_v18 }
  0x13   :  { %556 = vmatpush3.bf16.msra.mxu0 %v640_v17 }
  0x14   :  { %557 = vmatprep.subr.bf16.mxu0 %v643_v20 }
  0x15   :  { %578 = vmatpush3.bf16.msra.mxu1 %v642_v19 }
  0x16   :  { %579 = vmatprep.subr.bf16.mxu1 %v645_v22 }
  0x17   :  { %558 = vmatpush3.bf16.msra.mxu0 %v644_v21 }
  0x18   :  { %559 = vmatprep.subr.bf16.mxu0 %v647_v24 }
  0x19   :  { %580 = vmatpush3.bf16.msra.mxu1 %v646_v23 }
  0x1a   :  { %581 = vmatprep.subr.bf16.mxu1 %v649_v26 }
  0x1b   :  { %560 = vmatpush3.bf16.msra.mxu0 %v648_v25 }
  0x1c   :  { %561 = vmatprep.subr.bf16.mxu0 %v651_v28 }
  0x1d   :  { %582 = vmatpush3.bf16.msra.mxu1 %v650_v27 }
  0x1e   :  { %583 = vmatprep.subr.bf16.mxu1 %v653_v30 }
  0x1f   :  { %562 = vmatpush3.bf16.msra.mxu0 %v652_v29 }
  0x20   :  { %600 = vmatprep.subr.bf16.mxu0 %v690_v35 }
  0x21   :  { %584 = vmatpush3.bf16.msra.mxu1 %v656_v34 }
  0x22   :  { %397 = vmatmul.mubr.bf16.vlgmr.msra.gmra.mxu0 %v502_v32 }
  0x23   :  { %601 = vmatpush3.bf16.msra.mxu0 %v659_v39  ;;  %616 = vmatprep.mubr.msk.bf16.mxu0 %vm691_vm0, %v690_v35 }
  0x24   :  { %437 = vmatmul.mubr.bf16.vlgmr.msra.gmra.mxu1 %v504_v37  ;;  %602 = vmatprep.subr.bf16.mxu0 %v690_v35 }
  0x27   :  { %603 = vmatpush3.bf16.msra.mxu0 %v660_v40 }
  0x28   :  { %604 = vmatprep.subr.bf16.mxu0 %v690_v35 }
  0x29   :  { %8 = vsyncpa [#allocation3], 0  ;;  %v662_v42 = vld [vmem:[%s849_s1 + $0x120] sm:$0xff]   ;;  %v663_v43 = vld [vmem:[%s849_s1 + $0x118] sm:$0xff]   ;;  %vm485_vm1 = vcmask 523264  }
  0x2a   :  { %v664_v44 = vld [vmem:[%s849_s1 + $0x110] sm:$0xff]   ;;  %v665_v45 = vld [vmem:[%s849_s1 + $0x108] sm:$0xff]   ;;  %v666_v46 = vld [vmem:[%s849_s1 + $0x100] sm:$0xff]  }
  0x2b   :  { %605 = vmatpush3.bf16.msra.mxu0 %v661_v41  ;;  %v667_v47 = vld [vmem:[%s848_s0 + $0x10] ss:$0 sps:$4 sm:$0xff]   ;;  %v501_v57 = vld [vmem:[%s850_s2] ss:$0 sm:$0xff]  ;;  %s692_s0 = smov [#allocation2]  }
  0x2c   :  { %606 = vmatprep.subr.bf16.mxu0 %v690_v35  ;;  %s493_s1 = sshll.u32 %s692_s0, 4  ;;  %s494_s1 = int_to_ptr.vmem [resolvable:$true] %s493_s1 }
  0x2d   :  { %s668_s19 = scalar_lea.vmem %s494_s1, 128  ;;  %p673_p1 = scmp.lt.s32.totalorder %s494_s1, %s494_s1 }
  0x2e   :  { %p669_p0 = scmp.ne.s32.totalorder %s494_s1, %s668_s19  ;;  %p674_p2 = scmp.lt.s32.totalorder %s668_s19, %s668_s19 }
  0x2f   :  { %607 = vmatpush3.bf16.msra.mxu0 %v662_v42 }
  0x30   :  { %608 = vmatprep.subr.bf16.mxu0 %v690_v35  ;;  %p675_p3 = por %p674_p2, %p673_p1 }
  0x32   :  { %p676_p4 = pnand %p675_p3, %p669_p0 }
  0x33   :  { %609 = vmatpush3.bf16.msra.mxu0 %v663_v43 }
  0x34   :  { %610 = vmatprep.subr.bf16.mxu0 %v690_v35 }
  0x37   :  { %611 = vmatpush3.bf16.msra.mxu0 %v664_v44 }
  0x38   :  { %612 = vmatprep.subr.bf16.mxu0 %v690_v35 }
  0x3b   :  { %613 = vmatpush3.bf16.msra.mxu0 %v665_v45 }
  0x3c   :  { %614 = vmatprep.subr.bf16.mxu0 %v690_v35 }
  0x3f   :  { %615 = vmatpush3.bf16.msra.mxu0 %v666_v46 }
  0x42   :  { %617 = vmatmul.mubr.bf16.vlgmr.msra.gmra.mxu0 %v667_v47 }
  0xe2   :  { %v563_v48 = vpop.f32.mrf.mxu0 }
  0xe4   :  { %v564_v49 = vpop.f32.mrf.mxu0  ;;  %v585_v50 = vpop.f32.mrf.mxu1 }
  0xe5   :  { %v565_v56 = vadd.f32 %v564_v49, %v563_v48 }
  0xe6   :  { %v566_v51 = vpop.f32.mrf.mxu0  ;;  %v586_v52 = vpop.f32.mrf.mxu1 }
  0xe7   :  { %v399_v58 = vadd.f32 %v565_v56, %v501_v57  ;;  %v587_v59 = vadd.f32 %v586_v52, %v585_v50 }
  0xe8   :  { %v567_v53 = vpop.f32.mrf.mxu0  ;;  %v588_v54 = vpop.f32.mrf.mxu1 }
  0xe9   :  { %v439_v60 = vadd.f32 %v587_v59, %v399_v58 }
  0xea   :  { %v589_v55 = vpop.f32.mrf.mxu1 }
 0x102   :  { %v478_v61 = vpop.f32.mrf.mxu0 }
 0x103   :  { %v479_v62 = vadd.f32 %v478_v61, %v439_v60 }
 0x104   :  { %v618_v63 = vpop.f32.mrf.mxu0 }
 0x105   :  { %v484_v0 = vmax.f32 %v479_v62, 0.0 }
 0x106   :  { %v481_v1 = vpop.f32.mrf.mxu0 }
 0x107   :  { %486 = vst.msk [vmem:[#allocation2] sm:$0xff] %vm485_vm1, %v484_v0 }
 0x108   :  { %v619_v2 = vpop.f32.mrf.mxu0 }
 0x109   :  { %679 = shalt.err (!%p676_p4)
}
 0x10a   :  { %496 = dma.vmem_to_hbm [thread:$0]  %s494_s1, 128, %s851_s3, [#allocation3]  }
 0x10b   :  { %688 = dma.done.wait [#allocation3], 128  }
 0x10c   :  { %689 = vsyncadd [#allocation3], 4294967168 }
 0x10d   :  { %500 = vsyncpa [#allocation3], 1 }

</bundles_post_ra>
